<compile_context>
chip_gen: v7x
topology: tpu7x:2x2x1
jax: 0.10.0
libtpu: 0.0.40
codegen_flags: <defaults>
</compile_context>

<pallas_src>
import functools
import math

import jax
import jax.numpy as jnp
from jax import lax
from jax.experimental import pallas as pl
from jax.experimental.pallas import tpu as pltpu


# ---------------------------------------------------------------------------
# Pallas kernel 1: fused ConvLSTM cell update (gate nonlinearities + state).
#   gates  : (4, N) rows = [in_gate, remember_gate, out_gate, cell_gate] pre-acts
#   c_prev : (1, N)
#   outputs: hidden (1, N), cell (1, N)
# ---------------------------------------------------------------------------
def _lstm_update_kernel(gates_ref, c_prev_ref, h_ref, c_ref):
    g = gates_ref[...]
    in_g = 1.0 / (1.0 + jnp.exp(-g[0:1]))
    rem_g = 1.0 / (1.0 + jnp.exp(-g[1:2]))
    out_g = 1.0 / (1.0 + jnp.exp(-g[2:3]))
    cell_g = jnp.tanh(g[3:4])
    c_new = rem_g * c_prev_ref[...] + in_g * cell_g
    c_ref[...] = c_new
    h_ref[...] = out_g * jnp.tanh(c_new)


def lstm_update(gates, prev_c):
    """gates: (1, 4*hidden, d, h, w); prev_c: (1, hidden, d, h, w)."""
    assert gates.shape[0] == 1
    n = prev_c.size
    g2 = gates.reshape(4, n)          # channel groups are contiguous -> one gate per row
    c2 = prev_c.reshape(1, n)
    h_new, c_new = pl.pallas_call(
        _lstm_update_kernel,
        out_shape=(
            jax.ShapeDtypeStruct((1, n), gates.dtype),
            jax.ShapeDtypeStruct((1, n), gates.dtype),
        ),
    )(g2, c2)
    return h_new.reshape(prev_c.shape), c_new.reshape(prev_c.shape)


# ---------------------------------------------------------------------------
# Pallas kernel 2: fused final blend of RTSRVFD.forward.
#   s, e   : (3, TR, 128)         start / end vector fields (per component, flattened)
#   u,v,w  : (num, TR, 128)       interpolation-network outputs per time step
#   m*     : (num, TR, 128)       mask-network logits (sigmoid applied in-kernel)
#   out    : (num, 3, TR, 128)
# ---------------------------------------------------------------------------
def _blend_kernel(s_ref, e_ref, u_ref, v_ref, w_ref, mu_ref, mv_ref, mw_ref,
                  out_ref, *, num):
    comps = (u_ref, v_ref, w_ref)
    masks = (mu_ref, mv_ref, mw_ref)
    for c in range(3):                      # static unroll: 3 components
        s_c = s_ref[c]
        e_c = e_ref[c]
        for i in range(num):                # static unroll: num is small
            wt = (i + 1) / (num + 1)
            lin = wt * e_c + (1.0 - wt) * s_c
            m = 1.0 / (1.0 + jnp.exp(-masks[c][i]))   # RMaskNet sigmoid fused (EUP)
            out_ref[i, c, :, :] = m * comps[c][i] + (1.0 - m) * lin


def rtsrvfd_blend(s, e, u, v, w, mu_logits, mv_logits, mw_logits, num):
    b, _, dd, hh, ww = s.shape
    assert b == 1
    svol = dd * hh * ww
    # 16^3 etc. is a multiple of 128, so no padding copies are needed at all.
    assert svol % 128 == 0  # TODO(synk): mask a ragged final tile for volumes not divisible by 128.
    rows = svol // 128
    # Large lane-dense blocks: whole row axis if it fits VMEM comfortably, else
    # 1024-row (512 KiB f32) tiles, following the perf review.
    tr = rows if rows <= 1024 else 1024
    assert rows % tr == 0

    def as3(x):   # (1, 3, d, h, w)   -> (3, rows, 128)   free reshape, no pad copy
        return x.reshape(3, rows, 128)

    def asn(x):   # (1, num, d, h, w) -> (num, rows, 128)
        return x.reshape(num, rows, 128)

    out = pl.pallas_call(
        functools.partial(_blend_kernel, num=num),
        out_shape=jax.ShapeDtypeStruct((num, 3, rows, 128), s.dtype),
        grid=(rows // tr,),
        in_specs=(
            [pl.BlockSpec((3, tr, 128), lambda r: (0, r, 0))] * 2
            + [pl.BlockSpec((num, tr, 128), lambda r: (0, r, 0))] * 6
        ),
        out_specs=pl.BlockSpec((num, 3, tr, 128), lambda r: (0, 0, r, 0)),
        compiler_params=pltpu.CompilerParams(dimension_semantics=("parallel",)),
    )(as3(s), as3(e), asn(u), asn(v), asn(w),
      asn(mu_logits), asn(mv_logits), asn(mw_logits))
    return out.reshape(num, 3, dd, hh, ww)


# ---------------------------------------------------------------------------
# Conv helpers (XLA native TPU convolutions).
# ---------------------------------------------------------------------------
def conv3d(x, w, b=None, stride=1, padding=0):
    dn = lax.conv_dimension_numbers(x.shape, w.shape, ("NCDHW", "OIDHW", "NCDHW"))
    y = lax.conv_general_dilated(
        x, w, window_strides=(stride,) * 3, padding=[(padding, padding)] * 3,
        dimension_numbers=dn)
    if b is not None:
        y = y + b.reshape(1, -1, 1, 1, 1)
    return y


def conv_transpose3d(x, w, b=None, stride=2, padding=1):
    # w uses the PyTorch ConvTranspose3d layout: (in_c, out_c, k, k, k).
    k = w.shape[2]
    w_conv = jnp.flip(w, axis=(2, 3, 4)).transpose(1, 0, 2, 3, 4)   # (out_c, in_c, k,k,k)
    dn = lax.conv_dimension_numbers(x.shape, w_conv.shape, ("NCDHW", "OIDHW", "NCDHW"))
    pad = k - 1 - padding
    y = lax.conv_general_dilated(
        x, w_conv, window_strides=(1,) * 3, padding=[(pad, pad)] * 3,
        lhs_dilation=(stride,) * 3, dimension_numbers=dn)
    if b is not None:
        y = y + b.reshape(1, -1, 1, 1, 1)
    return y


# ---------------------------------------------------------------------------
# Parameters.
# ---------------------------------------------------------------------------
class KeyGen:
    def __init__(self, key):
        self._key = key

    def _next(self):
        self._key, sub = jax.random.split(self._key)
        return sub

    def conv_w(self, shape):       # (out_c, in_c, k, k, k)
        fan_in = shape[1] * shape[2] * shape[3] * shape[4]
        return jax.random.normal(self._next(), shape, jnp.float32) / math.sqrt(fan_in)

    def convt_w(self, shape):      # (in_c, out_c, k, k, k)
        fan_in = shape[0] * shape[2] * shape[3] * shape[4]
        return jax.random.normal(self._next(), shape, jnp.float32) / math.sqrt(fan_in)

    def bias(self, n):
        return 0.01 * jax.random.normal(self._next(), (n,), jnp.float32)


def make_fcn_params(kg, inc, outc, c0, with_lstm):
    p = {}
    enc_ch = [inc, c0, 2 * c0, 4 * c0, 8 * c0]
    for i in range(4):
        p[f"enc_w{i}"] = kg.conv_w((enc_ch[i + 1], enc_ch[i], 4, 4, 4))
        p[f"enc_b{i}"] = kg.bias(enc_ch[i + 1])
    if with_lstm:
        for r in range(3):   # 3 residual blocks, each with 3 bias-free convs
            p[f"res{r}"] = [kg.conv_w((8 * c0, 8 * c0, 3, 3, 3)) for _ in range(3)]
        p["lstm_w"] = kg.conv_w((4 * 8 * c0, 16 * c0, 3, 3, 3))
        p["lstm_b"] = kg.bias(4 * 8 * c0)
    dec_ch = [8 * c0, 4 * c0, 2 * c0, c0, c0 // 2]
    for i in range(4):
        p[f"dec_w{i}"] = kg.convt_w((dec_ch[i], dec_ch[i + 1], 4, 4, 4))
        p[f"dec_b{i}"] = kg.bias(dec_ch[i + 1])
    p["dec_w4"] = kg.conv_w((outc, c0 // 2, 3, 3, 3))
    p["dec_b4"] = kg.bias(outc)
    return p


def make_params(kg, inc, outc, c0, num):
    return {
        "interp": [make_fcn_params(kg, inc, outc, c0, True) for _ in range(3)],
        "mask": [make_fcn_params(kg, inc, num, c0, False) for _ in range(3)],
    }


# ---------------------------------------------------------------------------
# Module forward functions.
# ---------------------------------------------------------------------------
def residual_block(ws, x):
    y = jax.nn.relu(conv3d(x, ws[0], None, stride=1, padding=1))
    y = jax.nn.relu(conv3d(y, ws[1], None, stride=1, padding=1))
    y = conv3d(y, ws[2], None, stride=1, padding=1)
    return x + y


def fcn_encoder(p, x, with_res):
    for i in range(4):
        x = jax.nn.relu(conv3d(x, p[f"enc_w{i}"], p[f"enc_b{i}"], stride=2, padding=1))
    if with_res:
        for r in range(3):
            x = residual_block(p[f"res{r}"], x)
    return x


def fcn_decoder(p, x):
    for i in range(4):
        x = jax.nn.relu(conv_transpose3d(x, p[f"dec_w{i}"], p[f"dec_b{i}"],
                                         stride=2, padding=1))
    return conv3d(x, p["dec_w4"], p["dec_b4"], stride=1, padding=1)


def lstm_cell(p, x, h, c, hidden):
    if h is None:
        state_shape = (x.shape[0], hidden) + x.shape[2:]
        h = jnp.zeros(state_shape, x.dtype)
        c = jnp.zeros(state_shape, x.dtype)
    stacked = jnp.concatenate([x, h], axis=1)
    gates = conv3d(stacked, p["lstm_w"], p["lstm_b"], stride=1, padding=1)
    return lstm_update(gates, c)          # fused Pallas gate/state update


def fcn_forward(p, x, num, hidden):
    x = fcn_encoder(p, x, with_res=True)
    h = c = None
    comps = []
    for _ in range(num):
        h, c = lstm_cell(p, x, h, c, hidden)
        comps.append(fcn_decoder(p, h))
    comps = jnp.stack(comps)                           # (num, B, outc, d, h, w)
    comps = jnp.transpose(comps, (1, 2, 0, 3, 4, 5))   # (B, outc, num, d, h, w)
    if comps.shape[0] == 1:
        comps = jnp.squeeze(comps, axis=0)             # (outc, num, d, h, w)
    return comps


def fcn_wo_lstm_forward(p, x):
    # Returns pre-sigmoid logits; FCNwoLSTM's sigmoid is fused into the blend
    # Pallas kernel (the masks are only ever consumed there), saving one full
    # elementwise pass over HBM per mask tensor.
    return fcn_decoder(p, fcn_encoder(p, x, with_res=False))


def rtsrvfd_forward(params, s, e, *, num, hidden):
    u_in = jnp.concatenate([s[:, 0:1], e[:, 0:1]], axis=1)
    v_in = jnp.concatenate([s[:, 1:2], e[:, 1:2]], axis=1)
    w_in = jnp.concatenate([s[:, 2:3], e[:, 2:3]], axis=1)
    pu, pv, pw = params["interp"]
    mu, mv, mw = params["mask"]
    u = fcn_forward(pu, u_in, num, hidden)
    v = fcn_forward(pv, v_in, num, hidden)
    w = fcn_forward(pw, w_in, num, hidden)
    mu_l = fcn_wo_lstm_forward(mu, u_in)
    mv_l = fcn_wo_lstm_forward(mv, v_in)
    mw_l = fcn_wo_lstm_forward(mw, w_in)
    return rtsrvfd_blend(s, e, u, v, w, mu_l, mv_l, mw_l, num)


if __name__ == "__main__":
    INC, OUTC, INIT_CH, NUM = 2, 1, 4, 2
    D = H = W = 16
    HIDDEN = 8 * INIT_CH

    root = jax.random.PRNGKey(0)
    k_params, k_s, k_e = jax.random.split(root, 3)
    params = make_params(KeyGen(k_params), INC, OUTC, INIT_CH, NUM)
    s = jax.random.normal(k_s, (1, 3, D, H, W), dtype=jnp.float32)
    e = jax.random.normal(k_e, (1, 3, D, H, W), dtype=jnp.float32)

    fwd = jax.jit(rtsrvfd_forward, static_argnames=("num", "hidden"))
    out = fwd(params, s, e, num=NUM, hidden=HIDDEN)
    jax.block_until_ready(out)

    assert out.shape == (NUM, 3, D, H, W), out.shape
    assert bool(jnp.all(jnp.isfinite(out)))
    print("KERNEL_OK")
</pallas_src>

<mosaic_0001>
module attributes {stable_mosaic.version = 11 : i64} {
  func.func @_lstm_update_kernel(%arg0: memref<4x32xf32, #tpu.memory_space<vmem>>, %arg1: memref<1x32xf32, #tpu.memory_space<vmem>>, %arg2: memref<1x32xf32, #tpu.memory_space<vmem>>, %arg3: memref<1x32xf32, #tpu.memory_space<vmem>>) attributes {dimension_semantics = [], scalar_prefetch = 0 : i64, scratch_operands = 0 : i64, tpu.core_type = #tpu.core_type<tc>} {
    %c0 = arith.constant 0 : index
    %c0_0 = arith.constant 0 : index
    %0 = vector.load %arg0[%c0, %c0_0] : memref<4x32xf32, #tpu.memory_space<vmem>>, vector<4x32xf32>
    %1 = vector.extract_strided_slice %0 {offsets = [0, 0], sizes = [1, 32], strides = [1, 1]} : vector<4x32xf32> to vector<1x32xf32>
    %cst = arith.constant 0.000000e+00 : f32
    %2 = vector.broadcast %cst : f32 to vector<1x32xf32>
    %3 = arith.subf %2, %1 : vector<1x32xf32>
    %4 = math.exp %3 : vector<1x32xf32>
    %cst_1 = arith.constant 1.000000e+00 : f32
    %5 = vector.broadcast %cst_1 : f32 to vector<1x32xf32>
    %6 = arith.addf %5, %4 : vector<1x32xf32>
    %cst_2 = arith.constant 1.000000e+00 : f32
    %7 = vector.broadcast %cst_2 : f32 to vector<1x32xf32>
    %8 = arith.divf %7, %6 : vector<1x32xf32>
    %9 = vector.extract_strided_slice %0 {offsets = [1, 0], sizes = [1, 32], strides = [1, 1]} : vector<4x32xf32> to vector<1x32xf32>
    %cst_3 = arith.constant 0.000000e+00 : f32
    %10 = vector.broadcast %cst_3 : f32 to vector<1x32xf32>
    %11 = arith.subf %10, %9 : vector<1x32xf32>
    %12 = math.exp %11 : vector<1x32xf32>
    %cst_4 = arith.constant 1.000000e+00 : f32
    %13 = vector.broadcast %cst_4 : f32 to vector<1x32xf32>
    %14 = arith.addf %13, %12 : vector<1x32xf32>
    %cst_5 = arith.constant 1.000000e+00 : f32
    %15 = vector.broadcast %cst_5 : f32 to vector<1x32xf32>
    %16 = arith.divf %15, %14 : vector<1x32xf32>
    %17 = vector.extract_strided_slice %0 {offsets = [2, 0], sizes = [1, 32], strides = [1, 1]} : vector<4x32xf32> to vector<1x32xf32>
    %cst_6 = arith.constant 0.000000e+00 : f32
    %18 = vector.broadcast %cst_6 : f32 to vector<1x32xf32>
    %19 = arith.subf %18, %17 : vector<1x32xf32>
    %20 = math.exp %19 : vector<1x32xf32>
    %cst_7 = arith.constant 1.000000e+00 : f32
    %21 = vector.broadcast %cst_7 : f32 to vector<1x32xf32>
    %22 = arith.addf %21, %20 : vector<1x32xf32>
    %cst_8 = arith.constant 1.000000e+00 : f32
    %23 = vector.broadcast %cst_8 : f32 to vector<1x32xf32>
    %24 = arith.divf %23, %22 : vector<1x32xf32>
    %25 = vector.extract_strided_slice %0 {offsets = [3, 0], sizes = [1, 32], strides = [1, 1]} : vector<4x32xf32> to vector<1x32xf32>
    %26 = math.tanh %25 : vector<1x32xf32>
    %c0_9 = arith.constant 0 : index
    %c0_10 = arith.constant 0 : index
    %27 = vector.load %arg1[%c0_9, %c0_10] : memref<1x32xf32, #tpu.memory_space<vmem>>, vector<1x32xf32>
    %28 = arith.mulf %16, %27 : vector<1x32xf32>
    %29 = arith.mulf %8, %26 : vector<1x32xf32>
    %30 = arith.addf %28, %29 : vector<1x32xf32>
    %c0_11 = arith.constant 0 : index
    %c0_12 = arith.constant 0 : index
    %31 = vector.load %arg3[%c0_11, %c0_12] : memref<1x32xf32, #tpu.memory_space<vmem>>, vector<1x32xf32>
    tpu.vector_store %arg3[%c0_11, %c0_12], %30 {strides = array<i32>} : memref<1x32xf32, #tpu.memory_space<vmem>>, vector<1x32xf32>,
    %32 = math.tanh %30 : vector<1x32xf32>
    %33 = arith.mulf %24, %32 : vector<1x32xf32>
    %c0_13 = arith.constant 0 : index
    %c0_14 = arith.constant 0 : index
    %34 = vector.load %arg2[%c0_13, %c0_14] : memref<1x32xf32, #tpu.memory_space<vmem>>, vector<1x32xf32>
    tpu.vector_store %arg2[%c0_13, %c0_14], %33 {strides = array<i32>} : memref<1x32xf32, #tpu.memory_space<vmem>>, vector<1x32xf32>,
    return
  }
}

module attributes {stable_mosaic.version = 11 : i64} {
  func.func @_lstm_update_kernel(%arg0: memref<4x32xf32, #tpu.memory_space<vmem>>, %arg1: memref<1x32xf32, #tpu.memory_space<vmem>>, %arg2: memref<1x32xf32, #tpu.memory_space<vmem>>, %arg3: memref<1x32xf32, #tpu.memory_space<vmem>>) attributes {dimension_semantics = [], scalar_prefetch = 0 : i64, scratch_operands = 0 : i64, tpu.core_type = #tpu.core_type<tc>} {
    %c0 = arith.constant 0 : index
    %c0_0 = arith.constant 0 : index
    %0 = vector.load %arg0[%c0, %c0_0] : memref<4x32xf32, #tpu.memory_space<vmem>>, vector<4x32xf32>
    %1 = vector.extract_strided_slice %0 {offsets = [0, 0], sizes = [1, 32], strides = [1, 1]} : vector<4x32xf32> to vector<1x32xf32>
    %cst = arith.constant 0.000000e+00 : f32
    %2 = vector.broadcast %cst : f32 to vector<1x32xf32>
    %3 = arith.subf %2, %1 : vector<1x32xf32>
    %4 = math.exp %3 : vector<1x32xf32>
    %cst_1 = arith.constant 1.000000e+00 : f32
    %5 = vector.broadcast %cst_1 : f32 to vector<1x32xf32>
    %6 = arith.addf %5, %4 : vector<1x32xf32>
    %cst_2 = arith.constant 1.000000e+00 : f32
    %7 = vector.broadcast %cst_2 : f32 to vector<1x32xf32>
    %8 = arith.divf %7, %6 : vector<1x32xf32>
    %9 = vector.extract_strided_slice %0 {offsets = [1, 0], sizes = [1, 32], strides = [1, 1]} : vector<4x32xf32> to vector<1x32xf32>
    %cst_3 = arith.constant 0.000000e+00 : f32
    %10 = vector.broadcast %cst_3 : f32 to vector<1x32xf32>
    %11 = arith.subf %10, %9 : vector<1x32xf32>
    %12 = math.exp %11 : vector<1x32xf32>
    %cst_4 = arith.constant 1.000000e+00 : f32
    %13 = vector.broadcast %cst_4 : f32 to vector<1x32xf32>
    %14 = arith.addf %13, %12 : vector<1x32xf32>
    %cst_5 = arith.constant 1.000000e+00 : f32
    %15 = vector.broadcast %cst_5 : f32 to vector<1x32xf32>
    %16 = arith.divf %15, %14 : vector<1x32xf32>
    %17 = vector.extract_strided_slice %0 {offsets = [2, 0], sizes = [1, 32], strides = [1, 1]} : vector<4x32xf32> to vector<1x32xf32>
    %cst_6 = arith.constant 0.000000e+00 : f32
    %18 = vector.broadcast %cst_6 : f32 to vector<1x32xf32>
    %19 = arith.subf %18, %17 : vector<1x32xf32>
    %20 = math.exp %19 : vector<1x32xf32>
    %cst_7 = arith.constant 1.000000e+00 : f32
    %21 = vector.broadcast %cst_7 : f32 to vector<1x32xf32>
    %22 = arith.addf %21, %20 : vector<1x32xf32>
    %cst_8 = arith.constant 1.000000e+00 : f32
    %23 = vector.broadcast %cst_8 : f32 to vector<1x32xf32>
    %24 = arith.divf %23, %22 : vector<1x32xf32>
    %25 = vector.extract_strided_slice %0 {offsets = [3, 0], sizes = [1, 32], strides = [1, 1]} : vector<4x32xf32> to vector<1x32xf32>
    %26 = math.tanh %25 : vector<1x32xf32>
    %c0_9 = arith.constant 0 : index
    %c0_10 = arith.constant 0 : index
    %27 = vector.load %arg1[%c0_9, %c0_10] : memref<1x32xf32, #tpu.memory_space<vmem>>, vector<1x32xf32>
    %28 = arith.mulf %16, %27 : vector<1x32xf32>
    %29 = arith.mulf %8, %26 : vector<1x32xf32>
    %30 = arith.addf %28, %29 : vector<1x32xf32>
    %c0_11 = arith.constant 0 : index
    %c0_12 = arith.constant 0 : index
    %31 = vector.load %arg3[%c0_11, %c0_12] : memref<1x32xf32, #tpu.memory_space<vmem>>, vector<1x32xf32>
    tpu.vector_store %arg3[%c0_11, %c0_12], %30 {strides = array<i32>} : memref<1x32xf32, #tpu.memory_space<vmem>>, vector<1x32xf32>,
    %32 = math.tanh %30 : vector<1x32xf32>
    %33 = arith.mulf %24, %32 : vector<1x32xf32>
    %c0_13 = arith.constant 0 : index
    %c0_14 = arith.constant 0 : index
    %34 = vector.load %arg2[%c0_13, %c0_14] : memref<1x32xf32, #tpu.memory_space<vmem>>, vector<1x32xf32>
    tpu.vector_store %arg2[%c0_13, %c0_14], %33 {strides = array<i32>} : memref<1x32xf32, #tpu.memory_space<vmem>>, vector<1x32xf32>,
    return
  }
}

module attributes {stable_mosaic.version = 11 : i64} {
  func.func @_blend_kernel(%arg0: i32, %arg1: memref<3x32x128xf32, #tpu.memory_space<vmem>>, %arg2: memref<3x32x128xf32, #tpu.memory_space<vmem>>, %arg3: memref<2x32x128xf32, #tpu.memory_space<vmem>>, %arg4: memref<2x32x128xf32, #tpu.memory_space<vmem>>, %arg5: memref<2x32x128xf32, #tpu.memory_space<vmem>>, %arg6: memref<2x32x128xf32, #tpu.memory_space<vmem>>, %arg7: memref<2x32x128xf32, #tpu.memory_space<vmem>>, %arg8: memref<2x32x128xf32, #tpu.memory_space<vmem>>, %arg9: memref<2x3x32x128xf32, #tpu.memory_space<vmem>>) attributes {dimension_semantics = [#tpu.dimension_semantics<parallel>], iteration_bounds = array<i64: 1>, scalar_prefetch = 0 : i64, scratch_operands = 0 : i64, tpu.core_type = #tpu.core_type<tc>, window_params = [{transform_indices = @transform_0, window_bounds = array<i64: 3, 32, 128>}, {transform_indices = @transform_1, window_bounds = array<i64: 3, 32, 128>}, {transform_indices = @transform_2, window_bounds = array<i64: 2, 32, 128>}, {transform_indices = @transform_3, window_bounds = array<i64: 2, 32, 128>}, {transform_indices = @transform_4, window_bounds = array<i64: 2, 32, 128>}, {transform_indices = @transform_5, window_bounds = array<i64: 2, 32, 128>}, {transform_indices = @transform_6, window_bounds = array<i64: 2, 32, 128>}, {transform_indices = @transform_7, window_bounds = array<i64: 2, 32, 128>}, {transform_indices = @transform_8, window_bounds = array<i64: 2, 3, 32, 128>}]} {
    %c0 = arith.constant 0 : index
    %c0_0 = arith.constant 0 : index
    %c0_1 = arith.constant 0 : index
    %0 = vector.load %arg1[%c0, %c0_0, %c0_1] : memref<3x32x128xf32, #tpu.memory_space<vmem>>, vector<1x32x128xf32>
    %1 = vector.shape_cast %0 : vector<1x32x128xf32> to vector<32x128xf32>
    %c0_2 = arith.constant 0 : index
    %c0_3 = arith.constant 0 : index
    %c0_4 = arith.constant 0 : index
    %2 = vector.load %arg2[%c0_2, %c0_3, %c0_4] : memref<3x32x128xf32, #tpu.memory_space<vmem>>, vector<1x32x128xf32>
    %3 = vector.shape_cast %2 : vector<1x32x128xf32> to vector<32x128xf32>
    %cst = arith.constant 0.333333343 : f32
    %4 = vector.broadcast %cst : f32 to vector<32x128xf32>
    %5 = arith.mulf %4, %3 : vector<32x128xf32>
    %cst_5 = arith.constant 0.666666686 : f32
    %6 = vector.broadcast %cst_5 : f32 to vector<32x128xf32>
    %7 = arith.mulf %6, %1 : vector<32x128xf32>
    %8 = arith.addf %5, %7 : vector<32x128xf32>
    %c0_6 = arith.constant 0 : index
    %c0_7 = arith.constant 0 : index
    %c0_8 = arith.constant 0 : index
    %9 = vector.load %arg6[%c0_6, %c0_7, %c0_8] : memref<2x32x128xf32, #tpu.memory_space<vmem>>, vector<1x32x128xf32>
    %10 = vector.shape_cast %9 : vector<1x32x128xf32> to vector<32x128xf32>
    %cst_9 = arith.constant 0.000000e+00 : f32
    %11 = vector.broadcast %cst_9 : f32 to vector<32x128xf32>
    %12 = arith.subf %11, %10 : vector<32x128xf32>
    %13 = math.exp %12 : vector<32x128xf32>
    %cst_10 = arith.constant 1.000000e+00 : f32
    %14 = vector.broadcast %cst_10 : f32 to vector<32x128xf32>
    %15 = arith.addf %14, %13 : vector<32x128xf32>
    %cst_11 = arith.constant 1.000000e+00 : f32
    %16 = vector.broadcast %cst_11 : f32 to vector<32x128xf32>
    %17 = arith.divf %16, %15 : vector<32x128xf32>
    %c0_12 = arith.constant 0 : index
    %c0_13 = arith.constant 0 : index
    %c0_14 = arith.constant 0 : index
    %18 = vector.load %arg3[%c0_12, %c0_13, %c0_14] : memref<2x32x128xf32, #tpu.memory_space<vmem>>, vector<1x32x128xf32>
    %19 = vector.shape_cast %18 : vector<1x32x128xf32> to vector<32x128xf32>
    %20 = arith.mulf %17, %19 : vector<32x128xf32>
    %cst_15 = arith.constant 1.000000e+00 : f32
    %21 = vector.broadcast %cst_15 : f32 to vector<32x128xf32>
    %22 = arith.subf %21, %17 : vector<32x128xf32>
    %23 = arith.mulf %22, %8 : vector<32x128xf32>
    %24 = arith.addf %20, %23 : vector<32x128xf32>
    %c0_16 = arith.constant 0 : index
    %c0_17 = arith.constant 0 : index
    %c0_18 = arith.constant 0 : index
    %c0_19 = arith.constant 0 : index
    %25 = vector.load %arg9[%c0_16, %c0_17, %c0_18, %c0_19] : memref<2x3x32x128xf32, #tpu.memory_space<vmem>>, vector<1x1x32x128xf32>
    %26 = vector.shape_cast %25 : vector<1x1x32x128xf32> to vector<32x128xf32>
    %27 = vector.shape_cast %24 : vector<32x128xf32> to vector<1x1x32x128xf32>
    tpu.vector_store %arg9[%c0_16, %c0_17, %c0_18, %c0_19], %27 {strides = array<i32>} : memref<2x3x32x128xf32, #tpu.memory_space<vmem>>, vector<1x1x32x128xf32>,
    %cst_20 = arith.constant 0.666666686 : f32
    %28 = vector.broadcast %cst_20 : f32 to vector<32x128xf32>
    %29 = arith.mulf %28, %3 : vector<32x128xf32>
    %cst_21 = arith.constant 0.333333343 : f32
    %30 = vector.broadcast %cst_21 : f32 to vector<32x128xf32>
    %31 = arith.mulf %30, %1 : vector<32x128xf32>
    %32 = arith.addf %29, %31 : vector<32x128xf32>
    %c1 = arith.constant 1 : index
    %c0_22 = arith.constant 0 : index
    %c0_23 = arith.constant 0 : index
    %33 = vector.load %arg6[%c1, %c0_22, %c0_23] : memref<2x32x128xf32, #tpu.memory_space<vmem>>, vector<1x32x128xf32>
    %34 = vector.shape_cast %33 : vector<1x32x128xf32> to vector<32x128xf32>
    %cst_24 = arith.constant 0.000000e+00 : f32
    %35 = vector.broadcast %cst_24 : f32 to vector<32x128xf32>
    %36 = arith.subf %35, %34 : vector<32x128xf32>
    %37 = math.exp %36 : vector<32x128xf32>
    %cst_25 = arith.constant 1.000000e+00 : f32
    %38 = vector.broadcast %cst_25 : f32 to vector<32x128xf32>
    %39 = arith.addf %38, %37 : vector<32x128xf32>
    %cst_26 = arith.constant 1.000000e+00 : f32
    %40 = vector.broadcast %cst_26 : f32 to vector<32x128xf32>
    %41 = arith.divf %40, %39 : vector<32x128xf32>
    %c1_27 = arith.constant 1 : index
    %c0_28 = arith.constant 0 : index
    %c0_29 = arith.constant 0 : index
    %42 = vector.load %arg3[%c1_27, %c0_28, %c0_29] : memref<2x32x128xf32, #tpu.memory_space<vmem>>, vector<1x32x128xf32>
    %43 = vector.shape_cast %42 : vector<1x32x128xf32> to vector<32x128xf32>
    %44 = arith.mulf %41, %43 : vector<32x128xf32>
    %cst_30 = arith.constant 1.000000e+00 : f32
    %45 = vector.broadcast %cst_30 : f32 to vector<32x128xf32>
    %46 = arith.subf %45, %41 : vector<32x128xf32>
    %47 = arith.mulf %46, %32 : vector<32x128xf32>
    %48 = arith.addf %44, %47 : vector<32x128xf32>
    %c1_31 = arith.constant 1 : index
    %c0_32 = arith.constant 0 : index
    %c0_33 = arith.constant 0 : index
    %c0_34 = arith.constant 0 : index
    %49 = vector.load %arg9[%c1_31, %c0_32, %c0_33, %c0_34] : memref<2x3x32x128xf32, #tpu.memory_space<vmem>>, vector<1x1x32x128xf32>
    %50 = vector.shape_cast %49 : vector<1x1x32x128xf32> to vector<32x128xf32>
    %51 = vector.shape_cast %48 : vector<32x128xf32> to vector<1x1x32x128xf32>
    tpu.vector_store %arg9[%c1_31, %c0_32, %c0_33, %c0_34], %51 {strides = array<i32>} : memref<2x3x32x128xf32, #tpu.memory_space<vmem>>, vector<1x1x32x128xf32>,
    %c1_35 = arith.constant 1 : index
    %c0_36 = arith.constant 0 : index
    %c0_37 = arith.constant 0 : index
    %52 = vector.load %arg1[%c1_35, %c0_36, %c0_37] : memref<3x32x128xf32, #tpu.memory_space<vmem>>, vector<1x32x128xf32>
    %53 = vector.shape_cast %52 : vector<1x32x128xf32> to vector<32x128xf32>
    %c1_38 = arith.constant 1 : index
    %c0_39 = arith.constant 0 : index
    %c0_40 = arith.constant 0 : index
    %54 = vector.load %arg2[%c1_38, %c0_39, %c0_40] : memref<3x32x128xf32, #tpu.memory_space<vmem>>, vector<1x32x128xf32>
    %55 = vector.shape_cast %54 : vector<1x32x128xf32> to vector<32x128xf32>
    %cst_41 = arith.constant 0.333333343 : f32
    %56 = vector.broadcast %cst_41 : f32 to vector<32x128xf32>
    %57 = arith.mulf %56, %55 : vector<32x128xf32>
    %cst_42 = arith.constant 0.666666686 : f32
    %58 = vector.broadcast %cst_42 : f32 to vector<32x128xf32>
    %59 = arith.mulf %58, %53 : vector<32x128xf32>
    %60 = arith.addf %57, %59 : vector<32x128xf32>
    %c0_43 = arith.constant 0 : index
    %c0_44 = arith.constant 0 : index
    %c0_45 = arith.constant 0 : index
    %61 = vector.load %arg7[%c0_43, %c0_44, %c0_45] : memref<2x32x128xf32, #tpu.memory_space<vmem>>, vector<1x32x128xf32>
    %62 = vector.shape_cast %61 : vector<1x32x128xf32> to vector<32x128xf32>
    %cst_46 = arith.constant 0.000000e+00 : f32
    %63 = vector.broadcast %cst_46 : f32 to vector<32x128xf32>
    %64 = arith.subf %63, %62 : vector<32x128xf32>
    %65 = math.exp %64 : vector<32x128xf32>
    %cst_47 = arith.constant 1.000000e+00 : f32
    %66 = vector.broadcast %cst_47 : f32 to vector<32x128xf32>
    %67 = arith.addf %66, %65 : vector<32x128xf32>
    %cst_48 = arith.constant 1.000000e+00 : f32
    %68 = vector.broadcast %cst_48 : f32 to vector<32x128xf32>
    %69 = arith.divf %68, %67 : vector<32x128xf32>
    %c0_49 = arith.constant 0 : index
    %c0_50 = arith.constant 0 : index
    %c0_51 = arith.constant 0 : index
    %70 = vector.load %arg4[%c0_49, %c0_50, %c0_51] : memref<2x32x128xf32, #tpu.memory_space<vmem>>, vector<1x32x128xf32>
    %71 = vector.shape_cast %70 : vector<1x32x128xf32> to vector<32x128xf32>
    %72 = arith.mulf %69, %71 : vector<32x128xf32>
    %cst_52 = arith.constant 1.000000e+00 : f32
    %73 = vector.broadcast %cst_52 : f32 to vector<32x128xf32>
    %74 = arith.subf %73, %69 : vector<32x128xf32>
    %75 = arith.mulf %74, %60 : vector<32x128xf32>
    %76 = arith.addf %72, %75 : vector<32x128xf32>
    %c0_53 = arith.constant 0 : index
    %c1_54 = arith.constant 1 : index
    %c0_55 = arith.constant 0 : index
    %c0_56 = arith.constant 0 : index
    %77 = vector.load %arg9[%c0_53, %c1_54, %c0_55, %c0_56] : memref<2x3x32x128xf32, #tpu.memory_space<vmem>>, vector<1x1x32x128xf32>
    %78 = vector.shape_cast %77 : vector<1x1x32x128xf32> to vector<32x128xf32>
    %79 = vector.shape_cast %76 : vector<32x128xf32> to vector<1x1x32x128xf32>
    tpu.vector_store %arg9[%c0_53, %c1_54, %c0_55, %c0_56], %79 {strides = array<i32>} : memref<2x3x32x128xf32, #tpu.memory_space<vmem>>, vector<1x1x32x128xf32>,
    %cst_57 = arith.constant 0.666666686 : f32
    %80 = vector.broadcast %cst_57 : f32 to vector<32x128xf32>
    %81 = arith.mulf %80, %55 : vector<32x128xf32>
    %cst_58 = arith.constant 0.333333343 : f32
    %82 = vector.broadcast %cst_58 : f32 to vector<32x128xf32>
    %83 = arith.mulf %82, %53 : vector<32x128xf32>
    %84 = arith.addf %81, %83 : vector<32x128xf32>
    %c1_59 = arith.constant 1 : index
    %c0_60 = arith.constant 0 : index
    %c0_61 = arith.constant 0 : index
    %85 = vector.load %arg7[%c1_59, %c0_60, %c0_61] : memref<2x32x128xf32, #tpu.memory_space<vmem>>, vector<1x32x128xf32>
    %86 = vector.shape_cast %85 : vector<1x32x128xf32> to vector<32x128xf32>
    %cst_62 = arith.constant 0.000000e+00 : f32
    %87 = vector.broadcast %cst_62 : f32 to vector<32x128xf32>
    %88 = arith.subf %87, %86 : vector<32x128xf32>
    %89 = math.exp %88 : vector<32x128xf32>
    %cst_63 = arith.constant 1.000000e+00 : f32
    %90 = vector.broadcast %cst_63 : f32 to vector<32x128xf32>
    %91 = arith.addf %90, %89 : vector<32x128xf32>
    %cst_64 = arith.constant 1.000000e+00 : f32
    %92 = vector.broadcast %cst_64 : f32 to vector<32x128xf32>
    %93 = arith.divf %92, %91 : vector<32x128xf32>
    %c1_65 = arith.constant 1 : index
    %c0_66 = arith.constant 0 : index
    %c0_67 = arith.constant 0 : index
    %94 = vector.load %arg4[%c1_65, %c0_66, %c0_67] : memref<2x32x128xf32, #tpu.memory_space<vmem>>, vector<1x32x128xf32>
    %95 = vector.shape_cast %94 : vector<1x32x128xf32> to vector<32x128xf32>
    %96 = arith.mulf %93, %95 : vector<32x128xf32>
    %cst_68 = arith.constant 1.000000e+00 : f32
    %97 = vector.broadcast %cst_68 : f32 to vector<32x128xf32>
    %98 = arith.subf %97, %93 : vector<32x128xf32>
    %99 = arith.mulf %98, %84 : vector<32x128xf32>
    %100 = arith.addf %96, %99 : vector<32x128xf32>
    %c1_69 = arith.constant 1 : index
    %c1_70 = arith.constant 1 : index
    %c0_71 = arith.constant 0 : index
    %c0_72 = arith.constant 0 : index
    %101 = vector.load %arg9[%c1_69, %c1_70, %c0_71, %c0_72] : memref<2x3x32x128xf32, #tpu.memory_space<vmem>>, vector<1x1x32x128xf32>
    %102 = vector.shape_cast %101 : vector<1x1x32x128xf32> to vector<32x128xf32>
    %103 = vector.shape_cast %100 : vector<32x128xf32> to vector<1x1x32x128xf32>
    tpu.vector_store %arg9[%c1_69, %c1_70, %c0_71, %c0_72], %103 {strides = array<i32>} : memref<2x3x32x128xf32, #tpu.memory_space<vmem>>, vector<1x1x32x128xf32>,
    %c2 = arith.constant 2 : index
    %c0_73 = arith.constant 0 : index
    %c0_74 = arith.constant 0 : index
    %104 = vector.load %arg1[%c2, %c0_73, %c0_74] : memref<3x32x128xf32, #tpu.memory_space<vmem>>, vector<1x32x128xf32>
    %105 = vector.shape_cast %104 : vector<1x32x128xf32> to vector<32x128xf32>
    %c2_75 = arith.constant 2 : index
    %c0_76 = arith.constant 0 : index
    %c0_77 = arith.constant 0 : index
    %106 = vector.load %arg2[%c2_75, %c0_76, %c0_77] : memref<3x32x128xf32, #tpu.memory_space<vmem>>, vector<1x32x128xf32>
    %107 = vector.shape_cast %106 : vector<1x32x128xf32> to vector<32x128xf32>
    %cst_78 = arith.constant 0.333333343 : f32
    %108 = vector.broadcast %cst_78 : f32 to vector<32x128xf32>
    %109 = arith.mulf %108, %107 : vector<32x128xf32>
    %cst_79 = arith.constant 0.666666686 : f32
    %110 = vector.broadcast %cst_79 : f32 to vector<32x128xf32>
    %111 = arith.mulf %110, %105 : vector<32x128xf32>
    %112 = arith.addf %109, %111 : vector<32x128xf32>
    %c0_80 = arith.constant 0 : index
    %c0_81 = arith.constant 0 : index
    %c0_82 = arith.constant 0 : index
    %113 = vector.load %arg8[%c0_80, %c0_81, %c0_82] : memref<2x32x128xf32, #tpu.memory_space<vmem>>, vector<1x32x128xf32>
    %114 = vector.shape_cast %113 : vector<1x32x128xf32> to vector<32x128xf32>
    %cst_83 = arith.constant 0.000000e+00 : f32
    %115 = vector.broadcast %cst_83 : f32 to vector<32x128xf32>
    %116 = arith.subf %115, %114 : vector<32x128xf32>
    %117 = math.exp %116 : vector<32x128xf32>
    %cst_84 = arith.constant 1.000000e+00 : f32
    %118 = vector.broadcast %cst_84 : f32 to vector<32x128xf32>
    %119 = arith.addf %118, %117 : vector<32x128xf32>
    %cst_85 = arith.constant 1.000000e+00 : f32
    %120 = vector.broadcast %cst_85 : f32 to vector<32x128xf32>
    %121 = arith.divf %120, %119 : vector<32x128xf32>
    %c0_86 = arith.constant 0 : index
    %c0_87 = arith.constant 0 : index
    %c0_88 = arith.constant 0 : index
    %122 = vector.load %arg5[%c0_86, %c0_87, %c0_88] : memref<2x32x128xf32, #tpu.memory_space<vmem>>, vector<1x32x128xf32>
    %123 = vector.shape_cast %122 : vector<1x32x128xf32> to vector<32x128xf32>
    %124 = arith.mulf %121, %123 : vector<32x128xf32>
    %cst_89 = arith.constant 1.000000e+00 : f32
    %125 = vector.broadcast %cst_89 : f32 to vector<32x128xf32>
    %126 = arith.subf %125, %121 : vector<32x128xf32>
    %127 = arith.mulf %126, %112 : vector<32x128xf32>
    %128 = arith.addf %124, %127 : vector<32x128xf32>
    %c0_90 = arith.constant 0 : index
    %c2_91 = arith.constant 2 : index
    %c0_92 = arith.constant 0 : index
    %c0_93 = arith.constant 0 : index
    %129 = vector.load %arg9[%c0_90, %c2_91, %c0_92, %c0_93] : memref<2x3x32x128xf32, #tpu.memory_space<vmem>>, vector<1x1x32x128xf32>
    %130 = vector.shape_cast %129 : vector<1x1x32x128xf32> to vector<32x128xf32>
    %131 = vector.shape_cast %128 : vector<32x128xf32> to vector<1x1x32x128xf32>
    tpu.vector_store %arg9[%c0_90, %c2_91, %c0_92, %c0_93], %131 {strides = array<i32>} : memref<2x3x32x128xf32, #tpu.memory_space<vmem>>, vector<1x1x32x128xf32>,
    %cst_94 = arith.constant 0.666666686 : f32
    %132 = vector.broadcast %cst_94 : f32 to vector<32x128xf32>
    %133 = arith.mulf %132, %107 : vector<32x128xf32>
    %cst_95 = arith.constant 0.333333343 : f32
    %134 = vector.broadcast %cst_95 : f32 to vector<32x128xf32>
    %135 = arith.mulf %134, %105 : vector<32x128xf32>
    %136 = arith.addf %133, %135 : vector<32x128xf32>
    %c1_96 = arith.constant 1 : index
    %c0_97 = arith.constant 0 : index
    %c0_98 = arith.constant 0 : index
    %137 = vector.load %arg8[%c1_96, %c0_97, %c0_98] : memref<2x32x128xf32, #tpu.memory_space<vmem>>, vector<1x32x128xf32>
    %138 = vector.shape_cast %137 : vector<1x32x128xf32> to vector<32x128xf32>
    %cst_99 = arith.constant 0.000000e+00 : f32
    %139 = vector.broadcast %cst_99 : f32 to vector<32x128xf32>
    %140 = arith.subf %139, %138 : vector<32x128xf32>
    %141 = math.exp %140 : vector<32x128xf32>
    %cst_100 = arith.constant 1.000000e+00 : f32
    %142 = vector.broadcast %cst_100 : f32 to vector<32x128xf32>
    %143 = arith.addf %142, %141 : vector<32x128xf32>
    %cst_101 = arith.constant 1.000000e+00 : f32
    %144 = vector.broadcast %cst_101 : f32 to vector<32x128xf32>
    %145 = arith.divf %144, %143 : vector<32x128xf32>
    %c1_102 = arith.constant 1 : index
    %c0_103 = arith.constant 0 : index
    %c0_104 = arith.constant 0 : index
    %146 = vector.load %arg5[%c1_102, %c0_103, %c0_104] : memref<2x32x128xf32, #tpu.memory_space<vmem>>, vector<1x32x128xf32>
    %147 = vector.shape_cast %146 : vector<1x32x128xf32> to vector<32x128xf32>
    %148 = arith.mulf %145, %147 : vector<32x128xf32>
    %cst_105 = arith.constant 1.000000e+00 : f32
    %149 = vector.broadcast %cst_105 : f32 to vector<32x128xf32>
    %150 = arith.subf %149, %145 : vector<32x128xf32>
    %151 = arith.mulf %150, %136 : vector<32x128xf32>
    %152 = arith.addf %148, %151 : vector<32x128xf32>
    %c1_106 = arith.constant 1 : index
    %c2_107 = arith.constant 2 : index
    %c0_108 = arith.constant 0 : index
    %c0_109 = arith.constant 0 : index
    %153 = vector.load %arg9[%c1_106, %c2_107, %c0_108, %c0_109] : memref<2x3x32x128xf32, #tpu.memory_space<vmem>>, vector<1x1x32x128xf32>
    %154 = vector.shape_cast %153 : vector<1x1x32x128xf32> to vector<32x128xf32>
    %155 = vector.shape_cast %152 : vector<32x128xf32> to vector<1x1x32x128xf32>
    tpu.vector_store %arg9[%c1_106, %c2_107, %c0_108, %c0_109], %155 {strides = array<i32>} : memref<2x3x32x128xf32, #tpu.memory_space<vmem>>, vector<1x1x32x128xf32>,
    return
  }
  func.func @transform_0(%arg0: i32) -> (i32, i32, i32) {
    %c0_i32 = arith.constant 0 : i32
    %c0_i32_0 = arith.constant 0 : i32
    %c0_i32_1 = arith.constant 0 : i32
    return %c0_i32, %arg0, %c0_i32_0 : i32, i32, i32
  }
  func.func @transform_1(%arg0: i32) -> (i32, i32, i32) {
    %c0_i32 = arith.constant 0 : i32
    %c0_i32_0 = arith.constant 0 : i32
    %c0_i32_1 = arith.constant 0 : i32
    return %c0_i32, %arg0, %c0_i32_0 : i32, i32, i32
  }
  func.func @transform_2(%arg0: i32) -> (i32, i32, i32) {
    %c0_i32 = arith.constant 0 : i32
    %c0_i32_0 = arith.constant 0 : i32
    %c0_i32_1 = arith.constant 0 : i32
    return %c0_i32, %arg0, %c0_i32_0 : i32, i32, i32
  }
  func.func @transform_3(%arg0: i32) -> (i32, i32, i32) {
    %c0_i32 = arith.constant 0 : i32
    %c0_i32_0 = arith.constant 0 : i32
    %c0_i32_1 = arith.constant 0 : i32
    return %c0_i32, %arg0, %c0_i32_0 : i32, i32, i32
  }
  func.func @transform_4(%arg0: i32) -> (i32, i32, i32) {
    %c0_i32 = arith.constant 0 : i32
    %c0_i32_0 = arith.constant 0 : i32
    %c0_i32_1 = arith.constant 0 : i32
    return %c0_i32, %arg0, %c0_i32_0 : i32, i32, i32
  }
  func.func @transform_5(%arg0: i32) -> (i32, i32, i32) {
    %c0_i32 = arith.constant 0 : i32
    %c0_i32_0 = arith.constant 0 : i32
    %c0_i32_1 = arith.constant 0 : i32
    return %c0_i32, %arg0, %c0_i32_0 : i32, i32, i32
  }
  func.func @transform_6(%arg0: i32) -> (i32, i32, i32) {
    %c0_i32 = arith.constant 0 : i32
    %c0_i32_0 = arith.constant 0 : i32
    %c0_i32_1 = arith.constant 0 : i32
    return %c0_i32, %arg0, %c0_i32_0 : i32, i32, i32
  }
  func.func @transform_7(%arg0: i32) -> (i32, i32, i32) {
    %c0_i32 = arith.constant 0 : i32
    %c0_i32_0 = arith.constant 0 : i32
    %c0_i32_1 = arith.constant 0 : i32
    return %c0_i32, %arg0, %c0_i32_0 : i32, i32, i32
  }
  func.func @transform_8(%arg0: i32) -> (i32, i32, i32, i32) {
    %c0_i32 = arith.constant 0 : i32
    %c0_i32_0 = arith.constant 0 : i32
    %c0_i32_1 = arith.constant 0 : i32
    %c0_i32_2 = arith.constant 0 : i32
    return %c0_i32, %c0_i32_0, %arg0, %c0_i32_1 : i32, i32, i32, i32
  }
}

</mosaic_0001>

<bundles_post_ra>
// kernel: reverse.24
= control target key start
LH: loop header
LB: loop body
LE: loop exit
PB: predicated region body
PF: predicated region fallthrough
CT: control target
= control target key end

     0   :  { %s6585_s6 = smov 0   ;;  %s6587_s7 = smov 0   ;;  %s7815_s0 = inlined_call_operand.vmem [shape: f32[32,16,4,4,4], index: 0, kind: input, shape index: {}]   ;;  %s7816_s1 = inlined_call_operand.vmem [shape: bf16[32,16,4,4,4], index: 1, kind: output, shape index: {}]  }
   0x1   :  { %s6589_s8 = smov 0  }
   0x2 LB: > { %s6067_s9 = sadd.s32 4294967295, %s6564_s8   ;;  %s32_s10 = sadd.s32 1, %s6560_s7  ;;  %s6564_s8 = sphi %s6589_s8, %s7_s8   ;;  %s6560_s7 = sphi %s6587_s7, %s7820_s7   ;;  %s6556_s6 = sphi %s6585_s6, %s7819_s6  }
   0x3   : > { %p34_p0 = scmp.ge.s32.totalorder %s32_s10, 2  ;;  %p6069_p1 = scmp.ge.s32.totalorder %s6564_s8, 2 }
   0x4   : > { %s56_s11 = sand.u32 (!%p6069_p1), 1, %s6564_s8   ;;  %s60_s12 = ssub.s32 (!%p6069_p1), 1, %s6560_s7 }
   0x5   : > { %s7822_s10 = smov (%p34_p0, %s32_s10), 0  ;;  %54 = sbr.rel (%p6069_p1) target bundleno = 106 (0x6a), region = 16 }
   0x6   : > { %s6070_s13 = sshll.u32 (!%p6069_p1), %s56_s11, 10  ;;  %s6467_s14 = sshll.u32 (!%p6069_p1), %s60_s12, 3 }
   0x7   : > { %s6610_s17 = scalar_lea.vmem (!%p6069_p1), %s7815_s0, %s6467_s14   ;;  %s58_s18 = scalar_lea.vmem (!%p6069_p1), [#allocation1], %s6070_s13 }
   0x8   : > { %s6612_s19 = scalar_lea.vmem (!%p6069_p1), %s58_s18, 4 [#allocation1]   ;;  %s6617_s21 = smov (!%p6069_p1), 0  }
   0x9   : > { %s7817_s20 = smov (!%p6069_p1), %s6612_s19 }
   0xc LB: >> { %v99_v0 = vld [vmem:[%s6610_s17] sm:$0xf]  ;;  %v101_v1 = vld [vmem:[%s6610_s17 + $0x4] sm:$0xf]  ;;  %v103_v2 = vld [vmem:[%s6610_s17 + $0x10] sm:$0xf]  ;;  %s6572_s21 = sphi %s6617_s21, %s93_s21   ;;  %s6568_s20 = sphi %s7817_s20, %s7818_s20  }
   0xd   : >> { %100 = vst [vmem:[%s6568_s20] sm:$0xf] %v99_v0  ;;  %102 = vst [vmem:[%s6568_s20 + $0x8] sm:$0xf] %v101_v1  ;;  %v105_v3 = vld [vmem:[%s6610_s17 + $0x14] sm:$0xf]  ;;  %s93_s21 = sadd.s32 1, %s6572_s21  }
   0xe   : >> { %104 = vst [vmem:[%s6568_s20 + $0x10] sm:$0xf] %v103_v2  ;;  %v107_v4 = vld [vmem:[%s6610_s17 + $0x20] sm:$0xf]  ;;  %v109_v5 = vld [vmem:[%s6610_s17 + $0x24] sm:$0xf] }
   0xf   : >> { %106 = vst [vmem:[%s6568_s20 + $0x18] sm:$0xf] %v105_v3  ;;  %108 = vst [vmem:[%s6568_s20 + $0x20] sm:$0xf] %v107_v4  ;;  %v111_v6 = vld [vmem:[%s6610_s17 + $0x30] sm:$0xf] }
  0x10   : >> { %110 = vst [vmem:[%s6568_s20 + $0x28] sm:$0xf] %v109_v5  ;;  %v113_v7 = vld [vmem:[%s6610_s17 + $0x34] sm:$0xf]  ;;  %v115_v8 = vld [vmem:[%s6610_s17 + $0x40] sm:$0xf] }
  0x11   : >> { %112 = vst [vmem:[%s6568_s20 + $0x30] sm:$0xf] %v111_v6  ;;  %114 = vst [vmem:[%s6568_s20 + $0x38] sm:$0xf] %v113_v7  ;;  %v117_v9 = vld [vmem:[%s6610_s17 + $0x44] sm:$0xf] }
  0x12   : >> { %116 = vst [vmem:[%s6568_s20 + $0x40] sm:$0xf] %v115_v8  ;;  %v119_v10 = vld [vmem:[%s6610_s17 + $0x50] sm:$0xf]  ;;  %v121_v11 = vld [vmem:[%s6610_s17 + $0x54] sm:$0xf] }
  0x13   : >> { %118 = vst [vmem:[%s6568_s20 + $0x48] sm:$0xf] %v117_v9  ;;  %120 = vst [vmem:[%s6568_s20 + $0x50] sm:$0xf] %v119_v10  ;;  %v123_v12 = vld [vmem:[%s6610_s17 + $0x60] sm:$0xf] }
  0x14   : >> { %122 = vst [vmem:[%s6568_s20 + $0x58] sm:$0xf] %v121_v11  ;;  %v125_v13 = vld [vmem:[%s6610_s17 + $0x64] sm:$0xf]  ;;  %v127_v14 = vld [vmem:[%s6610_s17 + $0x70] sm:$0xf] }
  0x15   : >> { %124 = vst [vmem:[%s6568_s20 + $0x60] sm:$0xf] %v123_v12  ;;  %126 = vst [vmem:[%s6568_s20 + $0x68] sm:$0xf] %v125_v13  ;;  %v129_v15 = vld [vmem:[%s6610_s17 + $0x74] sm:$0xf] }
  0x16   : >> { %128 = vst [vmem:[%s6568_s20 + $0x70] sm:$0xf] %v127_v14  ;;  %v131_v16 = vld [vmem:[%s6610_s17 + $0x80] sm:$0xf]  ;;  %v133_v17 = vld [vmem:[%s6610_s17 + $0x84] sm:$0xf] }
  0x17   : >> { %130 = vst [vmem:[%s6568_s20 + $0x78] sm:$0xf] %v129_v15  ;;  %132 = vst [vmem:[%s6568_s20 + $0x80] sm:$0xf] %v131_v16  ;;  %v135_v18 = vld [vmem:[%s6610_s17 + $0x90] sm:$0xf] }
  0x18   : >> { %134 = vst [vmem:[%s6568_s20 + $0x88] sm:$0xf] %v133_v17  ;;  %v137_v19 = vld [vmem:[%s6610_s17 + $0x94] sm:$0xf]  ;;  %v139_v20 = vld [vmem:[%s6610_s17 + $0xa0] sm:$0xf] }
  0x19   : >> { %136 = vst [vmem:[%s6568_s20 + $0x90] sm:$0xf] %v135_v18  ;;  %138 = vst [vmem:[%s6568_s20 + $0x98] sm:$0xf] %v137_v19  ;;  %v141_v21 = vld [vmem:[%s6610_s17 + $0xa4] sm:$0xf] }
  0x1a   : >> { %140 = vst [vmem:[%s6568_s20 + $0xa0] sm:$0xf] %v139_v20  ;;  %v143_v22 = vld [vmem:[%s6610_s17 + $0xb0] sm:$0xf]  ;;  %v145_v23 = vld [vmem:[%s6610_s17 + $0xb4] sm:$0xf] }
  0x1b   : >> { %142 = vst [vmem:[%s6568_s20 + $0xa8] sm:$0xf] %v141_v21  ;;  %144 = vst [vmem:[%s6568_s20 + $0xb0] sm:$0xf] %v143_v22  ;;  %v147_v24 = vld [vmem:[%s6610_s17 + $0xc0] sm:$0xf] }
  0x1c   : >> { %146 = vst [vmem:[%s6568_s20 + $0xb8] sm:$0xf] %v145_v23  ;;  %v149_v25 = vld [vmem:[%s6610_s17 + $0xc4] sm:$0xf]  ;;  %v151_v26 = vld [vmem:[%s6610_s17 + $0xd0] sm:$0xf] }
  0x1d   : >> { %148 = vst [vmem:[%s6568_s20 + $0xc0] sm:$0xf] %v147_v24  ;;  %150 = vst [vmem:[%s6568_s20 + $0xc8] sm:$0xf] %v149_v25  ;;  %v153_v27 = vld [vmem:[%s6610_s17 + $0xd4] sm:$0xf] }
  0x1e   : >> { %152 = vst [vmem:[%s6568_s20 + $0xd0] sm:$0xf] %v151_v26  ;;  %v155_v28 = vld [vmem:[%s6610_s17 + $0xe0] sm:$0xf]  ;;  %v157_v29 = vld [vmem:[%s6610_s17 + $0xe4] sm:$0xf] }
  0x1f   : >> { %154 = vst [vmem:[%s6568_s20 + $0xd8] sm:$0xf] %v153_v27  ;;  %156 = vst [vmem:[%s6568_s20 + $0xe0] sm:$0xf] %v155_v28  ;;  %v159_v30 = vld [vmem:[%s6610_s17 + $0xf0] sm:$0xf] }
  0x20   : >> { %158 = vst [vmem:[%s6568_s20 + $0xe8] sm:$0xf] %v157_v29  ;;  %v161_v31 = vld [vmem:[%s6610_s17 + $0xf4] sm:$0xf]  ;;  %v163_v32 = vld [vmem:[%s6610_s17 + $0x100] sm:$0xf] }
  0x21   : >> { %160 = vst [vmem:[%s6568_s20 + $0xf0] sm:$0xf] %v159_v30  ;;  %162 = vst [vmem:[%s6568_s20 + $0xf8] sm:$0xf] %v161_v31  ;;  %v165_v33 = vld [vmem:[%s6610_s17 + $0x104] sm:$0xf] }
  0x22   : >> { %164 = vst [vmem:[%s6568_s20 + $0x100] sm:$0xf] %v163_v32  ;;  %v167_v34 = vld [vmem:[%s6610_s17 + $0x110] sm:$0xf]  ;;  %v169_v35 = vld [vmem:[%s6610_s17 + $0x114] sm:$0xf] }
  0x23   : >> { %166 = vst [vmem:[%s6568_s20 + $0x108] sm:$0xf] %v165_v33  ;;  %168 = vst [vmem:[%s6568_s20 + $0x110] sm:$0xf] %v167_v34  ;;  %v171_v36 = vld [vmem:[%s6610_s17 + $0x120] sm:$0xf] }
  0x24   : >> { %170 = vst [vmem:[%s6568_s20 + $0x118] sm:$0xf] %v169_v35  ;;  %v173_v37 = vld [vmem:[%s6610_s17 + $0x124] sm:$0xf]  ;;  %v175_v38 = vld [vmem:[%s6610_s17 + $0x130] sm:$0xf] }
  0x25   : >> { %172 = vst [vmem:[%s6568_s20 + $0x120] sm:$0xf] %v171_v36  ;;  %174 = vst [vmem:[%s6568_s20 + $0x128] sm:$0xf] %v173_v37  ;;  %v177_v39 = vld [vmem:[%s6610_s17 + $0x134] sm:$0xf] }
  0x26   : >> { %176 = vst [vmem:[%s6568_s20 + $0x130] sm:$0xf] %v175_v38  ;;  %v179_v40 = vld [vmem:[%s6610_s17 + $0x140] sm:$0xf]  ;;  %v181_v41 = vld [vmem:[%s6610_s17 + $0x144] sm:$0xf] }
  0x27   : >> { %178 = vst [vmem:[%s6568_s20 + $0x138] sm:$0xf] %v177_v39  ;;  %180 = vst [vmem:[%s6568_s20 + $0x140] sm:$0xf] %v179_v40  ;;  %v183_v42 = vld [vmem:[%s6610_s17 + $0x150] sm:$0xf] }
  0x28   : >> { %182 = vst [vmem:[%s6568_s20 + $0x148] sm:$0xf] %v181_v41  ;;  %v185_v43 = vld [vmem:[%s6610_s17 + $0x154] sm:$0xf]  ;;  %v187_v44 = vld [vmem:[%s6610_s17 + $0x160] sm:$0xf] }
  0x29   : >> { %184 = vst [vmem:[%s6568_s20 + $0x150] sm:$0xf] %v183_v42  ;;  %186 = vst [vmem:[%s6568_s20 + $0x158] sm:$0xf] %v185_v43  ;;  %v189_v45 = vld [vmem:[%s6610_s17 + $0x164] sm:$0xf] }
  0x2a   : >> { %188 = vst [vmem:[%s6568_s20 + $0x160] sm:$0xf] %v187_v44  ;;  %v191_v46 = vld [vmem:[%s6610_s17 + $0x170] sm:$0xf]  ;;  %v193_v47 = vld [vmem:[%s6610_s17 + $0x174] sm:$0xf] }
  0x2b   : >> { %190 = vst [vmem:[%s6568_s20 + $0x168] sm:$0xf] %v189_v45  ;;  %192 = vst [vmem:[%s6568_s20 + $0x170] sm:$0xf] %v191_v46  ;;  %v195_v48 = vld [vmem:[%s6610_s17 + $0x180] sm:$0xf] }
  0x2c   : >> { %194 = vst [vmem:[%s6568_s20 + $0x178] sm:$0xf] %v193_v47  ;;  %v197_v49 = vld [vmem:[%s6610_s17 + $0x184] sm:$0xf]  ;;  %v199_v50 = vld [vmem:[%s6610_s17 + $0x190] sm:$0xf] }
  0x2d   : >> { %196 = vst [vmem:[%s6568_s20 + $0x180] sm:$0xf] %v195_v48  ;;  %198 = vst [vmem:[%s6568_s20 + $0x188] sm:$0xf] %v197_v49  ;;  %v201_v51 = vld [vmem:[%s6610_s17 + $0x194] sm:$0xf] }
  0x2e   : >> { %200 = vst [vmem:[%s6568_s20 + $0x190] sm:$0xf] %v199_v50  ;;  %v203_v52 = vld [vmem:[%s6610_s17 + $0x1a0] sm:$0xf]  ;;  %v205_v53 = vld [vmem:[%s6610_s17 + $0x1a4] sm:$0xf] }
  0x2f   : >> { %202 = vst [vmem:[%s6568_s20 + $0x198] sm:$0xf] %v201_v51  ;;  %204 = vst [vmem:[%s6568_s20 + $0x1a0] sm:$0xf] %v203_v52  ;;  %v207_v54 = vld [vmem:[%s6610_s17 + $0x1b0] sm:$0xf] }
  0x30   : >> { %206 = vst [vmem:[%s6568_s20 + $0x1a8] sm:$0xf] %v205_v53  ;;  %v209_v55 = vld [vmem:[%s6610_s17 + $0x1b4] sm:$0xf]  ;;  %v211_v56 = vld [vmem:[%s6610_s17 + $0x1c0] sm:$0xf] }
  0x31   : >> { %208 = vst [vmem:[%s6568_s20 + $0x1b0] sm:$0xf] %v207_v54  ;;  %210 = vst [vmem:[%s6568_s20 + $0x1b8] sm:$0xf] %v209_v55  ;;  %v213_v57 = vld [vmem:[%s6610_s17 + $0x1c4] sm:$0xf] }
  0x32   : >> { %212 = vst [vmem:[%s6568_s20 + $0x1c0] sm:$0xf] %v211_v56  ;;  %v215_v58 = vld [vmem:[%s6610_s17 + $0x1d0] sm:$0xf]  ;;  %v217_v59 = vld [vmem:[%s6610_s17 + $0x1d4] sm:$0xf] }
  0x33   : >> { %214 = vst [vmem:[%s6568_s20 + $0x1c8] sm:$0xf] %v213_v57  ;;  %216 = vst [vmem:[%s6568_s20 + $0x1d0] sm:$0xf] %v215_v58  ;;  %v219_v60 = vld [vmem:[%s6610_s17 + $0x1e0] sm:$0xf] }
  0x34   : >> { %218 = vst [vmem:[%s6568_s20 + $0x1d8] sm:$0xf] %v217_v59  ;;  %v221_v61 = vld [vmem:[%s6610_s17 + $0x1e4] sm:$0xf]  ;;  %v223_v62 = vld [vmem:[%s6610_s17 + $0x1f0] sm:$0xf] }
  0x35   : >> { %220 = vst [vmem:[%s6568_s20 + $0x1e0] sm:$0xf] %v219_v60  ;;  %222 = vst [vmem:[%s6568_s20 + $0x1e8] sm:$0xf] %v221_v61  ;;  %v225_v63 = vld [vmem:[%s6610_s17 + $0x1f4] sm:$0xf] }
  0x36   : >> { %224 = vst [vmem:[%s6568_s20 + $0x1f0] sm:$0xf] %v223_v62  ;;  %v227_v0 = vld [vmem:[%s6610_s17 + $0x200] sm:$0xf]  ;;  %v229_v1 = vld [vmem:[%s6610_s17 + $0x204] sm:$0xf] }
  0x37   : >> { %226 = vst [vmem:[%s6568_s20 + $0x1f8] sm:$0xf] %v225_v63  ;;  %228 = vst [vmem:[%s6568_s20 + $0x200] sm:$0xf] %v227_v0  ;;  %v231_v2 = vld [vmem:[%s6610_s17 + $0x210] sm:$0xf] }
  0x38   : >> { %230 = vst [vmem:[%s6568_s20 + $0x208] sm:$0xf] %v229_v1  ;;  %v233_v3 = vld [vmem:[%s6610_s17 + $0x214] sm:$0xf]  ;;  %v235_v4 = vld [vmem:[%s6610_s17 + $0x220] sm:$0xf] }
  0x39   : >> { %232 = vst [vmem:[%s6568_s20 + $0x210] sm:$0xf] %v231_v2  ;;  %234 = vst [vmem:[%s6568_s20 + $0x218] sm:$0xf] %v233_v3  ;;  %v237_v5 = vld [vmem:[%s6610_s17 + $0x224] sm:$0xf] }
  0x3a   : >> { %236 = vst [vmem:[%s6568_s20 + $0x220] sm:$0xf] %v235_v4  ;;  %v239_v6 = vld [vmem:[%s6610_s17 + $0x230] sm:$0xf]  ;;  %v241_v7 = vld [vmem:[%s6610_s17 + $0x234] sm:$0xf] }
  0x3b   : >> { %238 = vst [vmem:[%s6568_s20 + $0x228] sm:$0xf] %v237_v5  ;;  %240 = vst [vmem:[%s6568_s20 + $0x230] sm:$0xf] %v239_v6  ;;  %v243_v8 = vld [vmem:[%s6610_s17 + $0x240] sm:$0xf] }
  0x3c   : >> { %242 = vst [vmem:[%s6568_s20 + $0x238] sm:$0xf] %v241_v7  ;;  %v245_v9 = vld [vmem:[%s6610_s17 + $0x244] sm:$0xf]  ;;  %v247_v10 = vld [vmem:[%s6610_s17 + $0x250] sm:$0xf] }
  0x3d   : >> { %244 = vst [vmem:[%s6568_s20 + $0x240] sm:$0xf] %v243_v8  ;;  %246 = vst [vmem:[%s6568_s20 + $0x248] sm:$0xf] %v245_v9  ;;  %v249_v11 = vld [vmem:[%s6610_s17 + $0x254] sm:$0xf] }
  0x3e   : >> { %248 = vst [vmem:[%s6568_s20 + $0x250] sm:$0xf] %v247_v10  ;;  %v251_v12 = vld [vmem:[%s6610_s17 + $0x260] sm:$0xf]  ;;  %v253_v13 = vld [vmem:[%s6610_s17 + $0x264] sm:$0xf] }
  0x3f   : >> { %250 = vst [vmem:[%s6568_s20 + $0x258] sm:$0xf] %v249_v11  ;;  %252 = vst [vmem:[%s6568_s20 + $0x260] sm:$0xf] %v251_v12  ;;  %v255_v14 = vld [vmem:[%s6610_s17 + $0x270] sm:$0xf] }
  0x40   : >> { %254 = vst [vmem:[%s6568_s20 + $0x268] sm:$0xf] %v253_v13  ;;  %v257_v15 = vld [vmem:[%s6610_s17 + $0x274] sm:$0xf]  ;;  %v259_v16 = vld [vmem:[%s6610_s17 + $0x280] sm:$0xf] }
  0x41   : >> { %256 = vst [vmem:[%s6568_s20 + $0x270] sm:$0xf] %v255_v14  ;;  %258 = vst [vmem:[%s6568_s20 + $0x278] sm:$0xf] %v257_v15  ;;  %v261_v17 = vld [vmem:[%s6610_s17 + $0x284] sm:$0xf] }
  0x42   : >> { %260 = vst [vmem:[%s6568_s20 + $0x280] sm:$0xf] %v259_v16  ;;  %v263_v18 = vld [vmem:[%s6610_s17 + $0x290] sm:$0xf]  ;;  %v265_v19 = vld [vmem:[%s6610_s17 + $0x294] sm:$0xf] }
  0x43   : >> { %262 = vst [vmem:[%s6568_s20 + $0x288] sm:$0xf] %v261_v17  ;;  %264 = vst [vmem:[%s6568_s20 + $0x290] sm:$0xf] %v263_v18  ;;  %v267_v20 = vld [vmem:[%s6610_s17 + $0x2a0] sm:$0xf] }
  0x44   : >> { %266 = vst [vmem:[%s6568_s20 + $0x298] sm:$0xf] %v265_v19  ;;  %v269_v21 = vld [vmem:[%s6610_s17 + $0x2a4] sm:$0xf]  ;;  %v271_v22 = vld [vmem:[%s6610_s17 + $0x2b0] sm:$0xf] }
  0x45   : >> { %268 = vst [vmem:[%s6568_s20 + $0x2a0] sm:$0xf] %v267_v20  ;;  %270 = vst [vmem:[%s6568_s20 + $0x2a8] sm:$0xf] %v269_v21  ;;  %v273_v23 = vld [vmem:[%s6610_s17 + $0x2b4] sm:$0xf] }
  0x46   : >> { %272 = vst [vmem:[%s6568_s20 + $0x2b0] sm:$0xf] %v271_v22  ;;  %v275_v24 = vld [vmem:[%s6610_s17 + $0x2c0] sm:$0xf]  ;;  %v277_v25 = vld [vmem:[%s6610_s17 + $0x2c4] sm:$0xf] }
  0x47   : >> { %274 = vst [vmem:[%s6568_s20 + $0x2b8] sm:$0xf] %v273_v23  ;;  %276 = vst [vmem:[%s6568_s20 + $0x2c0] sm:$0xf] %v275_v24  ;;  %v279_v26 = vld [vmem:[%s6610_s17 + $0x2d0] sm:$0xf] }
  0x48   : >> { %278 = vst [vmem:[%s6568_s20 + $0x2c8] sm:$0xf] %v277_v25  ;;  %v281_v27 = vld [vmem:[%s6610_s17 + $0x2d4] sm:$0xf]  ;;  %v283_v28 = vld [vmem:[%s6610_s17 + $0x2e0] sm:$0xf] }
  0x49   : >> { %280 = vst [vmem:[%s6568_s20 + $0x2d0] sm:$0xf] %v279_v26  ;;  %282 = vst [vmem:[%s6568_s20 + $0x2d8] sm:$0xf] %v281_v27  ;;  %v285_v29 = vld [vmem:[%s6610_s17 + $0x2e4] sm:$0xf] }
  0x4a   : >> { %284 = vst [vmem:[%s6568_s20 + $0x2e0] sm:$0xf] %v283_v28  ;;  %v287_v30 = vld [vmem:[%s6610_s17 + $0x2f0] sm:$0xf]  ;;  %v289_v31 = vld [vmem:[%s6610_s17 + $0x2f4] sm:$0xf] }
  0x4b   : >> { %286 = vst [vmem:[%s6568_s20 + $0x2e8] sm:$0xf] %v285_v29  ;;  %288 = vst [vmem:[%s6568_s20 + $0x2f0] sm:$0xf] %v287_v30  ;;  %v291_v32 = vld [vmem:[%s6610_s17 + $0x300] sm:$0xf] }
  0x4c   : >> { %290 = vst [vmem:[%s6568_s20 + $0x2f8] sm:$0xf] %v289_v31  ;;  %v293_v33 = vld [vmem:[%s6610_s17 + $0x304] sm:$0xf]  ;;  %v295_v34 = vld [vmem:[%s6610_s17 + $0x310] sm:$0xf] }
  0x4d   : >> { %292 = vst [vmem:[%s6568_s20 + $0x300] sm:$0xf] %v291_v32  ;;  %294 = vst [vmem:[%s6568_s20 + $0x308] sm:$0xf] %v293_v33  ;;  %v297_v35 = vld [vmem:[%s6610_s17 + $0x314] sm:$0xf] }
  0x4e   : >> { %296 = vst [vmem:[%s6568_s20 + $0x310] sm:$0xf] %v295_v34  ;;  %v299_v36 = vld [vmem:[%s6610_s17 + $0x320] sm:$0xf]  ;;  %v301_v37 = vld [vmem:[%s6610_s17 + $0x324] sm:$0xf] }
  0x4f   : >> { %298 = vst [vmem:[%s6568_s20 + $0x318] sm:$0xf] %v297_v35  ;;  %300 = vst [vmem:[%s6568_s20 + $0x320] sm:$0xf] %v299_v36  ;;  %v303_v38 = vld [vmem:[%s6610_s17 + $0x330] sm:$0xf] }
  0x50   : >> { %302 = vst [vmem:[%s6568_s20 + $0x328] sm:$0xf] %v301_v37  ;;  %v305_v39 = vld [vmem:[%s6610_s17 + $0x334] sm:$0xf]  ;;  %v307_v40 = vld [vmem:[%s6610_s17 + $0x340] sm:$0xf] }
  0x51   : >> { %304 = vst [vmem:[%s6568_s20 + $0x330] sm:$0xf] %v303_v38  ;;  %306 = vst [vmem:[%s6568_s20 + $0x338] sm:$0xf] %v305_v39  ;;  %v309_v41 = vld [vmem:[%s6610_s17 + $0x344] sm:$0xf] }
  0x52   : >> { %308 = vst [vmem:[%s6568_s20 + $0x340] sm:$0xf] %v307_v40  ;;  %v311_v42 = vld [vmem:[%s6610_s17 + $0x350] sm:$0xf]  ;;  %v313_v43 = vld [vmem:[%s6610_s17 + $0x354] sm:$0xf] }
  0x53   : >> { %310 = vst [vmem:[%s6568_s20 + $0x348] sm:$0xf] %v309_v41  ;;  %312 = vst [vmem:[%s6568_s20 + $0x350] sm:$0xf] %v311_v42  ;;  %v315_v44 = vld [vmem:[%s6610_s17 + $0x360] sm:$0xf] }
  0x54   : >> { %314 = vst [vmem:[%s6568_s20 + $0x358] sm:$0xf] %v313_v43  ;;  %v317_v45 = vld [vmem:[%s6610_s17 + $0x364] sm:$0xf]  ;;  %v319_v46 = vld [vmem:[%s6610_s17 + $0x370] sm:$0xf] }
  0x55   : >> { %316 = vst [vmem:[%s6568_s20 + $0x360] sm:$0xf] %v315_v44  ;;  %318 = vst [vmem:[%s6568_s20 + $0x368] sm:$0xf] %v317_v45  ;;  %v321_v47 = vld [vmem:[%s6610_s17 + $0x374] sm:$0xf] }
  0x56   : >> { %320 = vst [vmem:[%s6568_s20 + $0x370] sm:$0xf] %v319_v46  ;;  %v323_v48 = vld [vmem:[%s6610_s17 + $0x380] sm:$0xf]  ;;  %v325_v49 = vld [vmem:[%s6610_s17 + $0x384] sm:$0xf] }
  0x57   : >> { %322 = vst [vmem:[%s6568_s20 + $0x378] sm:$0xf] %v321_v47  ;;  %324 = vst [vmem:[%s6568_s20 + $0x380] sm:$0xf] %v323_v48  ;;  %v327_v50 = vld [vmem:[%s6610_s17 + $0x390] sm:$0xf] }
  0x58   : >> { %326 = vst [vmem:[%s6568_s20 + $0x388] sm:$0xf] %v325_v49  ;;  %v329_v51 = vld [vmem:[%s6610_s17 + $0x394] sm:$0xf]  ;;  %v331_v52 = vld [vmem:[%s6610_s17 + $0x3a0] sm:$0xf] }
  0x59   : >> { %328 = vst [vmem:[%s6568_s20 + $0x390] sm:$0xf] %v327_v50  ;;  %330 = vst [vmem:[%s6568_s20 + $0x398] sm:$0xf] %v329_v51  ;;  %v333_v53 = vld [vmem:[%s6610_s17 + $0x3a4] sm:$0xf] }
  0x5a   : >> { %332 = vst [vmem:[%s6568_s20 + $0x3a0] sm:$0xf] %v331_v52  ;;  %v335_v54 = vld [vmem:[%s6610_s17 + $0x3b0] sm:$0xf]  ;;  %v337_v55 = vld [vmem:[%s6610_s17 + $0x3b4] sm:$0xf] }
  0x5b   : >> { %334 = vst [vmem:[%s6568_s20 + $0x3a8] sm:$0xf] %v333_v53  ;;  %336 = vst [vmem:[%s6568_s20 + $0x3b0] sm:$0xf] %v335_v54  ;;  %v339_v56 = vld [vmem:[%s6610_s17 + $0x3c0] sm:$0xf] }
  0x5c   : >> { %338 = vst [vmem:[%s6568_s20 + $0x3b8] sm:$0xf] %v337_v55  ;;  %v341_v57 = vld [vmem:[%s6610_s17 + $0x3c4] sm:$0xf]  ;;  %v343_v58 = vld [vmem:[%s6610_s17 + $0x3d0] sm:$0xf] }
  0x5d   : >> { %340 = vst [vmem:[%s6568_s20 + $0x3c0] sm:$0xf] %v339_v56  ;;  %342 = vst [vmem:[%s6568_s20 + $0x3c8] sm:$0xf] %v341_v57  ;;  %v345_v59 = vld [vmem:[%s6610_s17 + $0x3d4] sm:$0xf] }
  0x5e   : >> { %344 = vst [vmem:[%s6568_s20 + $0x3d0] sm:$0xf] %v343_v58  ;;  %v347_v60 = vld [vmem:[%s6610_s17 + $0x3e0] sm:$0xf]  ;;  %v349_v61 = vld [vmem:[%s6610_s17 + $0x3e4] sm:$0xf] }
  0x5f   : >> { %346 = vst [vmem:[%s6568_s20 + $0x3d8] sm:$0xf] %v345_v59  ;;  %348 = vst [vmem:[%s6568_s20 + $0x3e0] sm:$0xf] %v347_v60  ;;  %v351_v62 = vld [vmem:[%s6610_s17 + $0x3f0] sm:$0xf] }
  0x60   : >> { %350 = vst [vmem:[%s6568_s20 + $0x3e8] sm:$0xf] %v349_v61  ;;  %v353_v63 = vld [vmem:[%s6610_s17 + $0x3f4] sm:$0xf]  ;;  %352 = vst [vmem:[%s6568_s20 + $0x3f0] sm:$0xf] %v351_v62 }
  0x61   : >> { %354 = vst [vmem:[%s6568_s20 + $0x3f8] sm:$0xf] %v353_v63  ;;  %p92_p2 = scmp.ge.s32.totalorder %s93_s21, 1  ;;  %s7818_s20 = smov %s6612_s19 }
  0x63   : > { %95 = sbr.rel (!%p92_p2) target bundleno = 12 (0xc), region = 1529 }
  0x6a PF: > { %p6077_p3 = scmp.ge.s32.totalorder %s6564_s8, 1  ;;  %p655_p4 = scmp.lt.s32.totalorder %s6564_s8, 3 }
  0x6c   : > { %p656_p5 = pnand %p6077_p3, %p655_p4 }
  0x6d   : > { %s6891_s22 = sand.u32 (!%p656_p5), 1, %s6067_s9   ;;  %v1972_v0 = vlaneseq (!%p656_p5)  ;;  %s6468_s27 = sshll.u32 (!%p656_p5), %s6556_s6, 2 }
  0x6e   : > { %659 = sbr.rel (%p656_p5) target bundleno = 602 (0x25a), region = 57  ;;  %s6078_s23 = sshll.u32 (!%p656_p5), %s6891_s22, 10 }
  0x6f   : > { %s6079_s24 = sshll.u32 (!%p656_p5), %s6891_s22, 8  ;;  %v6895_v1 = vshrl.u32 (!%p656_p5), %v1972_v0, 7  ;;  %s6897_s25 = scalar_lea.vmem (!%p656_p5), [#allocation1], %s6078_s23 }
  0x70   : > { %v6080_v2 = vld [vmem:[%s6897_s25 + $0x3fc] sm:$0xf] (!%p656_p5)  ;;  %v6081_v3 = vld [vmem:[%s6897_s25 + $0x3f8] sm:$0xf] (!%p656_p5)  ;;  %v6082_v4 = vld [vmem:[%s6897_s25 + $0x3f4] sm:$0xf] (!%p656_p5)  ;;  %s7671_s30 = scalar_lea.vmem (!%p656_p5), %s7816_s1, %s6468_s27 }
  0x71   : > { %679 = vst [vmem:[#allocation0 + $0x7f8] sm:$0xf] (!%p656_p5), %v6080_v2  ;;  %684 = vst [vmem:[#allocation0 + $0x7f0] sm:$0xf] (!%p656_p5), %v6081_v3  ;;  %v6083_v5 = vld [vmem:[%s6897_s25 + $0x3f0] sm:$0xf] (!%p656_p5) }
  0x72   : > { %689 = vst [vmem:[#allocation0 + $0x7e8] sm:$0xf] (!%p656_p5), %v6082_v4  ;;  %v6084_v6 = vld [vmem:[%s6897_s25 + $0x3ec] sm:$0xf] (!%p656_p5)  ;;  %v6085_v7 = vld [vmem:[%s6897_s25 + $0x3e8] sm:$0xf] (!%p656_p5) }
  0x73   : > { %694 = vst [vmem:[#allocation0 + $0x7e0] sm:$0xf] (!%p656_p5), %v6083_v5  ;;  %699 = vst [vmem:[#allocation0 + $0x7d8] sm:$0xf] (!%p656_p5), %v6084_v6  ;;  %v6086_v8 = vld [vmem:[%s6897_s25 + $0x3e4] sm:$0xf] (!%p656_p5) }
  0x74   : > { %704 = vst [vmem:[#allocation0 + $0x7d0] sm:$0xf] (!%p656_p5), %v6085_v7  ;;  %v6087_v9 = vld [vmem:[%s6897_s25 + $0x3e0] sm:$0xf] (!%p656_p5)  ;;  %v6088_v10 = vld [vmem:[%s6897_s25 + $0x3dc] sm:$0xf] (!%p656_p5) }
  0x75   : > { %709 = vst [vmem:[#allocation0 + $0x7c8] sm:$0xf] %v6086_v8  ;;  %714 = vst [vmem:[#allocation0 + $0x7c0] sm:$0xf] %v6087_v9  ;;  %v6089_v11 = vld [vmem:[%s6897_s25 + $0x3d8] sm:$0xf] }
  0x76   : > { %719 = vst [vmem:[#allocation0 + $0x7b8] sm:$0xf] %v6088_v10  ;;  %v6090_v12 = vld [vmem:[%s6897_s25 + $0x3d4] sm:$0xf]  ;;  %v6091_v13 = vld [vmem:[%s6897_s25 + $0x3d0] sm:$0xf] }
  0x77   : > { %724 = vst [vmem:[#allocation0 + $0x7b0] sm:$0xf] %v6089_v11  ;;  %729 = vst [vmem:[#allocation0 + $0x7a8] sm:$0xf] %v6090_v12  ;;  %v6092_v14 = vld [vmem:[%s6897_s25 + $0x3cc] sm:$0xf] }
  0x78   : > { %734 = vst [vmem:[#allocation0 + $0x7a0] sm:$0xf] %v6091_v13  ;;  %v6093_v15 = vld [vmem:[%s6897_s25 + $0x3c8] sm:$0xf]  ;;  %v6094_v16 = vld [vmem:[%s6897_s25 + $0x3c4] sm:$0xf] }
  0x79   : > { %739 = vst [vmem:[#allocation0 + $0x798] sm:$0xf] %v6092_v14  ;;  %744 = vst [vmem:[#allocation0 + $0x790] sm:$0xf] %v6093_v15  ;;  %v6095_v17 = vld [vmem:[%s6897_s25 + $0x3c0] sm:$0xf] }
  0x7a   : > { %749 = vst [vmem:[#allocation0 + $0x788] sm:$0xf] %v6094_v16  ;;  %v6096_v18 = vld [vmem:[%s6897_s25 + $0x3bc] sm:$0xf]  ;;  %v6097_v19 = vld [vmem:[%s6897_s25 + $0x3b8] sm:$0xf] }
  0x7b   : > { %754 = vst [vmem:[#allocation0 + $0x780] sm:$0xf] %v6095_v17  ;;  %759 = vst [vmem:[#allocation0 + $0x778] sm:$0xf] %v6096_v18  ;;  %v6098_v20 = vld [vmem:[%s6897_s25 + $0x3b4] sm:$0xf] }
  0x7c   : > { %764 = vst [vmem:[#allocation0 + $0x770] sm:$0xf] %v6097_v19  ;;  %v6099_v21 = vld [vmem:[%s6897_s25 + $0x3b0] sm:$0xf]  ;;  %v6100_v22 = vld [vmem:[%s6897_s25 + $0x3ac] sm:$0xf] }
  0x7d   : > { %769 = vst [vmem:[#allocation0 + $0x768] sm:$0xf] %v6098_v20  ;;  %774 = vst [vmem:[#allocation0 + $0x760] sm:$0xf] %v6099_v21  ;;  %v6101_v23 = vld [vmem:[%s6897_s25 + $0x3a8] sm:$0xf] }
  0x7e   : > { %779 = vst [vmem:[#allocation0 + $0x758] sm:$0xf] %v6100_v22  ;;  %v6102_v24 = vld [vmem:[%s6897_s25 + $0x3a4] sm:$0xf]  ;;  %v6103_v25 = vld [vmem:[%s6897_s25 + $0x3a0] sm:$0xf] }
  0x7f   : > { %784 = vst [vmem:[#allocation0 + $0x750] sm:$0xf] %v6101_v23  ;;  %789 = vst [vmem:[#allocation0 + $0x748] sm:$0xf] %v6102_v24  ;;  %v6104_v26 = vld [vmem:[%s6897_s25 + $0x39c] sm:$0xf] }
  0x80   : > { %794 = vst [vmem:[#allocation0 + $0x740] sm:$0xf] %v6103_v25  ;;  %v6105_v27 = vld [vmem:[%s6897_s25 + $0x398] sm:$0xf]  ;;  %v6106_v28 = vld [vmem:[%s6897_s25 + $0x394] sm:$0xf] }
  0x81   : > { %799 = vst [vmem:[#allocation0 + $0x738] sm:$0xf] %v6104_v26  ;;  %804 = vst [vmem:[#allocation0 + $0x730] sm:$0xf] %v6105_v27  ;;  %v6107_v29 = vld [vmem:[%s6897_s25 + $0x390] sm:$0xf] }
  0x82   : > { %809 = vst [vmem:[#allocation0 + $0x728] sm:$0xf] %v6106_v28  ;;  %v6108_v30 = vld [vmem:[%s6897_s25 + $0x38c] sm:$0xf]  ;;  %v6109_v31 = vld [vmem:[%s6897_s25 + $0x388] sm:$0xf] }
  0x83   : > { %814 = vst [vmem:[#allocation0 + $0x720] sm:$0xf] %v6107_v29  ;;  %819 = vst [vmem:[#allocation0 + $0x718] sm:$0xf] %v6108_v30  ;;  %v6110_v32 = vld [vmem:[%s6897_s25 + $0x384] sm:$0xf] }
  0x84   : > { %824 = vst [vmem:[#allocation0 + $0x710] sm:$0xf] %v6109_v31  ;;  %v6111_v33 = vld [vmem:[%s6897_s25 + $0x380] sm:$0xf]  ;;  %v6112_v34 = vld [vmem:[%s6897_s25 + $0x37c] sm:$0xf] }
  0x85   : > { %829 = vst [vmem:[#allocation0 + $0x708] sm:$0xf] %v6110_v32  ;;  %834 = vst [vmem:[#allocation0 + $0x700] sm:$0xf] %v6111_v33  ;;  %v6113_v35 = vld [vmem:[%s6897_s25 + $0x378] sm:$0xf] }
  0x86   : > { %839 = vst [vmem:[#allocation0 + $0x6f8] sm:$0xf] %v6112_v34  ;;  %v6114_v36 = vld [vmem:[%s6897_s25 + $0x374] sm:$0xf]  ;;  %v6115_v37 = vld [vmem:[%s6897_s25 + $0x370] sm:$0xf] }
  0x87   : > { %844 = vst [vmem:[#allocation0 + $0x6f0] sm:$0xf] %v6113_v35  ;;  %849 = vst [vmem:[#allocation0 + $0x6e8] sm:$0xf] %v6114_v36  ;;  %v6116_v38 = vld [vmem:[%s6897_s25 + $0x36c] sm:$0xf] }
  0x88   : > { %854 = vst [vmem:[#allocation0 + $0x6e0] sm:$0xf] %v6115_v37  ;;  %v6117_v39 = vld [vmem:[%s6897_s25 + $0x368] sm:$0xf]  ;;  %v6118_v40 = vld [vmem:[%s6897_s25 + $0x364] sm:$0xf] }
  0x89   : > { %859 = vst [vmem:[#allocation0 + $0x6d8] sm:$0xf] %v6116_v38  ;;  %864 = vst [vmem:[#allocation0 + $0x6d0] sm:$0xf] %v6117_v39  ;;  %v6119_v41 = vld [vmem:[%s6897_s25 + $0x360] sm:$0xf] }
  0x8a   : > { %869 = vst [vmem:[#allocation0 + $0x6c8] sm:$0xf] %v6118_v40  ;;  %v6120_v42 = vld [vmem:[%s6897_s25 + $0x35c] sm:$0xf]  ;;  %v6121_v43 = vld [vmem:[%s6897_s25 + $0x358] sm:$0xf] }
  0x8b   : > { %874 = vst [vmem:[#allocation0 + $0x6c0] sm:$0xf] %v6119_v41  ;;  %879 = vst [vmem:[#allocation0 + $0x6b8] sm:$0xf] %v6120_v42  ;;  %v6122_v44 = vld [vmem:[%s6897_s25 + $0x354] sm:$0xf] }
  0x8c   : > { %884 = vst [vmem:[#allocation0 + $0x6b0] sm:$0xf] %v6121_v43  ;;  %v6123_v45 = vld [vmem:[%s6897_s25 + $0x350] sm:$0xf]  ;;  %v6124_v46 = vld [vmem:[%s6897_s25 + $0x34c] sm:$0xf] }
  0x8d   : > { %889 = vst [vmem:[#allocation0 + $0x6a8] sm:$0xf] %v6122_v44  ;;  %894 = vst [vmem:[#allocation0 + $0x6a0] sm:$0xf] %v6123_v45  ;;  %v6125_v47 = vld [vmem:[%s6897_s25 + $0x348] sm:$0xf] }
  0x8e   : > { %899 = vst [vmem:[#allocation0 + $0x698] sm:$0xf] %v6124_v46  ;;  %v6126_v48 = vld [vmem:[%s6897_s25 + $0x344] sm:$0xf]  ;;  %v6127_v49 = vld [vmem:[%s6897_s25 + $0x340] sm:$0xf] }
  0x8f   : > { %904 = vst [vmem:[#allocation0 + $0x690] sm:$0xf] %v6125_v47  ;;  %909 = vst [vmem:[#allocation0 + $0x688] sm:$0xf] %v6126_v48  ;;  %v6128_v50 = vld [vmem:[%s6897_s25 + $0x33c] sm:$0xf] }
  0x90   : > { %914 = vst [vmem:[#allocation0 + $0x680] sm:$0xf] %v6127_v49  ;;  %v6129_v51 = vld [vmem:[%s6897_s25 + $0x338] sm:$0xf]  ;;  %v6130_v52 = vld [vmem:[%s6897_s25 + $0x334] sm:$0xf] }
  0x91   : > { %919 = vst [vmem:[#allocation0 + $0x678] sm:$0xf] %v6128_v50  ;;  %924 = vst [vmem:[#allocation0 + $0x670] sm:$0xf] %v6129_v51  ;;  %v6131_v53 = vld [vmem:[%s6897_s25 + $0x330] sm:$0xf] }
  0x92   : > { %929 = vst [vmem:[#allocation0 + $0x668] sm:$0xf] %v6130_v52  ;;  %v6132_v54 = vld [vmem:[%s6897_s25 + $0x32c] sm:$0xf]  ;;  %v6133_v55 = vld [vmem:[%s6897_s25 + $0x328] sm:$0xf] }
  0x93   : > { %934 = vst [vmem:[#allocation0 + $0x660] sm:$0xf] %v6131_v53  ;;  %939 = vst [vmem:[#allocation0 + $0x658] sm:$0xf] %v6132_v54  ;;  %v6134_v56 = vld [vmem:[%s6897_s25 + $0x324] sm:$0xf] }
  0x94   : > { %944 = vst [vmem:[#allocation0 + $0x650] sm:$0xf] %v6133_v55  ;;  %v6135_v57 = vld [vmem:[%s6897_s25 + $0x320] sm:$0xf]  ;;  %v6136_v58 = vld [vmem:[%s6897_s25 + $0x31c] sm:$0xf] }
  0x95   : > { %949 = vst [vmem:[#allocation0 + $0x648] sm:$0xf] %v6134_v56  ;;  %954 = vst [vmem:[#allocation0 + $0x640] sm:$0xf] %v6135_v57  ;;  %v6137_v59 = vld [vmem:[%s6897_s25 + $0x318] sm:$0xf] }
  0x96   : > { %959 = vst [vmem:[#allocation0 + $0x638] sm:$0xf] %v6136_v58  ;;  %v6138_v60 = vld [vmem:[%s6897_s25 + $0x314] sm:$0xf]  ;;  %v6139_v61 = vld [vmem:[%s6897_s25 + $0x310] sm:$0xf] }
  0x97   : > { %964 = vst [vmem:[#allocation0 + $0x630] sm:$0xf] %v6137_v59  ;;  %969 = vst [vmem:[#allocation0 + $0x628] sm:$0xf] %v6138_v60  ;;  %v6140_v62 = vld [vmem:[%s6897_s25 + $0x30c] sm:$0xf] }
  0x98   : > { %974 = vst [vmem:[#allocation0 + $0x620] sm:$0xf] %v6139_v61  ;;  %v6141_v63 = vld [vmem:[%s6897_s25 + $0x308] sm:$0xf]  ;;  %v6142_v0 = vld [vmem:[%s6897_s25 + $0x304] sm:$0xf] }
  0x99   : > { %979 = vst [vmem:[#allocation0 + $0x618] sm:$0xf] %v6140_v62  ;;  %984 = vst [vmem:[#allocation0 + $0x610] sm:$0xf] %v6141_v63  ;;  %v6143_v2 = vld [vmem:[%s6897_s25 + $0x300] sm:$0xf] }
  0x9a   : > { %989 = vst [vmem:[#allocation0 + $0x608] sm:$0xf] %v6142_v0  ;;  %v6144_v3 = vld [vmem:[%s6897_s25 + $0x2fc] sm:$0xf]  ;;  %v6145_v4 = vld [vmem:[%s6897_s25 + $0x2f8] sm:$0xf] }
  0x9b   : > { %994 = vst [vmem:[#allocation0 + $0x600] sm:$0xf] %v6143_v2  ;;  %999 = vst [vmem:[#allocation0 + $0x5f8] sm:$0xf] %v6144_v3  ;;  %v6146_v5 = vld [vmem:[%s6897_s25 + $0x2f4] sm:$0xf] }
  0x9c   : > { %1004 = vst [vmem:[#allocation0 + $0x5f0] sm:$0xf] %v6145_v4  ;;  %v6147_v6 = vld [vmem:[%s6897_s25 + $0x2f0] sm:$0xf]  ;;  %v6148_v7 = vld [vmem:[%s6897_s25 + $0x2ec] sm:$0xf] }
  0x9d   : > { %1009 = vst [vmem:[#allocation0 + $0x5e8] sm:$0xf] %v6146_v5  ;;  %1014 = vst [vmem:[#allocation0 + $0x5e0] sm:$0xf] %v6147_v6  ;;  %v6149_v8 = vld [vmem:[%s6897_s25 + $0x2e8] sm:$0xf] }
  0x9e   : > { %1019 = vst [vmem:[#allocation0 + $0x5d8] sm:$0xf] %v6148_v7  ;;  %v6150_v9 = vld [vmem:[%s6897_s25 + $0x2e4] sm:$0xf]  ;;  %v6151_v10 = vld [vmem:[%s6897_s25 + $0x2e0] sm:$0xf] }
  0x9f   : > { %1024 = vst [vmem:[#allocation0 + $0x5d0] sm:$0xf] %v6149_v8  ;;  %1029 = vst [vmem:[#allocation0 + $0x5c8] sm:$0xf] %v6150_v9  ;;  %v6152_v11 = vld [vmem:[%s6897_s25 + $0x2dc] sm:$0xf] }
  0xa0   : > { %1034 = vst [vmem:[#allocation0 + $0x5c0] sm:$0xf] %v6151_v10  ;;  %v6153_v12 = vld [vmem:[%s6897_s25 + $0x2d8] sm:$0xf]  ;;  %v6154_v13 = vld [vmem:[%s6897_s25 + $0x2d4] sm:$0xf] }
  0xa1   : > { %1039 = vst [vmem:[#allocation0 + $0x5b8] sm:$0xf] %v6152_v11  ;;  %1044 = vst [vmem:[#allocation0 + $0x5b0] sm:$0xf] %v6153_v12  ;;  %v6155_v14 = vld [vmem:[%s6897_s25 + $0x2d0] sm:$0xf] }
  0xa2   : > { %1049 = vst [vmem:[#allocation0 + $0x5a8] sm:$0xf] %v6154_v13  ;;  %v6156_v15 = vld [vmem:[%s6897_s25 + $0x2cc] sm:$0xf]  ;;  %v6157_v16 = vld [vmem:[%s6897_s25 + $0x2c8] sm:$0xf] }
  0xa3   : > { %1054 = vst [vmem:[#allocation0 + $0x5a0] sm:$0xf] %v6155_v14  ;;  %1059 = vst [vmem:[#allocation0 + $0x598] sm:$0xf] %v6156_v15  ;;  %v6158_v17 = vld [vmem:[%s6897_s25 + $0x2c4] sm:$0xf] }
  0xa4   : > { %1064 = vst [vmem:[#allocation0 + $0x590] sm:$0xf] %v6157_v16  ;;  %v6159_v18 = vld [vmem:[%s6897_s25 + $0x2c0] sm:$0xf]  ;;  %v6160_v19 = vld [vmem:[%s6897_s25 + $0x2bc] sm:$0xf] }
  0xa5   : > { %1069 = vst [vmem:[#allocation0 + $0x588] sm:$0xf] %v6158_v17  ;;  %1074 = vst [vmem:[#allocation0 + $0x580] sm:$0xf] %v6159_v18  ;;  %v6161_v20 = vld [vmem:[%s6897_s25 + $0x2b8] sm:$0xf] }
  0xa6   : > { %1079 = vst [vmem:[#allocation0 + $0x578] sm:$0xf] %v6160_v19  ;;  %v6162_v21 = vld [vmem:[%s6897_s25 + $0x2b4] sm:$0xf]  ;;  %v6163_v22 = vld [vmem:[%s6897_s25 + $0x2b0] sm:$0xf] }
  0xa7   : > { %1084 = vst [vmem:[#allocation0 + $0x570] sm:$0xf] %v6161_v20  ;;  %1089 = vst [vmem:[#allocation0 + $0x568] sm:$0xf] %v6162_v21  ;;  %v6164_v23 = vld [vmem:[%s6897_s25 + $0x2ac] sm:$0xf] }
  0xa8   : > { %1094 = vst [vmem:[#allocation0 + $0x560] sm:$0xf] %v6163_v22  ;;  %v6165_v24 = vld [vmem:[%s6897_s25 + $0x2a8] sm:$0xf]  ;;  %v6166_v25 = vld [vmem:[%s6897_s25 + $0x2a4] sm:$0xf] }
  0xa9   : > { %1099 = vst [vmem:[#allocation0 + $0x558] sm:$0xf] %v6164_v23  ;;  %1104 = vst [vmem:[#allocation0 + $0x550] sm:$0xf] %v6165_v24  ;;  %v6167_v26 = vld [vmem:[%s6897_s25 + $0x2a0] sm:$0xf] }
  0xaa   : > { %1109 = vst [vmem:[#allocation0 + $0x548] sm:$0xf] %v6166_v25  ;;  %v6168_v27 = vld [vmem:[%s6897_s25 + $0x29c] sm:$0xf]  ;;  %v6169_v28 = vld [vmem:[%s6897_s25 + $0x298] sm:$0xf] }
  0xab   : > { %1114 = vst [vmem:[#allocation0 + $0x540] sm:$0xf] %v6167_v26  ;;  %1119 = vst [vmem:[#allocation0 + $0x538] sm:$0xf] %v6168_v27  ;;  %v6170_v29 = vld [vmem:[%s6897_s25 + $0x294] sm:$0xf] }
  0xac   : > { %1124 = vst [vmem:[#allocation0 + $0x530] sm:$0xf] %v6169_v28  ;;  %v6171_v30 = vld [vmem:[%s6897_s25 + $0x290] sm:$0xf]  ;;  %v6172_v31 = vld [vmem:[%s6897_s25 + $0x28c] sm:$0xf] }
  0xad   : > { %1129 = vst [vmem:[#allocation0 + $0x528] sm:$0xf] %v6170_v29  ;;  %1134 = vst [vmem:[#allocation0 + $0x520] sm:$0xf] %v6171_v30  ;;  %v6173_v32 = vld [vmem:[%s6897_s25 + $0x288] sm:$0xf] }
  0xae   : > { %1139 = vst [vmem:[#allocation0 + $0x518] sm:$0xf] %v6172_v31  ;;  %v6174_v33 = vld [vmem:[%s6897_s25 + $0x284] sm:$0xf]  ;;  %v6175_v34 = vld [vmem:[%s6897_s25 + $0x280] sm:$0xf] }
  0xaf   : > { %1144 = vst [vmem:[#allocation0 + $0x510] sm:$0xf] %v6173_v32  ;;  %1149 = vst [vmem:[#allocation0 + $0x508] sm:$0xf] %v6174_v33  ;;  %v6176_v35 = vld [vmem:[%s6897_s25 + $0x27c] sm:$0xf] }
  0xb0   : > { %1154 = vst [vmem:[#allocation0 + $0x500] sm:$0xf] %v6175_v34  ;;  %v6177_v36 = vld [vmem:[%s6897_s25 + $0x278] sm:$0xf]  ;;  %v6178_v37 = vld [vmem:[%s6897_s25 + $0x274] sm:$0xf] }
  0xb1   : > { %1159 = vst [vmem:[#allocation0 + $0x4f8] sm:$0xf] %v6176_v35  ;;  %1164 = vst [vmem:[#allocation0 + $0x4f0] sm:$0xf] %v6177_v36  ;;  %v6179_v38 = vld [vmem:[%s6897_s25 + $0x270] sm:$0xf] }
  0xb2   : > { %1169 = vst [vmem:[#allocation0 + $0x4e8] sm:$0xf] %v6178_v37  ;;  %v6180_v39 = vld [vmem:[%s6897_s25 + $0x26c] sm:$0xf]  ;;  %v6181_v40 = vld [vmem:[%s6897_s25 + $0x268] sm:$0xf] }
  0xb3   : > { %1174 = vst [vmem:[#allocation0 + $0x4e0] sm:$0xf] %v6179_v38  ;;  %1179 = vst [vmem:[#allocation0 + $0x4d8] sm:$0xf] %v6180_v39  ;;  %v6182_v41 = vld [vmem:[%s6897_s25 + $0x264] sm:$0xf] }
  0xb4   : > { %1184 = vst [vmem:[#allocation0 + $0x4d0] sm:$0xf] %v6181_v40  ;;  %v6183_v42 = vld [vmem:[%s6897_s25 + $0x260] sm:$0xf]  ;;  %v6184_v43 = vld [vmem:[%s6897_s25 + $0x25c] sm:$0xf] }
  0xb5   : > { %1189 = vst [vmem:[#allocation0 + $0x4c8] sm:$0xf] %v6182_v41  ;;  %1194 = vst [vmem:[#allocation0 + $0x4c0] sm:$0xf] %v6183_v42  ;;  %v6185_v44 = vld [vmem:[%s6897_s25 + $0x258] sm:$0xf] }
  0xb6   : > { %1199 = vst [vmem:[#allocation0 + $0x4b8] sm:$0xf] %v6184_v43  ;;  %v6186_v45 = vld [vmem:[%s6897_s25 + $0x254] sm:$0xf]  ;;  %v6187_v46 = vld [vmem:[%s6897_s25 + $0x250] sm:$0xf] }
  0xb7   : > { %1204 = vst [vmem:[#allocation0 + $0x4b0] sm:$0xf] %v6185_v44  ;;  %1209 = vst [vmem:[#allocation0 + $0x4a8] sm:$0xf] %v6186_v45  ;;  %v6188_v47 = vld [vmem:[%s6897_s25 + $0x24c] sm:$0xf] }
  0xb8   : > { %1214 = vst [vmem:[#allocation0 + $0x4a0] sm:$0xf] %v6187_v46  ;;  %v6189_v48 = vld [vmem:[%s6897_s25 + $0x248] sm:$0xf]  ;;  %v6190_v49 = vld [vmem:[%s6897_s25 + $0x244] sm:$0xf] }
  0xb9   : > { %1219 = vst [vmem:[#allocation0 + $0x498] sm:$0xf] %v6188_v47  ;;  %1224 = vst [vmem:[#allocation0 + $0x490] sm:$0xf] %v6189_v48  ;;  %v6191_v50 = vld [vmem:[%s6897_s25 + $0x240] sm:$0xf] }
  0xba   : > { %1229 = vst [vmem:[#allocation0 + $0x488] sm:$0xf] %v6190_v49  ;;  %v6192_v51 = vld [vmem:[%s6897_s25 + $0x23c] sm:$0xf]  ;;  %v6193_v52 = vld [vmem:[%s6897_s25 + $0x238] sm:$0xf] }
  0xbb   : > { %1234 = vst [vmem:[#allocation0 + $0x480] sm:$0xf] %v6191_v50  ;;  %1239 = vst [vmem:[#allocation0 + $0x478] sm:$0xf] %v6192_v51  ;;  %v6194_v53 = vld [vmem:[%s6897_s25 + $0x234] sm:$0xf] }
  0xbc   : > { %1244 = vst [vmem:[#allocation0 + $0x470] sm:$0xf] %v6193_v52  ;;  %v6195_v54 = vld [vmem:[%s6897_s25 + $0x230] sm:$0xf]  ;;  %v6196_v55 = vld [vmem:[%s6897_s25 + $0x22c] sm:$0xf] }
  0xbd   : > { %1249 = vst [vmem:[#allocation0 + $0x468] sm:$0xf] %v6194_v53  ;;  %1254 = vst [vmem:[#allocation0 + $0x460] sm:$0xf] %v6195_v54  ;;  %v6197_v56 = vld [vmem:[%s6897_s25 + $0x228] sm:$0xf] }
  0xbe   : > { %1259 = vst [vmem:[#allocation0 + $0x458] sm:$0xf] %v6196_v55  ;;  %v6198_v57 = vld [vmem:[%s6897_s25 + $0x224] sm:$0xf]  ;;  %v6199_v58 = vld [vmem:[%s6897_s25 + $0x220] sm:$0xf] }
  0xbf   : > { %1264 = vst [vmem:[#allocation0 + $0x450] sm:$0xf] %v6197_v56  ;;  %1269 = vst [vmem:[#allocation0 + $0x448] sm:$0xf] %v6198_v57  ;;  %v6200_v59 = vld [vmem:[%s6897_s25 + $0x21c] sm:$0xf] }
  0xc0   : > { %1274 = vst [vmem:[#allocation0 + $0x440] sm:$0xf] %v6199_v58  ;;  %v6201_v60 = vld [vmem:[%s6897_s25 + $0x218] sm:$0xf]  ;;  %v6202_v61 = vld [vmem:[%s6897_s25 + $0x214] sm:$0xf] }
  0xc1   : > { %1279 = vst [vmem:[#allocation0 + $0x438] sm:$0xf] %v6200_v59  ;;  %1284 = vst [vmem:[#allocation0 + $0x430] sm:$0xf] %v6201_v60  ;;  %v6203_v62 = vld [vmem:[%s6897_s25 + $0x210] sm:$0xf] }
  0xc2   : > { %1289 = vst [vmem:[#allocation0 + $0x428] sm:$0xf] %v6202_v61  ;;  %v6204_v63 = vld [vmem:[%s6897_s25 + $0x20c] sm:$0xf]  ;;  %v6205_v0 = vld [vmem:[%s6897_s25 + $0x208] sm:$0xf] }
  0xc3   : > { %1294 = vst [vmem:[#allocation0 + $0x420] sm:$0xf] %v6203_v62  ;;  %1299 = vst [vmem:[#allocation0 + $0x418] sm:$0xf] %v6204_v63  ;;  %v6206_v2 = vld [vmem:[%s6897_s25 + $0x204] sm:$0xf] }
  0xc4   : > { %1304 = vst [vmem:[#allocation0 + $0x410] sm:$0xf] %v6205_v0  ;;  %v6207_v3 = vld [vmem:[%s6897_s25 + $0x200] sm:$0xf]  ;;  %v6208_v4 = vld [vmem:[%s6897_s25 + $0x1fc] sm:$0xf] }
  0xc5   : > { %1309 = vst [vmem:[#allocation0 + $0x408] sm:$0xf] %v6206_v2  ;;  %1314 = vst [vmem:[#allocation0 + $0x400] sm:$0xf] %v6207_v3  ;;  %v6209_v5 = vld [vmem:[%s6897_s25 + $0x1f8] sm:$0xf] }
  0xc6   : > { %1319 = vst [vmem:[#allocation0 + $0x3f8] sm:$0xf] %v6208_v4  ;;  %v6210_v6 = vld [vmem:[%s6897_s25 + $0x1f4] sm:$0xf]  ;;  %v6211_v7 = vld [vmem:[%s6897_s25 + $0x1f0] sm:$0xf] }
  0xc7   : > { %1324 = vst [vmem:[#allocation0 + $0x3f0] sm:$0xf] %v6209_v5  ;;  %1329 = vst [vmem:[#allocation0 + $0x3e8] sm:$0xf] %v6210_v6  ;;  %v6212_v8 = vld [vmem:[%s6897_s25 + $0x1ec] sm:$0xf] }
  0xc8   : > { %1334 = vst [vmem:[#allocation0 + $0x3e0] sm:$0xf] %v6211_v7  ;;  %v6213_v9 = vld [vmem:[%s6897_s25 + $0x1e8] sm:$0xf]  ;;  %v6214_v10 = vld [vmem:[%s6897_s25 + $0x1e4] sm:$0xf] }
  0xc9   : > { %1339 = vst [vmem:[#allocation0 + $0x3d8] sm:$0xf] %v6212_v8  ;;  %1344 = vst [vmem:[#allocation0 + $0x3d0] sm:$0xf] %v6213_v9  ;;  %v6215_v11 = vld [vmem:[%s6897_s25 + $0x1e0] sm:$0xf] }
  0xca   : > { %1349 = vst [vmem:[#allocation0 + $0x3c8] sm:$0xf] %v6214_v10  ;;  %v6216_v12 = vld [vmem:[%s6897_s25 + $0x1dc] sm:$0xf]  ;;  %v6217_v13 = vld [vmem:[%s6897_s25 + $0x1d8] sm:$0xf] }
  0xcb   : > { %1354 = vst [vmem:[#allocation0 + $0x3c0] sm:$0xf] %v6215_v11  ;;  %1359 = vst [vmem:[#allocation0 + $0x3b8] sm:$0xf] %v6216_v12  ;;  %v6218_v14 = vld [vmem:[%s6897_s25 + $0x1d4] sm:$0xf] }
  0xcc   : > { %1364 = vst [vmem:[#allocation0 + $0x3b0] sm:$0xf] %v6217_v13  ;;  %v6219_v15 = vld [vmem:[%s6897_s25 + $0x1d0] sm:$0xf]  ;;  %v6220_v16 = vld [vmem:[%s6897_s25 + $0x1cc] sm:$0xf] }
  0xcd   : > { %1369 = vst [vmem:[#allocation0 + $0x3a8] sm:$0xf] %v6218_v14  ;;  %1374 = vst [vmem:[#allocation0 + $0x3a0] sm:$0xf] %v6219_v15  ;;  %v6221_v17 = vld [vmem:[%s6897_s25 + $0x1c8] sm:$0xf] }
  0xce   : > { %1379 = vst [vmem:[#allocation0 + $0x398] sm:$0xf] %v6220_v16  ;;  %v6222_v18 = vld [vmem:[%s6897_s25 + $0x1c4] sm:$0xf]  ;;  %v6223_v19 = vld [vmem:[%s6897_s25 + $0x1c0] sm:$0xf] }
  0xcf   : > { %1384 = vst [vmem:[#allocation0 + $0x390] sm:$0xf] %v6221_v17  ;;  %1389 = vst [vmem:[#allocation0 + $0x388] sm:$0xf] %v6222_v18  ;;  %v6224_v20 = vld [vmem:[%s6897_s25 + $0x1bc] sm:$0xf] }
  0xd0   : > { %1394 = vst [vmem:[#allocation0 + $0x380] sm:$0xf] %v6223_v19  ;;  %v6225_v21 = vld [vmem:[%s6897_s25 + $0x1b8] sm:$0xf]  ;;  %v6226_v22 = vld [vmem:[%s6897_s25 + $0x1b4] sm:$0xf] }
  0xd1   : > { %1399 = vst [vmem:[#allocation0 + $0x378] sm:$0xf] %v6224_v20  ;;  %1404 = vst [vmem:[#allocation0 + $0x370] sm:$0xf] %v6225_v21  ;;  %v6227_v23 = vld [vmem:[%s6897_s25 + $0x1b0] sm:$0xf] }
  0xd2   : > { %1409 = vst [vmem:[#allocation0 + $0x368] sm:$0xf] %v6226_v22  ;;  %v6228_v24 = vld [vmem:[%s6897_s25 + $0x1ac] sm:$0xf]  ;;  %v6229_v25 = vld [vmem:[%s6897_s25 + $0x1a8] sm:$0xf] }
  0xd3   : > { %1414 = vst [vmem:[#allocation0 + $0x360] sm:$0xf] %v6227_v23  ;;  %1419 = vst [vmem:[#allocation0 + $0x358] sm:$0xf] %v6228_v24  ;;  %v6230_v26 = vld [vmem:[%s6897_s25 + $0x1a4] sm:$0xf] }
  0xd4   : > { %1424 = vst [vmem:[#allocation0 + $0x350] sm:$0xf] %v6229_v25  ;;  %v6231_v27 = vld [vmem:[%s6897_s25 + $0x1a0] sm:$0xf]  ;;  %v6232_v28 = vld [vmem:[%s6897_s25 + $0x19c] sm:$0xf] }
  0xd5   : > { %1429 = vst [vmem:[#allocation0 + $0x348] sm:$0xf] %v6230_v26  ;;  %1434 = vst [vmem:[#allocation0 + $0x340] sm:$0xf] %v6231_v27  ;;  %v6233_v29 = vld [vmem:[%s6897_s25 + $0x198] sm:$0xf] }
  0xd6   : > { %1439 = vst [vmem:[#allocation0 + $0x338] sm:$0xf] %v6232_v28  ;;  %v6234_v30 = vld [vmem:[%s6897_s25 + $0x194] sm:$0xf]  ;;  %v6235_v31 = vld [vmem:[%s6897_s25 + $0x190] sm:$0xf] }
  0xd7   : > { %1444 = vst [vmem:[#allocation0 + $0x330] sm:$0xf] %v6233_v29  ;;  %1449 = vst [vmem:[#allocation0 + $0x328] sm:$0xf] %v6234_v30  ;;  %v6236_v32 = vld [vmem:[%s6897_s25 + $0x18c] sm:$0xf] }
  0xd8   : > { %1454 = vst [vmem:[#allocation0 + $0x320] sm:$0xf] %v6235_v31  ;;  %v6237_v33 = vld [vmem:[%s6897_s25 + $0x188] sm:$0xf]  ;;  %v6238_v34 = vld [vmem:[%s6897_s25 + $0x184] sm:$0xf] }
  0xd9   : > { %1459 = vst [vmem:[#allocation0 + $0x318] sm:$0xf] %v6236_v32  ;;  %1464 = vst [vmem:[#allocation0 + $0x310] sm:$0xf] %v6237_v33  ;;  %v6239_v35 = vld [vmem:[%s6897_s25 + $0x180] sm:$0xf] }
  0xda   : > { %1469 = vst [vmem:[#allocation0 + $0x308] sm:$0xf] %v6238_v34  ;;  %v6240_v36 = vld [vmem:[%s6897_s25 + $0x17c] sm:$0xf]  ;;  %v6241_v37 = vld [vmem:[%s6897_s25 + $0x178] sm:$0xf] }
  0xdb   : > { %1474 = vst [vmem:[#allocation0 + $0x300] sm:$0xf] %v6239_v35  ;;  %1479 = vst [vmem:[#allocation0 + $0x2f8] sm:$0xf] %v6240_v36  ;;  %v6242_v38 = vld [vmem:[%s6897_s25 + $0x174] sm:$0xf] }
  0xdc   : > { %1484 = vst [vmem:[#allocation0 + $0x2f0] sm:$0xf] %v6241_v37  ;;  %v6243_v39 = vld [vmem:[%s6897_s25 + $0x170] sm:$0xf]  ;;  %v6244_v40 = vld [vmem:[%s6897_s25 + $0x16c] sm:$0xf] }
  0xdd   : > { %1489 = vst [vmem:[#allocation0 + $0x2e8] sm:$0xf] %v6242_v38  ;;  %1494 = vst [vmem:[#allocation0 + $0x2e0] sm:$0xf] %v6243_v39  ;;  %v6245_v41 = vld [vmem:[%s6897_s25 + $0x168] sm:$0xf] }
  0xde   : > { %1499 = vst [vmem:[#allocation0 + $0x2d8] sm:$0xf] %v6244_v40  ;;  %v6246_v42 = vld [vmem:[%s6897_s25 + $0x164] sm:$0xf]  ;;  %v6247_v43 = vld [vmem:[%s6897_s25 + $0x160] sm:$0xf] }
  0xdf   : > { %1504 = vst [vmem:[#allocation0 + $0x2d0] sm:$0xf] %v6245_v41  ;;  %1509 = vst [vmem:[#allocation0 + $0x2c8] sm:$0xf] %v6246_v42  ;;  %v6248_v44 = vld [vmem:[%s6897_s25 + $0x15c] sm:$0xf] }
  0xe0   : > { %1514 = vst [vmem:[#allocation0 + $0x2c0] sm:$0xf] %v6247_v43  ;;  %v6249_v45 = vld [vmem:[%s6897_s25 + $0x158] sm:$0xf]  ;;  %v6250_v46 = vld [vmem:[%s6897_s25 + $0x154] sm:$0xf] }
  0xe1   : > { %1519 = vst [vmem:[#allocation0 + $0x2b8] sm:$0xf] %v6248_v44  ;;  %1524 = vst [vmem:[#allocation0 + $0x2b0] sm:$0xf] %v6249_v45  ;;  %v6251_v47 = vld [vmem:[%s6897_s25 + $0x150] sm:$0xf] }
  0xe2   : > { %1529 = vst [vmem:[#allocation0 + $0x2a8] sm:$0xf] %v6250_v46  ;;  %v6252_v48 = vld [vmem:[%s6897_s25 + $0x14c] sm:$0xf]  ;;  %v6253_v49 = vld [vmem:[%s6897_s25 + $0x148] sm:$0xf] }
  0xe3   : > { %1534 = vst [vmem:[#allocation0 + $0x2a0] sm:$0xf] %v6251_v47  ;;  %1539 = vst [vmem:[#allocation0 + $0x298] sm:$0xf] %v6252_v48  ;;  %v6254_v50 = vld [vmem:[%s6897_s25 + $0x144] sm:$0xf] }
  0xe4   : > { %1544 = vst [vmem:[#allocation0 + $0x290] sm:$0xf] %v6253_v49  ;;  %v6255_v51 = vld [vmem:[%s6897_s25 + $0x140] sm:$0xf]  ;;  %v6256_v52 = vld [vmem:[%s6897_s25 + $0x13c] sm:$0xf] }
  0xe5   : > { %1549 = vst [vmem:[#allocation0 + $0x288] sm:$0xf] %v6254_v50  ;;  %1554 = vst [vmem:[#allocation0 + $0x280] sm:$0xf] %v6255_v51  ;;  %v6257_v53 = vld [vmem:[%s6897_s25 + $0x138] sm:$0xf] }
  0xe6   : > { %1559 = vst [vmem:[#allocation0 + $0x278] sm:$0xf] %v6256_v52  ;;  %v6258_v54 = vld [vmem:[%s6897_s25 + $0x134] sm:$0xf]  ;;  %v6259_v55 = vld [vmem:[%s6897_s25 + $0x130] sm:$0xf] }
  0xe7   : > { %1564 = vst [vmem:[#allocation0 + $0x270] sm:$0xf] %v6257_v53  ;;  %1569 = vst [vmem:[#allocation0 + $0x268] sm:$0xf] %v6258_v54  ;;  %v6260_v56 = vld [vmem:[%s6897_s25 + $0x12c] sm:$0xf] }
  0xe8   : > { %1574 = vst [vmem:[#allocation0 + $0x260] sm:$0xf] %v6259_v55  ;;  %v6261_v57 = vld [vmem:[%s6897_s25 + $0x128] sm:$0xf]  ;;  %v6262_v58 = vld [vmem:[%s6897_s25 + $0x124] sm:$0xf] }
  0xe9   : > { %1579 = vst [vmem:[#allocation0 + $0x258] sm:$0xf] %v6260_v56  ;;  %1584 = vst [vmem:[#allocation0 + $0x250] sm:$0xf] %v6261_v57  ;;  %v6263_v59 = vld [vmem:[%s6897_s25 + $0x120] sm:$0xf] }
  0xea   : > { %1589 = vst [vmem:[#allocation0 + $0x248] sm:$0xf] %v6262_v58  ;;  %v6264_v60 = vld [vmem:[%s6897_s25 + $0x11c] sm:$0xf]  ;;  %v6265_v61 = vld [vmem:[%s6897_s25 + $0x118] sm:$0xf] }
  0xeb   : > { %1594 = vst [vmem:[#allocation0 + $0x240] sm:$0xf] %v6263_v59  ;;  %1599 = vst [vmem:[#allocation0 + $0x238] sm:$0xf] %v6264_v60  ;;  %v6266_v62 = vld [vmem:[%s6897_s25 + $0x114] sm:$0xf] }
  0xec   : > { %1604 = vst [vmem:[#allocation0 + $0x230] sm:$0xf] %v6265_v61  ;;  %v6267_v63 = vld [vmem:[%s6897_s25 + $0x110] sm:$0xf]  ;;  %v6268_v0 = vld [vmem:[%s6897_s25 + $0x10c] sm:$0xf] }
  0xed   : > { %1609 = vst [vmem:[#allocation0 + $0x228] sm:$0xf] %v6266_v62  ;;  %1614 = vst [vmem:[#allocation0 + $0x220] sm:$0xf] %v6267_v63  ;;  %v6269_v2 = vld [vmem:[%s6897_s25 + $0x108] sm:$0xf] }
  0xee   : > { %1619 = vst [vmem:[#allocation0 + $0x218] sm:$0xf] %v6268_v0  ;;  %v6270_v3 = vld [vmem:[%s6897_s25 + $0x104] sm:$0xf]  ;;  %v6271_v4 = vld [vmem:[%s6897_s25 + $0x100] sm:$0xf] }
  0xef   : > { %1624 = vst [vmem:[#allocation0 + $0x210] sm:$0xf] %v6269_v2  ;;  %1629 = vst [vmem:[#allocation0 + $0x208] sm:$0xf] %v6270_v3  ;;  %v6272_v5 = vld [vmem:[%s6897_s25 + $0xfc] sm:$0xf] }
  0xf0   : > { %1634 = vst [vmem:[#allocation0 + $0x200] sm:$0xf] %v6271_v4  ;;  %v6273_v6 = vld [vmem:[%s6897_s25 + $0xf8] sm:$0xf]  ;;  %v6274_v7 = vld [vmem:[%s6897_s25 + $0xf4] sm:$0xf] }
  0xf1   : > { %1639 = vst [vmem:[#allocation0 + $0x1f8] sm:$0xf] %v6272_v5  ;;  %1644 = vst [vmem:[#allocation0 + $0x1f0] sm:$0xf] %v6273_v6  ;;  %v6275_v8 = vld [vmem:[%s6897_s25 + $0xf0] sm:$0xf] }
  0xf2   : > { %1649 = vst [vmem:[#allocation0 + $0x1e8] sm:$0xf] %v6274_v7  ;;  %v6276_v9 = vld [vmem:[%s6897_s25 + $0xec] sm:$0xf]  ;;  %v6277_v10 = vld [vmem:[%s6897_s25 + $0xe8] sm:$0xf] }
  0xf3   : > { %1654 = vst [vmem:[#allocation0 + $0x1e0] sm:$0xf] %v6275_v8  ;;  %1659 = vst [vmem:[#allocation0 + $0x1d8] sm:$0xf] %v6276_v9  ;;  %v6278_v11 = vld [vmem:[%s6897_s25 + $0xe4] sm:$0xf] }
  0xf4   : > { %1664 = vst [vmem:[#allocation0 + $0x1d0] sm:$0xf] %v6277_v10  ;;  %v6279_v12 = vld [vmem:[%s6897_s25 + $0xe0] sm:$0xf]  ;;  %v6280_v13 = vld [vmem:[%s6897_s25 + $0xdc] sm:$0xf] }
  0xf5   : > { %1669 = vst [vmem:[#allocation0 + $0x1c8] sm:$0xf] %v6278_v11  ;;  %1674 = vst [vmem:[#allocation0 + $0x1c0] sm:$0xf] %v6279_v12  ;;  %v6281_v14 = vld [vmem:[%s6897_s25 + $0xd8] sm:$0xf] }
  0xf6   : > { %1679 = vst [vmem:[#allocation0 + $0x1b8] sm:$0xf] %v6280_v13  ;;  %v6282_v15 = vld [vmem:[%s6897_s25 + $0xd4] sm:$0xf]  ;;  %v6283_v16 = vld [vmem:[%s6897_s25 + $0xd0] sm:$0xf] }
  0xf7   : > { %1684 = vst [vmem:[#allocation0 + $0x1b0] sm:$0xf] %v6281_v14  ;;  %1689 = vst [vmem:[#allocation0 + $0x1a8] sm:$0xf] %v6282_v15  ;;  %v6284_v17 = vld [vmem:[%s6897_s25 + $0xcc] sm:$0xf] }
  0xf8   : > { %1694 = vst [vmem:[#allocation0 + $0x1a0] sm:$0xf] %v6283_v16  ;;  %v6285_v18 = vld [vmem:[%s6897_s25 + $0xc8] sm:$0xf]  ;;  %v6286_v19 = vld [vmem:[%s6897_s25 + $0xc4] sm:$0xf] }
  0xf9   : > { %1699 = vst [vmem:[#allocation0 + $0x198] sm:$0xf] %v6284_v17  ;;  %1704 = vst [vmem:[#allocation0 + $0x190] sm:$0xf] %v6285_v18  ;;  %v6287_v20 = vld [vmem:[%s6897_s25 + $0xc0] sm:$0xf] }
  0xfa   : > { %1709 = vst [vmem:[#allocation0 + $0x188] sm:$0xf] %v6286_v19  ;;  %v6288_v21 = vld [vmem:[%s6897_s25 + $0xbc] sm:$0xf]  ;;  %v6289_v22 = vld [vmem:[%s6897_s25 + $0xb8] sm:$0xf] }
  0xfb   : > { %1714 = vst [vmem:[#allocation0 + $0x180] sm:$0xf] %v6287_v20  ;;  %1719 = vst [vmem:[#allocation0 + $0x178] sm:$0xf] %v6288_v21  ;;  %v6290_v23 = vld [vmem:[%s6897_s25 + $0xb4] sm:$0xf] }
  0xfc   : > { %1724 = vst [vmem:[#allocation0 + $0x170] sm:$0xf] %v6289_v22  ;;  %v6291_v24 = vld [vmem:[%s6897_s25 + $0xb0] sm:$0xf]  ;;  %v6292_v25 = vld [vmem:[%s6897_s25 + $0xac] sm:$0xf] }
  0xfd   : > { %1729 = vst [vmem:[#allocation0 + $0x168] sm:$0xf] %v6290_v23  ;;  %1734 = vst [vmem:[#allocation0 + $0x160] sm:$0xf] %v6291_v24  ;;  %v6293_v26 = vld [vmem:[%s6897_s25 + $0xa8] sm:$0xf] }
  0xfe   : > { %1739 = vst [vmem:[#allocation0 + $0x158] sm:$0xf] %v6292_v25  ;;  %v6294_v27 = vld [vmem:[%s6897_s25 + $0xa4] sm:$0xf]  ;;  %v6295_v28 = vld [vmem:[%s6897_s25 + $0xa0] sm:$0xf] }
  0xff   : > { %1744 = vst [vmem:[#allocation0 + $0x150] sm:$0xf] %v6293_v26  ;;  %1749 = vst [vmem:[#allocation0 + $0x148] sm:$0xf] %v6294_v27  ;;  %v6296_v29 = vld [vmem:[%s6897_s25 + $0x9c] sm:$0xf] }
 0x100   : > { %1754 = vst [vmem:[#allocation0 + $0x140] sm:$0xf] %v6295_v28  ;;  %v6297_v30 = vld [vmem:[%s6897_s25 + $0x98] sm:$0xf]  ;;  %v6298_v31 = vld [vmem:[%s6897_s25 + $0x94] sm:$0xf] }
 0x101   : > { %1759 = vst [vmem:[#allocation0 + $0x138] sm:$0xf] %v6296_v29  ;;  %1764 = vst [vmem:[#allocation0 + $0x130] sm:$0xf] %v6297_v30  ;;  %v6299_v32 = vld [vmem:[%s6897_s25 + $0x90] sm:$0xf] }
 0x102   : > { %1769 = vst [vmem:[#allocation0 + $0x128] sm:$0xf] %v6298_v31  ;;  %v6300_v33 = vld [vmem:[%s6897_s25 + $0x8c] sm:$0xf]  ;;  %v6301_v34 = vld [vmem:[%s6897_s25 + $0x88] sm:$0xf] }
 0x103   : > { %1774 = vst [vmem:[#allocation0 + $0x120] sm:$0xf] %v6299_v32  ;;  %1779 = vst [vmem:[#allocation0 + $0x118] sm:$0xf] %v6300_v33  ;;  %v6302_v35 = vld [vmem:[%s6897_s25 + $0x84] sm:$0xf] }
 0x104   : > { %1784 = vst [vmem:[#allocation0 + $0x110] sm:$0xf] %v6301_v34  ;;  %v6303_v36 = vld [vmem:[%s6897_s25 + $0x80] sm:$0xf]  ;;  %v6304_v37 = vld [vmem:[%s6897_s25 + $0x7c] sm:$0xf] }
 0x105   : > { %1789 = vst [vmem:[#allocation0 + $0x108] sm:$0xf] %v6302_v35  ;;  %1794 = vst [vmem:[#allocation0 + $0x100] sm:$0xf] %v6303_v36  ;;  %v6305_v38 = vld [vmem:[%s6897_s25 + $0x78] sm:$0xf] }
 0x106   : > { %1799 = vst [vmem:[#allocation0 + $0xf8] sm:$0xf] %v6304_v37  ;;  %v6306_v39 = vld [vmem:[%s6897_s25 + $0x74] sm:$0xf]  ;;  %v6307_v40 = vld [vmem:[%s6897_s25 + $0x70] sm:$0xf] }
 0x107   : > { %1804 = vst [vmem:[#allocation0 + $0xf0] sm:$0xf] %v6305_v38  ;;  %1809 = vst [vmem:[#allocation0 + $0xe8] sm:$0xf] %v6306_v39  ;;  %v6308_v41 = vld [vmem:[%s6897_s25 + $0x6c] sm:$0xf] }
 0x108   : > { %1814 = vst [vmem:[#allocation0 + $0xe0] sm:$0xf] %v6307_v40  ;;  %v6309_v42 = vld [vmem:[%s6897_s25 + $0x68] sm:$0xf]  ;;  %v6310_v43 = vld [vmem:[%s6897_s25 + $0x64] sm:$0xf] }
 0x109   : > { %1819 = vst [vmem:[#allocation0 + $0xd8] sm:$0xf] %v6308_v41  ;;  %1824 = vst [vmem:[#allocation0 + $0xd0] sm:$0xf] %v6309_v42  ;;  %v6311_v44 = vld [vmem:[%s6897_s25 + $0x60] sm:$0xf] }
 0x10a   : > { %1829 = vst [vmem:[#allocation0 + $0xc8] sm:$0xf] %v6310_v43  ;;  %v6312_v45 = vld [vmem:[%s6897_s25 + $0x5c] sm:$0xf]  ;;  %v6313_v46 = vld [vmem:[%s6897_s25 + $0x58] sm:$0xf] }
 0x10b   : > { %1834 = vst [vmem:[#allocation0 + $0xc0] sm:$0xf] %v6311_v44  ;;  %1839 = vst [vmem:[#allocation0 + $0xb8] sm:$0xf] %v6312_v45  ;;  %v6314_v47 = vld [vmem:[%s6897_s25 + $0x54] sm:$0xf] }
 0x10c   : > { %1844 = vst [vmem:[#allocation0 + $0xb0] sm:$0xf] %v6313_v46  ;;  %v6315_v48 = vld [vmem:[%s6897_s25 + $0x50] sm:$0xf]  ;;  %v6316_v49 = vld [vmem:[%s6897_s25 + $0x4c] sm:$0xf] }
 0x10d   : > { %1849 = vst [vmem:[#allocation0 + $0xa8] sm:$0xf] %v6314_v47  ;;  %1854 = vst [vmem:[#allocation0 + $0xa0] sm:$0xf] %v6315_v48  ;;  %v6317_v50 = vld [vmem:[%s6897_s25 + $0x48] sm:$0xf] }
 0x10e   : > { %1859 = vst [vmem:[#allocation0 + $0x98] sm:$0xf] %v6316_v49  ;;  %v6318_v51 = vld [vmem:[%s6897_s25 + $0x44] sm:$0xf]  ;;  %v6319_v52 = vld [vmem:[%s6897_s25 + $0x40] sm:$0xf] }
 0x10f   : > { %1864 = vst [vmem:[#allocation0 + $0x90] sm:$0xf] %v6317_v50  ;;  %1869 = vst [vmem:[#allocation0 + $0x88] sm:$0xf] %v6318_v51  ;;  %v6320_v53 = vld [vmem:[%s6897_s25 + $0x3c] sm:$0xf] }
 0x110   : > { %1874 = vst [vmem:[#allocation0 + $0x80] sm:$0xf] %v6319_v52  ;;  %v6321_v54 = vld [vmem:[%s6897_s25 + $0x38] sm:$0xf]  ;;  %v6322_v55 = vld [vmem:[%s6897_s25 + $0x34] sm:$0xf] }
 0x111   : > { %1879 = vst [vmem:[#allocation0 + $0x78] sm:$0xf] %v6320_v53  ;;  %1884 = vst [vmem:[#allocation0 + $0x70] sm:$0xf] %v6321_v54  ;;  %v6323_v56 = vld [vmem:[%s6897_s25 + $0x30] sm:$0xf] }
 0x112   : > { %1889 = vst [vmem:[#allocation0 + $0x68] sm:$0xf] %v6322_v55  ;;  %v6324_v57 = vld [vmem:[%s6897_s25 + $0x2c] sm:$0xf]  ;;  %v6325_v58 = vld [vmem:[%s6897_s25 + $0x28] sm:$0xf] }
 0x113   : > { %1894 = vst [vmem:[#allocation0 + $0x60] sm:$0xf] %v6323_v56  ;;  %1899 = vst [vmem:[#allocation0 + $0x58] sm:$0xf] %v6324_v57  ;;  %v6326_v59 = vld [vmem:[%s6897_s25 + $0x24] sm:$0xf] }
 0x114   : > { %1904 = vst [vmem:[#allocation0 + $0x50] sm:$0xf] %v6325_v58  ;;  %v6327_v60 = vld [vmem:[%s6897_s25 + $0x20] sm:$0xf]  ;;  %v6328_v61 = vld [vmem:[%s6897_s25 + $0x1c] sm:$0xf] }
 0x115   : > { %1909 = vst [vmem:[#allocation0 + $0x48] sm:$0xf] %v6326_v59  ;;  %1914 = vst [vmem:[#allocation0 + $0x40] sm:$0xf] %v6327_v60  ;;  %v6329_v62 = vld [vmem:[%s6897_s25 + $0x18] sm:$0xf] }
 0x116   : > { %1919 = vst [vmem:[#allocation0 + $0x38] sm:$0xf] %v6328_v61  ;;  %v6330_v63 = vld [vmem:[%s6897_s25 + $0x14] sm:$0xf]  ;;  %v6331_v0 = vld [vmem:[%s6897_s25 + $0x10] sm:$0xf] }
 0x117   : > { %1924 = vst [vmem:[#allocation0 + $0x30] sm:$0xf] %v6329_v62  ;;  %1929 = vst [vmem:[#allocation0 + $0x28] sm:$0xf] %v6330_v63  ;;  %v6332_v2 = vld [vmem:[%s6897_s25 + $0xc] sm:$0xf] }
 0x118   : > { %1934 = vst [vmem:[#allocation0 + $0x20] sm:$0xf] %v6331_v0  ;;  %v6333_v3 = vld [vmem:[%s6897_s25 + $0x8] sm:$0xf]  ;;  %v6334_v4 = vld [vmem:[%s6897_s25 + $0x4] sm:$0xf] }
 0x119   : > { %1939 = vst [vmem:[#allocation0 + $0x18] sm:$0xf] %v6332_v2  ;;  %1944 = vst [vmem:[#allocation0 + $0x10] sm:$0xf] %v6333_v3  ;;  %v1949_v5 = vld [vmem:[%s6897_s25] sm:$0xf] }
 0x11a   : > { %1948 = vst [vmem:[#allocation0 + $0x8] sm:$0xf] %v6334_v4  ;;  %v2076_v6 = vld [vmem:[#allocation0 + $0xf7] ss:$-1 sm:$0xff]  ;;  %1950 = vst [vmem:[#allocation0] sm:$0xf] %v1949_v5 }
 0x11b   : > { %vm1974_vm0 = vcmp.lt.s32.totalorder %v6895_v1, 4  ;;  %v2077_v7 = vrot.slane %v2076_v6, 4  ;;  %v2081_v8 = vld [vmem:[#allocation0 + $0xff] ss:$-1 sm:$0xff]  ;;  %v2090_v9 = vld [vmem:[#allocation0 + $0xe7] ss:$-1 sm:$0xff] }
 0x11c   : > { %v2082_v10 = vrot.slane %v2081_v8, 4  ;;  %v2091_v11 = vrot.slane %v2090_v9, 4  ;;  %v2095_v12 = vld [vmem:[#allocation0 + $0xef] ss:$-1 sm:$0xff]  ;;  %v2104_v13 = vld [vmem:[#allocation0 + $0xd7] ss:$-1 sm:$0xff] }
 0x11d   : > { %v1965_v14 = vld [vmem:[#allocation0 + $0x77] ss:$-1 sm:$0xff]  ;;  %v1970_v15 = vld [vmem:[#allocation0 + $0x7f] ss:$-1 sm:$0xff]  ;;  %v1984_v16 = vld [vmem:[#allocation0 + $0x6f] ss:$-1 sm:$0xff] }
 0x11e   : > { %2078 = vst [vmem:[#allocation2 + $0x40] sm:$0xff] %v2077_v7  ;;  %v1966_v17 = vrot.slane %v1965_v14, 4  ;;  %v1971_v18 = vrot.slane %v1970_v15, 4  ;;  %v1979_v19 = vld [vmem:[#allocation0 + $0x67] ss:$-1 sm:$0xff]  ;;  %v1985_v20 = vrot.slane %v1984_v16, 4 }
 0x11f   : > { %2086 = vst.msk [vmem:[#allocation2 + $0x40] sm:$0xff] %vm1974_vm0, %v2082_v10  ;;  %2092 = vst [vmem:[#allocation2 + $0x48] sm:$0xff] %v2091_v11  ;;  %v2096_v21 = vrot.slane %v2095_v12, 4  ;;  %v1980_v22 = vrot.slane %v1979_v19, 4  ;;  %v1993_v23 = vld [vmem:[#allocation0 + $0x57] ss:$-1 sm:$0xff] }
 0x120   : > { %v1998_v24 = vld [vmem:[#allocation0 + $0x5f] ss:$-1 sm:$0xff]  ;;  %v2105_v25 = vrot.slane %v2104_v13, 4  ;;  %1967 = vst [vmem:[#allocation2] sm:$0xff] %v1966_v17  ;;  %v1994_v26 = vrot.slane %v1993_v23, 4  ;;  %s7420_s26 = scalar_lea.vmem [#allocation3], %s6079_s24 }
 0x121   : > { %v1999_v27 = vrot.slane %v1998_v24, 4  ;;  %v2007_v28 = vld [vmem:[#allocation0 + $0x47] ss:$-1 sm:$0xff]  ;;  %v2012_v29 = vld [vmem:[#allocation0 + $0x4f] ss:$-1 sm:$0xff]  ;;  %2100 = vst.msk [vmem:[#allocation2 + $0x48] sm:$0xff] %vm1974_vm0, %v2096_v21 }
 0x122   : > { %1975 = vst.msk [vmem:[#allocation2] sm:$0xff] %vm1974_vm0, %v1971_v18  ;;  %1981 = vst [vmem:[#allocation2 + $0x8] sm:$0xff] %v1980_v22  ;;  %v2008_v30 = vrot.slane %v2007_v28, 4  ;;  %v2013_v31 = vrot.slane %v2012_v29, 4  ;;  %v2021_v32 = vld [vmem:[#allocation0 + $0x37] ss:$-1 sm:$0xff] }
 0x123   : > { %v2026_v33 = vld [vmem:[#allocation0 + $0x3f] ss:$-1 sm:$0xff]  ;;  %2106 = vst [vmem:[#allocation2 + $0x50] sm:$0xff] %v2105_v25  ;;  %1989 = vst.msk [vmem:[#allocation2 + $0x8] sm:$0xff] %vm1974_vm0, %v1985_v20  ;;  %v2022_v34 = vrot.slane %v2021_v32, 4 }
 0x124   : > { %1995 = vst [vmem:[#allocation2 + $0x10] sm:$0xff] %v1994_v26  ;;  %v2027_v35 = vrot.slane %v2026_v33, 4  ;;  %v2035_v36 = vld [vmem:[#allocation0 + $0x27] ss:$-1 sm:$0xff]  ;;  %v2040_v37 = vld [vmem:[#allocation0 + $0x2f] ss:$-1 sm:$0xff] }
 0x125   : > { %2003 = vst.msk [vmem:[#allocation2 + $0x10] sm:$0xff] %vm1974_vm0, %v1999_v27  ;;  %2009 = vst [vmem:[#allocation2 + $0x18] sm:$0xff] %v2008_v30  ;;  %v2036_v38 = vrot.slane %v2035_v36, 4  ;;  %v2041_v39 = vrot.slane %v2040_v37, 4  ;;  %v2049_v40 = vld [vmem:[#allocation0 + $0x17] ss:$-1 sm:$0xff] }
 0x126   : > { %v2054_v41 = vld [vmem:[#allocation0 + $0x1f] ss:$-1 sm:$0xff]  ;;  %2017 = vst.msk [vmem:[#allocation2 + $0x18] sm:$0xff] %vm1974_vm0, %v2013_v31  ;;  %2023 = vst [vmem:[#allocation2 + $0x20] sm:$0xff] %v2022_v34  ;;  %v2050_v42 = vrot.slane %v2049_v40, 4 }
 0x127   : > { %v2055_v43 = vrot.slane %v2054_v41, 4  ;;  %v2062_v44 = vld [vmem:[#allocation0 + $0x7] ss:$-1 sm:$0xff]  ;;  %v2067_v45 = vld [vmem:[#allocation0 + $0xf] ss:$-1 sm:$0xff]  ;;  %2031 = vst.msk [vmem:[#allocation2 + $0x20] sm:$0xff] %vm1974_vm0, %v2027_v35 }
 0x128   : > { %2037 = vst [vmem:[#allocation2 + $0x28] sm:$0xff] %v2036_v38  ;;  %v2063_v46 = vrot.slane %v2062_v44, 4  ;;  %v2068_v47 = vrot.slane %v2067_v45, 4  ;;  %v2109_v48 = vld [vmem:[#allocation0 + $0xdf] ss:$-1 sm:$0xff]  ;;  %2051 = vst [vmem:[#allocation2 + $0x30] sm:$0xff] %v2050_v42 }
 0x129   : > { %v2118_v49 = vld [vmem:[#allocation0 + $0xc7] ss:$-1 sm:$0xff]  ;;  %2045 = vst.msk [vmem:[#allocation2 + $0x28] sm:$0xff] %vm1974_vm0, %v2041_v39  ;;  %v2110_v50 = vrot.slane %v2109_v48, 4  ;;  %v2123_v52 = vld [vmem:[#allocation0 + $0xcf] ss:$-1 sm:$0xff] }
 0x12a   : > { %v2119_v51 = vrot.slane %v2118_v49, 4  ;;  %v2132_v53 = vld [vmem:[#allocation0 + $0xb7] ss:$-1 sm:$0xff]  ;;  %2059 = vst.msk [vmem:[#allocation2 + $0x30] sm:$0xff] %vm1974_vm0, %v2055_v43  ;;  %2064 = vst [vmem:[#allocation2 + $0x38] sm:$0xff] %v2063_v46  ;;  %v2124_v54 = vrot.slane %v2123_v52, 4 }
 0x12b   : > { %v2133_v55 = vrot.slane %v2132_v53, 4  ;;  %v2137_v56 = vld [vmem:[#allocation0 + $0xbf] ss:$-1 sm:$0xff]  ;;  %v2146_v57 = vld [vmem:[#allocation0 + $0xa7] ss:$-1 sm:$0xff]  ;;  %2072 = vst.msk [vmem:[#allocation2 + $0x38] sm:$0xff] %vm1974_vm0, %v2068_v47 }
 0x12c   : > { %2114 = vst.msk [vmem:[#allocation2 + $0x50] sm:$0xff] %vm1974_vm0, %v2110_v50  ;;  %2120 = vst [vmem:[#allocation2 + $0x58] sm:$0xff] %v2119_v51  ;;  %v2138_v58 = vrot.slane %v2137_v56, 4  ;;  %v2147_v59 = vrot.slane %v2146_v57, 4  ;;  %v2151_v60 = vld [vmem:[#allocation0 + $0xaf] ss:$-1 sm:$0xff] }
 0x12d   : > { %v2160_v61 = vld [vmem:[#allocation0 + $0x97] ss:$-1 sm:$0xff]  ;;  %2128 = vst.msk [vmem:[#allocation2 + $0x58] sm:$0xff] %vm1974_vm0, %v2124_v54  ;;  %2134 = vst [vmem:[#allocation2 + $0x60] sm:$0xff] %v2133_v55  ;;  %v2152_v62 = vrot.slane %v2151_v60, 4 }
 0x12e   : > { %v2161_v63 = vrot.slane %v2160_v61, 4  ;;  %v2165_v0 = vld [vmem:[#allocation0 + $0x9f] ss:$-1 sm:$0xff]  ;;  %v2174_v2 = vld [vmem:[#allocation0 + $0x87] ss:$-1 sm:$0xff]  ;;  %2142 = vst.msk [vmem:[#allocation2 + $0x60] sm:$0xff] %vm1974_vm0, %v2138_v58 }
 0x12f   : > { %2148 = vst [vmem:[#allocation2 + $0x68] sm:$0xff] %v2147_v59  ;;  %v2166_v3 = vrot.slane %v2165_v0, 4  ;;  %v2175_v4 = vrot.slane %v2174_v2, 4  ;;  %v2179_v5 = vld [vmem:[#allocation0 + $0x8f] ss:$-1 sm:$0xff] }
 0x130   : > { %v2188_v6 = vld [vmem:[#allocation0 + $0x177] ss:$-1 sm:$0xff]  ;;  %2156 = vst.msk [vmem:[#allocation2 + $0x68] sm:$0xff] %vm1974_vm0, %v2152_v62  ;;  %2162 = vst [vmem:[#allocation2 + $0x70] sm:$0xff] %v2161_v63  ;;  %v2180_v7 = vrot.slane %v2179_v5, 4 }
 0x131   : > { %v2189_v8 = vrot.slane %v2188_v6, 4  ;;  %v2193_v9 = vld [vmem:[#allocation0 + $0x17f] ss:$-1 sm:$0xff]  ;;  %v2202_v10 = vld [vmem:[#allocation0 + $0x167] ss:$-1 sm:$0xff]  ;;  %2170 = vst.msk [vmem:[#allocation2 + $0x70] sm:$0xff] %vm1974_vm0, %v2166_v3 }
 0x132   : > { %2176 = vst [vmem:[#allocation2 + $0x78] sm:$0xff] %v2175_v4  ;;  %v2194_v11 = vrot.slane %v2193_v9, 4  ;;  %v2203_v12 = vrot.slane %v2202_v10, 4  ;;  %v2207_v13 = vld [vmem:[#allocation0 + $0x16f] ss:$-1 sm:$0xff] }
 0x133   : > { %v2216_v14 = vld [vmem:[#allocation0 + $0x157] ss:$-1 sm:$0xff]  ;;  %2184 = vst.msk [vmem:[#allocation2 + $0x78] sm:$0xff] %vm1974_vm0, %v2180_v7  ;;  %2190 = vst [vmem:[#allocation2 + $0x80] sm:$0xff] %v2189_v8  ;;  %v2208_v15 = vrot.slane %v2207_v13, 4 }
 0x134   : > { %v2217_v16 = vrot.slane %v2216_v14, 4  ;;  %v2221_v17 = vld [vmem:[#allocation0 + $0x15f] ss:$-1 sm:$0xff]  ;;  %v2230_v18 = vld [vmem:[#allocation0 + $0x147] ss:$-1 sm:$0xff]  ;;  %2198 = vst.msk [vmem:[#allocation2 + $0x80] sm:$0xff] %vm1974_vm0, %v2194_v11 }
 0x135   : > { %2204 = vst [vmem:[#allocation2 + $0x88] sm:$0xff] %v2203_v12  ;;  %v2222_v19 = vrot.slane %v2221_v17, 4  ;;  %v2231_v20 = vrot.slane %v2230_v18, 4  ;;  %v2235_v21 = vld [vmem:[#allocation0 + $0x14f] ss:$-1 sm:$0xff] }
 0x136   : > { %v2244_v22 = vld [vmem:[#allocation0 + $0x137] ss:$-1 sm:$0xff]  ;;  %2212 = vst.msk [vmem:[#allocation2 + $0x88] sm:$0xff] %vm1974_vm0, %v2208_v15  ;;  %2218 = vst [vmem:[#allocation2 + $0x90] sm:$0xff] %v2217_v16  ;;  %v2236_v23 = vrot.slane %v2235_v21, 4 }
 0x137   : > { %v2245_v24 = vrot.slane %v2244_v22, 4  ;;  %v2249_v25 = vld [vmem:[#allocation0 + $0x13f] ss:$-1 sm:$0xff]  ;;  %v2258_v26 = vld [vmem:[#allocation0 + $0x127] ss:$-1 sm:$0xff]  ;;  %2226 = vst.msk [vmem:[#allocation2 + $0x90] sm:$0xff] %vm1974_vm0, %v2222_v19 }
 0x138   : > { %2232 = vst [vmem:[#allocation2 + $0x98] sm:$0xff] %v2231_v20  ;;  %v2250_v27 = vrot.slane %v2249_v25, 4  ;;  %v2259_v28 = vrot.slane %v2258_v26, 4  ;;  %v2263_v29 = vld [vmem:[#allocation0 + $0x12f] ss:$-1 sm:$0xff] }
 0x139   : > { %v2272_v30 = vld [vmem:[#allocation0 + $0x117] ss:$-1 sm:$0xff]  ;;  %2240 = vst.msk [vmem:[#allocation2 + $0x98] sm:$0xff] %vm1974_vm0, %v2236_v23  ;;  %2246 = vst [vmem:[#allocation2 + $0xa0] sm:$0xff] %v2245_v24  ;;  %v2264_v31 = vrot.slane %v2263_v29, 4 }
 0x13a   : > { %v2273_v32 = vrot.slane %v2272_v30, 4  ;;  %v2277_v33 = vld [vmem:[#allocation0 + $0x11f] ss:$-1 sm:$0xff]  ;;  %v2286_v34 = vld [vmem:[#allocation0 + $0x107] ss:$-1 sm:$0xff]  ;;  %2254 = vst.msk [vmem:[#allocation2 + $0xa0] sm:$0xff] %vm1974_vm0, %v2250_v27 }
 0x13b   : > { %2260 = vst [vmem:[#allocation2 + $0xa8] sm:$0xff] %v2259_v28  ;;  %v2278_v35 = vrot.slane %v2277_v33, 4  ;;  %v2287_v36 = vrot.slane %v2286_v34, 4  ;;  %v2291_v37 = vld [vmem:[#allocation0 + $0x10f] ss:$-1 sm:$0xff] }
 0x13c   : > { %v2300_v38 = vld [vmem:[#allocation0 + $0x1f7] ss:$-1 sm:$0xff]  ;;  %2268 = vst.msk [vmem:[#allocation2 + $0xa8] sm:$0xff] %vm1974_vm0, %v2264_v31  ;;  %2274 = vst [vmem:[#allocation2 + $0xb0] sm:$0xff] %v2273_v32  ;;  %v2292_v39 = vrot.slane %v2291_v37, 4 }
 0x13d   : > { %v2301_v40 = vrot.slane %v2300_v38, 4  ;;  %v2305_v41 = vld [vmem:[#allocation0 + $0x1ff] ss:$-1 sm:$0xff]  ;;  %v2314_v42 = vld [vmem:[#allocation0 + $0x1e7] ss:$-1 sm:$0xff]  ;;  %2282 = vst.msk [vmem:[#allocation2 + $0xb0] sm:$0xff] %vm1974_vm0, %v2278_v35 }
 0x13e   : > { %2288 = vst [vmem:[#allocation2 + $0xb8] sm:$0xff] %v2287_v36  ;;  %v2306_v43 = vrot.slane %v2305_v41, 4  ;;  %v2315_v44 = vrot.slane %v2314_v42, 4  ;;  %v2319_v45 = vld [vmem:[#allocation0 + $0x1ef] ss:$-1 sm:$0xff] }
 0x13f   : > { %v2328_v46 = vld [vmem:[#allocation0 + $0x1d7] ss:$-1 sm:$0xff]  ;;  %2296 = vst.msk [vmem:[#allocation2 + $0xb8] sm:$0xff] %vm1974_vm0, %v2292_v39  ;;  %2302 = vst [vmem:[#allocation2 + $0xc0] sm:$0xff] %v2301_v40  ;;  %v2320_v47 = vrot.slane %v2319_v45, 4 }
 0x140   : > { %v2329_v48 = vrot.slane %v2328_v46, 4  ;;  %v2333_v49 = vld [vmem:[#allocation0 + $0x1df] ss:$-1 sm:$0xff]  ;;  %v2342_v50 = vld [vmem:[#allocation0 + $0x1c7] ss:$-1 sm:$0xff]  ;;  %2310 = vst.msk [vmem:[#allocation2 + $0xc0] sm:$0xff] %vm1974_vm0, %v2306_v43 }
 0x141   : > { %2316 = vst [vmem:[#allocation2 + $0xc8] sm:$0xff] %v2315_v44  ;;  %v2334_v51 = vrot.slane %v2333_v49, 4  ;;  %v2343_v52 = vrot.slane %v2342_v50, 4  ;;  %v2347_v53 = vld [vmem:[#allocation0 + $0x1cf] ss:$-1 sm:$0xff] }
 0x142   : > { %v2356_v54 = vld [vmem:[#allocation0 + $0x1b7] ss:$-1 sm:$0xff]  ;;  %2324 = vst.msk [vmem:[#allocation2 + $0xc8] sm:$0xff] %vm1974_vm0, %v2320_v47  ;;  %2330 = vst [vmem:[#allocation2 + $0xd0] sm:$0xff] %v2329_v48  ;;  %v2348_v55 = vrot.slane %v2347_v53, 4 }
 0x143   : > { %v2357_v56 = vrot.slane %v2356_v54, 4  ;;  %v2361_v57 = vld [vmem:[#allocation0 + $0x1bf] ss:$-1 sm:$0xff]  ;;  %v2370_v58 = vld [vmem:[#allocation0 + $0x1a7] ss:$-1 sm:$0xff]  ;;  %2338 = vst.msk [vmem:[#allocation2 + $0xd0] sm:$0xff] %vm1974_vm0, %v2334_v51 }
 0x144   : > { %2344 = vst [vmem:[#allocation2 + $0xd8] sm:$0xff] %v2343_v52  ;;  %v2362_v59 = vrot.slane %v2361_v57, 4  ;;  %v2371_v60 = vrot.slane %v2370_v58, 4  ;;  %v2375_v61 = vld [vmem:[#allocation0 + $0x1af] ss:$-1 sm:$0xff] }
 0x145   : > { %v2384_v62 = vld [vmem:[#allocation0 + $0x197] ss:$-1 sm:$0xff]  ;;  %2352 = vst.msk [vmem:[#allocation2 + $0xd8] sm:$0xff] %vm1974_vm0, %v2348_v55  ;;  %2358 = vst [vmem:[#allocation2 + $0xe0] sm:$0xff] %v2357_v56  ;;  %v2376_v63 = vrot.slane %v2375_v61, 4 }
 0x146   : > { %v2385_v0 = vrot.slane %v2384_v62, 4  ;;  %v2389_v2 = vld [vmem:[#allocation0 + $0x19f] ss:$-1 sm:$0xff]  ;;  %v2398_v3 = vld [vmem:[#allocation0 + $0x187] ss:$-1 sm:$0xff]  ;;  %2366 = vst.msk [vmem:[#allocation2 + $0xe0] sm:$0xff] %vm1974_vm0, %v2362_v59 }
 0x147   : > { %2372 = vst [vmem:[#allocation2 + $0xe8] sm:$0xff] %v2371_v60  ;;  %v2390_v4 = vrot.slane %v2389_v2, 4  ;;  %v2399_v5 = vrot.slane %v2398_v3, 4  ;;  %v2403_v6 = vld [vmem:[#allocation0 + $0x18f] ss:$-1 sm:$0xff] }
 0x148   : > { %v2412_v7 = vld [vmem:[#allocation0 + $0x277] ss:$-1 sm:$0xff]  ;;  %2380 = vst.msk [vmem:[#allocation2 + $0xe8] sm:$0xff] %vm1974_vm0, %v2376_v63  ;;  %2386 = vst [vmem:[#allocation2 + $0xf0] sm:$0xff] %v2385_v0  ;;  %v2404_v8 = vrot.slane %v2403_v6, 4 }
 0x149   : > { %v2413_v9 = vrot.slane %v2412_v7, 4  ;;  %v2417_v10 = vld [vmem:[#allocation0 + $0x27f] ss:$-1 sm:$0xff]  ;;  %v2426_v11 = vld [vmem:[#allocation0 + $0x267] ss:$-1 sm:$0xff]  ;;  %2394 = vst.msk [vmem:[#allocation2 + $0xf0] sm:$0xff] %vm1974_vm0, %v2390_v4 }
 0x14a   : > { %2400 = vst [vmem:[#allocation2 + $0xf8] sm:$0xff] %v2399_v5  ;;  %v2418_v12 = vrot.slane %v2417_v10, 4  ;;  %v2427_v13 = vrot.slane %v2426_v11, 4  ;;  %v2431_v14 = vld [vmem:[#allocation0 + $0x26f] ss:$-1 sm:$0xff] }
 0x14b   : > { %v2440_v15 = vld [vmem:[#allocation0 + $0x257] ss:$-1 sm:$0xff]  ;;  %2408 = vst.msk [vmem:[#allocation2 + $0xf8] sm:$0xff] %vm1974_vm0, %v2404_v8  ;;  %2414 = vst [vmem:[#allocation2 + $0x100] sm:$0xff] %v2413_v9  ;;  %v2432_v16 = vrot.slane %v2431_v14, 4 }
 0x14c   : > { %v2441_v17 = vrot.slane %v2440_v15, 4  ;;  %v2445_v18 = vld [vmem:[#allocation0 + $0x25f] ss:$-1 sm:$0xff]  ;;  %v2454_v19 = vld [vmem:[#allocation0 + $0x247] ss:$-1 sm:$0xff]  ;;  %2422 = vst.msk [vmem:[#allocation2 + $0x100] sm:$0xff] %vm1974_vm0, %v2418_v12 }
 0x14d   : > { %2428 = vst [vmem:[#allocation2 + $0x108] sm:$0xff] %v2427_v13  ;;  %v2446_v20 = vrot.slane %v2445_v18, 4  ;;  %v2455_v21 = vrot.slane %v2454_v19, 4  ;;  %v2459_v22 = vld [vmem:[#allocation0 + $0x24f] ss:$-1 sm:$0xff] }
 0x14e   : > { %v2468_v23 = vld [vmem:[#allocation0 + $0x237] ss:$-1 sm:$0xff]  ;;  %2436 = vst.msk [vmem:[#allocation2 + $0x108] sm:$0xff] %vm1974_vm0, %v2432_v16  ;;  %2442 = vst [vmem:[#allocation2 + $0x110] sm:$0xff] %v2441_v17  ;;  %v2460_v24 = vrot.slane %v2459_v22, 4 }
 0x14f   : > { %v2469_v25 = vrot.slane %v2468_v23, 4  ;;  %v2473_v26 = vld [vmem:[#allocation0 + $0x23f] ss:$-1 sm:$0xff]  ;;  %v2482_v27 = vld [vmem:[#allocation0 + $0x227] ss:$-1 sm:$0xff]  ;;  %2450 = vst.msk [vmem:[#allocation2 + $0x110] sm:$0xff] %vm1974_vm0, %v2446_v20 }
 0x150   : > { %2456 = vst [vmem:[#allocation2 + $0x118] sm:$0xff] %v2455_v21  ;;  %v2474_v28 = vrot.slane %v2473_v26, 4  ;;  %v2483_v29 = vrot.slane %v2482_v27, 4  ;;  %v2487_v30 = vld [vmem:[#allocation0 + $0x22f] ss:$-1 sm:$0xff] }
 0x151   : > { %v2496_v31 = vld [vmem:[#allocation0 + $0x217] ss:$-1 sm:$0xff]  ;;  %2464 = vst.msk [vmem:[#allocation2 + $0x118] sm:$0xff] %vm1974_vm0, %v2460_v24  ;;  %2470 = vst [vmem:[#allocation2 + $0x120] sm:$0xff] %v2469_v25  ;;  %v2488_v32 = vrot.slane %v2487_v30, 4 }
 0x152   : > { %v2497_v33 = vrot.slane %v2496_v31, 4  ;;  %v2501_v34 = vld [vmem:[#allocation0 + $0x21f] ss:$-1 sm:$0xff]  ;;  %v2510_v35 = vld [vmem:[#allocation0 + $0x207] ss:$-1 sm:$0xff]  ;;  %2478 = vst.msk [vmem:[#allocation2 + $0x120] sm:$0xff] %vm1974_vm0, %v2474_v28 }
 0x153   : > { %2484 = vst [vmem:[#allocation2 + $0x128] sm:$0xff] %v2483_v29  ;;  %v2502_v36 = vrot.slane %v2501_v34, 4  ;;  %v2511_v37 = vrot.slane %v2510_v35, 4  ;;  %v2515_v38 = vld [vmem:[#allocation0 + $0x20f] ss:$-1 sm:$0xff] }
 0x154   : > { %v2524_v39 = vld [vmem:[#allocation0 + $0x2f7] ss:$-1 sm:$0xff]  ;;  %2492 = vst.msk [vmem:[#allocation2 + $0x128] sm:$0xff] %vm1974_vm0, %v2488_v32  ;;  %2498 = vst [vmem:[#allocation2 + $0x130] sm:$0xff] %v2497_v33  ;;  %v2516_v40 = vrot.slane %v2515_v38, 4 }
 0x155   : > { %v2525_v41 = vrot.slane %v2524_v39, 4  ;;  %v2529_v42 = vld [vmem:[#allocation0 + $0x2ff] ss:$-1 sm:$0xff]  ;;  %v2538_v43 = vld [vmem:[#allocation0 + $0x2e7] ss:$-1 sm:$0xff]  ;;  %2506 = vst.msk [vmem:[#allocation2 + $0x130] sm:$0xff] %vm1974_vm0, %v2502_v36 }
 0x156   : > { %2512 = vst [vmem:[#allocation2 + $0x138] sm:$0xff] %v2511_v37  ;;  %v2530_v44 = vrot.slane %v2529_v42, 4  ;;  %v2539_v45 = vrot.slane %v2538_v43, 4  ;;  %v2543_v46 = vld [vmem:[#allocation0 + $0x2ef] ss:$-1 sm:$0xff] }
 0x157   : > { %v2552_v47 = vld [vmem:[#allocation0 + $0x2d7] ss:$-1 sm:$0xff]  ;;  %2520 = vst.msk [vmem:[#allocation2 + $0x138] sm:$0xff] %vm1974_vm0, %v2516_v40  ;;  %2526 = vst [vmem:[#allocation2 + $0x140] sm:$0xff] %v2525_v41  ;;  %v2544_v48 = vrot.slane %v2543_v46, 4 }
 0x158   : > { %v2553_v49 = vrot.slane %v2552_v47, 4  ;;  %v2557_v50 = vld [vmem:[#allocation0 + $0x2df] ss:$-1 sm:$0xff]  ;;  %v2566_v51 = vld [vmem:[#allocation0 + $0x2c7] ss:$-1 sm:$0xff]  ;;  %2534 = vst.msk [vmem:[#allocation2 + $0x140] sm:$0xff] %vm1974_vm0, %v2530_v44 }
 0x159   : > { %2540 = vst [vmem:[#allocation2 + $0x148] sm:$0xff] %v2539_v45  ;;  %v2558_v52 = vrot.slane %v2557_v50, 4  ;;  %v2567_v53 = vrot.slane %v2566_v51, 4  ;;  %v2571_v54 = vld [vmem:[#allocation0 + $0x2cf] ss:$-1 sm:$0xff] }
 0x15a   : > { %v2580_v55 = vld [vmem:[#allocation0 + $0x2b7] ss:$-1 sm:$0xff]  ;;  %2548 = vst.msk [vmem:[#allocation2 + $0x148] sm:$0xff] %vm1974_vm0, %v2544_v48  ;;  %2554 = vst [vmem:[#allocation2 + $0x150] sm:$0xff] %v2553_v49  ;;  %v2572_v56 = vrot.slane %v2571_v54, 4 }
 0x15b   : > { %v2581_v57 = vrot.slane %v2580_v55, 4  ;;  %v2585_v58 = vld [vmem:[#allocation0 + $0x2bf] ss:$-1 sm:$0xff]  ;;  %v2594_v59 = vld [vmem:[#allocation0 + $0x2a7] ss:$-1 sm:$0xff]  ;;  %2562 = vst.msk [vmem:[#allocation2 + $0x150] sm:$0xff] %vm1974_vm0, %v2558_v52 }
 0x15c   : > { %2568 = vst [vmem:[#allocation2 + $0x158] sm:$0xff] %v2567_v53  ;;  %v2586_v60 = vrot.slane %v2585_v58, 4  ;;  %v2595_v61 = vrot.slane %v2594_v59, 4  ;;  %v2599_v62 = vld [vmem:[#allocation0 + $0x2af] ss:$-1 sm:$0xff] }
 0x15d   : > { %v2608_v63 = vld [vmem:[#allocation0 + $0x297] ss:$-1 sm:$0xff]  ;;  %2576 = vst.msk [vmem:[#allocation2 + $0x158] sm:$0xff] %vm1974_vm0, %v2572_v56  ;;  %2582 = vst [vmem:[#allocation2 + $0x160] sm:$0xff] %v2581_v57  ;;  %v2600_v0 = vrot.slane %v2599_v62, 4 }
 0x15e   : > { %v2609_v2 = vrot.slane %v2608_v63, 4  ;;  %v2613_v3 = vld [vmem:[#allocation0 + $0x29f] ss:$-1 sm:$0xff]  ;;  %v2622_v4 = vld [vmem:[#allocation0 + $0x287] ss:$-1 sm:$0xff]  ;;  %2590 = vst.msk [vmem:[#allocation2 + $0x160] sm:$0xff] %vm1974_vm0, %v2586_v60 }
 0x15f   : > { %2596 = vst [vmem:[#allocation2 + $0x168] sm:$0xff] %v2595_v61  ;;  %v2614_v5 = vrot.slane %v2613_v3, 4  ;;  %v2623_v6 = vrot.slane %v2622_v4, 4  ;;  %v2627_v7 = vld [vmem:[#allocation0 + $0x28f] ss:$-1 sm:$0xff] }
 0x160   : > { %v2636_v8 = vld [vmem:[#allocation0 + $0x377] ss:$-1 sm:$0xff]  ;;  %2604 = vst.msk [vmem:[#allocation2 + $0x168] sm:$0xff] %vm1974_vm0, %v2600_v0  ;;  %2610 = vst [vmem:[#allocation2 + $0x170] sm:$0xff] %v2609_v2  ;;  %v2628_v9 = vrot.slane %v2627_v7, 4 }
 0x161   : > { %v2637_v10 = vrot.slane %v2636_v8, 4  ;;  %v2641_v11 = vld [vmem:[#allocation0 + $0x37f] ss:$-1 sm:$0xff]  ;;  %v2650_v12 = vld [vmem:[#allocation0 + $0x367] ss:$-1 sm:$0xff]  ;;  %2618 = vst.msk [vmem:[#allocation2 + $0x170] sm:$0xff] %vm1974_vm0, %v2614_v5 }
 0x162   : > { %2624 = vst [vmem:[#allocation2 + $0x178] sm:$0xff] %v2623_v6  ;;  %v2642_v13 = vrot.slane %v2641_v11, 4  ;;  %v2651_v14 = vrot.slane %v2650_v12, 4  ;;  %v2655_v15 = vld [vmem:[#allocation0 + $0x36f] ss:$-1 sm:$0xff] }
 0x163   : > { %v2664_v16 = vld [vmem:[#allocation0 + $0x357] ss:$-1 sm:$0xff]  ;;  %2632 = vst.msk [vmem:[#allocation2 + $0x178] sm:$0xff] %vm1974_vm0, %v2628_v9  ;;  %2638 = vst [vmem:[#allocation2 + $0x180] sm:$0xff] %v2637_v10  ;;  %v2656_v17 = vrot.slane %v2655_v15, 4 }
 0x164   : > { %v2665_v18 = vrot.slane %v2664_v16, 4  ;;  %v2669_v19 = vld [vmem:[#allocation0 + $0x35f] ss:$-1 sm:$0xff]  ;;  %v2678_v20 = vld [vmem:[#allocation0 + $0x347] ss:$-1 sm:$0xff]  ;;  %2646 = vst.msk [vmem:[#allocation2 + $0x180] sm:$0xff] %vm1974_vm0, %v2642_v13 }
 0x165   : > { %2652 = vst [vmem:[#allocation2 + $0x188] sm:$0xff] %v2651_v14  ;;  %v2670_v21 = vrot.slane %v2669_v19, 4  ;;  %v2679_v22 = vrot.slane %v2678_v20, 4  ;;  %v2683_v23 = vld [vmem:[#allocation0 + $0x34f] ss:$-1 sm:$0xff] }
 0x166   : > { %v2692_v24 = vld [vmem:[#allocation0 + $0x337] ss:$-1 sm:$0xff]  ;;  %2660 = vst.msk [vmem:[#allocation2 + $0x188] sm:$0xff] %vm1974_vm0, %v2656_v17  ;;  %2666 = vst [vmem:[#allocation2 + $0x190] sm:$0xff] %v2665_v18  ;;  %v2684_v25 = vrot.slane %v2683_v23, 4 }
 0x167   : > { %v2693_v26 = vrot.slane %v2692_v24, 4  ;;  %v2697_v27 = vld [vmem:[#allocation0 + $0x33f] ss:$-1 sm:$0xff]  ;;  %v2706_v28 = vld [vmem:[#allocation0 + $0x327] ss:$-1 sm:$0xff]  ;;  %2674 = vst.msk [vmem:[#allocation2 + $0x190] sm:$0xff] %vm1974_vm0, %v2670_v21 }
 0x168   : > { %2680 = vst [vmem:[#allocation2 + $0x198] sm:$0xff] %v2679_v22  ;;  %v2698_v29 = vrot.slane %v2697_v27, 4  ;;  %v2707_v30 = vrot.slane %v2706_v28, 4  ;;  %v2711_v31 = vld [vmem:[#allocation0 + $0x32f] ss:$-1 sm:$0xff] }
 0x169   : > { %v2720_v32 = vld [vmem:[#allocation0 + $0x317] ss:$-1 sm:$0xff]  ;;  %2688 = vst.msk [vmem:[#allocation2 + $0x198] sm:$0xff] %vm1974_vm0, %v2684_v25  ;;  %2694 = vst [vmem:[#allocation2 + $0x1a0] sm:$0xff] %v2693_v26  ;;  %v2712_v33 = vrot.slane %v2711_v31, 4 }
 0x16a   : > { %v2721_v34 = vrot.slane %v2720_v32, 4  ;;  %v2725_v35 = vld [vmem:[#allocation0 + $0x31f] ss:$-1 sm:$0xff]  ;;  %v2734_v36 = vld [vmem:[#allocation0 + $0x307] ss:$-1 sm:$0xff]  ;;  %2702 = vst.msk [vmem:[#allocation2 + $0x1a0] sm:$0xff] %vm1974_vm0, %v2698_v29 }
 0x16b   : > { %2708 = vst [vmem:[#allocation2 + $0x1a8] sm:$0xff] %v2707_v30  ;;  %v2726_v37 = vrot.slane %v2725_v35, 4  ;;  %v2735_v38 = vrot.slane %v2734_v36, 4  ;;  %v2739_v39 = vld [vmem:[#allocation0 + $0x30f] ss:$-1 sm:$0xff] }
 0x16c   : > { %v2748_v40 = vld [vmem:[#allocation0 + $0x3f7] ss:$-1 sm:$0xff]  ;;  %2716 = vst.msk [vmem:[#allocation2 + $0x1a8] sm:$0xff] %vm1974_vm0, %v2712_v33  ;;  %2722 = vst [vmem:[#allocation2 + $0x1b0] sm:$0xff] %v2721_v34  ;;  %v2740_v41 = vrot.slane %v2739_v39, 4 }
 0x16d   : > { %v2749_v42 = vrot.slane %v2748_v40, 4  ;;  %v2753_v43 = vld [vmem:[#allocation0 + $0x3ff] ss:$-1 sm:$0xff]  ;;  %v2762_v44 = vld [vmem:[#allocation0 + $0x3e7] ss:$-1 sm:$0xff]  ;;  %2730 = vst.msk [vmem:[#allocation2 + $0x1b0] sm:$0xff] %vm1974_vm0, %v2726_v37 }
 0x16e   : > { %2736 = vst [vmem:[#allocation2 + $0x1b8] sm:$0xff] %v2735_v38  ;;  %v2754_v45 = vrot.slane %v2753_v43, 4  ;;  %v2763_v46 = vrot.slane %v2762_v44, 4  ;;  %v2767_v47 = vld [vmem:[#allocation0 + $0x3ef] ss:$-1 sm:$0xff] }
 0x16f   : > { %v2776_v48 = vld [vmem:[#allocation0 + $0x3d7] ss:$-1 sm:$0xff]  ;;  %2744 = vst.msk [vmem:[#allocation2 + $0x1b8] sm:$0xff] %vm1974_vm0, %v2740_v41  ;;  %2750 = vst [vmem:[#allocation2 + $0x1c0] sm:$0xff] %v2749_v42  ;;  %v2768_v49 = vrot.slane %v2767_v47, 4 }
 0x170   : > { %v2777_v50 = vrot.slane %v2776_v48, 4  ;;  %v2781_v51 = vld [vmem:[#allocation0 + $0x3df] ss:$-1 sm:$0xff]  ;;  %v2790_v52 = vld [vmem:[#allocation0 + $0x3c7] ss:$-1 sm:$0xff]  ;;  %2758 = vst.msk [vmem:[#allocation2 + $0x1c0] sm:$0xff] %vm1974_vm0, %v2754_v45 }
 0x171   : > { %2764 = vst [vmem:[#allocation2 + $0x1c8] sm:$0xff] %v2763_v46  ;;  %v2782_v53 = vrot.slane %v2781_v51, 4  ;;  %v2791_v54 = vrot.slane %v2790_v52, 4  ;;  %v2795_v55 = vld [vmem:[#allocation0 + $0x3cf] ss:$-1 sm:$0xff] }
 0x172   : > { %v2804_v56 = vld [vmem:[#allocation0 + $0x3b7] ss:$-1 sm:$0xff]  ;;  %2772 = vst.msk [vmem:[#allocation2 + $0x1c8] sm:$0xff] %vm1974_vm0, %v2768_v49  ;;  %2778 = vst [vmem:[#allocation2 + $0x1d0] sm:$0xff] %v2777_v50  ;;  %v2796_v57 = vrot.slane %v2795_v55, 4 }
 0x173   : > { %v2805_v58 = vrot.slane %v2804_v56, 4  ;;  %v2809_v59 = vld [vmem:[#allocation0 + $0x3bf] ss:$-1 sm:$0xff]  ;;  %v2818_v60 = vld [vmem:[#allocation0 + $0x3a7] ss:$-1 sm:$0xff]  ;;  %2786 = vst.msk [vmem:[#allocation2 + $0x1d0] sm:$0xff] %vm1974_vm0, %v2782_v53 }
 0x174   : > { %2792 = vst [vmem:[#allocation2 + $0x1d8] sm:$0xff] %v2791_v54  ;;  %v2810_v61 = vrot.slane %v2809_v59, 4  ;;  %v2819_v62 = vrot.slane %v2818_v60, 4  ;;  %v2823_v63 = vld [vmem:[#allocation0 + $0x3af] ss:$-1 sm:$0xff] }
 0x175   : > { %v2832_v0 = vld [vmem:[#allocation0 + $0x397] ss:$-1 sm:$0xff]  ;;  %2800 = vst.msk [vmem:[#allocation2 + $0x1d8] sm:$0xff] %vm1974_vm0, %v2796_v57  ;;  %2806 = vst [vmem:[#allocation2 + $0x1e0] sm:$0xff] %v2805_v58  ;;  %v2824_v2 = vrot.slane %v2823_v63, 4 }
 0x176   : > { %v2833_v3 = vrot.slane %v2832_v0, 4  ;;  %v2837_v4 = vld [vmem:[#allocation0 + $0x39f] ss:$-1 sm:$0xff]  ;;  %v2846_v5 = vld [vmem:[#allocation0 + $0x387] ss:$-1 sm:$0xff]  ;;  %2814 = vst.msk [vmem:[#allocation2 + $0x1e0] sm:$0xff] %vm1974_vm0, %v2810_v61 }
 0x177   : > { %2820 = vst [vmem:[#allocation2 + $0x1e8] sm:$0xff] %v2819_v62  ;;  %v2838_v6 = vrot.slane %v2837_v4, 4  ;;  %v2847_v7 = vrot.slane %v2846_v5, 4  ;;  %v2851_v8 = vld [vmem:[#allocation0 + $0x38f] ss:$-1 sm:$0xff] }
 0x178   : > { %v2860_v9 = vld [vmem:[#allocation0 + $0x477] ss:$-1 sm:$0xff]  ;;  %2828 = vst.msk [vmem:[#allocation2 + $0x1e8] sm:$0xff] %vm1974_vm0, %v2824_v2  ;;  %2834 = vst [vmem:[#allocation2 + $0x1f0] sm:$0xff] %v2833_v3  ;;  %v2852_v10 = vrot.slane %v2851_v8, 4 }
 0x179   : > { %v2861_v11 = vrot.slane %v2860_v9, 4  ;;  %v2865_v12 = vld [vmem:[#allocation0 + $0x47f] ss:$-1 sm:$0xff]  ;;  %v2874_v13 = vld [vmem:[#allocation0 + $0x467] ss:$-1 sm:$0xff]  ;;  %2842 = vst.msk [vmem:[#allocation2 + $0x1f0] sm:$0xff] %vm1974_vm0, %v2838_v6 }
 0x17a   : > { %2848 = vst [vmem:[#allocation2 + $0x1f8] sm:$0xff] %v2847_v7  ;;  %v2866_v14 = vrot.slane %v2865_v12, 4  ;;  %v2875_v15 = vrot.slane %v2874_v13, 4  ;;  %v2879_v16 = vld [vmem:[#allocation0 + $0x46f] ss:$-1 sm:$0xff] }
 0x17b   : > { %v2888_v17 = vld [vmem:[#allocation0 + $0x457] ss:$-1 sm:$0xff]  ;;  %2856 = vst.msk [vmem:[#allocation2 + $0x1f8] sm:$0xff] %vm1974_vm0, %v2852_v10  ;;  %2862 = vst [vmem:[#allocation2 + $0x200] sm:$0xff] %v2861_v11  ;;  %v2880_v18 = vrot.slane %v2879_v16, 4 }
 0x17c   : > { %v2889_v19 = vrot.slane %v2888_v17, 4  ;;  %v2893_v20 = vld [vmem:[#allocation0 + $0x45f] ss:$-1 sm:$0xff]  ;;  %v2902_v21 = vld [vmem:[#allocation0 + $0x447] ss:$-1 sm:$0xff]  ;;  %2870 = vst.msk [vmem:[#allocation2 + $0x200] sm:$0xff] %vm1974_vm0, %v2866_v14 }
 0x17d   : > { %2876 = vst [vmem:[#allocation2 + $0x208] sm:$0xff] %v2875_v15  ;;  %v2894_v22 = vrot.slane %v2893_v20, 4  ;;  %v2903_v23 = vrot.slane %v2902_v21, 4  ;;  %v2907_v24 = vld [vmem:[#allocation0 + $0x44f] ss:$-1 sm:$0xff] }
 0x17e   : > { %v2916_v25 = vld [vmem:[#allocation0 + $0x437] ss:$-1 sm:$0xff]  ;;  %2884 = vst.msk [vmem:[#allocation2 + $0x208] sm:$0xff] %vm1974_vm0, %v2880_v18  ;;  %2890 = vst [vmem:[#allocation2 + $0x210] sm:$0xff] %v2889_v19  ;;  %v2908_v26 = vrot.slane %v2907_v24, 4 }
 0x17f   : > { %v2917_v27 = vrot.slane %v2916_v25, 4  ;;  %v2921_v28 = vld [vmem:[#allocation0 + $0x43f] ss:$-1 sm:$0xff]  ;;  %v2930_v29 = vld [vmem:[#allocation0 + $0x427] ss:$-1 sm:$0xff]  ;;  %2898 = vst.msk [vmem:[#allocation2 + $0x210] sm:$0xff] %vm1974_vm0, %v2894_v22 }
 0x180   : > { %2904 = vst [vmem:[#allocation2 + $0x218] sm:$0xff] %v2903_v23  ;;  %v2922_v30 = vrot.slane %v2921_v28, 4  ;;  %v2931_v31 = vrot.slane %v2930_v29, 4  ;;  %v2935_v32 = vld [vmem:[#allocation0 + $0x42f] ss:$-1 sm:$0xff] }
 0x181   : > { %v2944_v33 = vld [vmem:[#allocation0 + $0x417] ss:$-1 sm:$0xff]  ;;  %2912 = vst.msk [vmem:[#allocation2 + $0x218] sm:$0xff] %vm1974_vm0, %v2908_v26  ;;  %2918 = vst [vmem:[#allocation2 + $0x220] sm:$0xff] %v2917_v27  ;;  %v2936_v34 = vrot.slane %v2935_v32, 4 }
 0x182   : > { %v2945_v35 = vrot.slane %v2944_v33, 4  ;;  %v2949_v36 = vld [vmem:[#allocation0 + $0x41f] ss:$-1 sm:$0xff]  ;;  %v2958_v37 = vld [vmem:[#allocation0 + $0x407] ss:$-1 sm:$0xff]  ;;  %2926 = vst.msk [vmem:[#allocation2 + $0x220] sm:$0xff] %vm1974_vm0, %v2922_v30 }
 0x183   : > { %2932 = vst [vmem:[#allocation2 + $0x228] sm:$0xff] %v2931_v31  ;;  %v2950_v38 = vrot.slane %v2949_v36, 4  ;;  %v2959_v39 = vrot.slane %v2958_v37, 4  ;;  %v2963_v40 = vld [vmem:[#allocation0 + $0x40f] ss:$-1 sm:$0xff] }
 0x184   : > { %v2972_v41 = vld [vmem:[#allocation0 + $0x4f7] ss:$-1 sm:$0xff]  ;;  %2940 = vst.msk [vmem:[#allocation2 + $0x228] sm:$0xff] %vm1974_vm0, %v2936_v34  ;;  %2946 = vst [vmem:[#allocation2 + $0x230] sm:$0xff] %v2945_v35  ;;  %v2964_v42 = vrot.slane %v2963_v40, 4 }
 0x185   : > { %v2973_v43 = vrot.slane %v2972_v41, 4  ;;  %v2977_v44 = vld [vmem:[#allocation0 + $0x4ff] ss:$-1 sm:$0xff]  ;;  %v2986_v45 = vld [vmem:[#allocation0 + $0x4e7] ss:$-1 sm:$0xff]  ;;  %2954 = vst.msk [vmem:[#allocation2 + $0x230] sm:$0xff] %vm1974_vm0, %v2950_v38 }
 0x186   : > { %2960 = vst [vmem:[#allocation2 + $0x238] sm:$0xff] %v2959_v39  ;;  %v2978_v46 = vrot.slane %v2977_v44, 4  ;;  %v2987_v47 = vrot.slane %v2986_v45, 4  ;;  %v2991_v48 = vld [vmem:[#allocation0 + $0x4ef] ss:$-1 sm:$0xff] }
 0x187   : > { %v3000_v49 = vld [vmem:[#allocation0 + $0x4d7] ss:$-1 sm:$0xff]  ;;  %2968 = vst.msk [vmem:[#allocation2 + $0x238] sm:$0xff] %vm1974_vm0, %v2964_v42  ;;  %2974 = vst [vmem:[#allocation2 + $0x240] sm:$0xff] %v2973_v43  ;;  %v2992_v50 = vrot.slane %v2991_v48, 4 }
 0x188   : > { %v3001_v51 = vrot.slane %v3000_v49, 4  ;;  %v3005_v52 = vld [vmem:[#allocation0 + $0x4df] ss:$-1 sm:$0xff]  ;;  %v3014_v53 = vld [vmem:[#allocation0 + $0x4c7] ss:$-1 sm:$0xff]  ;;  %2982 = vst.msk [vmem:[#allocation2 + $0x240] sm:$0xff] %vm1974_vm0, %v2978_v46 }
 0x189   : > { %2988 = vst [vmem:[#allocation2 + $0x248] sm:$0xff] %v2987_v47  ;;  %v3006_v54 = vrot.slane %v3005_v52, 4  ;;  %v3015_v55 = vrot.slane %v3014_v53, 4  ;;  %v3019_v56 = vld [vmem:[#allocation0 + $0x4cf] ss:$-1 sm:$0xff] }
 0x18a   : > { %v3028_v57 = vld [vmem:[#allocation0 + $0x4b7] ss:$-1 sm:$0xff]  ;;  %2996 = vst.msk [vmem:[#allocation2 + $0x248] sm:$0xff] %vm1974_vm0, %v2992_v50  ;;  %3002 = vst [vmem:[#allocation2 + $0x250] sm:$0xff] %v3001_v51  ;;  %v3020_v58 = vrot.slane %v3019_v56, 4 }
 0x18b   : > { %v3029_v59 = vrot.slane %v3028_v57, 4  ;;  %v3033_v60 = vld [vmem:[#allocation0 + $0x4bf] ss:$-1 sm:$0xff]  ;;  %v3042_v61 = vld [vmem:[#allocation0 + $0x4a7] ss:$-1 sm:$0xff]  ;;  %3010 = vst.msk [vmem:[#allocation2 + $0x250] sm:$0xff] %vm1974_vm0, %v3006_v54 }
 0x18c   : > { %3016 = vst [vmem:[#allocation2 + $0x258] sm:$0xff] %v3015_v55  ;;  %v3034_v62 = vrot.slane %v3033_v60, 4  ;;  %v3043_v63 = vrot.slane %v3042_v61, 4  ;;  %v3047_v0 = vld [vmem:[#allocation0 + $0x4af] ss:$-1 sm:$0xff] }
 0x18d   : > { %v3056_v2 = vld [vmem:[#allocation0 + $0x497] ss:$-1 sm:$0xff]  ;;  %3024 = vst.msk [vmem:[#allocation2 + $0x258] sm:$0xff] %vm1974_vm0, %v3020_v58  ;;  %3030 = vst [vmem:[#allocation2 + $0x260] sm:$0xff] %v3029_v59  ;;  %v3048_v3 = vrot.slane %v3047_v0, 4 }
 0x18e   : > { %v3057_v4 = vrot.slane %v3056_v2, 4  ;;  %v3061_v5 = vld [vmem:[#allocation0 + $0x49f] ss:$-1 sm:$0xff]  ;;  %v3070_v6 = vld [vmem:[#allocation0 + $0x487] ss:$-1 sm:$0xff]  ;;  %3038 = vst.msk [vmem:[#allocation2 + $0x260] sm:$0xff] %vm1974_vm0, %v3034_v62 }
 0x18f   : > { %3044 = vst [vmem:[#allocation2 + $0x268] sm:$0xff] %v3043_v63  ;;  %v3062_v7 = vrot.slane %v3061_v5, 4  ;;  %v3071_v8 = vrot.slane %v3070_v6, 4  ;;  %v3075_v9 = vld [vmem:[#allocation0 + $0x48f] ss:$-1 sm:$0xff] }
 0x190   : > { %v3084_v10 = vld [vmem:[#allocation0 + $0x577] ss:$-1 sm:$0xff]  ;;  %3052 = vst.msk [vmem:[#allocation2 + $0x268] sm:$0xff] %vm1974_vm0, %v3048_v3  ;;  %3058 = vst [vmem:[#allocation2 + $0x270] sm:$0xff] %v3057_v4  ;;  %v3076_v11 = vrot.slane %v3075_v9, 4 }
 0x191   : > { %v3085_v12 = vrot.slane %v3084_v10, 4  ;;  %v3089_v13 = vld [vmem:[#allocation0 + $0x57f] ss:$-1 sm:$0xff]  ;;  %v3098_v14 = vld [vmem:[#allocation0 + $0x567] ss:$-1 sm:$0xff]  ;;  %3066 = vst.msk [vmem:[#allocation2 + $0x270] sm:$0xff] %vm1974_vm0, %v3062_v7 }
 0x192   : > { %3072 = vst [vmem:[#allocation2 + $0x278] sm:$0xff] %v3071_v8  ;;  %v3090_v15 = vrot.slane %v3089_v13, 4  ;;  %v3099_v16 = vrot.slane %v3098_v14, 4  ;;  %v3103_v17 = vld [vmem:[#allocation0 + $0x56f] ss:$-1 sm:$0xff] }
 0x193   : > { %v3112_v18 = vld [vmem:[#allocation0 + $0x557] ss:$-1 sm:$0xff]  ;;  %3080 = vst.msk [vmem:[#allocation2 + $0x278] sm:$0xff] %vm1974_vm0, %v3076_v11  ;;  %3086 = vst [vmem:[#allocation2 + $0x280] sm:$0xff] %v3085_v12  ;;  %v3104_v19 = vrot.slane %v3103_v17, 4 }
 0x194   : > { %v3113_v20 = vrot.slane %v3112_v18, 4  ;;  %v3117_v21 = vld [vmem:[#allocation0 + $0x55f] ss:$-1 sm:$0xff]  ;;  %v3126_v22 = vld [vmem:[#allocation0 + $0x547] ss:$-1 sm:$0xff]  ;;  %3094 = vst.msk [vmem:[#allocation2 + $0x280] sm:$0xff] %vm1974_vm0, %v3090_v15 }
 0x195   : > { %3100 = vst [vmem:[#allocation2 + $0x288] sm:$0xff] %v3099_v16  ;;  %v3118_v23 = vrot.slane %v3117_v21, 4  ;;  %v3127_v24 = vrot.slane %v3126_v22, 4  ;;  %v3131_v25 = vld [vmem:[#allocation0 + $0x54f] ss:$-1 sm:$0xff] }
 0x196   : > { %v3140_v26 = vld [vmem:[#allocation0 + $0x537] ss:$-1 sm:$0xff]  ;;  %3108 = vst.msk [vmem:[#allocation2 + $0x288] sm:$0xff] %vm1974_vm0, %v3104_v19  ;;  %3114 = vst [vmem:[#allocation2 + $0x290] sm:$0xff] %v3113_v20  ;;  %v3132_v27 = vrot.slane %v3131_v25, 4 }
 0x197   : > { %v3141_v28 = vrot.slane %v3140_v26, 4  ;;  %v3145_v29 = vld [vmem:[#allocation0 + $0x53f] ss:$-1 sm:$0xff]  ;;  %v3154_v30 = vld [vmem:[#allocation0 + $0x527] ss:$-1 sm:$0xff]  ;;  %3122 = vst.msk [vmem:[#allocation2 + $0x290] sm:$0xff] %vm1974_vm0, %v3118_v23 }
 0x198   : > { %3128 = vst [vmem:[#allocation2 + $0x298] sm:$0xff] %v3127_v24  ;;  %v3146_v31 = vrot.slane %v3145_v29, 4  ;;  %v3155_v32 = vrot.slane %v3154_v30, 4  ;;  %v3159_v33 = vld [vmem:[#allocation0 + $0x52f] ss:$-1 sm:$0xff] }
 0x199   : > { %v3168_v34 = vld [vmem:[#allocation0 + $0x517] ss:$-1 sm:$0xff]  ;;  %3136 = vst.msk [vmem:[#allocation2 + $0x298] sm:$0xff] %vm1974_vm0, %v3132_v27  ;;  %3142 = vst [vmem:[#allocation2 + $0x2a0] sm:$0xff] %v3141_v28  ;;  %v3160_v35 = vrot.slane %v3159_v33, 4 }
 0x19a   : > { %v3169_v36 = vrot.slane %v3168_v34, 4  ;;  %v3173_v37 = vld [vmem:[#allocation0 + $0x51f] ss:$-1 sm:$0xff]  ;;  %v3182_v38 = vld [vmem:[#allocation0 + $0x507] ss:$-1 sm:$0xff]  ;;  %3150 = vst.msk [vmem:[#allocation2 + $0x2a0] sm:$0xff] %vm1974_vm0, %v3146_v31 }
 0x19b   : > { %3156 = vst [vmem:[#allocation2 + $0x2a8] sm:$0xff] %v3155_v32  ;;  %v3174_v39 = vrot.slane %v3173_v37, 4  ;;  %v3183_v40 = vrot.slane %v3182_v38, 4  ;;  %v3187_v41 = vld [vmem:[#allocation0 + $0x50f] ss:$-1 sm:$0xff] }
 0x19c   : > { %v3196_v42 = vld [vmem:[#allocation0 + $0x5f7] ss:$-1 sm:$0xff]  ;;  %3164 = vst.msk [vmem:[#allocation2 + $0x2a8] sm:$0xff] %vm1974_vm0, %v3160_v35  ;;  %3170 = vst [vmem:[#allocation2 + $0x2b0] sm:$0xff] %v3169_v36  ;;  %v3188_v43 = vrot.slane %v3187_v41, 4 }
 0x19d   : > { %v3197_v44 = vrot.slane %v3196_v42, 4  ;;  %v3201_v45 = vld [vmem:[#allocation0 + $0x5ff] ss:$-1 sm:$0xff]  ;;  %v3210_v46 = vld [vmem:[#allocation0 + $0x5e7] ss:$-1 sm:$0xff]  ;;  %3178 = vst.msk [vmem:[#allocation2 + $0x2b0] sm:$0xff] %vm1974_vm0, %v3174_v39 }
 0x19e   : > { %3184 = vst [vmem:[#allocation2 + $0x2b8] sm:$0xff] %v3183_v40  ;;  %v3202_v47 = vrot.slane %v3201_v45, 4  ;;  %v3211_v48 = vrot.slane %v3210_v46, 4  ;;  %v3215_v49 = vld [vmem:[#allocation0 + $0x5ef] ss:$-1 sm:$0xff] }
 0x19f   : > { %v3224_v50 = vld [vmem:[#allocation0 + $0x5d7] ss:$-1 sm:$0xff]  ;;  %3192 = vst.msk [vmem:[#allocation2 + $0x2b8] sm:$0xff] %vm1974_vm0, %v3188_v43  ;;  %3198 = vst [vmem:[#allocation2 + $0x2c0] sm:$0xff] %v3197_v44  ;;  %v3216_v51 = vrot.slane %v3215_v49, 4 }
 0x1a0   : > { %v3225_v52 = vrot.slane %v3224_v50, 4  ;;  %v3229_v53 = vld [vmem:[#allocation0 + $0x5df] ss:$-1 sm:$0xff]  ;;  %v3238_v54 = vld [vmem:[#allocation0 + $0x5c7] ss:$-1 sm:$0xff]  ;;  %3206 = vst.msk [vmem:[#allocation2 + $0x2c0] sm:$0xff] %vm1974_vm0, %v3202_v47 }
 0x1a1   : > { %3212 = vst [vmem:[#allocation2 + $0x2c8] sm:$0xff] %v3211_v48  ;;  %v3230_v55 = vrot.slane %v3229_v53, 4  ;;  %v3239_v56 = vrot.slane %v3238_v54, 4  ;;  %v3243_v57 = vld [vmem:[#allocation0 + $0x5cf] ss:$-1 sm:$0xff] }
 0x1a2   : > { %v3252_v58 = vld [vmem:[#allocation0 + $0x5b7] ss:$-1 sm:$0xff]  ;;  %3220 = vst.msk [vmem:[#allocation2 + $0x2c8] sm:$0xff] %vm1974_vm0, %v3216_v51  ;;  %3226 = vst [vmem:[#allocation2 + $0x2d0] sm:$0xff] %v3225_v52  ;;  %v3244_v59 = vrot.slane %v3243_v57, 4 }
 0x1a3   : > { %v3253_v60 = vrot.slane %v3252_v58, 4  ;;  %v3257_v61 = vld [vmem:[#allocation0 + $0x5bf] ss:$-1 sm:$0xff]  ;;  %v3266_v62 = vld [vmem:[#allocation0 + $0x5a7] ss:$-1 sm:$0xff]  ;;  %3234 = vst.msk [vmem:[#allocation2 + $0x2d0] sm:$0xff] %vm1974_vm0, %v3230_v55 }
 0x1a4   : > { %3240 = vst [vmem:[#allocation2 + $0x2d8] sm:$0xff] %v3239_v56  ;;  %v3258_v63 = vrot.slane %v3257_v61, 4  ;;  %v3267_v0 = vrot.slane %v3266_v62, 4  ;;  %v3271_v2 = vld [vmem:[#allocation0 + $0x5af] ss:$-1 sm:$0xff] }
 0x1a5   : > { %v3280_v3 = vld [vmem:[#allocation0 + $0x597] ss:$-1 sm:$0xff]  ;;  %3248 = vst.msk [vmem:[#allocation2 + $0x2d8] sm:$0xff] %vm1974_vm0, %v3244_v59  ;;  %3254 = vst [vmem:[#allocation2 + $0x2e0] sm:$0xff] %v3253_v60  ;;  %v3272_v4 = vrot.slane %v3271_v2, 4 }
 0x1a6   : > { %v3281_v5 = vrot.slane %v3280_v3, 4  ;;  %v3285_v6 = vld [vmem:[#allocation0 + $0x59f] ss:$-1 sm:$0xff]  ;;  %v3294_v7 = vld [vmem:[#allocation0 + $0x587] ss:$-1 sm:$0xff]  ;;  %3262 = vst.msk [vmem:[#allocation2 + $0x2e0] sm:$0xff] %vm1974_vm0, %v3258_v63 }
 0x1a7   : > { %3268 = vst [vmem:[#allocation2 + $0x2e8] sm:$0xff] %v3267_v0  ;;  %v3286_v8 = vrot.slane %v3285_v6, 4  ;;  %v3295_v9 = vrot.slane %v3294_v7, 4  ;;  %v3299_v10 = vld [vmem:[#allocation0 + $0x58f] ss:$-1 sm:$0xff] }
 0x1a8   : > { %v3308_v11 = vld [vmem:[#allocation0 + $0x677] ss:$-1 sm:$0xff]  ;;  %3276 = vst.msk [vmem:[#allocation2 + $0x2e8] sm:$0xff] %vm1974_vm0, %v3272_v4  ;;  %3282 = vst [vmem:[#allocation2 + $0x2f0] sm:$0xff] %v3281_v5  ;;  %v3300_v12 = vrot.slane %v3299_v10, 4 }
 0x1a9   : > { %v3309_v13 = vrot.slane %v3308_v11, 4  ;;  %v3313_v14 = vld [vmem:[#allocation0 + $0x67f] ss:$-1 sm:$0xff]  ;;  %v3322_v15 = vld [vmem:[#allocation0 + $0x667] ss:$-1 sm:$0xff]  ;;  %3290 = vst.msk [vmem:[#allocation2 + $0x2f0] sm:$0xff] %vm1974_vm0, %v3286_v8 }
 0x1aa   : > { %3296 = vst [vmem:[#allocation2 + $0x2f8] sm:$0xff] %v3295_v9  ;;  %v3314_v16 = vrot.slane %v3313_v14, 4  ;;  %v3323_v17 = vrot.slane %v3322_v15, 4  ;;  %v3327_v18 = vld [vmem:[#allocation0 + $0x66f] ss:$-1 sm:$0xff] }
 0x1ab   : > { %v3336_v19 = vld [vmem:[#allocation0 + $0x657] ss:$-1 sm:$0xff]  ;;  %3304 = vst.msk [vmem:[#allocation2 + $0x2f8] sm:$0xff] %vm1974_vm0, %v3300_v12  ;;  %3310 = vst [vmem:[#allocation2 + $0x300] sm:$0xff] %v3309_v13  ;;  %v3328_v20 = vrot.slane %v3327_v18, 4 }
 0x1ac   : > { %v3337_v21 = vrot.slane %v3336_v19, 4  ;;  %v3341_v22 = vld [vmem:[#allocation0 + $0x65f] ss:$-1 sm:$0xff]  ;;  %v3350_v23 = vld [vmem:[#allocation0 + $0x647] ss:$-1 sm:$0xff]  ;;  %3318 = vst.msk [vmem:[#allocation2 + $0x300] sm:$0xff] %vm1974_vm0, %v3314_v16 }
 0x1ad   : > { %3324 = vst [vmem:[#allocation2 + $0x308] sm:$0xff] %v3323_v17  ;;  %v3342_v24 = vrot.slane %v3341_v22, 4  ;;  %v3351_v25 = vrot.slane %v3350_v23, 4  ;;  %v3355_v26 = vld [vmem:[#allocation0 + $0x64f] ss:$-1 sm:$0xff] }
 0x1ae   : > { %v3364_v27 = vld [vmem:[#allocation0 + $0x637] ss:$-1 sm:$0xff]  ;;  %3332 = vst.msk [vmem:[#allocation2 + $0x308] sm:$0xff] %vm1974_vm0, %v3328_v20  ;;  %3338 = vst [vmem:[#allocation2 + $0x310] sm:$0xff] %v3337_v21  ;;  %v3356_v28 = vrot.slane %v3355_v26, 4 }
 0x1af   : > { %v3365_v29 = vrot.slane %v3364_v27, 4  ;;  %v3369_v30 = vld [vmem:[#allocation0 + $0x63f] ss:$-1 sm:$0xff]  ;;  %v3378_v31 = vld [vmem:[#allocation0 + $0x627] ss:$-1 sm:$0xff]  ;;  %3346 = vst.msk [vmem:[#allocation2 + $0x310] sm:$0xff] %vm1974_vm0, %v3342_v24 }
 0x1b0   : > { %3352 = vst [vmem:[#allocation2 + $0x318] sm:$0xff] %v3351_v25  ;;  %v3370_v32 = vrot.slane %v3369_v30, 4  ;;  %v3379_v33 = vrot.slane %v3378_v31, 4  ;;  %v3383_v34 = vld [vmem:[#allocation0 + $0x62f] ss:$-1 sm:$0xff] }
 0x1b1   : > { %v3392_v35 = vld [vmem:[#allocation0 + $0x617] ss:$-1 sm:$0xff]  ;;  %3360 = vst.msk [vmem:[#allocation2 + $0x318] sm:$0xff] %vm1974_vm0, %v3356_v28  ;;  %3366 = vst [vmem:[#allocation2 + $0x320] sm:$0xff] %v3365_v29  ;;  %v3384_v36 = vrot.slane %v3383_v34, 4 }
 0x1b2   : > { %v3393_v37 = vrot.slane %v3392_v35, 4  ;;  %v3397_v38 = vld [vmem:[#allocation0 + $0x61f] ss:$-1 sm:$0xff]  ;;  %v3406_v39 = vld [vmem:[#allocation0 + $0x607] ss:$-1 sm:$0xff]  ;;  %3374 = vst.msk [vmem:[#allocation2 + $0x320] sm:$0xff] %vm1974_vm0, %v3370_v32 }
 0x1b3   : > { %3380 = vst [vmem:[#allocation2 + $0x328] sm:$0xff] %v3379_v33  ;;  %v3398_v40 = vrot.slane %v3397_v38, 4  ;;  %v3407_v41 = vrot.slane %v3406_v39, 4  ;;  %v3411_v42 = vld [vmem:[#allocation0 + $0x60f] ss:$-1 sm:$0xff] }
 0x1b4   : > { %v3420_v43 = vld [vmem:[#allocation0 + $0x6f7] ss:$-1 sm:$0xff]  ;;  %3388 = vst.msk [vmem:[#allocation2 + $0x328] sm:$0xff] %vm1974_vm0, %v3384_v36  ;;  %3394 = vst [vmem:[#allocation2 + $0x330] sm:$0xff] %v3393_v37  ;;  %v3412_v44 = vrot.slane %v3411_v42, 4 }
 0x1b5   : > { %v3421_v45 = vrot.slane %v3420_v43, 4  ;;  %v3425_v46 = vld [vmem:[#allocation0 + $0x6ff] ss:$-1 sm:$0xff]  ;;  %v3434_v47 = vld [vmem:[#allocation0 + $0x6e7] ss:$-1 sm:$0xff]  ;;  %3402 = vst.msk [vmem:[#allocation2 + $0x330] sm:$0xff] %vm1974_vm0, %v3398_v40 }
 0x1b6   : > { %3408 = vst [vmem:[#allocation2 + $0x338] sm:$0xff] %v3407_v41  ;;  %v3426_v48 = vrot.slane %v3425_v46, 4  ;;  %v3435_v49 = vrot.slane %v3434_v47, 4  ;;  %v3439_v50 = vld [vmem:[#allocation0 + $0x6ef] ss:$-1 sm:$0xff] }
 0x1b7   : > { %v3448_v51 = vld [vmem:[#allocation0 + $0x6d7] ss:$-1 sm:$0xff]  ;;  %3416 = vst.msk [vmem:[#allocation2 + $0x338] sm:$0xff] %vm1974_vm0, %v3412_v44  ;;  %3422 = vst [vmem:[#allocation2 + $0x340] sm:$0xff] %v3421_v45  ;;  %v3440_v52 = vrot.slane %v3439_v50, 4 }
 0x1b8   : > { %v3449_v53 = vrot.slane %v3448_v51, 4  ;;  %v3453_v54 = vld [vmem:[#allocation0 + $0x6df] ss:$-1 sm:$0xff]  ;;  %v3462_v55 = vld [vmem:[#allocation0 + $0x6c7] ss:$-1 sm:$0xff]  ;;  %3430 = vst.msk [vmem:[#allocation2 + $0x340] sm:$0xff] %vm1974_vm0, %v3426_v48 }
 0x1b9   : > { %3436 = vst [vmem:[#allocation2 + $0x348] sm:$0xff] %v3435_v49  ;;  %v3454_v56 = vrot.slane %v3453_v54, 4  ;;  %v3463_v57 = vrot.slane %v3462_v55, 4  ;;  %v3467_v58 = vld [vmem:[#allocation0 + $0x6cf] ss:$-1 sm:$0xff] }
 0x1ba   : > { %v3476_v59 = vld [vmem:[#allocation0 + $0x6b7] ss:$-1 sm:$0xff]  ;;  %3444 = vst.msk [vmem:[#allocation2 + $0x348] sm:$0xff] %vm1974_vm0, %v3440_v52  ;;  %3450 = vst [vmem:[#allocation2 + $0x350] sm:$0xff] %v3449_v53  ;;  %v3468_v60 = vrot.slane %v3467_v58, 4 }
 0x1bb   : > { %v3477_v61 = vrot.slane %v3476_v59, 4  ;;  %v3481_v62 = vld [vmem:[#allocation0 + $0x6bf] ss:$-1 sm:$0xff]  ;;  %v3490_v63 = vld [vmem:[#allocation0 + $0x6a7] ss:$-1 sm:$0xff]  ;;  %3458 = vst.msk [vmem:[#allocation2 + $0x350] sm:$0xff] %vm1974_vm0, %v3454_v56 }
 0x1bc   : > { %3464 = vst [vmem:[#allocation2 + $0x358] sm:$0xff] %v3463_v57  ;;  %v3482_v0 = vrot.slane %v3481_v62, 4  ;;  %v3491_v2 = vrot.slane %v3490_v63, 4  ;;  %v3495_v3 = vld [vmem:[#allocation0 + $0x6af] ss:$-1 sm:$0xff] }
 0x1bd   : > { %v3504_v4 = vld [vmem:[#allocation0 + $0x697] ss:$-1 sm:$0xff]  ;;  %3472 = vst.msk [vmem:[#allocation2 + $0x358] sm:$0xff] %vm1974_vm0, %v3468_v60  ;;  %3478 = vst [vmem:[#allocation2 + $0x360] sm:$0xff] %v3477_v61  ;;  %v3496_v5 = vrot.slane %v3495_v3, 4 }
 0x1be   : > { %v3505_v6 = vrot.slane %v3504_v4, 4  ;;  %v3509_v7 = vld [vmem:[#allocation0 + $0x69f] ss:$-1 sm:$0xff]  ;;  %v3518_v8 = vld [vmem:[#allocation0 + $0x687] ss:$-1 sm:$0xff]  ;;  %3486 = vst.msk [vmem:[#allocation2 + $0x360] sm:$0xff] %vm1974_vm0, %v3482_v0 }
 0x1bf   : > { %3492 = vst [vmem:[#allocation2 + $0x368] sm:$0xff] %v3491_v2  ;;  %v3510_v9 = vrot.slane %v3509_v7, 4  ;;  %v3519_v10 = vrot.slane %v3518_v8, 4  ;;  %v3523_v11 = vld [vmem:[#allocation0 + $0x68f] ss:$-1 sm:$0xff] }
 0x1c0   : > { %v3532_v12 = vld [vmem:[#allocation0 + $0x777] ss:$-1 sm:$0xff]  ;;  %3500 = vst.msk [vmem:[#allocation2 + $0x368] sm:$0xff] %vm1974_vm0, %v3496_v5  ;;  %3506 = vst [vmem:[#allocation2 + $0x370] sm:$0xff] %v3505_v6  ;;  %v3524_v13 = vrot.slane %v3523_v11, 4 }
 0x1c1   : > { %v3533_v14 = vrot.slane %v3532_v12, 4  ;;  %v3537_v15 = vld [vmem:[#allocation0 + $0x77f] ss:$-1 sm:$0xff]  ;;  %v3546_v16 = vld [vmem:[#allocation0 + $0x767] ss:$-1 sm:$0xff]  ;;  %3514 = vst.msk [vmem:[#allocation2 + $0x370] sm:$0xff] %vm1974_vm0, %v3510_v9 }
 0x1c2   : > { %3520 = vst [vmem:[#allocation2 + $0x378] sm:$0xff] %v3519_v10  ;;  %v3538_v17 = vrot.slane %v3537_v15, 4  ;;  %v3547_v18 = vrot.slane %v3546_v16, 4  ;;  %v3551_v19 = vld [vmem:[#allocation0 + $0x76f] ss:$-1 sm:$0xff] }
 0x1c3   : > { %v3560_v20 = vld [vmem:[#allocation0 + $0x757] ss:$-1 sm:$0xff]  ;;  %3528 = vst.msk [vmem:[#allocation2 + $0x378] sm:$0xff] %vm1974_vm0, %v3524_v13  ;;  %3534 = vst [vmem:[#allocation2 + $0x380] sm:$0xff] %v3533_v14  ;;  %v3552_v21 = vrot.slane %v3551_v19, 4 }
 0x1c4   : > { %v3561_v22 = vrot.slane %v3560_v20, 4  ;;  %v3565_v23 = vld [vmem:[#allocation0 + $0x75f] ss:$-1 sm:$0xff]  ;;  %v3574_v24 = vld [vmem:[#allocation0 + $0x747] ss:$-1 sm:$0xff]  ;;  %3542 = vst.msk [vmem:[#allocation2 + $0x380] sm:$0xff] %vm1974_vm0, %v3538_v17 }
 0x1c5   : > { %3548 = vst [vmem:[#allocation2 + $0x388] sm:$0xff] %v3547_v18  ;;  %v3566_v25 = vrot.slane %v3565_v23, 4  ;;  %v3575_v26 = vrot.slane %v3574_v24, 4  ;;  %v3579_v27 = vld [vmem:[#allocation0 + $0x74f] ss:$-1 sm:$0xff]  ;;  %v6574_v17 = vmov 0.0  }
 0x1c6   : > { %v3588_v28 = vld [vmem:[#allocation0 + $0x737] ss:$-1 sm:$0xff]  ;;  %3556 = vst.msk [vmem:[#allocation2 + $0x388] sm:$0xff] %vm1974_vm0, %v3552_v21  ;;  %3562 = vst [vmem:[#allocation2 + $0x390] sm:$0xff] %v3561_v22  ;;  %v3580_v29 = vrot.slane %v3579_v27, 4 }
 0x1c7   : > { %v3589_v30 = vrot.slane %v3588_v28, 4  ;;  %v3593_v31 = vld [vmem:[#allocation0 + $0x73f] ss:$-1 sm:$0xff]  ;;  %v3602_v32 = vld [vmem:[#allocation0 + $0x727] ss:$-1 sm:$0xff]  ;;  %3570 = vst.msk [vmem:[#allocation2 + $0x390] sm:$0xff] %vm1974_vm0, %v3566_v25 }
 0x1c8   : > { %3576 = vst [vmem:[#allocation2 + $0x398] sm:$0xff] %v3575_v26  ;;  %v3594_v33 = vrot.slane %v3593_v31, 4  ;;  %v3603_v34 = vrot.slane %v3602_v32, 4  ;;  %v3607_v35 = vld [vmem:[#allocation0 + $0x72f] ss:$-1 sm:$0xff] }
 0x1c9   : > { %v3616_v36 = vld [vmem:[#allocation0 + $0x717] ss:$-1 sm:$0xff]  ;;  %3584 = vst.msk [vmem:[#allocation2 + $0x398] sm:$0xff] %vm1974_vm0, %v3580_v29  ;;  %3590 = vst [vmem:[#allocation2 + $0x3a0] sm:$0xff] %v3589_v30  ;;  %v3608_v37 = vrot.slane %v3607_v35, 4 }
 0x1ca   : > { %v3617_v38 = vrot.slane %v3616_v36, 4  ;;  %v3621_v39 = vld [vmem:[#allocation0 + $0x71f] ss:$-1 sm:$0xff]  ;;  %v3630_v40 = vld [vmem:[#allocation0 + $0x707] ss:$-1 sm:$0xff]  ;;  %3598 = vst.msk [vmem:[#allocation2 + $0x3a0] sm:$0xff] %vm1974_vm0, %v3594_v33 }
 0x1cb   : > { %3604 = vst [vmem:[#allocation2 + $0x3a8] sm:$0xff] %v3603_v34  ;;  %v3622_v41 = vrot.slane %v3621_v39, 4  ;;  %v3631_v42 = vrot.slane %v3630_v40, 4  ;;  %v3635_v43 = vld [vmem:[#allocation0 + $0x70f] ss:$-1 sm:$0xff] }
 0x1cc   : > { %v3644_v44 = vld [vmem:[#allocation0 + $0x7f7] ss:$-1 sm:$0xff]  ;;  %3612 = vst.msk [vmem:[#allocation2 + $0x3a8] sm:$0xff] %vm1974_vm0, %v3608_v37  ;;  %3618 = vst [vmem:[#allocation2 + $0x3b0] sm:$0xff] %v3617_v38  ;;  %v3636_v45 = vrot.slane %v3635_v43, 4 }
 0x1cd   : > { %v3645_v46 = vrot.slane %v3644_v44, 4  ;;  %v3649_v47 = vld [vmem:[#allocation0 + $0x7ff] ss:$-1 sm:$0xff]  ;;  %v3658_v48 = vld [vmem:[#allocation0 + $0x7e7] ss:$-1 sm:$0xff]  ;;  %3626 = vst.msk [vmem:[#allocation2 + $0x3b0] sm:$0xff] %vm1974_vm0, %v3622_v41 }
 0x1ce   : > { %3632 = vst [vmem:[#allocation2 + $0x3b8] sm:$0xff] %v3631_v42  ;;  %v3650_v49 = vrot.slane %v3649_v47, 4  ;;  %v3659_v50 = vrot.slane %v3658_v48, 4  ;;  %v3663_v51 = vld [vmem:[#allocation0 + $0x7ef] ss:$-1 sm:$0xff] }
 0x1cf   : > { %v3672_v52 = vld [vmem:[#allocation0 + $0x7d7] ss:$-1 sm:$0xff]  ;;  %3640 = vst.msk [vmem:[#allocation2 + $0x3b8] sm:$0xff] %vm1974_vm0, %v3636_v45  ;;  %3646 = vst [vmem:[#allocation2 + $0x3c0] sm:$0xff] %v3645_v46  ;;  %v3664_v53 = vrot.slane %v3663_v51, 4 }
 0x1d0   : > { %v3673_v54 = vrot.slane %v3672_v52, 4  ;;  %v3677_v55 = vld [vmem:[#allocation0 + $0x7df] ss:$-1 sm:$0xff]  ;;  %v3686_v56 = vld [vmem:[#allocation0 + $0x7c7] ss:$-1 sm:$0xff]  ;;  %3654 = vst.msk [vmem:[#allocation2 + $0x3c0] sm:$0xff] %vm1974_vm0, %v3650_v49 }
 0x1d1   : > { %3660 = vst [vmem:[#allocation2 + $0x3c8] sm:$0xff] %v3659_v50  ;;  %v3678_v57 = vrot.slane %v3677_v55, 4  ;;  %v3687_v58 = vrot.slane %v3686_v56, 4  ;;  %v3691_v59 = vld [vmem:[#allocation0 + $0x7cf] ss:$-1 sm:$0xff] }
 0x1d2   : > { %v3700_v60 = vld [vmem:[#allocation0 + $0x7b7] ss:$-1 sm:$0xff]  ;;  %3668 = vst.msk [vmem:[#allocation2 + $0x3c8] sm:$0xff] %vm1974_vm0, %v3664_v53  ;;  %3674 = vst [vmem:[#allocation2 + $0x3d0] sm:$0xff] %v3673_v54  ;;  %v3692_v61 = vrot.slane %v3691_v59, 4 }
 0x1d3   : > { %v3701_v62 = vrot.slane %v3700_v60, 4  ;;  %v3705_v63 = vld [vmem:[#allocation0 + $0x7bf] ss:$-1 sm:$0xff]  ;;  %v3714_v0 = vld [vmem:[#allocation0 + $0x7a7] ss:$-1 sm:$0xff]  ;;  %3682 = vst.msk [vmem:[#allocation2 + $0x3d0] sm:$0xff] %vm1974_vm0, %v3678_v57 }
 0x1d4   : > { %3688 = vst [vmem:[#allocation2 + $0x3d8] sm:$0xff] %v3687_v58  ;;  %v3706_v2 = vrot.slane %v3705_v63, 4  ;;  %v3715_v3 = vrot.slane %v3714_v0, 4  ;;  %v3719_v4 = vld [vmem:[#allocation0 + $0x7af] ss:$-1 sm:$0xff] }
 0x1d5   : > { %v3728_v5 = vld [vmem:[#allocation0 + $0x797] ss:$-1 sm:$0xff]  ;;  %3696 = vst.msk [vmem:[#allocation2 + $0x3d8] sm:$0xff] %vm1974_vm0, %v3692_v61  ;;  %3702 = vst [vmem:[#allocation2 + $0x3e0] sm:$0xff] %v3701_v62  ;;  %v3720_v6 = vrot.slane %v3719_v4, 4 }
 0x1d6   : > { %v3729_v7 = vrot.slane %v3728_v5, 4  ;;  %v3733_v8 = vld [vmem:[#allocation0 + $0x79f] ss:$-1 sm:$0xff]  ;;  %v3742_v9 = vld [vmem:[#allocation0 + $0x787] ss:$-1 sm:$0xff]  ;;  %3710 = vst.msk [vmem:[#allocation2 + $0x3e0] sm:$0xff] %vm1974_vm0, %v3706_v2 }
 0x1d7   : > { %3716 = vst [vmem:[#allocation2 + $0x3e8] sm:$0xff] %v3715_v3  ;;  %v3734_v10 = vrot.slane %v3733_v8, 4  ;;  %v3743_v11 = vrot.slane %v3742_v9, 4  ;;  %v3747_v12 = vld [vmem:[#allocation0 + $0x78f] ss:$-1 sm:$0xff] }
 0x1d8   : > { %v3757_v13 = vld [vmem:[#allocation2] sm:$0xf]  ;;  %3724 = vst.msk [vmem:[#allocation2 + $0x3e8] sm:$0xff] %vm1974_vm0, %v3720_v6  ;;  %3730 = vst [vmem:[#allocation2 + $0x3f0] sm:$0xff] %v3729_v7  ;;  %v3748_v14 = vrot.slane %v3747_v12, 4 }
 0x1d9   : > { %v3762_v15 = vld [vmem:[#allocation2 + $0x8] sm:$0xf]  ;;  %v3768_v16 = vld [vmem:[#allocation2 + $0x10] sm:$0xf]  ;;  %3738 = vst.msk [vmem:[#allocation2 + $0x3f0] sm:$0xff] %vm1974_vm0, %v3734_v10  ;;  %3744 = vst [vmem:[#allocation2 + $0x3f8] sm:$0xff] %v3743_v11  ;;  %v3758_v18 = vpack.c.bf16 %v6574_v17, %v3757_v13 }
 0x1da   : > { %v3763_v19 = vpack.c.bf16 %v6574_v17, %v3762_v15  ;;  %v3769_v20 = vpack.c.bf16 %v6574_v17, %v3768_v16  ;;  %v3775_v21 = vld [vmem:[#allocation2 + $0x18] sm:$0xf]  ;;  %v3782_v22 = vld [vmem:[#allocation2 + $0x20] sm:$0xf]  ;;  %v3789_v23 = vld [vmem:[#allocation2 + $0x28] sm:$0xf] }
 0x1db   : > { %3752 = vst.msk [vmem:[#allocation2 + $0x3f8] sm:$0xff] %vm1974_vm0, %v3748_v14  ;;  %v3776_v1 = vpack.c.bf16 %v6574_v17, %v3775_v21  ;;  %v3783_v24 = vpack.c.bf16 %v6574_v17, %v3782_v22  ;;  %v3790_v25 = vpack.c.bf16 %v6574_v17, %v3789_v23  ;;  %v3796_v26 = vld [vmem:[#allocation2 + $0x30] sm:$0xf]  ;;  %v3803_v27 = vld [vmem:[#allocation2 + $0x38] sm:$0xf]  ;;  %3760 = vst [vmem:[%s7420_s26] sm:$0x3] %v3758_v18 }
 0x1dc   : > { %v3810_v28 = vld [vmem:[#allocation2 + $0x40] sm:$0xf]  ;;  %6335 = vst [vmem:[%s7420_s26 + $0x2] sm:$0x3] %v3763_v19  ;;  %6336 = vst [vmem:[%s7420_s26 + $0x4] sm:$0x3] %v3769_v20  ;;  %v3797_v29 = vpack.c.bf16 %v6574_v17, %v3796_v26  ;;  %v3804_v30 = vpack.c.bf16 %v6574_v17, %v3803_v27 }
 0x1dd   : > { %v3811_v31 = vpack.c.bf16 %v6574_v17, %v3810_v28  ;;  %v3817_v32 = vld [vmem:[#allocation2 + $0x48] sm:$0xf]  ;;  %v3824_v33 = vld [vmem:[#allocation2 + $0x50] sm:$0xf]  ;;  %v3831_v34 = vld [vmem:[#allocation2 + $0x58] sm:$0xf] }
 0x1de   : > { %6337 = vst [vmem:[%s7420_s26 + $0x6] sm:$0x3] %v3776_v1  ;;  %6338 = vst [vmem:[%s7420_s26 + $0x8] sm:$0x3] %v3783_v24  ;;  %v3818_v35 = vpack.c.bf16 %v6574_v17, %v3817_v32  ;;  %v3825_v36 = vpack.c.bf16 %v6574_v17, %v3824_v33  ;;  %v3832_v37 = vpack.c.bf16 %v6574_v17, %v3831_v34  ;;  %v3838_v38 = vld [vmem:[#allocation2 + $0x60] sm:$0xf] }
 0x1df   : > { %6339 = vst [vmem:[%s7420_s26 + $0xa] sm:$0x3] %v3790_v25  ;;  %v3845_v39 = vld [vmem:[#allocation2 + $0x68] sm:$0xf]  ;;  %v3852_v40 = vld [vmem:[#allocation2 + $0x70] sm:$0xf]  ;;  %v3839_v41 = vpack.c.bf16 %v6574_v17, %v3838_v38 }
 0x1e0   : > { %6340 = vst [vmem:[%s7420_s26 + $0xc] sm:$0x3] %v3797_v29  ;;  %6341 = vst [vmem:[%s7420_s26 + $0xe] sm:$0x3] %v3804_v30  ;;  %v3846_v42 = vpack.c.bf16 %v6574_v17, %v3845_v39  ;;  %v3853_v43 = vpack.c.bf16 %v6574_v17, %v3852_v40  ;;  %v3859_v44 = vld [vmem:[#allocation2 + $0x78] sm:$0xf] }
 0x1e1   : > { %6342 = vst [vmem:[%s7420_s26 + $0x10] sm:$0x3] %v3811_v31  ;;  %v3866_v45 = vld [vmem:[#allocation2 + $0x80] sm:$0xf]  ;;  %v3873_v46 = vld [vmem:[#allocation2 + $0x88] sm:$0xf]  ;;  %v3860_v47 = vpack.c.bf16 %v6574_v17, %v3859_v44 }
 0x1e2   : > { %6343 = vst [vmem:[%s7420_s26 + $0x12] sm:$0x3] %v3818_v35  ;;  %6344 = vst [vmem:[%s7420_s26 + $0x14] sm:$0x3] %v3825_v36  ;;  %v3867_v48 = vpack.c.bf16 %v6574_v17, %v3866_v45  ;;  %v3874_v49 = vpack.c.bf16 %v6574_v17, %v3873_v46  ;;  %v3880_v50 = vld [vmem:[#allocation2 + $0x90] sm:$0xf] }
 0x1e3   : > { %6345 = vst [vmem:[%s7420_s26 + $0x16] sm:$0x3] %v3832_v37  ;;  %v3887_v51 = vld [vmem:[#allocation2 + $0x98] sm:$0xf]  ;;  %v3894_v52 = vld [vmem:[#allocation2 + $0xa0] sm:$0xf]  ;;  %v3881_v53 = vpack.c.bf16 %v6574_v17, %v3880_v50 }
 0x1e4   : > { %6346 = vst [vmem:[%s7420_s26 + $0x18] sm:$0x3] %v3839_v41  ;;  %6347 = vst [vmem:[%s7420_s26 + $0x1a] sm:$0x3] %v3846_v42  ;;  %v3888_v54 = vpack.c.bf16 %v6574_v17, %v3887_v51  ;;  %v3895_v55 = vpack.c.bf16 %v6574_v17, %v3894_v52  ;;  %v3901_v56 = vld [vmem:[#allocation2 + $0xa8] sm:$0xf] }
 0x1e5   : > { %6348 = vst [vmem:[%s7420_s26 + $0x1c] sm:$0x3] %v3853_v43  ;;  %v3908_v57 = vld [vmem:[#allocation2 + $0xb0] sm:$0xf]  ;;  %v3915_v58 = vld [vmem:[#allocation2 + $0xb8] sm:$0xf]  ;;  %v3902_v59 = vpack.c.bf16 %v6574_v17, %v3901_v56 }
 0x1e6   : > { %6349 = vst [vmem:[%s7420_s26 + $0x1e] sm:$0x3] %v3860_v47  ;;  %6350 = vst [vmem:[%s7420_s26 + $0x20] sm:$0x3] %v3867_v48  ;;  %v3909_v60 = vpack.c.bf16 %v6574_v17, %v3908_v57  ;;  %v3916_v61 = vpack.c.bf16 %v6574_v17, %v3915_v58  ;;  %v3922_v62 = vld [vmem:[#allocation2 + $0xc0] sm:$0xf] }
 0x1e7   : > { %6351 = vst [vmem:[%s7420_s26 + $0x22] sm:$0x3] %v3874_v49  ;;  %v3929_v63 = vld [vmem:[#allocation2 + $0xc8] sm:$0xf]  ;;  %v3936_v0 = vld [vmem:[#allocation2 + $0xd0] sm:$0xf]  ;;  %v3923_v2 = vpack.c.bf16 %v6574_v17, %v3922_v62 }
 0x1e8   : > { %6352 = vst [vmem:[%s7420_s26 + $0x24] sm:$0x3] %v3881_v53  ;;  %6353 = vst [vmem:[%s7420_s26 + $0x26] sm:$0x3] %v3888_v54  ;;  %v3930_v3 = vpack.c.bf16 %v6574_v17, %v3929_v63  ;;  %v3937_v4 = vpack.c.bf16 %v6574_v17, %v3936_v0  ;;  %v3943_v5 = vld [vmem:[#allocation2 + $0xd8] sm:$0xf] }
 0x1e9   : > { %6354 = vst [vmem:[%s7420_s26 + $0x28] sm:$0x3] %v3895_v55  ;;  %v3950_v6 = vld [vmem:[#allocation2 + $0xe0] sm:$0xf]  ;;  %v3957_v7 = vld [vmem:[#allocation2 + $0xe8] sm:$0xf]  ;;  %v3944_v8 = vpack.c.bf16 %v6574_v17, %v3943_v5 }
 0x1ea   : > { %6355 = vst [vmem:[%s7420_s26 + $0x2a] sm:$0x3] %v3902_v59  ;;  %6356 = vst [vmem:[%s7420_s26 + $0x2c] sm:$0x3] %v3909_v60  ;;  %v3951_v9 = vpack.c.bf16 %v6574_v17, %v3950_v6  ;;  %v3958_v10 = vpack.c.bf16 %v6574_v17, %v3957_v7  ;;  %v3964_v11 = vld [vmem:[#allocation2 + $0xf0] sm:$0xf] }
 0x1eb   : > { %6357 = vst [vmem:[%s7420_s26 + $0x2e] sm:$0x3] %v3916_v61  ;;  %v3971_v12 = vld [vmem:[#allocation2 + $0xf8] sm:$0xf]  ;;  %v3978_v13 = vld [vmem:[#allocation2 + $0x100] sm:$0xf]  ;;  %v3965_v14 = vpack.c.bf16 %v6574_v17, %v3964_v11 }
 0x1ec   : > { %6358 = vst [vmem:[%s7420_s26 + $0x30] sm:$0x3] %v3923_v2  ;;  %6359 = vst [vmem:[%s7420_s26 + $0x32] sm:$0x3] %v3930_v3  ;;  %v3972_v15 = vpack.c.bf16 %v6574_v17, %v3971_v12  ;;  %v3979_v16 = vpack.c.bf16 %v6574_v17, %v3978_v13  ;;  %v3985_v18 = vld [vmem:[#allocation2 + $0x108] sm:$0xf] }
 0x1ed   : > { %6360 = vst [vmem:[%s7420_s26 + $0x34] sm:$0x3] %v3937_v4  ;;  %v3992_v19 = vld [vmem:[#allocation2 + $0x110] sm:$0xf]  ;;  %v3999_v20 = vld [vmem:[#allocation2 + $0x118] sm:$0xf]  ;;  %v3986_v21 = vpack.c.bf16 %v6574_v17, %v3985_v18 }
 0x1ee   : > { %6361 = vst [vmem:[%s7420_s26 + $0x36] sm:$0x3] %v3944_v8  ;;  %6362 = vst [vmem:[%s7420_s26 + $0x38] sm:$0x3] %v3951_v9  ;;  %v3993_v22 = vpack.c.bf16 %v6574_v17, %v3992_v19  ;;  %v4000_v23 = vpack.c.bf16 %v6574_v17, %v3999_v20  ;;  %v4006_v1 = vld [vmem:[#allocation2 + $0x120] sm:$0xf] }
 0x1ef   : > { %6363 = vst [vmem:[%s7420_s26 + $0x3a] sm:$0x3] %v3958_v10  ;;  %v4013_v24 = vld [vmem:[#allocation2 + $0x128] sm:$0xf]  ;;  %v4020_v25 = vld [vmem:[#allocation2 + $0x130] sm:$0xf]  ;;  %v4007_v26 = vpack.c.bf16 %v6574_v17, %v4006_v1 }
 0x1f0   : > { %6364 = vst [vmem:[%s7420_s26 + $0x3c] sm:$0x3] %v3965_v14  ;;  %6365 = vst [vmem:[%s7420_s26 + $0x3e] sm:$0x3] %v3972_v15  ;;  %v4014_v27 = vpack.c.bf16 %v6574_v17, %v4013_v24  ;;  %v4021_v28 = vpack.c.bf16 %v6574_v17, %v4020_v25  ;;  %v4027_v29 = vld [vmem:[#allocation2 + $0x138] sm:$0xf] }
 0x1f1   : > { %6366 = vst [vmem:[%s7420_s26 + $0x40] sm:$0x3] %v3979_v16  ;;  %v4034_v30 = vld [vmem:[#allocation2 + $0x140] sm:$0xf]  ;;  %v4041_v31 = vld [vmem:[#allocation2 + $0x148] sm:$0xf]  ;;  %v4028_v32 = vpack.c.bf16 %v6574_v17, %v4027_v29 }
 0x1f2   : > { %6367 = vst [vmem:[%s7420_s26 + $0x42] sm:$0x3] %v3986_v21  ;;  %6368 = vst [vmem:[%s7420_s26 + $0x44] sm:$0x3] %v3993_v22  ;;  %v4035_v33 = vpack.c.bf16 %v6574_v17, %v4034_v30  ;;  %v4042_v34 = vpack.c.bf16 %v6574_v17, %v4041_v31  ;;  %v4048_v35 = vld [vmem:[#allocation2 + $0x150] sm:$0xf] }
 0x1f3   : > { %6369 = vst [vmem:[%s7420_s26 + $0x46] sm:$0x3] %v4000_v23  ;;  %v4055_v36 = vld [vmem:[#allocation2 + $0x158] sm:$0xf]  ;;  %v4062_v37 = vld [vmem:[#allocation2 + $0x160] sm:$0xf]  ;;  %v4049_v38 = vpack.c.bf16 %v6574_v17, %v4048_v35 }
 0x1f4   : > { %6370 = vst [vmem:[%s7420_s26 + $0x48] sm:$0x3] %v4007_v26  ;;  %6371 = vst [vmem:[%s7420_s26 + $0x4a] sm:$0x3] %v4014_v27  ;;  %v4056_v39 = vpack.c.bf16 %v6574_v17, %v4055_v36  ;;  %v4063_v40 = vpack.c.bf16 %v6574_v17, %v4062_v37  ;;  %v4069_v41 = vld [vmem:[#allocation2 + $0x168] sm:$0xf] }
 0x1f5   : > { %6372 = vst [vmem:[%s7420_s26 + $0x4c] sm:$0x3] %v4021_v28  ;;  %v4076_v42 = vld [vmem:[#allocation2 + $0x170] sm:$0xf]  ;;  %v4083_v43 = vld [vmem:[#allocation2 + $0x178] sm:$0xf]  ;;  %v4070_v44 = vpack.c.bf16 %v6574_v17, %v4069_v41 }
 0x1f6   : > { %6373 = vst [vmem:[%s7420_s26 + $0x4e] sm:$0x3] %v4028_v32  ;;  %6374 = vst [vmem:[%s7420_s26 + $0x50] sm:$0x3] %v4035_v33  ;;  %v4077_v45 = vpack.c.bf16 %v6574_v17, %v4076_v42  ;;  %v4084_v46 = vpack.c.bf16 %v6574_v17, %v4083_v43  ;;  %v4090_v47 = vld [vmem:[#allocation2 + $0x180] sm:$0xf] }
 0x1f7   : > { %6375 = vst [vmem:[%s7420_s26 + $0x52] sm:$0x3] %v4042_v34  ;;  %v4097_v48 = vld [vmem:[#allocation2 + $0x188] sm:$0xf]  ;;  %v4104_v49 = vld [vmem:[#allocation2 + $0x190] sm:$0xf]  ;;  %v4091_v50 = vpack.c.bf16 %v6574_v17, %v4090_v47 }
 0x1f8   : > { %6376 = vst [vmem:[%s7420_s26 + $0x54] sm:$0x3] %v4049_v38  ;;  %6377 = vst [vmem:[%s7420_s26 + $0x56] sm:$0x3] %v4056_v39  ;;  %v4098_v51 = vpack.c.bf16 %v6574_v17, %v4097_v48  ;;  %v4105_v52 = vpack.c.bf16 %v6574_v17, %v4104_v49  ;;  %v4111_v53 = vld [vmem:[#allocation2 + $0x198] sm:$0xf] }
 0x1f9   : > { %6378 = vst [vmem:[%s7420_s26 + $0x58] sm:$0x3] %v4063_v40  ;;  %v4118_v54 = vld [vmem:[#allocation2 + $0x1a0] sm:$0xf]  ;;  %v4125_v55 = vld [vmem:[#allocation2 + $0x1a8] sm:$0xf]  ;;  %v4112_v56 = vpack.c.bf16 %v6574_v17, %v4111_v53 }
 0x1fa   : > { %6379 = vst [vmem:[%s7420_s26 + $0x5a] sm:$0x3] %v4070_v44  ;;  %6380 = vst [vmem:[%s7420_s26 + $0x5c] sm:$0x3] %v4077_v45  ;;  %v4119_v57 = vpack.c.bf16 %v6574_v17, %v4118_v54  ;;  %v4126_v58 = vpack.c.bf16 %v6574_v17, %v4125_v55  ;;  %v4132_v59 = vld [vmem:[#allocation2 + $0x1b0] sm:$0xf] }
 0x1fb   : > { %6381 = vst [vmem:[%s7420_s26 + $0x5e] sm:$0x3] %v4084_v46  ;;  %v4139_v60 = vld [vmem:[#allocation2 + $0x1b8] sm:$0xf]  ;;  %v4146_v61 = vld [vmem:[#allocation2 + $0x1c0] sm:$0xf]  ;;  %v4133_v62 = vpack.c.bf16 %v6574_v17, %v4132_v59 }
 0x1fc   : > { %6382 = vst [vmem:[%s7420_s26 + $0x60] sm:$0x3] %v4091_v50  ;;  %6383 = vst [vmem:[%s7420_s26 + $0x62] sm:$0x3] %v4098_v51  ;;  %v4140_v63 = vpack.c.bf16 %v6574_v17, %v4139_v60  ;;  %v4147_v0 = vpack.c.bf16 %v6574_v17, %v4146_v61  ;;  %v4153_v2 = vld [vmem:[#allocation2 + $0x1c8] sm:$0xf] }
 0x1fd   : > { %6384 = vst [vmem:[%s7420_s26 + $0x64] sm:$0x3] %v4105_v52  ;;  %v4160_v3 = vld [vmem:[#allocation2 + $0x1d0] sm:$0xf]  ;;  %v4167_v4 = vld [vmem:[#allocation2 + $0x1d8] sm:$0xf]  ;;  %v4154_v5 = vpack.c.bf16 %v6574_v17, %v4153_v2 }
 0x1fe   : > { %6385 = vst [vmem:[%s7420_s26 + $0x66] sm:$0x3] %v4112_v56  ;;  %6386 = vst [vmem:[%s7420_s26 + $0x68] sm:$0x3] %v4119_v57  ;;  %v4161_v6 = vpack.c.bf16 %v6574_v17, %v4160_v3  ;;  %v4168_v7 = vpack.c.bf16 %v6574_v17, %v4167_v4  ;;  %v4174_v8 = vld [vmem:[#allocation2 + $0x1e0] sm:$0xf] }
 0x1ff   : > { %6387 = vst [vmem:[%s7420_s26 + $0x6a] sm:$0x3] %v4126_v58  ;;  %v4181_v9 = vld [vmem:[#allocation2 + $0x1e8] sm:$0xf]  ;;  %v4188_v10 = vld [vmem:[#allocation2 + $0x1f0] sm:$0xf]  ;;  %v4175_v11 = vpack.c.bf16 %v6574_v17, %v4174_v8 }
 0x200   : > { %6388 = vst [vmem:[%s7420_s26 + $0x6c] sm:$0x3] %v4133_v62  ;;  %6389 = vst [vmem:[%s7420_s26 + $0x6e] sm:$0x3] %v4140_v63  ;;  %v4182_v12 = vpack.c.bf16 %v6574_v17, %v4181_v9  ;;  %v4189_v13 = vpack.c.bf16 %v6574_v17, %v4188_v10  ;;  %v4195_v14 = vld [vmem:[#allocation2 + $0x1f8] sm:$0xf] }
 0x201   : > { %6390 = vst [vmem:[%s7420_s26 + $0x70] sm:$0x3] %v4147_v0  ;;  %v4202_v15 = vld [vmem:[#allocation2 + $0x200] sm:$0xf]  ;;  %v4209_v16 = vld [vmem:[#allocation2 + $0x208] sm:$0xf]  ;;  %v4196_v18 = vpack.c.bf16 %v6574_v17, %v4195_v14 }
 0x202   : > { %6391 = vst [vmem:[%s7420_s26 + $0x72] sm:$0x3] %v4154_v5  ;;  %6392 = vst [vmem:[%s7420_s26 + $0x74] sm:$0x3] %v4161_v6  ;;  %v4203_v19 = vpack.c.bf16 %v6574_v17, %v4202_v15  ;;  %v4210_v20 = vpack.c.bf16 %v6574_v17, %v4209_v16  ;;  %v4216_v21 = vld [vmem:[#allocation2 + $0x210] sm:$0xf] }
 0x203   : > { %6393 = vst [vmem:[%s7420_s26 + $0x76] sm:$0x3] %v4168_v7  ;;  %v4223_v22 = vld [vmem:[#allocation2 + $0x218] sm:$0xf]  ;;  %v4230_v23 = vld [vmem:[#allocation2 + $0x220] sm:$0xf]  ;;  %v4217_v1 = vpack.c.bf16 %v6574_v17, %v4216_v21 }
 0x204   : > { %6394 = vst [vmem:[%s7420_s26 + $0x78] sm:$0x3] %v4175_v11  ;;  %6395 = vst [vmem:[%s7420_s26 + $0x7a] sm:$0x3] %v4182_v12  ;;  %v4224_v24 = vpack.c.bf16 %v6574_v17, %v4223_v22  ;;  %v4231_v25 = vpack.c.bf16 %v6574_v17, %v4230_v23  ;;  %v4237_v26 = vld [vmem:[#allocation2 + $0x228] sm:$0xf] }
 0x205   : > { %6396 = vst [vmem:[%s7420_s26 + $0x7c] sm:$0x3] %v4189_v13  ;;  %v4244_v27 = vld [vmem:[#allocation2 + $0x230] sm:$0xf]  ;;  %v4251_v28 = vld [vmem:[#allocation2 + $0x238] sm:$0xf]  ;;  %v4238_v29 = vpack.c.bf16 %v6574_v17, %v4237_v26 }
 0x206   : > { %6397 = vst [vmem:[%s7420_s26 + $0x7e] sm:$0x3] %v4196_v18  ;;  %6398 = vst [vmem:[%s7420_s26 + $0x80] sm:$0x3] %v4203_v19  ;;  %v4245_v30 = vpack.c.bf16 %v6574_v17, %v4244_v27  ;;  %v4252_v31 = vpack.c.bf16 %v6574_v17, %v4251_v28  ;;  %v4258_v32 = vld [vmem:[#allocation2 + $0x240] sm:$0xf] }
 0x207   : > { %6399 = vst [vmem:[%s7420_s26 + $0x82] sm:$0x3] %v4210_v20  ;;  %v4265_v33 = vld [vmem:[#allocation2 + $0x248] sm:$0xf]  ;;  %v4272_v34 = vld [vmem:[#allocation2 + $0x250] sm:$0xf]  ;;  %v4259_v35 = vpack.c.bf16 %v6574_v17, %v4258_v32 }
 0x208   : > { %6400 = vst [vmem:[%s7420_s26 + $0x84] sm:$0x3] %v4217_v1  ;;  %6401 = vst [vmem:[%s7420_s26 + $0x86] sm:$0x3] %v4224_v24  ;;  %v4266_v36 = vpack.c.bf16 %v6574_v17, %v4265_v33  ;;  %v4273_v37 = vpack.c.bf16 %v6574_v17, %v4272_v34  ;;  %v4279_v38 = vld [vmem:[#allocation2 + $0x258] sm:$0xf] }
 0x209   : > { %6402 = vst [vmem:[%s7420_s26 + $0x88] sm:$0x3] %v4231_v25  ;;  %v4286_v39 = vld [vmem:[#allocation2 + $0x260] sm:$0xf]  ;;  %v4293_v40 = vld [vmem:[#allocation2 + $0x268] sm:$0xf]  ;;  %v4280_v41 = vpack.c.bf16 %v6574_v17, %v4279_v38 }
 0x20a   : > { %6403 = vst [vmem:[%s7420_s26 + $0x8a] sm:$0x3] %v4238_v29  ;;  %6404 = vst [vmem:[%s7420_s26 + $0x8c] sm:$0x3] %v4245_v30  ;;  %v4287_v42 = vpack.c.bf16 %v6574_v17, %v4286_v39  ;;  %v4294_v43 = vpack.c.bf16 %v6574_v17, %v4293_v40  ;;  %v4300_v44 = vld [vmem:[#allocation2 + $0x270] sm:$0xf] }
 0x20b   : > { %6405 = vst [vmem:[%s7420_s26 + $0x8e] sm:$0x3] %v4252_v31  ;;  %v4307_v45 = vld [vmem:[#allocation2 + $0x278] sm:$0xf]  ;;  %v4314_v46 = vld [vmem:[#allocation2 + $0x280] sm:$0xf]  ;;  %v4301_v47 = vpack.c.bf16 %v6574_v17, %v4300_v44 }
 0x20c   : > { %6406 = vst [vmem:[%s7420_s26 + $0x90] sm:$0x3] %v4259_v35  ;;  %6407 = vst [vmem:[%s7420_s26 + $0x92] sm:$0x3] %v4266_v36  ;;  %v4308_v48 = vpack.c.bf16 %v6574_v17, %v4307_v45  ;;  %v4315_v49 = vpack.c.bf16 %v6574_v17, %v4314_v46  ;;  %v4321_v50 = vld [vmem:[#allocation2 + $0x288] sm:$0xf] }
 0x20d   : > { %6408 = vst [vmem:[%s7420_s26 + $0x94] sm:$0x3] %v4273_v37  ;;  %v4328_v51 = vld [vmem:[#allocation2 + $0x290] sm:$0xf]  ;;  %v4335_v52 = vld [vmem:[#allocation2 + $0x298] sm:$0xf]  ;;  %v4322_v53 = vpack.c.bf16 %v6574_v17, %v4321_v50 }
 0x20e   : > { %6409 = vst [vmem:[%s7420_s26 + $0x96] sm:$0x3] %v4280_v41  ;;  %6410 = vst [vmem:[%s7420_s26 + $0x98] sm:$0x3] %v4287_v42  ;;  %v4329_v54 = vpack.c.bf16 %v6574_v17, %v4328_v51  ;;  %v4336_v55 = vpack.c.bf16 %v6574_v17, %v4335_v52  ;;  %v4342_v56 = vld [vmem:[#allocation2 + $0x2a0] sm:$0xf] }
 0x20f   : > { %6411 = vst [vmem:[%s7420_s26 + $0x9a] sm:$0x3] %v4294_v43  ;;  %v4349_v57 = vld [vmem:[#allocation2 + $0x2a8] sm:$0xf]  ;;  %v4356_v58 = vld [vmem:[#allocation2 + $0x2b0] sm:$0xf]  ;;  %v4343_v59 = vpack.c.bf16 %v6574_v17, %v4342_v56 }
 0x210   : > { %6412 = vst [vmem:[%s7420_s26 + $0x9c] sm:$0x3] %v4301_v47  ;;  %6413 = vst [vmem:[%s7420_s26 + $0x9e] sm:$0x3] %v4308_v48  ;;  %v4350_v60 = vpack.c.bf16 %v6574_v17, %v4349_v57  ;;  %v4357_v61 = vpack.c.bf16 %v6574_v17, %v4356_v58  ;;  %v4363_v62 = vld [vmem:[#allocation2 + $0x2b8] sm:$0xf] }
 0x211   : > { %6414 = vst [vmem:[%s7420_s26 + $0xa0] sm:$0x3] %v4315_v49  ;;  %v4370_v63 = vld [vmem:[#allocation2 + $0x2c0] sm:$0xf]  ;;  %v4377_v0 = vld [vmem:[#allocation2 + $0x2c8] sm:$0xf]  ;;  %v4364_v2 = vpack.c.bf16 %v6574_v17, %v4363_v62 }
 0x212   : > { %6415 = vst [vmem:[%s7420_s26 + $0xa2] sm:$0x3] %v4322_v53  ;;  %6416 = vst [vmem:[%s7420_s26 + $0xa4] sm:$0x3] %v4329_v54  ;;  %v4371_v3 = vpack.c.bf16 %v6574_v17, %v4370_v63  ;;  %v4378_v4 = vpack.c.bf16 %v6574_v17, %v4377_v0  ;;  %v4384_v5 = vld [vmem:[#allocation2 + $0x2d0] sm:$0xf] }
 0x213   : > { %6417 = vst [vmem:[%s7420_s26 + $0xa6] sm:$0x3] %v4336_v55  ;;  %v4391_v6 = vld [vmem:[#allocation2 + $0x2d8] sm:$0xf]  ;;  %v4398_v7 = vld [vmem:[#allocation2 + $0x2e0] sm:$0xf]  ;;  %v4385_v8 = vpack.c.bf16 %v6574_v17, %v4384_v5 }
 0x214   : > { %6418 = vst [vmem:[%s7420_s26 + $0xa8] sm:$0x3] %v4343_v59  ;;  %6419 = vst [vmem:[%s7420_s26 + $0xaa] sm:$0x3] %v4350_v60  ;;  %v4392_v9 = vpack.c.bf16 %v6574_v17, %v4391_v6  ;;  %v4399_v10 = vpack.c.bf16 %v6574_v17, %v4398_v7  ;;  %v4405_v11 = vld [vmem:[#allocation2 + $0x2e8] sm:$0xf] }
 0x215   : > { %6420 = vst [vmem:[%s7420_s26 + $0xac] sm:$0x3] %v4357_v61  ;;  %v4412_v12 = vld [vmem:[#allocation2 + $0x2f0] sm:$0xf]  ;;  %v4419_v13 = vld [vmem:[#allocation2 + $0x2f8] sm:$0xf]  ;;  %v4406_v14 = vpack.c.bf16 %v6574_v17, %v4405_v11 }
 0x216   : > { %6421 = vst [vmem:[%s7420_s26 + $0xae] sm:$0x3] %v4364_v2  ;;  %6422 = vst [vmem:[%s7420_s26 + $0xb0] sm:$0x3] %v4371_v3  ;;  %v4413_v15 = vpack.c.bf16 %v6574_v17, %v4412_v12  ;;  %v4420_v16 = vpack.c.bf16 %v6574_v17, %v4419_v13  ;;  %v4426_v18 = vld [vmem:[#allocation2 + $0x300] sm:$0xf] }
 0x217   : > { %6423 = vst [vmem:[%s7420_s26 + $0xb2] sm:$0x3] %v4378_v4  ;;  %v4433_v19 = vld [vmem:[#allocation2 + $0x308] sm:$0xf]  ;;  %v4440_v20 = vld [vmem:[#allocation2 + $0x310] sm:$0xf]  ;;  %v4427_v21 = vpack.c.bf16 %v6574_v17, %v4426_v18 }
 0x218   : > { %6424 = vst [vmem:[%s7420_s26 + $0xb4] sm:$0x3] %v4385_v8  ;;  %6425 = vst [vmem:[%s7420_s26 + $0xb6] sm:$0x3] %v4392_v9  ;;  %v4434_v22 = vpack.c.bf16 %v6574_v17, %v4433_v19  ;;  %v4441_v23 = vpack.c.bf16 %v6574_v17, %v4440_v20  ;;  %v4447_v1 = vld [vmem:[#allocation2 + $0x318] sm:$0xf] }
 0x219   : > { %6426 = vst [vmem:[%s7420_s26 + $0xb8] sm:$0x3] %v4399_v10  ;;  %v4454_v24 = vld [vmem:[#allocation2 + $0x320] sm:$0xf]  ;;  %v4461_v25 = vld [vmem:[#allocation2 + $0x328] sm:$0xf]  ;;  %v4448_v26 = vpack.c.bf16 %v6574_v17, %v4447_v1 }
 0x21a   : > { %6427 = vst [vmem:[%s7420_s26 + $0xba] sm:$0x3] %v4406_v14  ;;  %6428 = vst [vmem:[%s7420_s26 + $0xbc] sm:$0x3] %v4413_v15  ;;  %v4455_v27 = vpack.c.bf16 %v6574_v17, %v4454_v24  ;;  %v4462_v28 = vpack.c.bf16 %v6574_v17, %v4461_v25  ;;  %v4468_v29 = vld [vmem:[#allocation2 + $0x330] sm:$0xf] }
 0x21b   : > { %6429 = vst [vmem:[%s7420_s26 + $0xbe] sm:$0x3] %v4420_v16  ;;  %v4475_v30 = vld [vmem:[#allocation2 + $0x338] sm:$0xf]  ;;  %v4482_v31 = vld [vmem:[#allocation2 + $0x340] sm:$0xf]  ;;  %v4469_v32 = vpack.c.bf16 %v6574_v17, %v4468_v29 }
 0x21c   : > { %6430 = vst [vmem:[%s7420_s26 + $0xc0] sm:$0x3] %v4427_v21  ;;  %6431 = vst [vmem:[%s7420_s26 + $0xc2] sm:$0x3] %v4434_v22  ;;  %v4476_v33 = vpack.c.bf16 %v6574_v17, %v4475_v30  ;;  %v4483_v34 = vpack.c.bf16 %v6574_v17, %v4482_v31  ;;  %v4489_v35 = vld [vmem:[#allocation2 + $0x348] sm:$0xf] }
 0x21d   : > { %6432 = vst [vmem:[%s7420_s26 + $0xc4] sm:$0x3] %v4441_v23  ;;  %v4496_v36 = vld [vmem:[#allocation2 + $0x350] sm:$0xf]  ;;  %v4503_v37 = vld [vmem:[#allocation2 + $0x358] sm:$0xf]  ;;  %v4490_v38 = vpack.c.bf16 %v6574_v17, %v4489_v35 }
 0x21e   : > { %6433 = vst [vmem:[%s7420_s26 + $0xc6] sm:$0x3] %v4448_v26  ;;  %6434 = vst [vmem:[%s7420_s26 + $0xc8] sm:$0x3] %v4455_v27  ;;  %v4497_v39 = vpack.c.bf16 %v6574_v17, %v4496_v36  ;;  %v4504_v40 = vpack.c.bf16 %v6574_v17, %v4503_v37  ;;  %v4510_v41 = vld [vmem:[#allocation2 + $0x360] sm:$0xf] }
 0x21f   : > { %6435 = vst [vmem:[%s7420_s26 + $0xca] sm:$0x3] %v4462_v28  ;;  %v4517_v42 = vld [vmem:[#allocation2 + $0x368] sm:$0xf]  ;;  %v4524_v43 = vld [vmem:[#allocation2 + $0x370] sm:$0xf]  ;;  %v4511_v44 = vpack.c.bf16 %v6574_v17, %v4510_v41 }
 0x220   : > { %6436 = vst [vmem:[%s7420_s26 + $0xcc] sm:$0x3] %v4469_v32  ;;  %6437 = vst [vmem:[%s7420_s26 + $0xce] sm:$0x3] %v4476_v33  ;;  %v4518_v45 = vpack.c.bf16 %v6574_v17, %v4517_v42  ;;  %v4525_v46 = vpack.c.bf16 %v6574_v17, %v4524_v43  ;;  %v4531_v47 = vld [vmem:[#allocation2 + $0x378] sm:$0xf] }
 0x221   : > { %6438 = vst [vmem:[%s7420_s26 + $0xd0] sm:$0x3] %v4483_v34  ;;  %v4538_v48 = vld [vmem:[#allocation2 + $0x380] sm:$0xf]  ;;  %v4545_v49 = vld [vmem:[#allocation2 + $0x388] sm:$0xf]  ;;  %v4532_v50 = vpack.c.bf16 %v6574_v17, %v4531_v47 }
 0x222   : > { %6439 = vst [vmem:[%s7420_s26 + $0xd2] sm:$0x3] %v4490_v38  ;;  %6440 = vst [vmem:[%s7420_s26 + $0xd4] sm:$0x3] %v4497_v39  ;;  %v4539_v51 = vpack.c.bf16 %v6574_v17, %v4538_v48  ;;  %v4546_v52 = vpack.c.bf16 %v6574_v17, %v4545_v49  ;;  %v4552_v53 = vld [vmem:[#allocation2 + $0x390] sm:$0xf] }
 0x223   : > { %6441 = vst [vmem:[%s7420_s26 + $0xd6] sm:$0x3] %v4504_v40  ;;  %v4559_v54 = vld [vmem:[#allocation2 + $0x398] sm:$0xf]  ;;  %v4566_v55 = vld [vmem:[#allocation2 + $0x3a0] sm:$0xf]  ;;  %v4553_v56 = vpack.c.bf16 %v6574_v17, %v4552_v53 }
 0x224   : > { %6442 = vst [vmem:[%s7420_s26 + $0xd8] sm:$0x3] %v4511_v44  ;;  %6443 = vst [vmem:[%s7420_s26 + $0xda] sm:$0x3] %v4518_v45  ;;  %v4560_v57 = vpack.c.bf16 %v6574_v17, %v4559_v54  ;;  %v4567_v58 = vpack.c.bf16 %v6574_v17, %v4566_v55  ;;  %v4573_v59 = vld [vmem:[#allocation2 + $0x3a8] sm:$0xf] }
 0x225   : > { %6444 = vst [vmem:[%s7420_s26 + $0xdc] sm:$0x3] %v4525_v46  ;;  %v4580_v60 = vld [vmem:[#allocation2 + $0x3b0] sm:$0xf]  ;;  %v4587_v61 = vld [vmem:[#allocation2 + $0x3b8] sm:$0xf]  ;;  %v4574_v62 = vpack.c.bf16 %v6574_v17, %v4573_v59 }
 0x226   : > { %6445 = vst [vmem:[%s7420_s26 + $0xde] sm:$0x3] %v4532_v50  ;;  %6446 = vst [vmem:[%s7420_s26 + $0xe0] sm:$0x3] %v4539_v51  ;;  %v4581_v63 = vpack.c.bf16 %v6574_v17, %v4580_v60  ;;  %v4588_v0 = vpack.c.bf16 %v6574_v17, %v4587_v61  ;;  %v4594_v2 = vld [vmem:[#allocation2 + $0x3c0] sm:$0xf] }
 0x227   : > { %6447 = vst [vmem:[%s7420_s26 + $0xe2] sm:$0x3] %v4546_v52  ;;  %v4601_v3 = vld [vmem:[#allocation2 + $0x3c8] sm:$0xf]  ;;  %v4608_v4 = vld [vmem:[#allocation2 + $0x3d0] sm:$0xf]  ;;  %v4595_v5 = vpack.c.bf16 %v6574_v17, %v4594_v2 }
 0x228   : > { %6448 = vst [vmem:[%s7420_s26 + $0xe4] sm:$0x3] %v4553_v56  ;;  %6449 = vst [vmem:[%s7420_s26 + $0xe6] sm:$0x3] %v4560_v57  ;;  %v4602_v6 = vpack.c.bf16 %v6574_v17, %v4601_v3  ;;  %v4609_v7 = vpack.c.bf16 %v6574_v17, %v4608_v4  ;;  %v4615_v8 = vld [vmem:[#allocation2 + $0x3d8] sm:$0xf] }
 0x229   : > { %6450 = vst [vmem:[%s7420_s26 + $0xe8] sm:$0x3] %v4567_v58  ;;  %v4622_v9 = vld [vmem:[#allocation2 + $0x3e0] sm:$0xf]  ;;  %v4629_v10 = vld [vmem:[#allocation2 + $0x3e8] sm:$0xf]  ;;  %v4616_v11 = vpack.c.bf16 %v6574_v17, %v4615_v8 }
 0x22a   : > { %6451 = vst [vmem:[%s7420_s26 + $0xea] sm:$0x3] %v4574_v62  ;;  %6452 = vst [vmem:[%s7420_s26 + $0xec] sm:$0x3] %v4581_v63  ;;  %v4623_v12 = vpack.c.bf16 %v6574_v17, %v4622_v9  ;;  %v4630_v13 = vpack.c.bf16 %v6574_v17, %v4629_v10  ;;  %v4636_v14 = vld [vmem:[#allocation2 + $0x3f0] sm:$0xf] }
 0x22b   : > { %6453 = vst [vmem:[%s7420_s26 + $0xee] sm:$0x3] %v4588_v0  ;;  %v4643_v15 = vld [vmem:[#allocation2 + $0x3f8] sm:$0xf]  ;;  %6454 = vst [vmem:[%s7420_s26 + $0xf0] sm:$0x3] %v4595_v5  ;;  %v4637_v16 = vpack.c.bf16 %v6574_v17, %v4636_v14 }
 0x22c   : > { %6455 = vst [vmem:[%s7420_s26 + $0xf2] sm:$0x3] %v4602_v6  ;;  %6456 = vst [vmem:[%s7420_s26 + $0xf4] sm:$0x3] %v4609_v7  ;;  %v4644_v17 = vpack.c.bf16 %v6574_v17, %v4643_v15  ;;  %v4679_v18 = vld [vmem:[%s7420_s26] sm:$0xf]  }
 0x22d   : > { %v4683_v19 = vld [vmem:[%s7420_s26 + $0x4] sm:$0xf]   ;;  %v4687_v20 = vld [vmem:[%s7420_s26 + $0x8] sm:$0xf]   ;;  %6457 = vst [vmem:[%s7420_s26 + $0xf6] sm:$0x3] %v4616_v11 }
 0x22e   : > { %6458 = vst [vmem:[%s7420_s26 + $0xf8] sm:$0x3] %v4623_v12  ;;  %6459 = vst [vmem:[%s7420_s26 + $0xfa] sm:$0x3] %v4630_v13  ;;  %v4691_v21 = vld [vmem:[%s7420_s26 + $0xc] sm:$0xf]  }
 0x22f   : > { %4680 = vst [vmem:[%s7671_s30] sm:$0xf] %v4679_v18   ;;  %4684 = vst [vmem:[%s7671_s30 + $0x8] sm:$0xf] %v4683_v19   ;;  %v4695_v22 = vld [vmem:[%s7420_s26 + $0x10] sm:$0xf]  }
 0x230   : > { %4688 = vst [vmem:[%s7671_s30 + $0x10] sm:$0xf] %v4687_v20   ;;  %v4699_v23 = vld [vmem:[%s7420_s26 + $0x14] sm:$0xf]   ;;  %6460 = vst [vmem:[%s7420_s26 + $0xfc] sm:$0x3] %v4637_v16 }
 0x231   : > { %6461 = vst [vmem:[%s7420_s26 + $0xfe] sm:$0x3] %v4644_v17  ;;  %4692 = vst [vmem:[%s7671_s30 + $0x18] sm:$0xf] %v4691_v21   ;;  %v4703_v1 = vld [vmem:[%s7420_s26 + $0x18] sm:$0xf]  }
 0x232   : > { %4696 = vst [vmem:[%s7671_s30 + $0x20] sm:$0xf] %v4695_v22   ;;  %4700 = vst [vmem:[%s7671_s30 + $0x28] sm:$0xf] %v4699_v23   ;;  %v4707_v24 = vld [vmem:[%s7420_s26 + $0x1c] sm:$0xf]  }
 0x233   : > { %v4711_v25 = vld [vmem:[%s7420_s26 + $0x20] sm:$0xf]   ;;  %4704 = vst [vmem:[%s7671_s30 + $0x30] sm:$0xf] %v4703_v1   ;;  %4708 = vst [vmem:[%s7671_s30 + $0x38] sm:$0xf] %v4707_v24  }
 0x234   : > { %4712 = vst [vmem:[%s7671_s30 + $0x40] sm:$0xf] %v4711_v25   ;;  %v4715_v26 = vld [vmem:[%s7420_s26 + $0x24] sm:$0xf]   ;;  %v4719_v27 = vld [vmem:[%s7420_s26 + $0x28] sm:$0xf]  }
 0x235   : > { %v4723_v28 = vld [vmem:[%s7420_s26 + $0x2c] sm:$0xf]   ;;  %4716 = vst [vmem:[%s7671_s30 + $0x48] sm:$0xf] %v4715_v26   ;;  %4720 = vst [vmem:[%s7671_s30 + $0x50] sm:$0xf] %v4719_v27  }
 0x236   : > { %4724 = vst [vmem:[%s7671_s30 + $0x58] sm:$0xf] %v4723_v28   ;;  %v4727_v29 = vld [vmem:[%s7420_s26 + $0x30] sm:$0xf]   ;;  %v4731_v30 = vld [vmem:[%s7420_s26 + $0x34] sm:$0xf]  }
 0x237   : > { %v4735_v31 = vld [vmem:[%s7420_s26 + $0x38] sm:$0xf]   ;;  %4728 = vst [vmem:[%s7671_s30 + $0x60] sm:$0xf] %v4727_v29   ;;  %4732 = vst [vmem:[%s7671_s30 + $0x68] sm:$0xf] %v4731_v30  }
 0x238   : > { %4736 = vst [vmem:[%s7671_s30 + $0x70] sm:$0xf] %v4735_v31   ;;  %v4739_v32 = vld [vmem:[%s7420_s26 + $0x3c] sm:$0xf]   ;;  %v4743_v33 = vld [vmem:[%s7420_s26 + $0x40] sm:$0xf]  }
 0x239   : > { %v4747_v34 = vld [vmem:[%s7420_s26 + $0x44] sm:$0xf]   ;;  %4740 = vst [vmem:[%s7671_s30 + $0x78] sm:$0xf] %v4739_v32   ;;  %4744 = vst [vmem:[%s7671_s30 + $0x80] sm:$0xf] %v4743_v33  }
 0x23a   : > { %4748 = vst [vmem:[%s7671_s30 + $0x88] sm:$0xf] %v4747_v34   ;;  %v4751_v35 = vld [vmem:[%s7420_s26 + $0x48] sm:$0xf]   ;;  %v4755_v36 = vld [vmem:[%s7420_s26 + $0x4c] sm:$0xf]  }
 0x23b   : > { %v4759_v37 = vld [vmem:[%s7420_s26 + $0x50] sm:$0xf]   ;;  %4752 = vst [vmem:[%s7671_s30 + $0x90] sm:$0xf] %v4751_v35   ;;  %4756 = vst [vmem:[%s7671_s30 + $0x98] sm:$0xf] %v4755_v36  }
 0x23c   : > { %4760 = vst [vmem:[%s7671_s30 + $0xa0] sm:$0xf] %v4759_v37   ;;  %v4763_v38 = vld [vmem:[%s7420_s26 + $0x54] sm:$0xf]   ;;  %v4767_v39 = vld [vmem:[%s7420_s26 + $0x58] sm:$0xf]  }
 0x23d   : > { %v4771_v40 = vld [vmem:[%s7420_s26 + $0x5c] sm:$0xf]   ;;  %4764 = vst [vmem:[%s7671_s30 + $0xa8] sm:$0xf] %v4763_v38   ;;  %4768 = vst [vmem:[%s7671_s30 + $0xb0] sm:$0xf] %v4767_v39  }
 0x23e   : > { %4772 = vst [vmem:[%s7671_s30 + $0xb8] sm:$0xf] %v4771_v40   ;;  %v4775_v41 = vld [vmem:[%s7420_s26 + $0x60] sm:$0xf]   ;;  %v4779_v42 = vld [vmem:[%s7420_s26 + $0x64] sm:$0xf]  }
 0x23f   : > { %v4783_v43 = vld [vmem:[%s7420_s26 + $0x68] sm:$0xf]   ;;  %4776 = vst [vmem:[%s7671_s30 + $0xc0] sm:$0xf] %v4775_v41   ;;  %4780 = vst [vmem:[%s7671_s30 + $0xc8] sm:$0xf] %v4779_v42  }
 0x240   : > { %4784 = vst [vmem:[%s7671_s30 + $0xd0] sm:$0xf] %v4783_v43   ;;  %v4787_v44 = vld [vmem:[%s7420_s26 + $0x6c] sm:$0xf]   ;;  %v4791_v45 = vld [vmem:[%s7420_s26 + $0x70] sm:$0xf]  }
 0x241   : > { %v4795_v46 = vld [vmem:[%s7420_s26 + $0x74] sm:$0xf]   ;;  %4788 = vst [vmem:[%s7671_s30 + $0xd8] sm:$0xf] %v4787_v44   ;;  %4792 = vst [vmem:[%s7671_s30 + $0xe0] sm:$0xf] %v4791_v45  }
 0x242   : > { %4796 = vst [vmem:[%s7671_s30 + $0xe8] sm:$0xf] %v4795_v46   ;;  %v4799_v47 = vld [vmem:[%s7420_s26 + $0x78] sm:$0xf]   ;;  %v4803_v48 = vld [vmem:[%s7420_s26 + $0x7c] sm:$0xf]  }
 0x243   : > { %v4807_v49 = vld [vmem:[%s7420_s26 + $0x80] sm:$0xf]   ;;  %4800 = vst [vmem:[%s7671_s30 + $0xf0] sm:$0xf] %v4799_v47   ;;  %4804 = vst [vmem:[%s7671_s30 + $0xf8] sm:$0xf] %v4803_v48  }
 0x244   : > { %4808 = vst [vmem:[%s7671_s30 + $0x100] sm:$0xf] %v4807_v49   ;;  %v4811_v50 = vld [vmem:[%s7420_s26 + $0x84] sm:$0xf]   ;;  %v4815_v51 = vld [vmem:[%s7420_s26 + $0x88] sm:$0xf]  }
 0x245   : > { %v4819_v52 = vld [vmem:[%s7420_s26 + $0x8c] sm:$0xf]   ;;  %4812 = vst [vmem:[%s7671_s30 + $0x108] sm:$0xf] %v4811_v50   ;;  %4816 = vst [vmem:[%s7671_s30 + $0x110] sm:$0xf] %v4815_v51  }
 0x246   : > { %4820 = vst [vmem:[%s7671_s30 + $0x118] sm:$0xf] %v4819_v52   ;;  %v4823_v53 = vld [vmem:[%s7420_s26 + $0x90] sm:$0xf]   ;;  %v4827_v54 = vld [vmem:[%s7420_s26 + $0x94] sm:$0xf]  }
 0x247   : > { %v4831_v55 = vld [vmem:[%s7420_s26 + $0x98] sm:$0xf]   ;;  %4824 = vst [vmem:[%s7671_s30 + $0x120] sm:$0xf] %v4823_v53   ;;  %4828 = vst [vmem:[%s7671_s30 + $0x128] sm:$0xf] %v4827_v54  }
 0x248   : > { %4832 = vst [vmem:[%s7671_s30 + $0x130] sm:$0xf] %v4831_v55   ;;  %v4835_v56 = vld [vmem:[%s7420_s26 + $0x9c] sm:$0xf]   ;;  %v4839_v57 = vld [vmem:[%s7420_s26 + $0xa0] sm:$0xf]  }
 0x249   : > { %v4843_v58 = vld [vmem:[%s7420_s26 + $0xa4] sm:$0xf]   ;;  %4836 = vst [vmem:[%s7671_s30 + $0x138] sm:$0xf] %v4835_v56   ;;  %4840 = vst [vmem:[%s7671_s30 + $0x140] sm:$0xf] %v4839_v57  }
 0x24a   : > { %4844 = vst [vmem:[%s7671_s30 + $0x148] sm:$0xf] %v4843_v58   ;;  %v4847_v59 = vld [vmem:[%s7420_s26 + $0xa8] sm:$0xf]   ;;  %v4851_v60 = vld [vmem:[%s7420_s26 + $0xac] sm:$0xf]  }
 0x24b   : > { %v4855_v61 = vld [vmem:[%s7420_s26 + $0xb0] sm:$0xf]   ;;  %4848 = vst [vmem:[%s7671_s30 + $0x150] sm:$0xf] %v4847_v59   ;;  %4852 = vst [vmem:[%s7671_s30 + $0x158] sm:$0xf] %v4851_v60  }
 0x24c   : > { %4856 = vst [vmem:[%s7671_s30 + $0x160] sm:$0xf] %v4855_v61   ;;  %v4859_v62 = vld [vmem:[%s7420_s26 + $0xb4] sm:$0xf]   ;;  %v4863_v63 = vld [vmem:[%s7420_s26 + $0xb8] sm:$0xf]  }
 0x24d   : > { %v4867_v0 = vld [vmem:[%s7420_s26 + $0xbc] sm:$0xf]   ;;  %4860 = vst [vmem:[%s7671_s30 + $0x168] sm:$0xf] %v4859_v62   ;;  %4864 = vst [vmem:[%s7671_s30 + $0x170] sm:$0xf] %v4863_v63  }
 0x24e   : > { %4868 = vst [vmem:[%s7671_s30 + $0x178] sm:$0xf] %v4867_v0   ;;  %v4871_v2 = vld [vmem:[%s7420_s26 + $0xc0] sm:$0xf]   ;;  %v4875_v3 = vld [vmem:[%s7420_s26 + $0xc4] sm:$0xf]  }
 0x24f   : > { %v4879_v4 = vld [vmem:[%s7420_s26 + $0xc8] sm:$0xf]   ;;  %4872 = vst [vmem:[%s7671_s30 + $0x180] sm:$0xf] %v4871_v2   ;;  %4876 = vst [vmem:[%s7671_s30 + $0x188] sm:$0xf] %v4875_v3  }
 0x250   : > { %4880 = vst [vmem:[%s7671_s30 + $0x190] sm:$0xf] %v4879_v4   ;;  %v4883_v5 = vld [vmem:[%s7420_s26 + $0xcc] sm:$0xf]   ;;  %v4887_v6 = vld [vmem:[%s7420_s26 + $0xd0] sm:$0xf]  }
 0x251   : > { %v4891_v7 = vld [vmem:[%s7420_s26 + $0xd4] sm:$0xf]   ;;  %4884 = vst [vmem:[%s7671_s30 + $0x198] sm:$0xf] %v4883_v5   ;;  %4888 = vst [vmem:[%s7671_s30 + $0x1a0] sm:$0xf] %v4887_v6  }
 0x252   : > { %4892 = vst [vmem:[%s7671_s30 + $0x1a8] sm:$0xf] %v4891_v7   ;;  %v4895_v8 = vld [vmem:[%s7420_s26 + $0xd8] sm:$0xf]   ;;  %v4899_v9 = vld [vmem:[%s7420_s26 + $0xdc] sm:$0xf]  }
 0x253   : > { %v4903_v10 = vld [vmem:[%s7420_s26 + $0xe0] sm:$0xf]   ;;  %4896 = vst [vmem:[%s7671_s30 + $0x1b0] sm:$0xf] %v4895_v8   ;;  %4900 = vst [vmem:[%s7671_s30 + $0x1b8] sm:$0xf] %v4899_v9  }
 0x254   : > { %4904 = vst [vmem:[%s7671_s30 + $0x1c0] sm:$0xf] %v4903_v10   ;;  %v4907_v11 = vld [vmem:[%s7420_s26 + $0xe4] sm:$0xf]   ;;  %v4911_v12 = vld [vmem:[%s7420_s26 + $0xe8] sm:$0xf]  }
 0x255   : > { %v4915_v13 = vld [vmem:[%s7420_s26 + $0xec] sm:$0xf]   ;;  %4908 = vst [vmem:[%s7671_s30 + $0x1c8] sm:$0xf] %v4907_v11   ;;  %4912 = vst [vmem:[%s7671_s30 + $0x1d0] sm:$0xf] %v4911_v12  }
 0x256   : > { %4916 = vst [vmem:[%s7671_s30 + $0x1d8] sm:$0xf] %v4915_v13   ;;  %v4919_v14 = vld [vmem:[%s7420_s26 + $0xf0] sm:$0xf]   ;;  %v4923_v15 = vld [vmem:[%s7420_s26 + $0xf4] sm:$0xf]  }
 0x257   : > { %v4927_v16 = vld [vmem:[%s7420_s26 + $0xf8] sm:$0xf]   ;;  %4920 = vst [vmem:[%s7671_s30 + $0x1e0] sm:$0xf] %v4919_v14   ;;  %4924 = vst [vmem:[%s7671_s30 + $0x1e8] sm:$0xf] %v4923_v15  }
 0x258   : > { %4928 = vst [vmem:[%s7671_s30 + $0x1f0] sm:$0xf] %v4927_v16   ;;  %v4931_v17 = vld [vmem:[%s7420_s26 + $0xfc] sm:$0xf]  }
 0x259   : > { %4932 = vst [vmem:[%s7671_s30 + $0x1f8] sm:$0xf] %v4931_v17  }
 0x25a PF: > { %s7_s8 = sadd.s32 1, %s6564_s8   ;;  %s7819_s6 = smov %s6560_s7 }
 0x25b   : > { %p4_p6 = scmp.ge.s32.totalorder %s7_s8, 4   ;;  %s7820_s7 = smov %s7822_s10 }
 0x25d   :  { %6 = sbr.rel (!%p4_p6) target bundleno = 2 (0x2), region = 1540 }

// kernel: reverse.25
= control target key start
LH: loop header
LB: loop body
LE: loop exit
PB: predicated region body
PF: predicated region fallthrough
CT: control target
= control target key end

     0   :  { %v755_v3 = vmov 0.0   ;;  %s1522_s0 = inlined_call_operand.vmem [shape: f32[32,32,3,3,3], index: 0, kind: input, shape index: {}]   ;;  %s1523_s1 = inlined_call_operand.vmem [shape: bf16[32,32,3,3,3], index: 1, kind: output, shape index: {}]  }
   0x1   :  { %v540_v0 = vld [vmem:[%s1522_s0 + $0x340] sm:$0xff]  ;;  %v592_v55 = vld [vmem:[%s1522_s0 + $0x348] sm:$0xff] }
   0x2   :  { %v541_v1 = vld [vmem:[%s1522_s0 + $0x220] sm:$0xff]  ;;  %v4_v4 = vpack.c.bf16 %v755_v3, %v540_v0  ;;  %v594_v56 = vld [vmem:[%s1522_s0 + $0x228] sm:$0xff]  ;;  %v138_v58 = vpack.c.bf16 %v755_v3, %v592_v55 }
   0x3   :  { %v543_v2 = vld [vmem:[%s1522_s0 + $0x100] sm:$0xff]  ;;  %v9_v5 = vpack.c.bf16 %v755_v3, %v541_v1  ;;  %v596_v57 = vld [vmem:[%s1522_s0 + $0x108] sm:$0xff]  ;;  %v143_v59 = vpack.c.bf16 %v755_v3, %v594_v56 }
   0x4   :  { %v14_v6 = vpack.c.bf16 %v755_v3, %v543_v2  ;;  %v545_v7 = vld [vmem:[%s1522_s0 + $0x2e0] sm:$0xff]  ;;  %5 = vst [vmem:[%s1523_s1] sm:$0xf] %v4_v4  ;;  %v148_v60 = vpack.c.bf16 %v755_v3, %v596_v57  ;;  %v598_v61 = vld [vmem:[%s1522_s0 + $0x2e8] sm:$0xff]  ;;  %593 = vst [vmem:[%s1523_s1 + $0x4] sm:$0xf] %v138_v58 }
   0x5   :  { %v547_v8 = vld [vmem:[%s1522_s0 + $0x1c0] sm:$0xff]  ;;  %v19_v10 = vpack.c.bf16 %v755_v3, %v545_v7  ;;  %542 = vst [vmem:[%s1523_s1 + $0x90] sm:$0xf] %v9_v5  ;;  %v600_v62 = vld [vmem:[%s1522_s0 + $0x1c8] sm:$0xff]  ;;  %v153_v0 = vpack.c.bf16 %v755_v3, %v598_v61  ;;  %595 = vst [vmem:[%s1523_s1 + $0x94] sm:$0xf] %v143_v59 }
   0x6   :  { %v549_v9 = vld [vmem:[%s1522_s0 + $0xa0] sm:$0xff]  ;;  %v24_v11 = vpack.c.bf16 %v755_v3, %v547_v8  ;;  %544 = vst [vmem:[%s1523_s1 + $0x120] sm:$0xf] %v14_v6  ;;  %v602_v63 = vld [vmem:[%s1522_s0 + $0xa8] sm:$0xff]  ;;  %v158_v1 = vpack.c.bf16 %v755_v3, %v600_v62  ;;  %597 = vst [vmem:[%s1523_s1 + $0x124] sm:$0xf] %v148_v60 }
   0x7   :  { %v29_v12 = vpack.c.bf16 %v755_v3, %v549_v9  ;;  %v551_v13 = vld [vmem:[%s1522_s0 + $0x280] sm:$0xff]  ;;  %546 = vst [vmem:[%s1523_s1 + $0x30] sm:$0xf] %v19_v10  ;;  %v163_v2 = vpack.c.bf16 %v755_v3, %v602_v63  ;;  %v604_v4 = vld [vmem:[%s1522_s0 + $0x288] sm:$0xff]  ;;  %599 = vst [vmem:[%s1523_s1 + $0x34] sm:$0xf] %v153_v0 }
   0x8   :  { %v553_v14 = vld [vmem:[%s1522_s0 + $0x160] sm:$0xff]  ;;  %v34_v16 = vpack.c.bf16 %v755_v3, %v551_v13  ;;  %548 = vst [vmem:[%s1523_s1 + $0xc0] sm:$0xf] %v24_v11  ;;  %v606_v5 = vld [vmem:[%s1522_s0 + $0x168] sm:$0xff]  ;;  %v168_v7 = vpack.c.bf16 %v755_v3, %v604_v4  ;;  %601 = vst [vmem:[%s1523_s1 + $0xc4] sm:$0xf] %v158_v1 }
   0x9   :  { %v555_v15 = vld [vmem:[%s1522_s0 + $0x40] sm:$0xff]  ;;  %v39_v17 = vpack.c.bf16 %v755_v3, %v553_v14  ;;  %550 = vst [vmem:[%s1523_s1 + $0x150] sm:$0xf] %v29_v12  ;;  %v608_v6 = vld [vmem:[%s1522_s0 + $0x48] sm:$0xff]  ;;  %v173_v8 = vpack.c.bf16 %v755_v3, %v606_v5  ;;  %603 = vst [vmem:[%s1523_s1 + $0x154] sm:$0xf] %v163_v2 }
   0xa   :  { %v44_v18 = vpack.c.bf16 %v755_v3, %v555_v15  ;;  %v557_v19 = vld [vmem:[%s1522_s0 + $0x320] sm:$0xff]  ;;  %552 = vst [vmem:[%s1523_s1 + $0x60] sm:$0xf] %v34_v16  ;;  %v178_v9 = vpack.c.bf16 %v755_v3, %v608_v6  ;;  %v610_v10 = vld [vmem:[%s1522_s0 + $0x328] sm:$0xff]  ;;  %605 = vst [vmem:[%s1523_s1 + $0x64] sm:$0xf] %v168_v7 }
   0xb   :  { %v559_v20 = vld [vmem:[%s1522_s0 + $0x200] sm:$0xff]  ;;  %v49_v22 = vpack.c.bf16 %v755_v3, %v557_v19  ;;  %554 = vst [vmem:[%s1523_s1 + $0xf0] sm:$0xf] %v39_v17  ;;  %v612_v11 = vld [vmem:[%s1522_s0 + $0x208] sm:$0xff]  ;;  %v183_v13 = vpack.c.bf16 %v755_v3, %v610_v10  ;;  %607 = vst [vmem:[%s1523_s1 + $0xf4] sm:$0xf] %v173_v8 }
   0xc   :  { %v561_v21 = vld [vmem:[%s1522_s0 + $0xe0] sm:$0xff]  ;;  %v54_v23 = vpack.c.bf16 %v755_v3, %v559_v20  ;;  %556 = vst [vmem:[%s1523_s1 + $0x180] sm:$0xf] %v44_v18  ;;  %v614_v12 = vld [vmem:[%s1522_s0 + $0xe8] sm:$0xff]  ;;  %v188_v14 = vpack.c.bf16 %v755_v3, %v612_v11  ;;  %609 = vst [vmem:[%s1523_s1 + $0x184] sm:$0xf] %v178_v9 }
   0xd   :  { %v59_v24 = vpack.c.bf16 %v755_v3, %v561_v21  ;;  %v563_v25 = vld [vmem:[%s1522_s0 + $0x2c0] sm:$0xff]  ;;  %558 = vst [vmem:[%s1523_s1 + $0x10] sm:$0xf] %v49_v22  ;;  %v193_v15 = vpack.c.bf16 %v755_v3, %v614_v12  ;;  %v616_v16 = vld [vmem:[%s1522_s0 + $0x2c8] sm:$0xff]  ;;  %611 = vst [vmem:[%s1523_s1 + $0x14] sm:$0xf] %v183_v13 }
   0xe   :  { %v565_v26 = vld [vmem:[%s1522_s0 + $0x1a0] sm:$0xff]  ;;  %v64_v28 = vpack.c.bf16 %v755_v3, %v563_v25  ;;  %560 = vst [vmem:[%s1523_s1 + $0xa0] sm:$0xf] %v54_v23  ;;  %v618_v17 = vld [vmem:[%s1522_s0 + $0x1a8] sm:$0xff]  ;;  %v198_v19 = vpack.c.bf16 %v755_v3, %v616_v16  ;;  %613 = vst [vmem:[%s1523_s1 + $0xa4] sm:$0xf] %v188_v14 }
   0xf   :  { %v567_v27 = vld [vmem:[%s1522_s0 + $0x80] sm:$0xff]  ;;  %v69_v29 = vpack.c.bf16 %v755_v3, %v565_v26  ;;  %562 = vst [vmem:[%s1523_s1 + $0x130] sm:$0xf] %v59_v24  ;;  %v620_v18 = vld [vmem:[%s1522_s0 + $0x88] sm:$0xff]  ;;  %v203_v20 = vpack.c.bf16 %v755_v3, %v618_v17  ;;  %615 = vst [vmem:[%s1523_s1 + $0x134] sm:$0xf] %v193_v15 }
  0x10   :  { %v74_v30 = vpack.c.bf16 %v755_v3, %v567_v27  ;;  %v569_v31 = vld [vmem:[%s1522_s0 + $0x260] sm:$0xff]  ;;  %564 = vst [vmem:[%s1523_s1 + $0x40] sm:$0xf] %v64_v28  ;;  %v208_v21 = vpack.c.bf16 %v755_v3, %v620_v18  ;;  %v622_v22 = vld [vmem:[%s1522_s0 + $0x268] sm:$0xff]  ;;  %617 = vst [vmem:[%s1523_s1 + $0x44] sm:$0xf] %v198_v19 }
  0x11   :  { %v571_v32 = vld [vmem:[%s1522_s0 + $0x140] sm:$0xff]  ;;  %v79_v34 = vpack.c.bf16 %v755_v3, %v569_v31  ;;  %566 = vst [vmem:[%s1523_s1 + $0xd0] sm:$0xf] %v69_v29  ;;  %v624_v23 = vld [vmem:[%s1522_s0 + $0x148] sm:$0xff]  ;;  %v213_v25 = vpack.c.bf16 %v755_v3, %v622_v22  ;;  %619 = vst [vmem:[%s1523_s1 + $0xd4] sm:$0xf] %v203_v20 }
  0x12   :  { %v573_v33 = vld [vmem:[%s1522_s0 + $0x20] sm:$0xff]  ;;  %v84_v35 = vpack.c.bf16 %v755_v3, %v571_v32  ;;  %568 = vst [vmem:[%s1523_s1 + $0x160] sm:$0xf] %v74_v30  ;;  %v626_v24 = vld [vmem:[%s1522_s0 + $0x28] sm:$0xff]  ;;  %v218_v26 = vpack.c.bf16 %v755_v3, %v624_v23  ;;  %621 = vst [vmem:[%s1523_s1 + $0x164] sm:$0xf] %v208_v21 }
  0x13   :  { %v89_v36 = vpack.c.bf16 %v755_v3, %v573_v33  ;;  %v575_v37 = vld [vmem:[%s1522_s0 + $0x300] sm:$0xff]  ;;  %570 = vst [vmem:[%s1523_s1 + $0x70] sm:$0xf] %v79_v34  ;;  %v223_v27 = vpack.c.bf16 %v755_v3, %v626_v24  ;;  %v628_v28 = vld [vmem:[%s1522_s0 + $0x308] sm:$0xff]  ;;  %623 = vst [vmem:[%s1523_s1 + $0x74] sm:$0xf] %v213_v25 }
  0x14   :  { %v577_v38 = vld [vmem:[%s1522_s0 + $0x1e0] sm:$0xff]  ;;  %v94_v40 = vpack.c.bf16 %v755_v3, %v575_v37  ;;  %572 = vst [vmem:[%s1523_s1 + $0x100] sm:$0xf] %v84_v35  ;;  %v630_v29 = vld [vmem:[%s1522_s0 + $0x1e8] sm:$0xff]  ;;  %v228_v31 = vpack.c.bf16 %v755_v3, %v628_v28  ;;  %625 = vst [vmem:[%s1523_s1 + $0x104] sm:$0xf] %v218_v26 }
  0x15   :  { %v579_v39 = vld [vmem:[%s1522_s0 + $0xc0] sm:$0xff]  ;;  %v99_v41 = vpack.c.bf16 %v755_v3, %v577_v38  ;;  %574 = vst [vmem:[%s1523_s1 + $0x190] sm:$0xf] %v89_v36  ;;  %v632_v30 = vld [vmem:[%s1522_s0 + $0xc8] sm:$0xff]  ;;  %v233_v32 = vpack.c.bf16 %v755_v3, %v630_v29  ;;  %627 = vst [vmem:[%s1523_s1 + $0x194] sm:$0xf] %v223_v27 }
  0x16   :  { %v104_v42 = vpack.c.bf16 %v755_v3, %v579_v39  ;;  %v581_v43 = vld [vmem:[%s1522_s0 + $0x2a0] sm:$0xff]  ;;  %576 = vst [vmem:[%s1523_s1 + $0x20] sm:$0xf] %v94_v40  ;;  %v238_v33 = vpack.c.bf16 %v755_v3, %v632_v30  ;;  %v634_v34 = vld [vmem:[%s1522_s0 + $0x2a8] sm:$0xff]  ;;  %629 = vst [vmem:[%s1523_s1 + $0x24] sm:$0xf] %v228_v31 }
  0x17   :  { %v583_v44 = vld [vmem:[%s1522_s0 + $0x180] sm:$0xff]  ;;  %v109_v46 = vpack.c.bf16 %v755_v3, %v581_v43  ;;  %578 = vst [vmem:[%s1523_s1 + $0xb0] sm:$0xf] %v99_v41  ;;  %v636_v35 = vld [vmem:[%s1522_s0 + $0x188] sm:$0xff]  ;;  %v243_v37 = vpack.c.bf16 %v755_v3, %v634_v34  ;;  %631 = vst [vmem:[%s1523_s1 + $0xb4] sm:$0xf] %v233_v32 }
  0x18   :  { %v585_v45 = vld [vmem:[%s1522_s0 + $0x60] sm:$0xff]  ;;  %v114_v47 = vpack.c.bf16 %v755_v3, %v583_v44  ;;  %580 = vst [vmem:[%s1523_s1 + $0x140] sm:$0xf] %v104_v42  ;;  %v638_v36 = vld [vmem:[%s1522_s0 + $0x68] sm:$0xff]  ;;  %v248_v38 = vpack.c.bf16 %v755_v3, %v636_v35  ;;  %633 = vst [vmem:[%s1523_s1 + $0x144] sm:$0xf] %v238_v33 }
  0x19   :  { %v119_v48 = vpack.c.bf16 %v755_v3, %v585_v45  ;;  %v587_v49 = vld [vmem:[%s1522_s0 + $0x240] sm:$0xff]  ;;  %582 = vst [vmem:[%s1523_s1 + $0x50] sm:$0xf] %v109_v46  ;;  %v253_v39 = vpack.c.bf16 %v755_v3, %v638_v36  ;;  %v640_v40 = vld [vmem:[%s1522_s0 + $0x248] sm:$0xff]  ;;  %v646_v46 = vld [vmem:[%s1522_s0 + $0x350] sm:$0xff] }
  0x1a   :  { %v589_v50 = vld [vmem:[%s1522_s0 + $0x120] sm:$0xff]  ;;  %v124_v52 = vpack.c.bf16 %v755_v3, %v587_v49  ;;  %584 = vst [vmem:[%s1523_s1 + $0xe0] sm:$0xf] %v114_v47  ;;  %v642_v41 = vld [vmem:[%s1522_s0 + $0x128] sm:$0xff]  ;;  %v258_v43 = vpack.c.bf16 %v755_v3, %v640_v40  ;;  %v648_v47 = vld [vmem:[%s1522_s0 + $0x230] sm:$0xff]  ;;  %v273_v49 = vpack.c.bf16 %v755_v3, %v646_v46 }
  0x1b   :  { %v131_v51 = vld [vmem:[%s1522_s0] sm:$0xff]  ;;  %v129_v53 = vpack.c.bf16 %v755_v3, %v589_v50  ;;  %586 = vst [vmem:[%s1523_s1 + $0x170] sm:$0xf] %v119_v48  ;;  %v644_v42 = vld [vmem:[%s1522_s0 + $0x8] sm:$0xff]  ;;  %v263_v44 = vpack.c.bf16 %v755_v3, %v642_v41  ;;  %v650_v48 = vld [vmem:[%s1522_s0 + $0x110] sm:$0xff]  ;;  %v278_v50 = vpack.c.bf16 %v755_v3, %v648_v47 }
  0x1c   :  { %v133_v54 = vpack.c.bf16 %v755_v3, %v131_v51  ;;  %588 = vst [vmem:[%s1523_s1 + $0x80] sm:$0xf] %v124_v52  ;;  %v268_v45 = vpack.c.bf16 %v755_v3, %v644_v42  ;;  %635 = vst [vmem:[%s1523_s1 + $0x54] sm:$0xf] %v243_v37  ;;  %v283_v51 = vpack.c.bf16 %v755_v3, %v650_v48  ;;  %v652_v52 = vld [vmem:[%s1522_s0 + $0x2f0] sm:$0xff]  ;;  %v700_v37 = vld [vmem:[%s1522_s0 + $0x358] sm:$0xff] }
  0x1d   :  { %590 = vst [vmem:[%s1523_s1 + $0x110] sm:$0xf] %v129_v53  ;;  %637 = vst [vmem:[%s1523_s1 + $0xe4] sm:$0xf] %v248_v38  ;;  %v654_v53 = vld [vmem:[%s1522_s0 + $0x1d0] sm:$0xff]  ;;  %v288_v55 = vpack.c.bf16 %v755_v3, %v652_v52  ;;  %v702_v38 = vld [vmem:[%s1522_s0 + $0x238] sm:$0xff]  ;;  %v408_v40 = vpack.c.bf16 %v755_v3, %v700_v37 }
  0x1e   :  { %591 = vst [vmem:[%s1523_s1 + $0x1a0] sm:$0xf] %v133_v54  ;;  %639 = vst [vmem:[%s1523_s1 + $0x174] sm:$0xf] %v253_v39  ;;  %v656_v54 = vld [vmem:[%s1522_s0 + $0xb0] sm:$0xff]  ;;  %v293_v56 = vpack.c.bf16 %v755_v3, %v654_v53  ;;  %v704_v39 = vld [vmem:[%s1522_s0 + $0x118] sm:$0xff]  ;;  %v413_v41 = vpack.c.bf16 %v755_v3, %v702_v38 }
  0x1f   :  { %641 = vst [vmem:[%s1523_s1 + $0x84] sm:$0xf] %v258_v43  ;;  %643 = vst [vmem:[%s1523_s1 + $0x114] sm:$0xf] %v263_v44  ;;  %v298_v57 = vpack.c.bf16 %v755_v3, %v656_v54  ;;  %v658_v58 = vld [vmem:[%s1522_s0 + $0x290] sm:$0xff]  ;;  %v418_v42 = vpack.c.bf16 %v755_v3, %v704_v39  ;;  %v706_v43 = vld [vmem:[%s1522_s0 + $0x2f8] sm:$0xff] }
  0x20   :  { %645 = vst [vmem:[%s1523_s1 + $0x1a4] sm:$0xf] %v268_v45  ;;  %v660_v59 = vld [vmem:[%s1522_s0 + $0x170] sm:$0xff]  ;;  %647 = vst [vmem:[%s1523_s1 + $0x8] sm:$0xf] %v273_v49  ;;  %v303_v61 = vpack.c.bf16 %v755_v3, %v658_v58  ;;  %v708_v44 = vld [vmem:[%s1522_s0 + $0x1d8] sm:$0xff]  ;;  %v423_v46 = vpack.c.bf16 %v755_v3, %v706_v43 }
  0x21   :  { %v662_v60 = vld [vmem:[%s1522_s0 + $0x50] sm:$0xff]  ;;  %649 = vst [vmem:[%s1523_s1 + $0x98] sm:$0xf] %v278_v50  ;;  %651 = vst [vmem:[%s1523_s1 + $0x128] sm:$0xf] %v283_v51  ;;  %v308_v62 = vpack.c.bf16 %v755_v3, %v660_v59  ;;  %v710_v45 = vld [vmem:[%s1522_s0 + $0xb8] sm:$0xff]  ;;  %v428_v47 = vpack.c.bf16 %v755_v3, %v708_v44 }
  0x22   :  { %v313_v63 = vpack.c.bf16 %v755_v3, %v662_v60  ;;  %v664_v0 = vld [vmem:[%s1522_s0 + $0x330] sm:$0xff]  ;;  %653 = vst [vmem:[%s1523_s1 + $0x38] sm:$0xf] %v288_v55  ;;  %655 = vst [vmem:[%s1523_s1 + $0xc8] sm:$0xf] %v293_v56  ;;  %v433_v48 = vpack.c.bf16 %v755_v3, %v710_v45  ;;  %v712_v49 = vld [vmem:[%s1522_s0 + $0x298] sm:$0xff] }
  0x23   :  { %v666_v1 = vld [vmem:[%s1522_s0 + $0x210] sm:$0xff]  ;;  %657 = vst [vmem:[%s1523_s1 + $0x158] sm:$0xf] %v298_v57  ;;  %v318_v4 = vpack.c.bf16 %v755_v3, %v664_v0  ;;  %659 = vst [vmem:[%s1523_s1 + $0x68] sm:$0xf] %v303_v61  ;;  %v714_v50 = vld [vmem:[%s1522_s0 + $0x178] sm:$0xff]  ;;  %v438_v52 = vpack.c.bf16 %v755_v3, %v712_v49 }
  0x24   :  { %v668_v2 = vld [vmem:[%s1522_s0 + $0xf0] sm:$0xff]  ;;  %v323_v5 = vpack.c.bf16 %v755_v3, %v666_v1  ;;  %661 = vst [vmem:[%s1523_s1 + $0xf8] sm:$0xf] %v308_v62  ;;  %663 = vst [vmem:[%s1523_s1 + $0x188] sm:$0xf] %v313_v63  ;;  %v716_v51 = vld [vmem:[%s1522_s0 + $0x58] sm:$0xff]  ;;  %v443_v53 = vpack.c.bf16 %v755_v3, %v714_v50 }
  0x25   :  { %v328_v6 = vpack.c.bf16 %v755_v3, %v668_v2  ;;  %v670_v7 = vld [vmem:[%s1522_s0 + $0x2d0] sm:$0xff]  ;;  %665 = vst [vmem:[%s1523_s1 + $0x18] sm:$0xf] %v318_v4  ;;  %701 = vst [vmem:[%s1523_s1 + $0xc] sm:$0xf] %v408_v40  ;;  %v448_v54 = vpack.c.bf16 %v755_v3, %v716_v51  ;;  %v718_v55 = vld [vmem:[%s1522_s0 + $0x338] sm:$0xff] }
  0x26   :  { %v672_v8 = vld [vmem:[%s1522_s0 + $0x1b0] sm:$0xff]  ;;  %v333_v10 = vpack.c.bf16 %v755_v3, %v670_v7  ;;  %667 = vst [vmem:[%s1523_s1 + $0xa8] sm:$0xf] %v323_v5  ;;  %703 = vst [vmem:[%s1523_s1 + $0x9c] sm:$0xf] %v413_v41  ;;  %v720_v56 = vld [vmem:[%s1522_s0 + $0x218] sm:$0xff]  ;;  %v453_v58 = vpack.c.bf16 %v755_v3, %v718_v55 }
  0x27   :  { %v674_v9 = vld [vmem:[%s1522_s0 + $0x90] sm:$0xff]  ;;  %v338_v11 = vpack.c.bf16 %v755_v3, %v672_v8  ;;  %669 = vst [vmem:[%s1523_s1 + $0x138] sm:$0xf] %v328_v6  ;;  %705 = vst [vmem:[%s1523_s1 + $0x12c] sm:$0xf] %v418_v42  ;;  %v722_v57 = vld [vmem:[%s1522_s0 + $0xf8] sm:$0xff]  ;;  %v458_v59 = vpack.c.bf16 %v755_v3, %v720_v56 }
  0x28   :  { %v343_v12 = vpack.c.bf16 %v755_v3, %v674_v9  ;;  %v676_v13 = vld [vmem:[%s1522_s0 + $0x270] sm:$0xff]  ;;  %671 = vst [vmem:[%s1523_s1 + $0x48] sm:$0xf] %v333_v10  ;;  %707 = vst [vmem:[%s1523_s1 + $0x3c] sm:$0xf] %v423_v46  ;;  %v463_v60 = vpack.c.bf16 %v755_v3, %v722_v57  ;;  %v724_v61 = vld [vmem:[%s1522_s0 + $0x2d8] sm:$0xff] }
  0x29   :  { %v678_v14 = vld [vmem:[%s1522_s0 + $0x150] sm:$0xff]  ;;  %v348_v16 = vpack.c.bf16 %v755_v3, %v676_v13  ;;  %673 = vst [vmem:[%s1523_s1 + $0xd8] sm:$0xf] %v338_v11  ;;  %709 = vst [vmem:[%s1523_s1 + $0xcc] sm:$0xf] %v428_v47  ;;  %v726_v62 = vld [vmem:[%s1522_s0 + $0x1b8] sm:$0xff]  ;;  %v468_v0 = vpack.c.bf16 %v755_v3, %v724_v61 }
  0x2a   :  { %v680_v15 = vld [vmem:[%s1522_s0 + $0x30] sm:$0xff]  ;;  %v353_v17 = vpack.c.bf16 %v755_v3, %v678_v14  ;;  %675 = vst [vmem:[%s1523_s1 + $0x168] sm:$0xf] %v343_v12  ;;  %711 = vst [vmem:[%s1523_s1 + $0x15c] sm:$0xf] %v433_v48  ;;  %v728_v63 = vld [vmem:[%s1522_s0 + $0x98] sm:$0xff]  ;;  %v473_v1 = vpack.c.bf16 %v755_v3, %v726_v62 }
  0x2b   :  { %v358_v18 = vpack.c.bf16 %v755_v3, %v680_v15  ;;  %v682_v19 = vld [vmem:[%s1522_s0 + $0x310] sm:$0xff]  ;;  %677 = vst [vmem:[%s1523_s1 + $0x78] sm:$0xf] %v348_v16  ;;  %713 = vst [vmem:[%s1523_s1 + $0x6c] sm:$0xf] %v438_v52  ;;  %v478_v2 = vpack.c.bf16 %v755_v3, %v728_v63  ;;  %v730_v4 = vld [vmem:[%s1522_s0 + $0x278] sm:$0xff] }
  0x2c   :  { %v684_v20 = vld [vmem:[%s1522_s0 + $0x1f0] sm:$0xff]  ;;  %v363_v22 = vpack.c.bf16 %v755_v3, %v682_v19  ;;  %679 = vst [vmem:[%s1523_s1 + $0x108] sm:$0xf] %v353_v17  ;;  %715 = vst [vmem:[%s1523_s1 + $0xfc] sm:$0xf] %v443_v53  ;;  %v732_v5 = vld [vmem:[%s1522_s0 + $0x158] sm:$0xff]  ;;  %v483_v7 = vpack.c.bf16 %v755_v3, %v730_v4 }
  0x2d   :  { %v686_v21 = vld [vmem:[%s1522_s0 + $0xd0] sm:$0xff]  ;;  %v368_v23 = vpack.c.bf16 %v755_v3, %v684_v20  ;;  %681 = vst [vmem:[%s1523_s1 + $0x198] sm:$0xf] %v358_v18  ;;  %717 = vst [vmem:[%s1523_s1 + $0x18c] sm:$0xf] %v448_v54  ;;  %v734_v6 = vld [vmem:[%s1522_s0 + $0x38] sm:$0xff]  ;;  %v488_v8 = vpack.c.bf16 %v755_v3, %v732_v5 }
  0x2e   :  { %v373_v24 = vpack.c.bf16 %v755_v3, %v686_v21  ;;  %v688_v25 = vld [vmem:[%s1522_s0 + $0x2b0] sm:$0xff]  ;;  %683 = vst [vmem:[%s1523_s1 + $0x28] sm:$0xf] %v363_v22  ;;  %719 = vst [vmem:[%s1523_s1 + $0x1c] sm:$0xf] %v453_v58  ;;  %v493_v9 = vpack.c.bf16 %v755_v3, %v734_v6  ;;  %v736_v10 = vld [vmem:[%s1522_s0 + $0x318] sm:$0xff] }
  0x2f   :  { %v690_v26 = vld [vmem:[%s1522_s0 + $0x190] sm:$0xff]  ;;  %v378_v28 = vpack.c.bf16 %v755_v3, %v688_v25  ;;  %685 = vst [vmem:[%s1523_s1 + $0xb8] sm:$0xf] %v368_v23  ;;  %721 = vst [vmem:[%s1523_s1 + $0xac] sm:$0xf] %v458_v59  ;;  %v738_v11 = vld [vmem:[%s1522_s0 + $0x1f8] sm:$0xff]  ;;  %v498_v13 = vpack.c.bf16 %v755_v3, %v736_v10 }
  0x30   :  { %v692_v27 = vld [vmem:[%s1522_s0 + $0x70] sm:$0xff]  ;;  %v383_v29 = vpack.c.bf16 %v755_v3, %v690_v26  ;;  %687 = vst [vmem:[%s1523_s1 + $0x148] sm:$0xf] %v373_v24  ;;  %723 = vst [vmem:[%s1523_s1 + $0x13c] sm:$0xf] %v463_v60  ;;  %v740_v12 = vld [vmem:[%s1522_s0 + $0xd8] sm:$0xff]  ;;  %v503_v14 = vpack.c.bf16 %v755_v3, %v738_v11 }
  0x31   :  { %v388_v30 = vpack.c.bf16 %v755_v3, %v692_v27  ;;  %v694_v31 = vld [vmem:[%s1522_s0 + $0x250] sm:$0xff]  ;;  %689 = vst [vmem:[%s1523_s1 + $0x58] sm:$0xf] %v378_v28  ;;  %725 = vst [vmem:[%s1523_s1 + $0x4c] sm:$0xf] %v468_v0  ;;  %v508_v15 = vpack.c.bf16 %v755_v3, %v740_v12  ;;  %v742_v16 = vld [vmem:[%s1522_s0 + $0x2b8] sm:$0xff] }
  0x32   :  { %v696_v32 = vld [vmem:[%s1522_s0 + $0x130] sm:$0xff]  ;;  %v393_v34 = vpack.c.bf16 %v755_v3, %v694_v31  ;;  %691 = vst [vmem:[%s1523_s1 + $0xe8] sm:$0xf] %v383_v29  ;;  %727 = vst [vmem:[%s1523_s1 + $0xdc] sm:$0xf] %v473_v1  ;;  %v744_v17 = vld [vmem:[%s1522_s0 + $0x198] sm:$0xff]  ;;  %v513_v19 = vpack.c.bf16 %v755_v3, %v742_v16 }
  0x33   :  { %v698_v33 = vld [vmem:[%s1522_s0 + $0x10] sm:$0xff]  ;;  %v398_v35 = vpack.c.bf16 %v755_v3, %v696_v32  ;;  %693 = vst [vmem:[%s1523_s1 + $0x178] sm:$0xf] %v388_v30  ;;  %729 = vst [vmem:[%s1523_s1 + $0x16c] sm:$0xf] %v478_v2  ;;  %v746_v18 = vld [vmem:[%s1522_s0 + $0x78] sm:$0xff]  ;;  %v518_v20 = vpack.c.bf16 %v755_v3, %v744_v17 }
  0x34   :  { %v403_v36 = vpack.c.bf16 %v755_v3, %v698_v33  ;;  %695 = vst [vmem:[%s1523_s1 + $0x88] sm:$0xf] %v393_v34  ;;  %731 = vst [vmem:[%s1523_s1 + $0x7c] sm:$0xf] %v483_v7  ;;  %v523_v21 = vpack.c.bf16 %v755_v3, %v746_v18  ;;  %v748_v22 = vld [vmem:[%s1522_s0 + $0x258] sm:$0xff] }
  0x35   :  { %697 = vst [vmem:[%s1523_s1 + $0x118] sm:$0xf] %v398_v35  ;;  %733 = vst [vmem:[%s1523_s1 + $0x10c] sm:$0xf] %v488_v8  ;;  %v750_v23 = vld [vmem:[%s1522_s0 + $0x138] sm:$0xff]  ;;  %v528_v25 = vpack.c.bf16 %v755_v3, %v748_v22 }
  0x36   :  { %699 = vst [vmem:[%s1523_s1 + $0x1a8] sm:$0xf] %v403_v36  ;;  %735 = vst [vmem:[%s1523_s1 + $0x19c] sm:$0xf] %v493_v9  ;;  %v752_v24 = vld [vmem:[%s1522_s0 + $0x18] sm:$0xff]  ;;  %v533_v26 = vpack.c.bf16 %v755_v3, %v750_v23 }
  0x37   :  { %737 = vst [vmem:[%s1523_s1 + $0x2c] sm:$0xf] %v498_v13  ;;  %739 = vst [vmem:[%s1523_s1 + $0xbc] sm:$0xf] %v503_v14  ;;  %v538_v3 = vpack.c.bf16 %v755_v3, %v752_v24 }
  0x38   :  { %741 = vst [vmem:[%s1523_s1 + $0x14c] sm:$0xf] %v508_v15  ;;  %743 = vst [vmem:[%s1523_s1 + $0x5c] sm:$0xf] %v513_v19 }
  0x39   :  { %745 = vst [vmem:[%s1523_s1 + $0xec] sm:$0xf] %v518_v20  ;;  %747 = vst [vmem:[%s1523_s1 + $0x17c] sm:$0xf] %v523_v21 }
  0x3a   :  { %749 = vst [vmem:[%s1523_s1 + $0x8c] sm:$0xf] %v528_v25  ;;  %751 = vst [vmem:[%s1523_s1 + $0x11c] sm:$0xf] %v533_v26 }
  0x3b   :  { %753 = vst [vmem:[%s1523_s1 + $0x1ac] sm:$0xf] %v538_v3 }

// kernel: reverse.34
= control target key start
LH: loop header
LB: loop body
LE: loop exit
PB: predicated region body
PF: predicated region fallthrough
CT: control target
= control target key end

     0   :  { %v1511_v3 = vmov 0.0   ;;  %s3034_s0 = inlined_call_operand.vmem [shape: f32[128,64,3,3,3], index: 0, kind: input, shape index: {}]   ;;  %s3035_s1 = inlined_call_operand.vmem [shape: bf16[128,64,3,3,3], index: 1, kind: output, shape index: {}]  }
   0x1   :  { %v1080_v0 = vld [vmem:[%s3034_s0 + $0x680] sm:$0xff]  ;;  %v1132_v55 = vld [vmem:[%s3034_s0 + $0x688] sm:$0xff] }
   0x2   :  { %v1081_v1 = vld [vmem:[%s3034_s0 + $0x440] sm:$0xff]  ;;  %v4_v4 = vpack.c.bf16 %v1511_v3, %v1080_v0  ;;  %v1134_v56 = vld [vmem:[%s3034_s0 + $0x448] sm:$0xff]  ;;  %v138_v58 = vpack.c.bf16 %v1511_v3, %v1132_v55 }
   0x3   :  { %v1083_v2 = vld [vmem:[%s3034_s0 + $0x200] sm:$0xff]  ;;  %v9_v5 = vpack.c.bf16 %v1511_v3, %v1081_v1  ;;  %v1136_v57 = vld [vmem:[%s3034_s0 + $0x208] sm:$0xff]  ;;  %v143_v59 = vpack.c.bf16 %v1511_v3, %v1134_v56 }
   0x4   :  { %v14_v6 = vpack.c.bf16 %v1511_v3, %v1083_v2  ;;  %v1085_v7 = vld [vmem:[%s3034_s0 + $0x5c0] sm:$0xff]  ;;  %5 = vst [vmem:[%s3035_s1] sm:$0xf] %v4_v4  ;;  %v148_v60 = vpack.c.bf16 %v1511_v3, %v1136_v57  ;;  %v1138_v61 = vld [vmem:[%s3034_s0 + $0x5c8] sm:$0xff]  ;;  %1133 = vst [vmem:[%s3035_s1 + $0x4] sm:$0xf] %v138_v58 }
   0x5   :  { %v1087_v8 = vld [vmem:[%s3034_s0 + $0x380] sm:$0xff]  ;;  %v19_v10 = vpack.c.bf16 %v1511_v3, %v1085_v7  ;;  %1082 = vst [vmem:[%s3035_s1 + $0x120] sm:$0xf] %v9_v5  ;;  %v1140_v62 = vld [vmem:[%s3034_s0 + $0x388] sm:$0xff]  ;;  %v153_v0 = vpack.c.bf16 %v1511_v3, %v1138_v61  ;;  %1135 = vst [vmem:[%s3035_s1 + $0x124] sm:$0xf] %v143_v59 }
   0x6   :  { %v1089_v9 = vld [vmem:[%s3034_s0 + $0x140] sm:$0xff]  ;;  %v24_v11 = vpack.c.bf16 %v1511_v3, %v1087_v8  ;;  %1084 = vst [vmem:[%s3035_s1 + $0x240] sm:$0xf] %v14_v6  ;;  %v1142_v63 = vld [vmem:[%s3034_s0 + $0x148] sm:$0xff]  ;;  %v158_v1 = vpack.c.bf16 %v1511_v3, %v1140_v62  ;;  %1137 = vst [vmem:[%s3035_s1 + $0x244] sm:$0xf] %v148_v60 }
   0x7   :  { %v29_v12 = vpack.c.bf16 %v1511_v3, %v1089_v9  ;;  %v1091_v13 = vld [vmem:[%s3034_s0 + $0x500] sm:$0xff]  ;;  %1086 = vst [vmem:[%s3035_s1 + $0x60] sm:$0xf] %v19_v10  ;;  %v163_v2 = vpack.c.bf16 %v1511_v3, %v1142_v63  ;;  %v1144_v4 = vld [vmem:[%s3034_s0 + $0x508] sm:$0xff]  ;;  %1139 = vst [vmem:[%s3035_s1 + $0x64] sm:$0xf] %v153_v0 }
   0x8   :  { %v1093_v14 = vld [vmem:[%s3034_s0 + $0x2c0] sm:$0xff]  ;;  %v34_v16 = vpack.c.bf16 %v1511_v3, %v1091_v13  ;;  %1088 = vst [vmem:[%s3035_s1 + $0x180] sm:$0xf] %v24_v11  ;;  %v1146_v5 = vld [vmem:[%s3034_s0 + $0x2c8] sm:$0xff]  ;;  %v168_v7 = vpack.c.bf16 %v1511_v3, %v1144_v4  ;;  %1141 = vst [vmem:[%s3035_s1 + $0x184] sm:$0xf] %v158_v1 }
   0x9   :  { %v1095_v15 = vld [vmem:[%s3034_s0 + $0x80] sm:$0xff]  ;;  %v39_v17 = vpack.c.bf16 %v1511_v3, %v1093_v14  ;;  %1090 = vst [vmem:[%s3035_s1 + $0x2a0] sm:$0xf] %v29_v12  ;;  %v1148_v6 = vld [vmem:[%s3034_s0 + $0x88] sm:$0xff]  ;;  %v173_v8 = vpack.c.bf16 %v1511_v3, %v1146_v5  ;;  %1143 = vst [vmem:[%s3035_s1 + $0x2a4] sm:$0xf] %v163_v2 }
   0xa   :  { %v44_v18 = vpack.c.bf16 %v1511_v3, %v1095_v15  ;;  %v1097_v19 = vld [vmem:[%s3034_s0 + $0x640] sm:$0xff]  ;;  %1092 = vst [vmem:[%s3035_s1 + $0xc0] sm:$0xf] %v34_v16  ;;  %v178_v9 = vpack.c.bf16 %v1511_v3, %v1148_v6  ;;  %v1150_v10 = vld [vmem:[%s3034_s0 + $0x648] sm:$0xff]  ;;  %1145 = vst [vmem:[%s3035_s1 + $0xc4] sm:$0xf] %v168_v7 }
   0xb   :  { %v1099_v20 = vld [vmem:[%s3034_s0 + $0x400] sm:$0xff]  ;;  %v49_v22 = vpack.c.bf16 %v1511_v3, %v1097_v19  ;;  %1094 = vst [vmem:[%s3035_s1 + $0x1e0] sm:$0xf] %v39_v17  ;;  %v1152_v11 = vld [vmem:[%s3034_s0 + $0x408] sm:$0xff]  ;;  %v183_v13 = vpack.c.bf16 %v1511_v3, %v1150_v10  ;;  %1147 = vst [vmem:[%s3035_s1 + $0x1e4] sm:$0xf] %v173_v8 }
   0xc   :  { %v1101_v21 = vld [vmem:[%s3034_s0 + $0x1c0] sm:$0xff]  ;;  %v54_v23 = vpack.c.bf16 %v1511_v3, %v1099_v20  ;;  %1096 = vst [vmem:[%s3035_s1 + $0x300] sm:$0xf] %v44_v18  ;;  %v1154_v12 = vld [vmem:[%s3034_s0 + $0x1c8] sm:$0xff]  ;;  %v188_v14 = vpack.c.bf16 %v1511_v3, %v1152_v11  ;;  %1149 = vst [vmem:[%s3035_s1 + $0x304] sm:$0xf] %v178_v9 }
   0xd   :  { %v59_v24 = vpack.c.bf16 %v1511_v3, %v1101_v21  ;;  %v1103_v25 = vld [vmem:[%s3034_s0 + $0x580] sm:$0xff]  ;;  %1098 = vst [vmem:[%s3035_s1 + $0x20] sm:$0xf] %v49_v22  ;;  %v193_v15 = vpack.c.bf16 %v1511_v3, %v1154_v12  ;;  %v1156_v16 = vld [vmem:[%s3034_s0 + $0x588] sm:$0xff]  ;;  %1151 = vst [vmem:[%s3035_s1 + $0x24] sm:$0xf] %v183_v13 }
   0xe   :  { %v1105_v26 = vld [vmem:[%s3034_s0 + $0x340] sm:$0xff]  ;;  %v64_v28 = vpack.c.bf16 %v1511_v3, %v1103_v25  ;;  %1100 = vst [vmem:[%s3035_s1 + $0x140] sm:$0xf] %v54_v23  ;;  %v1158_v17 = vld [vmem:[%s3034_s0 + $0x348] sm:$0xff]  ;;  %v198_v19 = vpack.c.bf16 %v1511_v3, %v1156_v16  ;;  %1153 = vst [vmem:[%s3035_s1 + $0x144] sm:$0xf] %v188_v14 }
   0xf   :  { %v1107_v27 = vld [vmem:[%s3034_s0 + $0x100] sm:$0xff]  ;;  %v69_v29 = vpack.c.bf16 %v1511_v3, %v1105_v26  ;;  %1102 = vst [vmem:[%s3035_s1 + $0x260] sm:$0xf] %v59_v24  ;;  %v1160_v18 = vld [vmem:[%s3034_s0 + $0x108] sm:$0xff]  ;;  %v203_v20 = vpack.c.bf16 %v1511_v3, %v1158_v17  ;;  %1155 = vst [vmem:[%s3035_s1 + $0x264] sm:$0xf] %v193_v15 }
  0x10   :  { %v74_v30 = vpack.c.bf16 %v1511_v3, %v1107_v27  ;;  %v1109_v31 = vld [vmem:[%s3034_s0 + $0x4c0] sm:$0xff]  ;;  %1104 = vst [vmem:[%s3035_s1 + $0x80] sm:$0xf] %v64_v28  ;;  %v208_v21 = vpack.c.bf16 %v1511_v3, %v1160_v18  ;;  %v1162_v22 = vld [vmem:[%s3034_s0 + $0x4c8] sm:$0xff]  ;;  %1157 = vst [vmem:[%s3035_s1 + $0x84] sm:$0xf] %v198_v19 }
  0x11   :  { %v1111_v32 = vld [vmem:[%s3034_s0 + $0x280] sm:$0xff]  ;;  %v79_v34 = vpack.c.bf16 %v1511_v3, %v1109_v31  ;;  %1106 = vst [vmem:[%s3035_s1 + $0x1a0] sm:$0xf] %v69_v29  ;;  %v1164_v23 = vld [vmem:[%s3034_s0 + $0x288] sm:$0xff]  ;;  %v213_v25 = vpack.c.bf16 %v1511_v3, %v1162_v22  ;;  %1159 = vst [vmem:[%s3035_s1 + $0x1a4] sm:$0xf] %v203_v20 }
  0x12   :  { %v1113_v33 = vld [vmem:[%s3034_s0 + $0x40] sm:$0xff]  ;;  %v84_v35 = vpack.c.bf16 %v1511_v3, %v1111_v32  ;;  %1108 = vst [vmem:[%s3035_s1 + $0x2c0] sm:$0xf] %v74_v30  ;;  %v1166_v24 = vld [vmem:[%s3034_s0 + $0x48] sm:$0xff]  ;;  %v218_v26 = vpack.c.bf16 %v1511_v3, %v1164_v23  ;;  %1161 = vst [vmem:[%s3035_s1 + $0x2c4] sm:$0xf] %v208_v21 }
  0x13   :  { %v89_v36 = vpack.c.bf16 %v1511_v3, %v1113_v33  ;;  %v1115_v37 = vld [vmem:[%s3034_s0 + $0x600] sm:$0xff]  ;;  %1110 = vst [vmem:[%s3035_s1 + $0xe0] sm:$0xf] %v79_v34  ;;  %v223_v27 = vpack.c.bf16 %v1511_v3, %v1166_v24  ;;  %v1168_v28 = vld [vmem:[%s3034_s0 + $0x608] sm:$0xff]  ;;  %1163 = vst [vmem:[%s3035_s1 + $0xe4] sm:$0xf] %v213_v25 }
  0x14   :  { %v1117_v38 = vld [vmem:[%s3034_s0 + $0x3c0] sm:$0xff]  ;;  %v94_v40 = vpack.c.bf16 %v1511_v3, %v1115_v37  ;;  %1112 = vst [vmem:[%s3035_s1 + $0x200] sm:$0xf] %v84_v35  ;;  %v1170_v29 = vld [vmem:[%s3034_s0 + $0x3c8] sm:$0xff]  ;;  %v228_v31 = vpack.c.bf16 %v1511_v3, %v1168_v28  ;;  %1165 = vst [vmem:[%s3035_s1 + $0x204] sm:$0xf] %v218_v26 }
  0x15   :  { %v1119_v39 = vld [vmem:[%s3034_s0 + $0x180] sm:$0xff]  ;;  %v99_v41 = vpack.c.bf16 %v1511_v3, %v1117_v38  ;;  %1114 = vst [vmem:[%s3035_s1 + $0x320] sm:$0xf] %v89_v36  ;;  %v1172_v30 = vld [vmem:[%s3034_s0 + $0x188] sm:$0xff]  ;;  %v233_v32 = vpack.c.bf16 %v1511_v3, %v1170_v29  ;;  %1167 = vst [vmem:[%s3035_s1 + $0x324] sm:$0xf] %v223_v27 }
  0x16   :  { %v104_v42 = vpack.c.bf16 %v1511_v3, %v1119_v39  ;;  %v1121_v43 = vld [vmem:[%s3034_s0 + $0x540] sm:$0xff]  ;;  %1116 = vst [vmem:[%s3035_s1 + $0x40] sm:$0xf] %v94_v40  ;;  %v238_v33 = vpack.c.bf16 %v1511_v3, %v1172_v30  ;;  %v1174_v34 = vld [vmem:[%s3034_s0 + $0x548] sm:$0xff]  ;;  %1169 = vst [vmem:[%s3035_s1 + $0x44] sm:$0xf] %v228_v31 }
  0x17   :  { %v1123_v44 = vld [vmem:[%s3034_s0 + $0x300] sm:$0xff]  ;;  %v109_v46 = vpack.c.bf16 %v1511_v3, %v1121_v43  ;;  %1118 = vst [vmem:[%s3035_s1 + $0x160] sm:$0xf] %v99_v41  ;;  %v1176_v35 = vld [vmem:[%s3034_s0 + $0x308] sm:$0xff]  ;;  %v243_v37 = vpack.c.bf16 %v1511_v3, %v1174_v34  ;;  %1171 = vst [vmem:[%s3035_s1 + $0x164] sm:$0xf] %v233_v32 }
  0x18   :  { %v1125_v45 = vld [vmem:[%s3034_s0 + $0xc0] sm:$0xff]  ;;  %v114_v47 = vpack.c.bf16 %v1511_v3, %v1123_v44  ;;  %1120 = vst [vmem:[%s3035_s1 + $0x280] sm:$0xf] %v104_v42  ;;  %v1178_v36 = vld [vmem:[%s3034_s0 + $0xc8] sm:$0xff]  ;;  %v248_v38 = vpack.c.bf16 %v1511_v3, %v1176_v35  ;;  %1173 = vst [vmem:[%s3035_s1 + $0x284] sm:$0xf] %v238_v33 }
  0x19   :  { %v119_v48 = vpack.c.bf16 %v1511_v3, %v1125_v45  ;;  %v1127_v49 = vld [vmem:[%s3034_s0 + $0x480] sm:$0xff]  ;;  %1122 = vst [vmem:[%s3035_s1 + $0xa0] sm:$0xf] %v109_v46  ;;  %v253_v39 = vpack.c.bf16 %v1511_v3, %v1178_v36  ;;  %v1180_v40 = vld [vmem:[%s3034_s0 + $0x488] sm:$0xff]  ;;  %v1186_v46 = vld [vmem:[%s3034_s0 + $0x690] sm:$0xff] }
  0x1a   :  { %v1129_v50 = vld [vmem:[%s3034_s0 + $0x240] sm:$0xff]  ;;  %v124_v52 = vpack.c.bf16 %v1511_v3, %v1127_v49  ;;  %1124 = vst [vmem:[%s3035_s1 + $0x1c0] sm:$0xf] %v114_v47  ;;  %v1182_v41 = vld [vmem:[%s3034_s0 + $0x248] sm:$0xff]  ;;  %v258_v43 = vpack.c.bf16 %v1511_v3, %v1180_v40  ;;  %v1188_v47 = vld [vmem:[%s3034_s0 + $0x450] sm:$0xff]  ;;  %v273_v49 = vpack.c.bf16 %v1511_v3, %v1186_v46 }
  0x1b   :  { %v131_v51 = vld [vmem:[%s3034_s0] sm:$0xff]  ;;  %v129_v53 = vpack.c.bf16 %v1511_v3, %v1129_v50  ;;  %1126 = vst [vmem:[%s3035_s1 + $0x2e0] sm:$0xf] %v119_v48  ;;  %v1184_v42 = vld [vmem:[%s3034_s0 + $0x8] sm:$0xff]  ;;  %v263_v44 = vpack.c.bf16 %v1511_v3, %v1182_v41  ;;  %v1190_v48 = vld [vmem:[%s3034_s0 + $0x210] sm:$0xff]  ;;  %v278_v50 = vpack.c.bf16 %v1511_v3, %v1188_v47 }
  0x1c   :  { %v133_v54 = vpack.c.bf16 %v1511_v3, %v131_v51  ;;  %1128 = vst [vmem:[%s3035_s1 + $0x100] sm:$0xf] %v124_v52  ;;  %v268_v45 = vpack.c.bf16 %v1511_v3, %v1184_v42  ;;  %1175 = vst [vmem:[%s3035_s1 + $0xa4] sm:$0xf] %v243_v37  ;;  %v283_v51 = vpack.c.bf16 %v1511_v3, %v1190_v48  ;;  %v1192_v52 = vld [vmem:[%s3034_s0 + $0x5d0] sm:$0xff]  ;;  %v1240_v37 = vld [vmem:[%s3034_s0 + $0x698] sm:$0xff] }
  0x1d   :  { %1130 = vst [vmem:[%s3035_s1 + $0x220] sm:$0xf] %v129_v53  ;;  %1177 = vst [vmem:[%s3035_s1 + $0x1c4] sm:$0xf] %v248_v38  ;;  %v1194_v53 = vld [vmem:[%s3034_s0 + $0x390] sm:$0xff]  ;;  %v288_v55 = vpack.c.bf16 %v1511_v3, %v1192_v52  ;;  %v1242_v38 = vld [vmem:[%s3034_s0 + $0x458] sm:$0xff]  ;;  %v408_v40 = vpack.c.bf16 %v1511_v3, %v1240_v37 }
  0x1e   :  { %1131 = vst [vmem:[%s3035_s1 + $0x340] sm:$0xf] %v133_v54  ;;  %1179 = vst [vmem:[%s3035_s1 + $0x2e4] sm:$0xf] %v253_v39  ;;  %v1196_v54 = vld [vmem:[%s3034_s0 + $0x150] sm:$0xff]  ;;  %v293_v56 = vpack.c.bf16 %v1511_v3, %v1194_v53  ;;  %v1244_v39 = vld [vmem:[%s3034_s0 + $0x218] sm:$0xff]  ;;  %v413_v41 = vpack.c.bf16 %v1511_v3, %v1242_v38 }
  0x1f   :  { %1181 = vst [vmem:[%s3035_s1 + $0x104] sm:$0xf] %v258_v43  ;;  %1183 = vst [vmem:[%s3035_s1 + $0x224] sm:$0xf] %v263_v44  ;;  %v298_v57 = vpack.c.bf16 %v1511_v3, %v1196_v54  ;;  %v1198_v58 = vld [vmem:[%s3034_s0 + $0x510] sm:$0xff]  ;;  %v418_v42 = vpack.c.bf16 %v1511_v3, %v1244_v39  ;;  %v1246_v43 = vld [vmem:[%s3034_s0 + $0x5d8] sm:$0xff] }
  0x20   :  { %1185 = vst [vmem:[%s3035_s1 + $0x344] sm:$0xf] %v268_v45  ;;  %v1200_v59 = vld [vmem:[%s3034_s0 + $0x2d0] sm:$0xff]  ;;  %1187 = vst [vmem:[%s3035_s1 + $0x8] sm:$0xf] %v273_v49  ;;  %v303_v61 = vpack.c.bf16 %v1511_v3, %v1198_v58  ;;  %v1248_v44 = vld [vmem:[%s3034_s0 + $0x398] sm:$0xff]  ;;  %v423_v46 = vpack.c.bf16 %v1511_v3, %v1246_v43 }
  0x21   :  { %v1202_v60 = vld [vmem:[%s3034_s0 + $0x90] sm:$0xff]  ;;  %1189 = vst [vmem:[%s3035_s1 + $0x128] sm:$0xf] %v278_v50  ;;  %1191 = vst [vmem:[%s3035_s1 + $0x248] sm:$0xf] %v283_v51  ;;  %v308_v62 = vpack.c.bf16 %v1511_v3, %v1200_v59  ;;  %v1250_v45 = vld [vmem:[%s3034_s0 + $0x158] sm:$0xff]  ;;  %v428_v47 = vpack.c.bf16 %v1511_v3, %v1248_v44 }
  0x22   :  { %v313_v63 = vpack.c.bf16 %v1511_v3, %v1202_v60  ;;  %v1204_v0 = vld [vmem:[%s3034_s0 + $0x650] sm:$0xff]  ;;  %1193 = vst [vmem:[%s3035_s1 + $0x68] sm:$0xf] %v288_v55  ;;  %1195 = vst [vmem:[%s3035_s1 + $0x188] sm:$0xf] %v293_v56  ;;  %v433_v48 = vpack.c.bf16 %v1511_v3, %v1250_v45  ;;  %v1252_v49 = vld [vmem:[%s3034_s0 + $0x518] sm:$0xff] }
  0x23   :  { %v1206_v1 = vld [vmem:[%s3034_s0 + $0x410] sm:$0xff]  ;;  %1197 = vst [vmem:[%s3035_s1 + $0x2a8] sm:$0xf] %v298_v57  ;;  %v318_v4 = vpack.c.bf16 %v1511_v3, %v1204_v0  ;;  %1199 = vst [vmem:[%s3035_s1 + $0xc8] sm:$0xf] %v303_v61  ;;  %v1254_v50 = vld [vmem:[%s3034_s0 + $0x2d8] sm:$0xff]  ;;  %v438_v52 = vpack.c.bf16 %v1511_v3, %v1252_v49 }
  0x24   :  { %v1208_v2 = vld [vmem:[%s3034_s0 + $0x1d0] sm:$0xff]  ;;  %v323_v5 = vpack.c.bf16 %v1511_v3, %v1206_v1  ;;  %1201 = vst [vmem:[%s3035_s1 + $0x1e8] sm:$0xf] %v308_v62  ;;  %1203 = vst [vmem:[%s3035_s1 + $0x308] sm:$0xf] %v313_v63  ;;  %v1256_v51 = vld [vmem:[%s3034_s0 + $0x98] sm:$0xff]  ;;  %v443_v53 = vpack.c.bf16 %v1511_v3, %v1254_v50 }
  0x25   :  { %v328_v6 = vpack.c.bf16 %v1511_v3, %v1208_v2  ;;  %v1210_v7 = vld [vmem:[%s3034_s0 + $0x590] sm:$0xff]  ;;  %1205 = vst [vmem:[%s3035_s1 + $0x28] sm:$0xf] %v318_v4  ;;  %1241 = vst [vmem:[%s3035_s1 + $0xc] sm:$0xf] %v408_v40  ;;  %v448_v54 = vpack.c.bf16 %v1511_v3, %v1256_v51  ;;  %v1258_v55 = vld [vmem:[%s3034_s0 + $0x658] sm:$0xff] }
  0x26   :  { %v1212_v8 = vld [vmem:[%s3034_s0 + $0x350] sm:$0xff]  ;;  %v333_v10 = vpack.c.bf16 %v1511_v3, %v1210_v7  ;;  %1207 = vst [vmem:[%s3035_s1 + $0x148] sm:$0xf] %v323_v5  ;;  %1243 = vst [vmem:[%s3035_s1 + $0x12c] sm:$0xf] %v413_v41  ;;  %v1260_v56 = vld [vmem:[%s3034_s0 + $0x418] sm:$0xff]  ;;  %v453_v58 = vpack.c.bf16 %v1511_v3, %v1258_v55 }
  0x27   :  { %v1214_v9 = vld [vmem:[%s3034_s0 + $0x110] sm:$0xff]  ;;  %v338_v11 = vpack.c.bf16 %v1511_v3, %v1212_v8  ;;  %1209 = vst [vmem:[%s3035_s1 + $0x268] sm:$0xf] %v328_v6  ;;  %1245 = vst [vmem:[%s3035_s1 + $0x24c] sm:$0xf] %v418_v42  ;;  %v1262_v57 = vld [vmem:[%s3034_s0 + $0x1d8] sm:$0xff]  ;;  %v458_v59 = vpack.c.bf16 %v1511_v3, %v1260_v56 }
  0x28   :  { %v343_v12 = vpack.c.bf16 %v1511_v3, %v1214_v9  ;;  %v1216_v13 = vld [vmem:[%s3034_s0 + $0x4d0] sm:$0xff]  ;;  %1211 = vst [vmem:[%s3035_s1 + $0x88] sm:$0xf] %v333_v10  ;;  %1247 = vst [vmem:[%s3035_s1 + $0x6c] sm:$0xf] %v423_v46  ;;  %v463_v60 = vpack.c.bf16 %v1511_v3, %v1262_v57  ;;  %v1264_v61 = vld [vmem:[%s3034_s0 + $0x598] sm:$0xff] }
  0x29   :  { %v1218_v14 = vld [vmem:[%s3034_s0 + $0x290] sm:$0xff]  ;;  %v348_v16 = vpack.c.bf16 %v1511_v3, %v1216_v13  ;;  %1213 = vst [vmem:[%s3035_s1 + $0x1a8] sm:$0xf] %v338_v11  ;;  %1249 = vst [vmem:[%s3035_s1 + $0x18c] sm:$0xf] %v428_v47  ;;  %v1266_v62 = vld [vmem:[%s3034_s0 + $0x358] sm:$0xff]  ;;  %v468_v0 = vpack.c.bf16 %v1511_v3, %v1264_v61 }
  0x2a   :  { %v1220_v15 = vld [vmem:[%s3034_s0 + $0x50] sm:$0xff]  ;;  %v353_v17 = vpack.c.bf16 %v1511_v3, %v1218_v14  ;;  %1215 = vst [vmem:[%s3035_s1 + $0x2c8] sm:$0xf] %v343_v12  ;;  %1251 = vst [vmem:[%s3035_s1 + $0x2ac] sm:$0xf] %v433_v48  ;;  %v1268_v63 = vld [vmem:[%s3034_s0 + $0x118] sm:$0xff]  ;;  %v473_v1 = vpack.c.bf16 %v1511_v3, %v1266_v62 }
  0x2b   :  { %v358_v18 = vpack.c.bf16 %v1511_v3, %v1220_v15  ;;  %v1222_v19 = vld [vmem:[%s3034_s0 + $0x610] sm:$0xff]  ;;  %1217 = vst [vmem:[%s3035_s1 + $0xe8] sm:$0xf] %v348_v16  ;;  %1253 = vst [vmem:[%s3035_s1 + $0xcc] sm:$0xf] %v438_v52  ;;  %v478_v2 = vpack.c.bf16 %v1511_v3, %v1268_v63  ;;  %v1270_v4 = vld [vmem:[%s3034_s0 + $0x4d8] sm:$0xff] }
  0x2c   :  { %v1224_v20 = vld [vmem:[%s3034_s0 + $0x3d0] sm:$0xff]  ;;  %v363_v22 = vpack.c.bf16 %v1511_v3, %v1222_v19  ;;  %1219 = vst [vmem:[%s3035_s1 + $0x208] sm:$0xf] %v353_v17  ;;  %1255 = vst [vmem:[%s3035_s1 + $0x1ec] sm:$0xf] %v443_v53  ;;  %v1272_v5 = vld [vmem:[%s3034_s0 + $0x298] sm:$0xff]  ;;  %v483_v7 = vpack.c.bf16 %v1511_v3, %v1270_v4 }
  0x2d   :  { %v1226_v21 = vld [vmem:[%s3034_s0 + $0x190] sm:$0xff]  ;;  %v368_v23 = vpack.c.bf16 %v1511_v3, %v1224_v20  ;;  %1221 = vst [vmem:[%s3035_s1 + $0x328] sm:$0xf] %v358_v18  ;;  %1257 = vst [vmem:[%s3035_s1 + $0x30c] sm:$0xf] %v448_v54  ;;  %v1274_v6 = vld [vmem:[%s3034_s0 + $0x58] sm:$0xff]  ;;  %v488_v8 = vpack.c.bf16 %v1511_v3, %v1272_v5 }
  0x2e   :  { %v373_v24 = vpack.c.bf16 %v1511_v3, %v1226_v21  ;;  %v1228_v25 = vld [vmem:[%s3034_s0 + $0x550] sm:$0xff]  ;;  %1223 = vst [vmem:[%s3035_s1 + $0x48] sm:$0xf] %v363_v22  ;;  %1259 = vst [vmem:[%s3035_s1 + $0x2c] sm:$0xf] %v453_v58  ;;  %v493_v9 = vpack.c.bf16 %v1511_v3, %v1274_v6  ;;  %v1276_v10 = vld [vmem:[%s3034_s0 + $0x618] sm:$0xff] }
  0x2f   :  { %v1230_v26 = vld [vmem:[%s3034_s0 + $0x310] sm:$0xff]  ;;  %v378_v28 = vpack.c.bf16 %v1511_v3, %v1228_v25  ;;  %1225 = vst [vmem:[%s3035_s1 + $0x168] sm:$0xf] %v368_v23  ;;  %1261 = vst [vmem:[%s3035_s1 + $0x14c] sm:$0xf] %v458_v59  ;;  %v1278_v11 = vld [vmem:[%s3034_s0 + $0x3d8] sm:$0xff]  ;;  %v498_v13 = vpack.c.bf16 %v1511_v3, %v1276_v10 }
  0x30   :  { %v1232_v27 = vld [vmem:[%s3034_s0 + $0xd0] sm:$0xff]  ;;  %v383_v29 = vpack.c.bf16 %v1511_v3, %v1230_v26  ;;  %1227 = vst [vmem:[%s3035_s1 + $0x288] sm:$0xf] %v373_v24  ;;  %1263 = vst [vmem:[%s3035_s1 + $0x26c] sm:$0xf] %v463_v60  ;;  %v1280_v12 = vld [vmem:[%s3034_s0 + $0x198] sm:$0xff]  ;;  %v503_v14 = vpack.c.bf16 %v1511_v3, %v1278_v11 }
  0x31   :  { %v388_v30 = vpack.c.bf16 %v1511_v3, %v1232_v27  ;;  %v1234_v31 = vld [vmem:[%s3034_s0 + $0x490] sm:$0xff]  ;;  %1229 = vst [vmem:[%s3035_s1 + $0xa8] sm:$0xf] %v378_v28  ;;  %1265 = vst [vmem:[%s3035_s1 + $0x8c] sm:$0xf] %v468_v0  ;;  %v508_v15 = vpack.c.bf16 %v1511_v3, %v1280_v12  ;;  %v1282_v16 = vld [vmem:[%s3034_s0 + $0x558] sm:$0xff] }
  0x32   :  { %v1236_v32 = vld [vmem:[%s3034_s0 + $0x250] sm:$0xff]  ;;  %v393_v34 = vpack.c.bf16 %v1511_v3, %v1234_v31  ;;  %1231 = vst [vmem:[%s3035_s1 + $0x1c8] sm:$0xf] %v383_v29  ;;  %1267 = vst [vmem:[%s3035_s1 + $0x1ac] sm:$0xf] %v473_v1  ;;  %v1284_v17 = vld [vmem:[%s3034_s0 + $0x318] sm:$0xff]  ;;  %v513_v19 = vpack.c.bf16 %v1511_v3, %v1282_v16 }
  0x33   :  { %v1238_v33 = vld [vmem:[%s3034_s0 + $0x10] sm:$0xff]  ;;  %v398_v35 = vpack.c.bf16 %v1511_v3, %v1236_v32  ;;  %1233 = vst [vmem:[%s3035_s1 + $0x2e8] sm:$0xf] %v388_v30  ;;  %1269 = vst [vmem:[%s3035_s1 + $0x2cc] sm:$0xf] %v478_v2  ;;  %v1286_v18 = vld [vmem:[%s3034_s0 + $0xd8] sm:$0xff]  ;;  %v518_v20 = vpack.c.bf16 %v1511_v3, %v1284_v17 }
  0x34   :  { %v403_v36 = vpack.c.bf16 %v1511_v3, %v1238_v33  ;;  %1235 = vst [vmem:[%s3035_s1 + $0x108] sm:$0xf] %v393_v34  ;;  %1271 = vst [vmem:[%s3035_s1 + $0xec] sm:$0xf] %v483_v7  ;;  %v523_v21 = vpack.c.bf16 %v1511_v3, %v1286_v18  ;;  %v1288_v22 = vld [vmem:[%s3034_s0 + $0x498] sm:$0xff]  ;;  %v1294_v28 = vld [vmem:[%s3034_s0 + $0x6a0] sm:$0xff] }
  0x35   :  { %1237 = vst [vmem:[%s3035_s1 + $0x228] sm:$0xf] %v398_v35  ;;  %1273 = vst [vmem:[%s3035_s1 + $0x20c] sm:$0xf] %v488_v8  ;;  %v1290_v23 = vld [vmem:[%s3034_s0 + $0x258] sm:$0xff]  ;;  %v528_v25 = vpack.c.bf16 %v1511_v3, %v1288_v22  ;;  %v1296_v29 = vld [vmem:[%s3034_s0 + $0x460] sm:$0xff]  ;;  %v543_v31 = vpack.c.bf16 %v1511_v3, %v1294_v28 }
  0x36   :  { %1239 = vst [vmem:[%s3035_s1 + $0x348] sm:$0xf] %v403_v36  ;;  %1275 = vst [vmem:[%s3035_s1 + $0x32c] sm:$0xf] %v493_v9  ;;  %v1292_v24 = vld [vmem:[%s3034_s0 + $0x18] sm:$0xff]  ;;  %v533_v26 = vpack.c.bf16 %v1511_v3, %v1290_v23  ;;  %v1298_v30 = vld [vmem:[%s3034_s0 + $0x220] sm:$0xff]  ;;  %v548_v32 = vpack.c.bf16 %v1511_v3, %v1296_v29 }
  0x37   :  { %1277 = vst [vmem:[%s3035_s1 + $0x4c] sm:$0xf] %v498_v13  ;;  %1279 = vst [vmem:[%s3035_s1 + $0x16c] sm:$0xf] %v503_v14  ;;  %v538_v27 = vpack.c.bf16 %v1511_v3, %v1292_v24  ;;  %v553_v33 = vpack.c.bf16 %v1511_v3, %v1298_v30  ;;  %v1300_v34 = vld [vmem:[%s3034_s0 + $0x5e0] sm:$0xff] }
  0x38   :  { %1281 = vst [vmem:[%s3035_s1 + $0x28c] sm:$0xf] %v508_v15  ;;  %1283 = vst [vmem:[%s3035_s1 + $0xac] sm:$0xf] %v513_v19  ;;  %v1302_v35 = vld [vmem:[%s3034_s0 + $0x3a0] sm:$0xff]  ;;  %v558_v37 = vpack.c.bf16 %v1511_v3, %v1300_v34  ;;  %v1348_v19 = vld [vmem:[%s3034_s0 + $0x6a8] sm:$0xff] }
  0x39   :  { %1285 = vst [vmem:[%s3035_s1 + $0x1cc] sm:$0xf] %v518_v20  ;;  %1287 = vst [vmem:[%s3035_s1 + $0x2ec] sm:$0xf] %v523_v21  ;;  %v1304_v36 = vld [vmem:[%s3034_s0 + $0x160] sm:$0xff]  ;;  %v563_v38 = vpack.c.bf16 %v1511_v3, %v1302_v35  ;;  %v1350_v20 = vld [vmem:[%s3034_s0 + $0x468] sm:$0xff]  ;;  %v678_v22 = vpack.c.bf16 %v1511_v3, %v1348_v19 }
  0x3a   :  { %1289 = vst [vmem:[%s3035_s1 + $0x10c] sm:$0xf] %v528_v25  ;;  %1291 = vst [vmem:[%s3035_s1 + $0x22c] sm:$0xf] %v533_v26  ;;  %v568_v39 = vpack.c.bf16 %v1511_v3, %v1304_v36  ;;  %v1306_v40 = vld [vmem:[%s3034_s0 + $0x520] sm:$0xff]  ;;  %v1352_v21 = vld [vmem:[%s3034_s0 + $0x228] sm:$0xff]  ;;  %v683_v23 = vpack.c.bf16 %v1511_v3, %v1350_v20 }
  0x3b   :  { %1293 = vst [vmem:[%s3035_s1 + $0x34c] sm:$0xf] %v538_v27  ;;  %v1308_v41 = vld [vmem:[%s3034_s0 + $0x2e0] sm:$0xff]  ;;  %1295 = vst [vmem:[%s3035_s1 + $0x10] sm:$0xf] %v543_v31  ;;  %v573_v43 = vpack.c.bf16 %v1511_v3, %v1306_v40  ;;  %v688_v24 = vpack.c.bf16 %v1511_v3, %v1352_v21  ;;  %v1354_v25 = vld [vmem:[%s3034_s0 + $0x5e8] sm:$0xff] }
  0x3c   :  { %v1310_v42 = vld [vmem:[%s3034_s0 + $0xa0] sm:$0xff]  ;;  %1297 = vst [vmem:[%s3035_s1 + $0x130] sm:$0xf] %v548_v32  ;;  %1299 = vst [vmem:[%s3035_s1 + $0x250] sm:$0xf] %v553_v33  ;;  %v578_v44 = vpack.c.bf16 %v1511_v3, %v1308_v41  ;;  %v1356_v26 = vld [vmem:[%s3034_s0 + $0x3a8] sm:$0xff]  ;;  %v693_v28 = vpack.c.bf16 %v1511_v3, %v1354_v25 }
  0x3d   :  { %v583_v45 = vpack.c.bf16 %v1511_v3, %v1310_v42  ;;  %v1312_v46 = vld [vmem:[%s3034_s0 + $0x660] sm:$0xff]  ;;  %1301 = vst [vmem:[%s3035_s1 + $0x70] sm:$0xf] %v558_v37  ;;  %1303 = vst [vmem:[%s3035_s1 + $0x190] sm:$0xf] %v563_v38  ;;  %v1358_v27 = vld [vmem:[%s3034_s0 + $0x168] sm:$0xff]  ;;  %v698_v29 = vpack.c.bf16 %v1511_v3, %v1356_v26 }
  0x3e   :  { %v1314_v47 = vld [vmem:[%s3034_s0 + $0x420] sm:$0xff]  ;;  %1305 = vst [vmem:[%s3035_s1 + $0x2b0] sm:$0xf] %v568_v39  ;;  %v588_v49 = vpack.c.bf16 %v1511_v3, %v1312_v46  ;;  %1307 = vst [vmem:[%s3035_s1 + $0xd0] sm:$0xf] %v573_v43  ;;  %v703_v30 = vpack.c.bf16 %v1511_v3, %v1358_v27  ;;  %v1360_v31 = vld [vmem:[%s3034_s0 + $0x528] sm:$0xff] }
  0x3f   :  { %v1316_v48 = vld [vmem:[%s3034_s0 + $0x1e0] sm:$0xff]  ;;  %v593_v50 = vpack.c.bf16 %v1511_v3, %v1314_v47  ;;  %1309 = vst [vmem:[%s3035_s1 + $0x1f0] sm:$0xf] %v578_v44  ;;  %1311 = vst [vmem:[%s3035_s1 + $0x310] sm:$0xf] %v583_v45  ;;  %v1362_v32 = vld [vmem:[%s3034_s0 + $0x2e8] sm:$0xff]  ;;  %v708_v34 = vpack.c.bf16 %v1511_v3, %v1360_v31 }
  0x40   :  { %v598_v51 = vpack.c.bf16 %v1511_v3, %v1316_v48  ;;  %v1318_v52 = vld [vmem:[%s3034_s0 + $0x5a0] sm:$0xff]  ;;  %1313 = vst [vmem:[%s3035_s1 + $0x30] sm:$0xf] %v588_v49  ;;  %v1364_v33 = vld [vmem:[%s3034_s0 + $0xa8] sm:$0xff]  ;;  %1349 = vst [vmem:[%s3035_s1 + $0x14] sm:$0xf] %v678_v22  ;;  %v713_v35 = vpack.c.bf16 %v1511_v3, %v1362_v32 }
  0x41   :  { %v1320_v53 = vld [vmem:[%s3034_s0 + $0x360] sm:$0xff]  ;;  %v603_v55 = vpack.c.bf16 %v1511_v3, %v1318_v52  ;;  %1315 = vst [vmem:[%s3035_s1 + $0x150] sm:$0xf] %v593_v50  ;;  %1351 = vst [vmem:[%s3035_s1 + $0x134] sm:$0xf] %v683_v23  ;;  %v718_v36 = vpack.c.bf16 %v1511_v3, %v1364_v33  ;;  %v1366_v37 = vld [vmem:[%s3034_s0 + $0x668] sm:$0xff] }
  0x42   :  { %v1322_v54 = vld [vmem:[%s3034_s0 + $0x120] sm:$0xff]  ;;  %v608_v56 = vpack.c.bf16 %v1511_v3, %v1320_v53  ;;  %1317 = vst [vmem:[%s3035_s1 + $0x270] sm:$0xf] %v598_v51  ;;  %1353 = vst [vmem:[%s3035_s1 + $0x254] sm:$0xf] %v688_v24  ;;  %v1368_v38 = vld [vmem:[%s3034_s0 + $0x428] sm:$0xff]  ;;  %v723_v40 = vpack.c.bf16 %v1511_v3, %v1366_v37 }
  0x43   :  { %v613_v57 = vpack.c.bf16 %v1511_v3, %v1322_v54  ;;  %v1324_v58 = vld [vmem:[%s3034_s0 + $0x4e0] sm:$0xff]  ;;  %1319 = vst [vmem:[%s3035_s1 + $0x90] sm:$0xf] %v603_v55  ;;  %v1370_v39 = vld [vmem:[%s3034_s0 + $0x1e8] sm:$0xff]  ;;  %1355 = vst [vmem:[%s3035_s1 + $0x74] sm:$0xf] %v693_v28  ;;  %v728_v41 = vpack.c.bf16 %v1511_v3, %v1368_v38 }
  0x44   :  { %v1326_v59 = vld [vmem:[%s3034_s0 + $0x2a0] sm:$0xff]  ;;  %v618_v61 = vpack.c.bf16 %v1511_v3, %v1324_v58  ;;  %1321 = vst [vmem:[%s3035_s1 + $0x1b0] sm:$0xf] %v608_v56  ;;  %1357 = vst [vmem:[%s3035_s1 + $0x194] sm:$0xf] %v698_v29  ;;  %v733_v42 = vpack.c.bf16 %v1511_v3, %v1370_v39  ;;  %v1372_v43 = vld [vmem:[%s3034_s0 + $0x5a8] sm:$0xff] }
  0x45   :  { %v1328_v60 = vld [vmem:[%s3034_s0 + $0x60] sm:$0xff]  ;;  %v623_v62 = vpack.c.bf16 %v1511_v3, %v1326_v59  ;;  %1323 = vst [vmem:[%s3035_s1 + $0x2d0] sm:$0xf] %v613_v57  ;;  %1359 = vst [vmem:[%s3035_s1 + $0x2b4] sm:$0xf] %v703_v30  ;;  %v1374_v44 = vld [vmem:[%s3034_s0 + $0x368] sm:$0xff]  ;;  %v738_v46 = vpack.c.bf16 %v1511_v3, %v1372_v43 }
  0x46   :  { %v628_v63 = vpack.c.bf16 %v1511_v3, %v1328_v60  ;;  %v1330_v0 = vld [vmem:[%s3034_s0 + $0x620] sm:$0xff]  ;;  %1325 = vst [vmem:[%s3035_s1 + $0xf0] sm:$0xf] %v618_v61  ;;  %v1376_v45 = vld [vmem:[%s3034_s0 + $0x128] sm:$0xff]  ;;  %1361 = vst [vmem:[%s3035_s1 + $0xd4] sm:$0xf] %v708_v34  ;;  %v743_v47 = vpack.c.bf16 %v1511_v3, %v1374_v44 }
  0x47   :  { %v1332_v1 = vld [vmem:[%s3034_s0 + $0x3e0] sm:$0xff]  ;;  %v633_v4 = vpack.c.bf16 %v1511_v3, %v1330_v0  ;;  %1327 = vst [vmem:[%s3035_s1 + $0x210] sm:$0xf] %v623_v62  ;;  %1363 = vst [vmem:[%s3035_s1 + $0x1f4] sm:$0xf] %v713_v35  ;;  %v748_v48 = vpack.c.bf16 %v1511_v3, %v1376_v45  ;;  %v1378_v49 = vld [vmem:[%s3034_s0 + $0x4e8] sm:$0xff] }
  0x48   :  { %v1334_v2 = vld [vmem:[%s3034_s0 + $0x1a0] sm:$0xff]  ;;  %v638_v5 = vpack.c.bf16 %v1511_v3, %v1332_v1  ;;  %1329 = vst [vmem:[%s3035_s1 + $0x330] sm:$0xf] %v628_v63  ;;  %1365 = vst [vmem:[%s3035_s1 + $0x314] sm:$0xf] %v718_v36  ;;  %v1380_v50 = vld [vmem:[%s3034_s0 + $0x2a8] sm:$0xff]  ;;  %v753_v52 = vpack.c.bf16 %v1511_v3, %v1378_v49 }
  0x49   :  { %v643_v6 = vpack.c.bf16 %v1511_v3, %v1334_v2  ;;  %v1336_v7 = vld [vmem:[%s3034_s0 + $0x560] sm:$0xff]  ;;  %1331 = vst [vmem:[%s3035_s1 + $0x50] sm:$0xf] %v633_v4  ;;  %v1382_v51 = vld [vmem:[%s3034_s0 + $0x68] sm:$0xff]  ;;  %1367 = vst [vmem:[%s3035_s1 + $0x34] sm:$0xf] %v723_v40  ;;  %v758_v53 = vpack.c.bf16 %v1511_v3, %v1380_v50 }
  0x4a   :  { %v1338_v8 = vld [vmem:[%s3034_s0 + $0x320] sm:$0xff]  ;;  %v648_v10 = vpack.c.bf16 %v1511_v3, %v1336_v7  ;;  %1333 = vst [vmem:[%s3035_s1 + $0x170] sm:$0xf] %v638_v5  ;;  %1369 = vst [vmem:[%s3035_s1 + $0x154] sm:$0xf] %v728_v41  ;;  %v763_v54 = vpack.c.bf16 %v1511_v3, %v1382_v51  ;;  %v1384_v55 = vld [vmem:[%s3034_s0 + $0x628] sm:$0xff] }
  0x4b   :  { %v1340_v9 = vld [vmem:[%s3034_s0 + $0xe0] sm:$0xff]  ;;  %v653_v11 = vpack.c.bf16 %v1511_v3, %v1338_v8  ;;  %1335 = vst [vmem:[%s3035_s1 + $0x290] sm:$0xf] %v643_v6  ;;  %1371 = vst [vmem:[%s3035_s1 + $0x274] sm:$0xf] %v733_v42  ;;  %v1386_v56 = vld [vmem:[%s3034_s0 + $0x3e8] sm:$0xff]  ;;  %v768_v58 = vpack.c.bf16 %v1511_v3, %v1384_v55 }
  0x4c   :  { %v658_v12 = vpack.c.bf16 %v1511_v3, %v1340_v9  ;;  %v1342_v13 = vld [vmem:[%s3034_s0 + $0x4a0] sm:$0xff]  ;;  %1337 = vst [vmem:[%s3035_s1 + $0xb0] sm:$0xf] %v648_v10  ;;  %v1388_v57 = vld [vmem:[%s3034_s0 + $0x1a8] sm:$0xff]  ;;  %1373 = vst [vmem:[%s3035_s1 + $0x94] sm:$0xf] %v738_v46  ;;  %v773_v59 = vpack.c.bf16 %v1511_v3, %v1386_v56 }
  0x4d   :  { %v1344_v14 = vld [vmem:[%s3034_s0 + $0x260] sm:$0xff]  ;;  %v663_v16 = vpack.c.bf16 %v1511_v3, %v1342_v13  ;;  %1339 = vst [vmem:[%s3035_s1 + $0x1d0] sm:$0xf] %v653_v11  ;;  %1375 = vst [vmem:[%s3035_s1 + $0x1b4] sm:$0xf] %v743_v47  ;;  %v778_v60 = vpack.c.bf16 %v1511_v3, %v1388_v57  ;;  %v1390_v61 = vld [vmem:[%s3034_s0 + $0x568] sm:$0xff] }
  0x4e   :  { %v1346_v15 = vld [vmem:[%s3034_s0 + $0x20] sm:$0xff]  ;;  %v668_v17 = vpack.c.bf16 %v1511_v3, %v1344_v14  ;;  %1341 = vst [vmem:[%s3035_s1 + $0x2f0] sm:$0xf] %v658_v12  ;;  %1377 = vst [vmem:[%s3035_s1 + $0x2d4] sm:$0xf] %v748_v48  ;;  %v1392_v62 = vld [vmem:[%s3034_s0 + $0x328] sm:$0xff]  ;;  %v783_v0 = vpack.c.bf16 %v1511_v3, %v1390_v61 }
  0x4f   :  { %v673_v18 = vpack.c.bf16 %v1511_v3, %v1346_v15  ;;  %1343 = vst [vmem:[%s3035_s1 + $0x110] sm:$0xf] %v663_v16  ;;  %v1394_v63 = vld [vmem:[%s3034_s0 + $0xe8] sm:$0xff]  ;;  %1379 = vst [vmem:[%s3035_s1 + $0xf4] sm:$0xf] %v753_v52  ;;  %v788_v1 = vpack.c.bf16 %v1511_v3, %v1392_v62  ;;  %v1402_v10 = vld [vmem:[%s3034_s0 + $0x6b0] sm:$0xff] }
  0x50   :  { %1345 = vst [vmem:[%s3035_s1 + $0x230] sm:$0xf] %v668_v17  ;;  %1381 = vst [vmem:[%s3035_s1 + $0x214] sm:$0xf] %v758_v53  ;;  %v793_v2 = vpack.c.bf16 %v1511_v3, %v1394_v63  ;;  %v1396_v4 = vld [vmem:[%s3034_s0 + $0x4a8] sm:$0xff]  ;;  %v1404_v11 = vld [vmem:[%s3034_s0 + $0x470] sm:$0xff]  ;;  %v813_v13 = vpack.c.bf16 %v1511_v3, %v1402_v10 }
  0x51   :  { %1347 = vst [vmem:[%s3035_s1 + $0x350] sm:$0xf] %v673_v18  ;;  %1383 = vst [vmem:[%s3035_s1 + $0x334] sm:$0xf] %v763_v54  ;;  %v1398_v5 = vld [vmem:[%s3034_s0 + $0x268] sm:$0xff]  ;;  %v798_v7 = vpack.c.bf16 %v1511_v3, %v1396_v4  ;;  %v1406_v12 = vld [vmem:[%s3034_s0 + $0x230] sm:$0xff]  ;;  %v818_v14 = vpack.c.bf16 %v1511_v3, %v1404_v11 }
  0x52   :  { %v1400_v6 = vld [vmem:[%s3034_s0 + $0x28] sm:$0xff]  ;;  %1385 = vst [vmem:[%s3035_s1 + $0x54] sm:$0xf] %v768_v58  ;;  %1387 = vst [vmem:[%s3035_s1 + $0x174] sm:$0xf] %v773_v59  ;;  %v803_v8 = vpack.c.bf16 %v1511_v3, %v1398_v5  ;;  %v823_v15 = vpack.c.bf16 %v1511_v3, %v1406_v12  ;;  %v1408_v16 = vld [vmem:[%s3034_s0 + $0x5f0] sm:$0xff] }
  0x53   :  { %1389 = vst [vmem:[%s3035_s1 + $0x294] sm:$0xf] %v778_v60  ;;  %v808_v9 = vpack.c.bf16 %v1511_v3, %v1400_v6  ;;  %1391 = vst [vmem:[%s3035_s1 + $0xb4] sm:$0xf] %v783_v0  ;;  %v1410_v17 = vld [vmem:[%s3034_s0 + $0x3b0] sm:$0xff]  ;;  %v828_v19 = vpack.c.bf16 %v1511_v3, %v1408_v16  ;;  %v1456_v0 = vld [vmem:[%s3034_s0 + $0x6b8] sm:$0xff] }
  0x54   :  { %1393 = vst [vmem:[%s3035_s1 + $0x1d4] sm:$0xf] %v788_v1  ;;  %1395 = vst [vmem:[%s3035_s1 + $0x2f4] sm:$0xf] %v793_v2  ;;  %v1412_v18 = vld [vmem:[%s3034_s0 + $0x170] sm:$0xff]  ;;  %v833_v20 = vpack.c.bf16 %v1511_v3, %v1410_v17  ;;  %v1458_v1 = vld [vmem:[%s3034_s0 + $0x478] sm:$0xff]  ;;  %v948_v4 = vpack.c.bf16 %v1511_v3, %v1456_v0 }
  0x55   :  { %1397 = vst [vmem:[%s3035_s1 + $0x114] sm:$0xf] %v798_v7  ;;  %1399 = vst [vmem:[%s3035_s1 + $0x234] sm:$0xf] %v803_v8  ;;  %v838_v21 = vpack.c.bf16 %v1511_v3, %v1412_v18  ;;  %v1414_v22 = vld [vmem:[%s3034_s0 + $0x530] sm:$0xff]  ;;  %v1460_v2 = vld [vmem:[%s3034_s0 + $0x238] sm:$0xff]  ;;  %v953_v5 = vpack.c.bf16 %v1511_v3, %v1458_v1 }
  0x56   :  { %1401 = vst [vmem:[%s3035_s1 + $0x354] sm:$0xf] %v808_v9  ;;  %v1416_v23 = vld [vmem:[%s3034_s0 + $0x2f0] sm:$0xff]  ;;  %1403 = vst [vmem:[%s3035_s1 + $0x18] sm:$0xf] %v813_v13  ;;  %v843_v25 = vpack.c.bf16 %v1511_v3, %v1414_v22  ;;  %v958_v6 = vpack.c.bf16 %v1511_v3, %v1460_v2  ;;  %v1462_v7 = vld [vmem:[%s3034_s0 + $0x5f8] sm:$0xff] }
  0x57   :  { %v1418_v24 = vld [vmem:[%s3034_s0 + $0xb0] sm:$0xff]  ;;  %1405 = vst [vmem:[%s3035_s1 + $0x138] sm:$0xf] %v818_v14  ;;  %1407 = vst [vmem:[%s3035_s1 + $0x258] sm:$0xf] %v823_v15  ;;  %v848_v26 = vpack.c.bf16 %v1511_v3, %v1416_v23  ;;  %v1464_v8 = vld [vmem:[%s3034_s0 + $0x3b8] sm:$0xff]  ;;  %v963_v10 = vpack.c.bf16 %v1511_v3, %v1462_v7 }
  0x58   :  { %v853_v27 = vpack.c.bf16 %v1511_v3, %v1418_v24  ;;  %v1420_v28 = vld [vmem:[%s3034_s0 + $0x670] sm:$0xff]  ;;  %1409 = vst [vmem:[%s3035_s1 + $0x78] sm:$0xf] %v828_v19  ;;  %1411 = vst [vmem:[%s3035_s1 + $0x198] sm:$0xf] %v833_v20  ;;  %v1466_v9 = vld [vmem:[%s3034_s0 + $0x178] sm:$0xff]  ;;  %v968_v11 = vpack.c.bf16 %v1511_v3, %v1464_v8 }
  0x59   :  { %v1422_v29 = vld [vmem:[%s3034_s0 + $0x430] sm:$0xff]  ;;  %1413 = vst [vmem:[%s3035_s1 + $0x2b8] sm:$0xf] %v838_v21  ;;  %v858_v31 = vpack.c.bf16 %v1511_v3, %v1420_v28  ;;  %1415 = vst [vmem:[%s3035_s1 + $0xd8] sm:$0xf] %v843_v25  ;;  %v973_v12 = vpack.c.bf16 %v1511_v3, %v1466_v9  ;;  %v1468_v13 = vld [vmem:[%s3034_s0 + $0x538] sm:$0xff] }
  0x5a   :  { %v1424_v30 = vld [vmem:[%s3034_s0 + $0x1f0] sm:$0xff]  ;;  %v863_v32 = vpack.c.bf16 %v1511_v3, %v1422_v29  ;;  %1417 = vst [vmem:[%s3035_s1 + $0x1f8] sm:$0xf] %v848_v26  ;;  %1419 = vst [vmem:[%s3035_s1 + $0x318] sm:$0xf] %v853_v27  ;;  %v1470_v14 = vld [vmem:[%s3034_s0 + $0x2f8] sm:$0xff]  ;;  %v978_v16 = vpack.c.bf16 %v1511_v3, %v1468_v13 }
  0x5b   :  { %v868_v33 = vpack.c.bf16 %v1511_v3, %v1424_v30  ;;  %v1426_v34 = vld [vmem:[%s3034_s0 + $0x5b0] sm:$0xff]  ;;  %1421 = vst [vmem:[%s3035_s1 + $0x38] sm:$0xf] %v858_v31  ;;  %v1472_v15 = vld [vmem:[%s3034_s0 + $0xb8] sm:$0xff]  ;;  %1457 = vst [vmem:[%s3035_s1 + $0x1c] sm:$0xf] %v948_v4  ;;  %v983_v17 = vpack.c.bf16 %v1511_v3, %v1470_v14 }
  0x5c   :  { %v1428_v35 = vld [vmem:[%s3034_s0 + $0x370] sm:$0xff]  ;;  %v873_v37 = vpack.c.bf16 %v1511_v3, %v1426_v34  ;;  %1423 = vst [vmem:[%s3035_s1 + $0x158] sm:$0xf] %v863_v32  ;;  %1459 = vst [vmem:[%s3035_s1 + $0x13c] sm:$0xf] %v953_v5  ;;  %v988_v18 = vpack.c.bf16 %v1511_v3, %v1472_v15  ;;  %v1474_v19 = vld [vmem:[%s3034_s0 + $0x678] sm:$0xff] }
  0x5d   :  { %v1430_v36 = vld [vmem:[%s3034_s0 + $0x130] sm:$0xff]  ;;  %v878_v38 = vpack.c.bf16 %v1511_v3, %v1428_v35  ;;  %1425 = vst [vmem:[%s3035_s1 + $0x278] sm:$0xf] %v868_v33  ;;  %1461 = vst [vmem:[%s3035_s1 + $0x25c] sm:$0xf] %v958_v6  ;;  %v1476_v20 = vld [vmem:[%s3034_s0 + $0x438] sm:$0xff]  ;;  %v993_v22 = vpack.c.bf16 %v1511_v3, %v1474_v19 }
  0x5e   :  { %v883_v39 = vpack.c.bf16 %v1511_v3, %v1430_v36  ;;  %v1432_v40 = vld [vmem:[%s3034_s0 + $0x4f0] sm:$0xff]  ;;  %1427 = vst [vmem:[%s3035_s1 + $0x98] sm:$0xf] %v873_v37  ;;  %v1478_v21 = vld [vmem:[%s3034_s0 + $0x1f8] sm:$0xff]  ;;  %1463 = vst [vmem:[%s3035_s1 + $0x7c] sm:$0xf] %v963_v10  ;;  %v998_v23 = vpack.c.bf16 %v1511_v3, %v1476_v20 }
  0x5f   :  { %v1434_v41 = vld [vmem:[%s3034_s0 + $0x2b0] sm:$0xff]  ;;  %v888_v43 = vpack.c.bf16 %v1511_v3, %v1432_v40  ;;  %1429 = vst [vmem:[%s3035_s1 + $0x1b8] sm:$0xf] %v878_v38  ;;  %1465 = vst [vmem:[%s3035_s1 + $0x19c] sm:$0xf] %v968_v11  ;;  %v1003_v24 = vpack.c.bf16 %v1511_v3, %v1478_v21  ;;  %v1480_v25 = vld [vmem:[%s3034_s0 + $0x5b8] sm:$0xff] }
  0x60   :  { %v1436_v42 = vld [vmem:[%s3034_s0 + $0x70] sm:$0xff]  ;;  %v893_v44 = vpack.c.bf16 %v1511_v3, %v1434_v41  ;;  %1431 = vst [vmem:[%s3035_s1 + $0x2d8] sm:$0xf] %v883_v39  ;;  %1467 = vst [vmem:[%s3035_s1 + $0x2bc] sm:$0xf] %v973_v12  ;;  %v1482_v26 = vld [vmem:[%s3034_s0 + $0x378] sm:$0xff]  ;;  %v1008_v28 = vpack.c.bf16 %v1511_v3, %v1480_v25 }
  0x61   :  { %v898_v45 = vpack.c.bf16 %v1511_v3, %v1436_v42  ;;  %v1438_v46 = vld [vmem:[%s3034_s0 + $0x630] sm:$0xff]  ;;  %1433 = vst [vmem:[%s3035_s1 + $0xf8] sm:$0xf] %v888_v43  ;;  %v1484_v27 = vld [vmem:[%s3034_s0 + $0x138] sm:$0xff]  ;;  %1469 = vst [vmem:[%s3035_s1 + $0xdc] sm:$0xf] %v978_v16  ;;  %v1013_v29 = vpack.c.bf16 %v1511_v3, %v1482_v26 }
  0x62   :  { %v1440_v47 = vld [vmem:[%s3034_s0 + $0x3f0] sm:$0xff]  ;;  %v903_v49 = vpack.c.bf16 %v1511_v3, %v1438_v46  ;;  %1435 = vst [vmem:[%s3035_s1 + $0x218] sm:$0xf] %v893_v44  ;;  %1471 = vst [vmem:[%s3035_s1 + $0x1fc] sm:$0xf] %v983_v17  ;;  %v1018_v30 = vpack.c.bf16 %v1511_v3, %v1484_v27  ;;  %v1486_v31 = vld [vmem:[%s3034_s0 + $0x4f8] sm:$0xff] }
  0x63   :  { %v1442_v48 = vld [vmem:[%s3034_s0 + $0x1b0] sm:$0xff]  ;;  %v908_v50 = vpack.c.bf16 %v1511_v3, %v1440_v47  ;;  %1437 = vst [vmem:[%s3035_s1 + $0x338] sm:$0xf] %v898_v45  ;;  %1473 = vst [vmem:[%s3035_s1 + $0x31c] sm:$0xf] %v988_v18  ;;  %v1488_v32 = vld [vmem:[%s3034_s0 + $0x2b8] sm:$0xff]  ;;  %v1023_v34 = vpack.c.bf16 %v1511_v3, %v1486_v31 }
  0x64   :  { %v913_v51 = vpack.c.bf16 %v1511_v3, %v1442_v48  ;;  %v1444_v52 = vld [vmem:[%s3034_s0 + $0x570] sm:$0xff]  ;;  %1439 = vst [vmem:[%s3035_s1 + $0x58] sm:$0xf] %v903_v49  ;;  %v1490_v33 = vld [vmem:[%s3034_s0 + $0x78] sm:$0xff]  ;;  %1475 = vst [vmem:[%s3035_s1 + $0x3c] sm:$0xf] %v993_v22  ;;  %v1028_v35 = vpack.c.bf16 %v1511_v3, %v1488_v32 }
  0x65   :  { %v1446_v53 = vld [vmem:[%s3034_s0 + $0x330] sm:$0xff]  ;;  %v918_v55 = vpack.c.bf16 %v1511_v3, %v1444_v52  ;;  %1441 = vst [vmem:[%s3035_s1 + $0x178] sm:$0xf] %v908_v50  ;;  %1477 = vst [vmem:[%s3035_s1 + $0x15c] sm:$0xf] %v998_v23  ;;  %v1033_v36 = vpack.c.bf16 %v1511_v3, %v1490_v33  ;;  %v1492_v37 = vld [vmem:[%s3034_s0 + $0x638] sm:$0xff] }
  0x66   :  { %v1448_v54 = vld [vmem:[%s3034_s0 + $0xf0] sm:$0xff]  ;;  %v923_v56 = vpack.c.bf16 %v1511_v3, %v1446_v53  ;;  %1443 = vst [vmem:[%s3035_s1 + $0x298] sm:$0xf] %v913_v51  ;;  %1479 = vst [vmem:[%s3035_s1 + $0x27c] sm:$0xf] %v1003_v24  ;;  %v1494_v38 = vld [vmem:[%s3034_s0 + $0x3f8] sm:$0xff]  ;;  %v1038_v40 = vpack.c.bf16 %v1511_v3, %v1492_v37 }
  0x67   :  { %v928_v57 = vpack.c.bf16 %v1511_v3, %v1448_v54  ;;  %v1450_v58 = vld [vmem:[%s3034_s0 + $0x4b0] sm:$0xff]  ;;  %1445 = vst [vmem:[%s3035_s1 + $0xb8] sm:$0xf] %v918_v55  ;;  %v1496_v39 = vld [vmem:[%s3034_s0 + $0x1b8] sm:$0xff]  ;;  %1481 = vst [vmem:[%s3035_s1 + $0x9c] sm:$0xf] %v1008_v28  ;;  %v1043_v41 = vpack.c.bf16 %v1511_v3, %v1494_v38 }
  0x68   :  { %v1452_v59 = vld [vmem:[%s3034_s0 + $0x270] sm:$0xff]  ;;  %v933_v61 = vpack.c.bf16 %v1511_v3, %v1450_v58  ;;  %1447 = vst [vmem:[%s3035_s1 + $0x1d8] sm:$0xf] %v923_v56  ;;  %1483 = vst [vmem:[%s3035_s1 + $0x1bc] sm:$0xf] %v1013_v29  ;;  %v1048_v42 = vpack.c.bf16 %v1511_v3, %v1496_v39  ;;  %v1498_v43 = vld [vmem:[%s3034_s0 + $0x578] sm:$0xff] }
  0x69   :  { %v1454_v60 = vld [vmem:[%s3034_s0 + $0x30] sm:$0xff]  ;;  %v938_v62 = vpack.c.bf16 %v1511_v3, %v1452_v59  ;;  %1449 = vst [vmem:[%s3035_s1 + $0x2f8] sm:$0xf] %v928_v57  ;;  %1485 = vst [vmem:[%s3035_s1 + $0x2dc] sm:$0xf] %v1018_v30  ;;  %v1500_v44 = vld [vmem:[%s3034_s0 + $0x338] sm:$0xff]  ;;  %v1053_v46 = vpack.c.bf16 %v1511_v3, %v1498_v43 }
  0x6a   :  { %v943_v63 = vpack.c.bf16 %v1511_v3, %v1454_v60  ;;  %1451 = vst [vmem:[%s3035_s1 + $0x118] sm:$0xf] %v933_v61  ;;  %v1502_v45 = vld [vmem:[%s3034_s0 + $0xf8] sm:$0xff]  ;;  %1487 = vst [vmem:[%s3035_s1 + $0xfc] sm:$0xf] %v1023_v34  ;;  %v1058_v47 = vpack.c.bf16 %v1511_v3, %v1500_v44 }
  0x6b   :  { %1453 = vst [vmem:[%s3035_s1 + $0x238] sm:$0xf] %v938_v62  ;;  %1489 = vst [vmem:[%s3035_s1 + $0x21c] sm:$0xf] %v1028_v35  ;;  %v1063_v48 = vpack.c.bf16 %v1511_v3, %v1502_v45  ;;  %v1504_v49 = vld [vmem:[%s3034_s0 + $0x4b8] sm:$0xff] }
  0x6c   :  { %1455 = vst [vmem:[%s3035_s1 + $0x358] sm:$0xf] %v943_v63  ;;  %1491 = vst [vmem:[%s3035_s1 + $0x33c] sm:$0xf] %v1033_v36  ;;  %v1506_v50 = vld [vmem:[%s3034_s0 + $0x278] sm:$0xff]  ;;  %v1068_v52 = vpack.c.bf16 %v1511_v3, %v1504_v49 }
  0x6d   :  { %v1508_v51 = vld [vmem:[%s3034_s0 + $0x38] sm:$0xff]  ;;  %1493 = vst [vmem:[%s3035_s1 + $0x5c] sm:$0xf] %v1038_v40  ;;  %1495 = vst [vmem:[%s3035_s1 + $0x17c] sm:$0xf] %v1043_v41  ;;  %v1073_v53 = vpack.c.bf16 %v1511_v3, %v1506_v50 }
  0x6e   :  { %1497 = vst [vmem:[%s3035_s1 + $0x29c] sm:$0xf] %v1048_v42  ;;  %v1078_v3 = vpack.c.bf16 %v1511_v3, %v1508_v51  ;;  %1499 = vst [vmem:[%s3035_s1 + $0xbc] sm:$0xf] %v1053_v46 }
  0x6f   :  { %1501 = vst [vmem:[%s3035_s1 + $0x1dc] sm:$0xf] %v1058_v47  ;;  %1503 = vst [vmem:[%s3035_s1 + $0x2fc] sm:$0xf] %v1063_v48 }
  0x70   :  { %1505 = vst [vmem:[%s3035_s1 + $0x11c] sm:$0xf] %v1068_v52  ;;  %1507 = vst [vmem:[%s3035_s1 + $0x23c] sm:$0xf] %v1073_v53 }
  0x71   :  { %1509 = vst [vmem:[%s3035_s1 + $0x35c] sm:$0xf] %v1078_v3 }

// kernel: rtsrvfd_forward.11
= control target key start
LH: loop header
LB: loop body
LE: loop exit
PB: predicated region body
PF: predicated region fallthrough
CT: control target
= control target key end

     0   :  { %vm37_vm0 = vcmask 254977   ;;  %vm44_vm1 = vcmask 256002   ;;  %s95_s0 = inlined_call_operand.vmem [shape: f32[4,32], index: 0, kind: input, shape index: {}]   ;;  %s96_s1 = inlined_call_operand.vmem [shape: f32[1,32], index: 1, kind: input, shape index: {}]   ;;  %s97_s3 = inlined_call_operand.vmem [shape: f32[1,32], index: 3, kind: output, shape index: {1}]   ;;  %s98_s2 = inlined_call_operand.vmem [shape: f32[1,32], index: 2, kind: output, shape index: {0}]  }
   0x1   :  { %v13_v0 = vld [vmem:[%s95_s0] sm:$0xf] }
   0x2   :  { %v14_v1 = vsub.f32 0.0, %v13_v0  ;;  %v54_v7 = vld [vmem:[%s96_s1] ss:$0 sm:$0xff] }
   0x4   :  { %v15_v2 = vmul.f32 1.442695, %v14_v1 }
   0x6   :  { %55 = vpow2.f32 %v15_v2 }
   0x7   :  { %57 = vtanh.f32 %v13_v0 }
  0x10   :  { %v56_v3 = vpop.eup %55 }
  0x11   :  { %v17_v4 = vadd.f32 1.0, %v56_v3  ;;  %v58_v5 = vpop.eup %57 }
  0x12   :  { %v30_v6 = vrot.slane %v58_v5, 3 }
  0x13   :  { %59 = vrcp.f32 %v17_v4 }
  0x1d   :  { %v60_v8 = vpop.eup %59 }
  0x1e   :  { %v28_v9 = vmul.f32 %v60_v8, %v54_v7  ;;  %v32_v10 = vmul.f32 %v60_v8, %v30_v6 }
  0x20   :  { %v34_v11 = vrot.slane %v32_v10, 7 }
  0x22   :  { %v36_v12 = vadd.f32 %v34_v11, %v28_v9 }
  0x24   :  { %38 = vst.msk [vmem:[%s97_s3 - $0x1] sm:$0x2] %vm37_vm0, %v36_v12  ;;  %61 = vtanh.f32 %v36_v12 }
  0x2e   :  { %v62_v13 = vpop.eup %61 }
  0x2f   :  { %v41_v14 = vrot.slane %v62_v13, 7 }
  0x31   :  { %v43_v15 = vmul.f32 %v60_v8, %v41_v14 }
  0x33   :  { %45 = vst.msk [vmem:[%s98_s2 - $0x2] sm:$0x4] %vm44_vm1, %v43_v15 }

// kernel: rtsrvfd_forward.12
= control target key start
LH: loop header
LB: loop body
LE: loop exit
PB: predicated region body
PF: predicated region fallthrough
CT: control target
= control target key end

     0   :  { %s141_s0 = inlined_call_operand.vmem [shape: f32[4,32], index: 0, kind: input, shape index: {}]   ;;  %s142_s1 = inlined_call_operand.vmem [shape: f32[1,32], index: 1, kind: input, shape index: {}]   ;;  %s143_s2 = inlined_call_operand.vmem [shape: f32[1,32], index: 2, kind: output, shape index: {0}]   ;;  %s144_s3 = inlined_call_operand.hbm [shape: f32[1,32], index: 3, kind: output, shape index: {1}]  }
   0x1   :  { %v14_v0 = vld [vmem:[%s141_s0] sm:$0xf] }
   0x2   :  { %v15_v1 = vsub.f32 0.0, %v14_v0 }
   0x3   :  { %9 = vsyncpa [#allocation3], 0  ;;  %v65_v7 = vld [vmem:[%s142_s1] ss:$0 sm:$0xff]  ;;  %s99_s16 = smov [#allocation2]   ;;  %vm38_vm0 = vcmask 254977  }
   0x4   :  { %v16_v2 = vmul.f32 1.442695, %v15_v1  ;;  %s55_s17 = sshll.u32 %s99_s16, 4  ;;  %s56_s17 = int_to_ptr.vmem [resolvable:$true] %s55_s17 }
   0x5   :  { %s75_s0 = scalar_lea.vmem %s56_s17, 16  ;;  %s79_s18 = scalar_lea.vmem %s56_s17, 32 }
   0x6   :  { %67 = vpow2.f32 %v16_v2  ;;  %p76_p0 = scmp.ne.s32.totalorder %s56_s17, %s75_s0  ;;  %p80_p1 = scmp.lt.s32.totalorder %s56_s17, %s56_s17 }
   0x7   :  { %69 = vtanh.f32 %v14_v0  ;;  %p81_p2 = scmp.lt.s32.totalorder %s79_s18, %s75_s0 }
   0x9   :  { %p82_p3 = por %p81_p2, %p80_p1 }
   0xb   :  { %p83_p4 = pnand %p82_p3, %p76_p0 }
  0x10   :  { %v68_v3 = vpop.eup %67 }
  0x11   :  { %v18_v4 = vadd.f32 1.0, %v68_v3  ;;  %v70_v5 = vpop.eup %69 }
  0x12   :  { %v31_v6 = vrot.slane %v70_v5, 3 }
  0x13   :  { %71 = vrcp.f32 %v18_v4 }
  0x1d   :  { %v72_v8 = vpop.eup %71 }
  0x1e   :  { %v29_v9 = vmul.f32 %v72_v8, %v65_v7  ;;  %v33_v10 = vmul.f32 %v72_v8, %v31_v6 }
  0x20   :  { %v35_v11 = vrot.slane %v33_v10, 7 }
  0x22   :  { %v37_v12 = vadd.f32 %v35_v11, %v29_v9 }
  0x24   :  { %39 = vst.msk [vmem:[#allocation2 - $0x1] sm:$0x2] %vm38_vm0, %v37_v12  ;;  %73 = vtanh.f32 %v37_v12 }
  0x25   :  { %86 = shalt.err (!%p83_p4)
}
  0x26   :  { %s87_s20 = scalar_lea.hbm %s144_s3, 16 }
  0x27   :  { %p88_p5 = scmp.ne.s32.totalorder %s144_s3, %s87_s20  ;;  %p91_p6 = scmp.lt.u32.totalorder %s87_s20, %s144_s3 }
  0x29   :  { %p93_p7 = pnand %p91_p6, %p88_p5 }
  0x2b   :  { %96 = shalt.err (!%p93_p7)
}
  0x2c   :  { %58 = dma.vmem_to_hbm [thread:$0]  %s56_s17, 16, %s144_s3, [#allocation3]   ;;  %vm45_vm1 = vcmask 256002  }
  0x2e   :  { %v74_v13 = vpop.eup %73 }
  0x2f   :  { %v42_v14 = vrot.slane %v74_v13, 7 }
  0x31   :  { %v44_v15 = vmul.f32 %v72_v8, %v42_v14 }
  0x33   :  { %46 = vst.msk [vmem:[%s143_s2 - $0x2] sm:$0x4] %vm45_vm1, %v44_v15 }
  0x34   :  { %97 = dma.done.wait [#allocation3], 16  }
  0x35   :  { %98 = vsyncadd [#allocation3], 4294967280 }
  0x36   :  { %64 = vsyncpa [#allocation3], 1 }

// kernel: rtsrvfd_forward.13
= control target key start
LH: loop header
LB: loop body
LE: loop exit
PB: predicated region body
PF: predicated region fallthrough
CT: control target
= control target key end

     0   :  { %s1035_s5 = inlined_call_operand.vmem [shape: f32[2,32,128], index: 5, kind: input, shape index: {}]   ;;  %s1036_s1 = inlined_call_operand.vmem [shape: f32[3,32,128], index: 1, kind: input, shape index: {}]   ;;  %s1037_s0 = inlined_call_operand.vmem [shape: f32[3,32,128], index: 0, kind: input, shape index: {}]   ;;  %s1038_s6 = inlined_call_operand.vmem [shape: f32[2,32,128], index: 6, kind: input, shape index: {}]   ;;  %s1039_s2 = inlined_call_operand.vmem [shape: f32[2,32,128], index: 2, kind: input, shape index: {}]   ;;  %s1040_s8 = inlined_call_operand.vmem [shape: f32[2,3,32,128], index: 8, kind: output, shape index: {}]   ;;  %s1041_s7 = inlined_call_operand.vmem [shape: f32[2,32,128], index: 7, kind: input, shape index: {}]   ;;  %s1042_s3 = inlined_call_operand.vmem [shape: f32[2,32,128], index: 3, kind: input, shape index: {}]   ;;  %s1043_s4 = inlined_call_operand.vmem [shape: f32[2,32,128], index: 4, kind: input, shape index: {}]  }
   0x1   :  { %v49_v0 = vld [vmem:[%s1035_s5] sm:$0xff]  ;;  %v50_v2 = vld [vmem:[%s1035_s5 + $0x8] sm:$0xff]  ;;  %v51_v5 = vld [vmem:[%s1035_s5 + $0x10] sm:$0xff] }
   0x2   :  { %v53_v1 = vsub.f32 0.0, %v49_v0  ;;  %v54_v4 = vsub.f32 0.0, %v50_v2  ;;  %v55_v7 = vsub.f32 0.0, %v51_v5  ;;  %v52_v8 = vld [vmem:[%s1035_s5 + $0x18] sm:$0xff]  ;;  %v33_v9 = vld [vmem:[%s1036_s1] sm:$0xff]  ;;  %v457_v16 = vld [vmem:[%s1035_s5 + $0x28] sm:$0xff] }
   0x3   :  { %v56_v10 = vsub.f32 0.0, %v52_v8  ;;  %v29_v11 = vld [vmem:[%s1037_s0] sm:$0xff]  ;;  %v37_v17 = vmul.f32 0.33333334, %v33_v9  ;;  %v34_v18 = vld [vmem:[%s1036_s1 + $0x8] sm:$0xff]  ;;  %v119_v19 = vsub.f32 0.0, %v457_v16 }
   0x4   :  { %v57_v3 = vmul.f32 1.442695, %v53_v1  ;;  %v59_v6 = vmul.f32 1.442695, %v54_v4  ;;  %v61_v12 = vmul.f32 1.442695, %v55_v7 }
   0x5   :  { %v456_v13 = vld [vmem:[%s1035_s5 + $0x20] sm:$0xff]  ;;  %v63_v14 = vmul.f32 1.442695, %v56_v10  ;;  %v41_v20 = vmul.f32 0.6666667, %v29_v11  ;;  %v458_v22 = vld [vmem:[%s1035_s5 + $0x30] sm:$0xff] }
   0x6   :  { %516 = vpow2.f32 %v57_v3  ;;  %v118_v15 = vsub.f32 0.0, %v456_v13  ;;  %v30_v23 = vld [vmem:[%s1037_s0 + $0x8] sm:$0xff]  ;;  %v124_v24 = vmul.f32 1.442695, %v119_v19  ;;  %v120_v25 = vsub.f32 0.0, %v458_v22  ;;  %v459_v26 = vld [vmem:[%s1035_s5 + $0x38] sm:$0xff] }
   0x7   :  { %518 = vpow2.f32 %v59_v6  ;;  %v38_v27 = vmul.f32 0.33333334, %v34_v18  ;;  %v35_v28 = vld [vmem:[%s1036_s1 + $0x10] sm:$0xff]  ;;  %v101_v29 = vmul.f32 0.6666667, %v33_v9  ;;  %v121_v30 = vsub.f32 0.0, %v459_v26 }
   0x8   :  { %520 = vpow2.f32 %v61_v12  ;;  %v122_v21 = vmul.f32 1.442695, %v118_v15  ;;  %v31_v31 = vld [vmem:[%s1037_s0 + $0x10] sm:$0xff]  ;;  %v36_v32 = vld [vmem:[%s1036_s1 + $0x18] sm:$0xff]  ;;  %v126_v33 = vmul.f32 1.442695, %v120_v25  ;;  %v705_v36 = vadd.f32 %v41_v20, %v37_v17 }
   0x9   :  { %522 = vpow2.f32 %v63_v14  ;;  %v190_v34 = vld [vmem:[%s1038_s6] sm:$0xff]  ;;  %v42_v37 = vmul.f32 0.6666667, %v30_v23  ;;  %v32_v38 = vld [vmem:[%s1037_s0 + $0x18] sm:$0xff]  ;;  %v128_v39 = vmul.f32 1.442695, %v121_v30 }
   0xa   :  { %524 = vpow2.f32 %v122_v21  ;;  %v194_v40 = vsub.f32 0.0, %v190_v34  ;;  %v39_v42 = vmul.f32 0.33333334, %v35_v28  ;;  %v105_v43 = vmul.f32 0.33333334, %v29_v11  ;;  %v191_v44 = vld [vmem:[%s1038_s6 + $0x8] sm:$0xff] }
   0xb   :  { %526 = vpow2.f32 %v124_v24  ;;  %v43_v45 = vmul.f32 0.6666667, %v31_v31  ;;  %v40_v46 = vmul.f32 0.33333334, %v36_v32  ;;  %v44_v49 = vmul.f32 0.6666667, %v32_v38 }
   0xc   :  { %528 = vpow2.f32 %v126_v33  ;;  %v198_v47 = vmul.f32 1.442695, %v194_v40  ;;  %v102_v50 = vmul.f32 0.6666667, %v34_v18  ;;  %v195_v51 = vsub.f32 0.0, %v191_v44  ;;  %v192_v52 = vld [vmem:[%s1038_s6 + $0x10] sm:$0xff] }
   0xd   :  { %530 = vpow2.f32 %v128_v39  ;;  %v106_v54 = vmul.f32 0.33333334, %v30_v23  ;;  %v196_v55 = vsub.f32 0.0, %v192_v52  ;;  %v716_v57 = vadd.f32 %v42_v37, %v38_v27  ;;  %v193_v1 = vld [vmem:[%s1038_s6 + $0x18] sm:$0xff]  ;;  %v480_v2 = vld [vmem:[%s1038_s6 + $0x20] sm:$0xff]  ;;  %v481_v12 = vld [vmem:[%s1038_s6 + $0x28] sm:$0xff] }
   0xe   :  { %v103_v58 = vmul.f32 0.6666667, %v35_v28  ;;  %v107_v59 = vmul.f32 0.33333334, %v31_v31  ;;  %v200_v60 = vmul.f32 1.442695, %v195_v51  ;;  %v718_v63 = vadd.f32 %v105_v43, %v101_v29 }
   0xf   :  { %v202_v0 = vmul.f32 1.442695, %v196_v55  ;;  %v726_v3 = vadd.f32 %v43_v45, %v39_v42  ;;  %v197_v5 = vsub.f32 0.0, %v193_v1  ;;  %v728_v7 = vadd.f32 %v44_v49, %v40_v46  ;;  %v733_v9 = vld [vmem:[%s1037_s0 + $0x20] sm:$0xff]  ;;  %v482_v17 = vld [vmem:[%s1038_s6 + $0x30] sm:$0xff]  ;;  %v753_v21 = vld [vmem:[%s1037_s0 + $0x28] sm:$0xff] }
  0x10   :  { %v517_v35 = vpop.eup %516  ;;  %v104_v8 = vmul.f32 0.6666667, %v36_v32  ;;  %v738_v10 = vld [vmem:[%s1036_s1 + $0x20] sm:$0xff]  ;;  %v260_v11 = vsub.f32 0.0, %v480_v2  ;;  %v108_v15 = vmul.f32 0.33333334, %v32_v38  ;;  %v746_v18 = vadd.f32 %v106_v54, %v102_v50 }
  0x11   :  { %v65_v41 = vadd.f32 1.0, %v517_v35  ;;  %v519_v48 = vpop.eup %518  ;;  %v204_v16 = vmul.f32 1.442695, %v197_v5  ;;  %v748_v20 = vadd.f32 %v107_v59, %v103_v58  ;;  %v77_v23 = vld [vmem:[%s1039_s2] sm:$0xff]  ;;  %v178_v24 = vmul.f32 0.33333334, %v738_v10 }
  0x12   :  { %v66_v53 = vadd.f32 1.0, %v519_v48  ;;  %v521_v56 = vpop.eup %520  ;;  %v182_v25 = vmul.f32 0.6666667, %v733_v9  ;;  %v261_v26 = vsub.f32 0.0, %v481_v12  ;;  %v264_v29 = vmul.f32 1.442695, %v260_v11 }
  0x13   :  { %532 = vrcp.f32 %v65_v41  ;;  %v523_v61 = vpop.eup %522  ;;  %v67_v62 = vadd.f32 1.0, %v521_v56  ;;  %v262_v30 = vsub.f32 0.0, %v482_v17  ;;  %v760_v32 = vadd.f32 %v108_v15, %v104_v8  ;;  %v765_v34 = vld [vmem:[%s1036_s1 + $0x28] sm:$0xff]  ;;  %v483_v37 = vld [vmem:[%s1038_s6 + $0x38] sm:$0xff]  ;;  %v779_v42 = vld [vmem:[%s1036_s1 + $0x30] sm:$0xff] }
  0x14   :  { %534 = vpow2.f32 %v198_v47  ;;  %v68_v4 = vadd.f32 1.0, %v523_v61  ;;  %v525_v6 = vpop.eup %524  ;;  %v768_v35 = vmul.f32 0.6666667, %v753_v21  ;;  %v78_v41 = vld [vmem:[%s1039_s2 + $0x8] sm:$0xff]  ;;  %v266_v43 = vmul.f32 1.442695, %v261_v26 }
  0x15   :  { %536 = vrcp.f32 %v66_v53  ;;  %v527_v13 = vpop.eup %526  ;;  %v130_v14 = vadd.f32 1.0, %v525_v6  ;;  %v781_v44 = vadd.f32 %v182_v25, %v178_v24  ;;  %v786_v46 = vld [vmem:[%s1037_s0 + $0x30] sm:$0xff]  ;;  %v268_v47 = vmul.f32 1.442695, %v262_v30  ;;  %v80_v56 = vld [vmem:[%s1039_s2 + $0x18] sm:$0xff]  ;;  %v460_v5 = vld [vmem:[%s1039_s2 + $0x20] sm:$0xff] }
  0x16   :  { %538 = vpow2.f32 %v200_v60  ;;  %v131_v19 = vadd.f32 1.0, %v527_v13  ;;  %v529_v22 = vpop.eup %528  ;;  %v79_v50 = vld [vmem:[%s1039_s2 + $0x10] sm:$0xff]  ;;  %v793_v51 = vmul.f32 0.33333334, %v765_v34  ;;  %v263_v52 = vsub.f32 0.0, %v483_v37  ;;  %v461_v12 = vld [vmem:[%s1039_s2 + $0x28] sm:$0xff] }
  0x17   :  { %540 = vrcp.f32 %v67_v62  ;;  %v531_v27 = vpop.eup %530  ;;  %v132_v28 = vadd.f32 1.0, %v529_v22  ;;  %v799_v58 = vmul.f32 0.33333334, %v779_v42  ;;  %v802_v61 = vmul.f32 0.6666667, %v786_v46  ;;  %v807_v62 = vld [vmem:[%s1036_s1 + $0x38] sm:$0xff] }
  0x18   :  { %542 = vrcp.f32 %v68_v4  ;;  %v133_v33 = vadd.f32 1.0, %v531_v27  ;;  %v823_v17 = vld [vmem:[%s1037_s0 + $0x38] sm:$0xff]  ;;  %v462_v26 = vld [vmem:[%s1039_s2 + $0x30] sm:$0xff] }
  0x19   :  { %544 = vpow2.f32 %v202_v0 }
  0x1a   :  { %546 = vrcp.f32 %v130_v14 }
  0x1b   :  { %548 = vrcp.f32 %v131_v19  ;;  %v826_v19 = vmul.f32 0.33333334, %v807_v62 }
  0x1c   :  { %550 = vpow2.f32 %v204_v16 }
  0x1d   :  { %v533_v31 = vpop.eup %532  ;;  %552 = vrcp.f32 %v132_v28 }
  0x1e   :  { %v535_v38 = vpop.eup %534  ;;  %v81_v39 = vmul.f32 %v533_v31, %v77_v23  ;;  %v85_v40 = vsub.f32 1.0, %v533_v31  ;;  %554 = vrcp.f32 %v133_v33 }
  0x1f   :  { %v206_v45 = vadd.f32 1.0, %v535_v38  ;;  %v537_v48 = vpop.eup %536  ;;  %556 = vpow2.f32 %v264_v29  ;;  %v185_v38 = vmul.f32 0.6666667, %v823_v17 }
  0x20   :  { %v89_v49 = vmul.f32 %v85_v40, %v705_v36  ;;  %v539_v53 = vpop.eup %538  ;;  %v82_v54 = vmul.f32 %v537_v48, %v78_v41  ;;  %v86_v55 = vsub.f32 1.0, %v537_v48 }
  0x21   :  { %558 = vrcp.f32 %v206_v45  ;;  %v541_v36 = vpop.eup %540  ;;  %v207_v60 = vadd.f32 1.0, %v539_v53 }
  0x22   :  { %v93_v59 = vadd.f32 %v89_v49, %v81_v39  ;;  %560 = vpow2.f32 %v266_v43  ;;  %v543_v0 = vpop.eup %542  ;;  %v90_v1 = vmul.f32 %v86_v55, %v716_v57  ;;  %v83_v2 = vmul.f32 %v541_v36, %v79_v50 }
  0x23   :  { %v87_v4 = vsub.f32 1.0, %v541_v36  ;;  %562 = vpow2.f32 %v268_v47  ;;  %v545_v6 = vpop.eup %544  ;;  %v84_v8 = vmul.f32 %v543_v0, %v80_v56  ;;  %v88_v11 = vsub.f32 1.0, %v543_v0  ;;  %v218_v47 = vld [vmem:[%s1042_s3] sm:$0xff] }
  0x24   :  { %97 = vst [vmem:[%s1040_s8] sm:$0xff] %v93_v59  ;;  %564 = vrcp.f32 %v207_v60  ;;  %v270_v57 = vmul.f32 1.442695, %v263_v52  ;;  %v547_v13 = vpop.eup %546  ;;  %v94_v14 = vadd.f32 %v90_v1, %v82_v54  ;;  %v208_v16 = vadd.f32 1.0, %v545_v6  ;;  %v333_v6 = vld [vmem:[%s1041_s7 + $0x8] sm:$0xff] }
  0x25   :  { %v91_v15 = vmul.f32 %v87_v4, %v726_v3  ;;  %v549_v22 = vpop.eup %548  ;;  %v92_v23 = vmul.f32 %v88_v11, %v728_v7  ;;  %v147_v24 = vmul.f32 %v547_v13, %v460_v5  ;;  %v151_v25 = vsub.f32 1.0, %v547_v13  ;;  %v332_v3 = vld [vmem:[%s1041_s7] sm:$0xff]  ;;  %v463_v7 = vld [vmem:[%s1039_s2 + $0x38] sm:$0xff] }
  0x26   :  { %566 = vpow2.f32 %v270_v57  ;;  %v551_v27 = vpop.eup %550  ;;  %98 = vst [vmem:[%s1040_s8 + $0x8] sm:$0xff] %v94_v14  ;;  %v148_v29 = vmul.f32 %v549_v22, %v461_v12  ;;  %v152_v30 = vsub.f32 1.0, %v549_v22  ;;  %v336_v48 = vsub.f32 0.0, %v332_v3  ;;  %v334_v12 = vld [vmem:[%s1041_s7 + $0x10] sm:$0xff] }
  0x27   :  { %v95_v28 = vadd.f32 %v91_v15, %v83_v2  ;;  %568 = vrcp.f32 %v208_v16  ;;  %v553_v31 = vpop.eup %552  ;;  %v96_v33 = vadd.f32 %v92_v23, %v84_v8  ;;  %v155_v37 = vmul.f32 %v151_v25, %v718_v63  ;;  %v219_v2 = vld [vmem:[%s1042_s3 + $0x8] sm:$0xff]  ;;  %v220_v57 = vld [vmem:[%s1042_s3 + $0x10] sm:$0xff] }
  0x28   :  { %v209_v39 = vadd.f32 1.0, %v551_v27  ;;  %v555_v40 = vpop.eup %554  ;;  %v156_v41 = vmul.f32 %v152_v30, %v746_v18  ;;  %v149_v43 = vmul.f32 %v553_v31, %v462_v26  ;;  %v153_v45 = vsub.f32 1.0, %v553_v31 }
  0x29   :  { %99 = vst [vmem:[%s1040_s8 + $0x10] sm:$0xff] %v95_v28  ;;  %v557_v49 = vpop.eup %556  ;;  %100 = vst [vmem:[%s1040_s8 + $0x18] sm:$0xff] %v96_v33  ;;  %v159_v63 = vadd.f32 %v155_v37, %v147_v24  ;;  %v150_v50 = vmul.f32 %v555_v40, %v463_v7  ;;  %v154_v52 = vsub.f32 1.0, %v555_v40  ;;  %v340_v56 = vmul.f32 1.442695, %v336_v48 }
  0x2a   :  { %570 = vrcp.f32 %v209_v39  ;;  %v160_v54 = vadd.f32 %v156_v41, %v148_v29  ;;  %v157_v18 = vmul.f32 %v153_v45, %v748_v20  ;;  %v272_v55 = vadd.f32 1.0, %v557_v49  ;;  %v504_v39 = vld [vmem:[%s1041_s7 + $0x20] sm:$0xff]  ;;  %v485_v45 = vld [vmem:[%s1042_s3 + $0x28] sm:$0xff] }
  0x2b   :  { %v559_v53 = vpop.eup %558  ;;  %464 = vst [vmem:[%s1040_s8 + $0x60] sm:$0xff] %v159_v63  ;;  %v158_v59 = vmul.f32 %v154_v52, %v760_v32  ;;  %v187_v1 = vadd.f32 %v768_v35, %v793_v51  ;;  %v188_v5 = vadd.f32 %v802_v61, %v799_v58  ;;  %v189_v13 = vadd.f32 %v185_v38, %v826_v19  ;;  %v335_v19 = vld [vmem:[%s1041_s7 + $0x18] sm:$0xff] }
  0x2c   :  { %v561_v36 = vpop.eup %560  ;;  %v222_v60 = vmul.f32 %v559_v53, %v218_v47  ;;  %v226_v0 = vsub.f32 1.0, %v559_v53  ;;  %465 = vst [vmem:[%s1040_s8 + $0x68] sm:$0xff] %v160_v54  ;;  %v161_v20 = vadd.f32 %v157_v18, %v149_v43  ;;  %572 = vrcp.f32 %v272_v55  ;;  %v505_v53 = vld [vmem:[%s1041_s7 + $0x28] sm:$0xff] }
  0x2d   :  { %v563_v4 = vpop.eup %562  ;;  %v273_v32 = vadd.f32 1.0, %v561_v36  ;;  %v162_v51 = vadd.f32 %v158_v59, %v150_v50  ;;  %574 = vpow2.f32 %v340_v56  ;;  %v243_v15 = vmul.f32 0.6666667, %v738_v10  ;;  %v221_v10 = vld [vmem:[%s1042_s3 + $0x18] sm:$0xff]  ;;  %v486_v56 = vld [vmem:[%s1042_s3 + $0x30] sm:$0xff] }
  0x2e   :  { %v565_v35 = vpop.eup %564  ;;  %v230_v8 = vmul.f32 %v226_v0, %v781_v44  ;;  %v274_v11 = vadd.f32 1.0, %v563_v4  ;;  %466 = vst [vmem:[%s1040_s8 + $0x70] sm:$0xff] %v161_v20  ;;  %v337_v16 = vsub.f32 0.0, %v333_v6  ;;  %v247_v24 = vmul.f32 0.33333334, %v733_v9 }
  0x2f   :  { %v223_v58 = vmul.f32 %v565_v35, %v219_v2  ;;  %v227_v61 = vsub.f32 1.0, %v565_v35  ;;  %576 = vrcp.f32 %v273_v32  ;;  %467 = vst [vmem:[%s1040_s8 + $0x78] sm:$0xff] %v162_v51  ;;  %v338_v26 = vsub.f32 0.0, %v334_v12  ;;  %v487_v51 = vld [vmem:[%s1042_s3 + $0x38] sm:$0xff]  ;;  %v935_v12 = vld [vmem:[%s1036_s1 + $0x40] sm:$0xff] }
  0x30   :  { %v567_v44 = vpop.eup %566  ;;  %v234_v14 = vadd.f32 %v230_v8, %v222_v60  ;;  %578 = vrcp.f32 %v274_v11  ;;  %v244_v28 = vmul.f32 0.6666667, %v765_v34  ;;  %v342_v29 = vmul.f32 1.442695, %v337_v16 }
  0x31   :  { %v569_v22 = vpop.eup %568  ;;  %v231_v23 = vmul.f32 %v227_v61, %v187_v1  ;;  %v275_v25 = vadd.f32 1.0, %v567_v44  ;;  %v248_v30 = vmul.f32 0.33333334, %v753_v21  ;;  %v344_v7 = vmul.f32 1.442695, %v338_v26  ;;  %v484_v21 = vld [vmem:[%s1042_s3 + $0x20] sm:$0xff] }
  0x32   :  { %476 = vst [vmem:[%s1040_s8 + $0x20] sm:$0xff] %v234_v14  ;;  %v224_v3 = vmul.f32 %v569_v22, %v220_v57  ;;  %v228_v27 = vsub.f32 1.0, %v569_v22  ;;  %v245_v37 = vmul.f32 0.6666667, %v779_v42  ;;  %v339_v38 = vsub.f32 0.0, %v335_v19  ;;  %v507_v14 = vld [vmem:[%s1041_s7 + $0x38] sm:$0xff] }
  0x33   :  { %v235_v9 = vadd.f32 %v231_v23, %v223_v58  ;;  %580 = vrcp.f32 %v275_v25  ;;  %v249_v41 = vmul.f32 0.33333334, %v786_v46  ;;  %v251_v43 = vadd.f32 %v247_v24, %v243_v15 }
  0x34   :  { %v571_v31 = vpop.eup %570  ;;  %v232_v33 = vmul.f32 %v228_v27, %v188_v5  ;;  %582 = vpow2.f32 %v342_v29  ;;  %v346_v47 = vmul.f32 1.442695, %v339_v38  ;;  %v246_v63 = vmul.f32 0.6666667, %v807_v62  ;;  %v506_v5 = vld [vmem:[%s1041_s7 + $0x30] sm:$0xff] }
  0x35   :  { %477 = vst [vmem:[%s1040_s8 + $0x28] sm:$0xff] %v235_v9  ;;  %v225_v34 = vmul.f32 %v571_v31, %v221_v10  ;;  %v229_v40 = vsub.f32 1.0, %v571_v31  ;;  %584 = vpow2.f32 %v344_v7  ;;  %v250_v50 = vmul.f32 0.33333334, %v823_v17  ;;  %v360_v31 = vld [vmem:[%s1043_s4] sm:$0xff] }
  0x36   :  { %v236_v42 = vadd.f32 %v232_v33, %v224_v3  ;;  %v573_v48 = vpop.eup %572  ;;  %v402_v52 = vsub.f32 0.0, %v504_v39  ;;  %v252_v55 = vadd.f32 %v248_v30, %v244_v28  ;;  %586 = vpow2.f32 %v346_v47  ;;  %v493_v33 = vld [vmem:[%s1037_s0 + $0x48] sm:$0xff] }
  0x37   :  { %v233_v49 = vmul.f32 %v229_v40, %v189_v13  ;;  %v575_v46 = vpop.eup %574  ;;  %v289_v54 = vmul.f32 %v573_v48, %v484_v21  ;;  %v293_v18 = vsub.f32 1.0, %v573_v48  ;;  %v253_v36 = vadd.f32 %v249_v41, %v245_v37  ;;  %v940_v13 = vld [vmem:[%s1037_s0 + $0x40] sm:$0xff]  ;;  %v497_v37 = vld [vmem:[%s1036_s1 + $0x48] sm:$0xff]  ;;  %v976_v40 = vld [vmem:[%s1036_s1 + $0x50] sm:$0xff] }
  0x38   :  { %478 = vst [vmem:[%s1040_s8 + $0x30] sm:$0xff] %v236_v42  ;;  %v348_v59 = vadd.f32 1.0, %v575_v46  ;;  %v406_v60 = vmul.f32 1.442695, %v402_v52  ;;  %v403_v20 = vsub.f32 0.0, %v505_v53  ;;  %v254_v35 = vadd.f32 %v250_v50, %v246_v63  ;;  %v495_v48 = vld [vmem:[%s1037_s0 + $0x58] sm:$0xff] }
  0x39   :  { %v577_v62 = vpop.eup %576  ;;  %v237_v17 = vadd.f32 %v233_v49, %v225_v34  ;;  %v297_v1 = vmul.f32 %v293_v18, %v251_v43  ;;  %v404_v44 = vsub.f32 0.0, %v506_v5  ;;  %v320_v26 = vmul.f32 0.33333334, %v935_v12  ;;  %v971_v34 = vld [vmem:[%s1037_s0 + $0x50] sm:$0xff]  ;;  %v499_v50 = vld [vmem:[%s1036_s1 + $0x58] sm:$0xff] }
  0x3a   :  { %v579_v0 = vpop.eup %578  ;;  %v290_v2 = vmul.f32 %v577_v62, %v485_v45  ;;  %v294_v4 = vsub.f32 1.0, %v577_v62  ;;  %588 = vrcp.f32 %v348_v59  ;;  %v408_v58 = vmul.f32 1.442695, %v403_v20  ;;  %v362_v62 = vld [vmem:[%s1043_s4 + $0x10] sm:$0xff] }
  0x3b   :  { %479 = vst [vmem:[%s1040_s8 + $0x38] sm:$0xff] %v237_v17  ;;  %v291_v32 = vmul.f32 %v579_v0, %v486_v56  ;;  %v295_v6 = vsub.f32 1.0, %v579_v0  ;;  %v301_v8 = vadd.f32 %v297_v1, %v289_v54  ;;  %590 = vpow2.f32 %v406_v60  ;;  %v361_v54 = vld [vmem:[%s1043_s4 + $0x8] sm:$0xff] }
  0x3c   :  { %v298_v11 = vmul.f32 %v294_v4, %v252_v55  ;;  %592 = vpow2.f32 %v408_v58  ;;  %v410_v3 = vmul.f32 1.442695, %v404_v44  ;;  %v324_v10 = vmul.f32 0.6666667, %v940_v13 }
  0x3d   :  { %v581_v61 = vpop.eup %580  ;;  %v299_v57 = vmul.f32 %v295_v6, %v253_v36  ;;  %488 = vst [vmem:[%s1040_s8 + $0x80] sm:$0xff] %v301_v8  ;;  %v405_v29 = vsub.f32 0.0, %v507_v14  ;;  %v321_v45 = vmul.f32 0.33333334, %v497_v37  ;;  %v325_v47 = vmul.f32 0.6666667, %v493_v33 }
  0x3e   :  { %v583_v15 = vpop.eup %582  ;;  %v302_v16 = vadd.f32 %v298_v11, %v290_v2  ;;  %v292_v22 = vmul.f32 %v581_v61, %v487_v51  ;;  %v296_v23 = vsub.f32 1.0, %v581_v61  ;;  %v328_v39 = vadd.f32 %v324_v10, %v320_v26 }
  0x3f   :  { %v585_v24 = vpop.eup %584  ;;  %v303_v25 = vadd.f32 %v299_v57, %v291_v32  ;;  %v349_v19 = vadd.f32 1.0, %v583_v15  ;;  %v412_v7 = vmul.f32 1.442695, %v405_v29  ;;  %v322_v49 = vmul.f32 0.33333334, %v976_v40  ;;  %v363_v32 = vld [vmem:[%s1043_s4 + $0x18] sm:$0xff] }
  0x40   :  { %489 = vst [vmem:[%s1040_s8 + $0x88] sm:$0xff] %v302_v16  ;;  %v300_v27 = vmul.f32 %v296_v23, %v254_v35  ;;  %v350_v28 = vadd.f32 1.0, %v585_v24  ;;  %v587_v9 = vpop.eup %586  ;;  %v326_v63 = vmul.f32 0.6666667, %v971_v34  ;;  %v329_v56 = vadd.f32 %v325_v47, %v321_v45 }
  0x41   :  { %490 = vst [vmem:[%s1040_s8 + $0x90] sm:$0xff] %v303_v25  ;;  %594 = vrcp.f32 %v349_v19  ;;  %v351_v38 = vadd.f32 1.0, %v587_v9  ;;  %v323_v17 = vmul.f32 0.33333334, %v499_v50  ;;  %v327_v36 = vmul.f32 0.6666667, %v495_v48 }
  0x42   :  { %v304_v30 = vadd.f32 %v300_v27, %v292_v22  ;;  %596 = vrcp.f32 %v350_v28  ;;  %v330_v60 = vadd.f32 %v326_v63, %v322_v49  ;;  %v385_v6 = vmul.f32 0.6666667, %v935_v12  ;;  %v508_v12 = vld [vmem:[%s1043_s4 + $0x20] sm:$0xff]  ;;  %v509_v19 = vld [vmem:[%s1043_s4 + $0x28] sm:$0xff] }
  0x43   :  { %598 = vpow2.f32 %v410_v3  ;;  %v331_v8 = vadd.f32 %v327_v36, %v323_v17  ;;  %v389_v11 = vmul.f32 0.33333334, %v940_v13  ;;  %v386_v44 = vmul.f32 0.6666667, %v497_v37 }
  0x44   :  { %491 = vst [vmem:[%s1040_s8 + $0x98] sm:$0xff] %v304_v30  ;;  %600 = vpow2.f32 %v412_v7  ;;  %v589_v21 = vpop.eup %588  ;;  %v390_v14 = vmul.f32 0.33333334, %v493_v33  ;;  %v387_v9 = vmul.f32 0.6666667, %v976_v40 }
  0x45   :  { %602 = vrcp.f32 %v351_v38  ;;  %v591_v41 = vpop.eup %590  ;;  %v364_v42 = vmul.f32 %v589_v21, %v360_v31  ;;  %v368_v43 = vsub.f32 1.0, %v589_v21  ;;  %v393_v25 = vadd.f32 %v389_v11, %v385_v6 }
  0x46   :  { %v414_v52 = vadd.f32 1.0, %v591_v41  ;;  %v593_v53 = vpop.eup %592  ;;  %v394_v28 = vadd.f32 %v390_v14, %v386_v44  ;;  %v391_v30 = vmul.f32 0.33333334, %v971_v34  ;;  %v388_v7 = vmul.f32 0.6666667, %v499_v50  ;;  %v510_v41 = vld [vmem:[%s1043_s4 + $0x30] sm:$0xff] }
  0x47   :  { %v372_v46 = vmul.f32 %v368_v43, %v328_v39  ;;  %v415_v18 = vadd.f32 1.0, %v593_v53  ;;  %v392_v38 = vmul.f32 0.33333334, %v495_v48  ;;  %v511_v34 = vld [vmem:[%s1043_s4 + $0x38] sm:$0xff] }
  0x48   :  { %604 = vrcp.f32 %v414_v52 }
  0x49   :  { %v376_v55 = vadd.f32 %v372_v46, %v364_v42  ;;  %606 = vrcp.f32 %v415_v18  ;;  %v395_v42 = vadd.f32 %v391_v30, %v387_v9  ;;  %v396_v45 = vadd.f32 %v392_v38, %v388_v7 }
  0x4b   :  { %v595_v59 = vpop.eup %594  ;;  %500 = vst [vmem:[%s1040_s8 + $0x40] sm:$0xff] %v376_v55 }
  0x4c   :  { %v597_v0 = vpop.eup %596  ;;  %v365_v1 = vmul.f32 %v595_v59, %v361_v54  ;;  %v369_v2 = vsub.f32 1.0, %v595_v59 }
  0x4d   :  { %v599_v4 = vpop.eup %598  ;;  %v366_v20 = vmul.f32 %v597_v0, %v362_v62  ;;  %v370_v5 = vsub.f32 1.0, %v597_v0 }
  0x4e   :  { %v601_v35 = vpop.eup %600  ;;  %v373_v51 = vmul.f32 %v369_v2, %v329_v56  ;;  %v416_v58 = vadd.f32 1.0, %v599_v4 }
  0x4f   :  { %v603_v61 = vpop.eup %602  ;;  %v374_v57 = vmul.f32 %v370_v5, %v330_v60  ;;  %v417_v15 = vadd.f32 1.0, %v601_v35 }
  0x50   :  { %v377_v16 = vadd.f32 %v373_v51, %v365_v1  ;;  %v367_v22 = vmul.f32 %v603_v61, %v363_v32  ;;  %v371_v23 = vsub.f32 1.0, %v603_v61  ;;  %608 = vrcp.f32 %v416_v58 }
  0x51   :  { %v378_v24 = vadd.f32 %v374_v57, %v366_v20  ;;  %610 = vrcp.f32 %v417_v15 }
  0x52   :  { %501 = vst [vmem:[%s1040_s8 + $0x48] sm:$0xff] %v377_v16  ;;  %v375_v13 = vmul.f32 %v371_v23, %v331_v8  ;;  %v605_v26 = vpop.eup %604 }
  0x53   :  { %502 = vst [vmem:[%s1040_s8 + $0x50] sm:$0xff] %v378_v24  ;;  %v431_v27 = vmul.f32 %v605_v26, %v508_v12  ;;  %v435_v10 = vsub.f32 1.0, %v605_v26  ;;  %v607_v29 = vpop.eup %606 }
  0x54   :  { %v379_v3 = vadd.f32 %v375_v13, %v367_v22  ;;  %v432_v33 = vmul.f32 %v607_v29, %v509_v19  ;;  %v436_v37 = vsub.f32 1.0, %v607_v29 }
  0x55   :  { %v439_v31 = vmul.f32 %v435_v10, %v393_v25 }
  0x56   :  { %503 = vst [vmem:[%s1040_s8 + $0x58] sm:$0xff] %v379_v3  ;;  %v440_v21 = vmul.f32 %v436_v37, %v394_v28 }
  0x57   :  { %v443_v39 = vadd.f32 %v439_v31, %v431_v27 }
  0x58   :  { %v444_v43 = vadd.f32 %v440_v21, %v432_v33 }
  0x59   :  { %512 = vst [vmem:[%s1040_s8 + $0xa0] sm:$0xff] %v443_v39 }
  0x5a   :  { %v609_v40 = vpop.eup %608  ;;  %513 = vst [vmem:[%s1040_s8 + $0xa8] sm:$0xff] %v444_v43 }
  0x5b   :  { %v611_v47 = vpop.eup %610  ;;  %v433_v48 = vmul.f32 %v609_v40, %v510_v41  ;;  %v437_v49 = vsub.f32 1.0, %v609_v40 }
  0x5c   :  { %v434_v63 = vmul.f32 %v611_v47, %v511_v34  ;;  %v438_v50 = vsub.f32 1.0, %v611_v47 }
  0x5d   :  { %v441_v52 = vmul.f32 %v437_v49, %v395_v42 }
  0x5e   :  { %v442_v53 = vmul.f32 %v438_v50, %v396_v45 }
  0x5f   :  { %v445_v46 = vadd.f32 %v441_v52, %v433_v48 }
  0x60   :  { %v446_v54 = vadd.f32 %v442_v53, %v434_v63 }
  0x61   :  { %514 = vst [vmem:[%s1040_s8 + $0xb0] sm:$0xff] %v445_v46 }
  0x62   :  { %515 = vst [vmem:[%s1040_s8 + $0xb8] sm:$0xff] %v446_v54 }

</bundles_post_ra>
